<compile_context>
chip_gen: v7x
topology: tpu7x:2x2x1
jax: 0.10.0
libtpu: 0.0.40
codegen_flags: <defaults>
</compile_context>

<pallas_src>
import functools

import numpy as np
import jax
import jax.numpy as jnp
from jax import lax
from jax.experimental import pallas as pl
from jax.experimental.pallas import tpu as pltpu

LANE = 128      # TPU lane width: pad every minor dim to a multiple of this
SUBLANE = 8


def _round_up(x, m):
    return (x + m - 1) // m * m


# ---------------------------------------------------------------------------
# Pallas kernel: gat1 -> gat2 fused (one invocation, everything VMEM-resident)
# ---------------------------------------------------------------------------
def _fused_gat_kernel(z_ref, mask_ref,
                      w1_ref, a1b1_ref, a2b1_ref,
                      w2_ref, a1b2_ref, a2b2_ref,
                      x1_ref, x2_ref, attn1_ref, attn2_ref,
                      *, heads, head_dim, n_valid):
    """Fused MultiHeadGATLayer x2.

    z     : [NP, I1P]  pooled node features (layer-1 input)
    mask  : [NP, NP]   1.0 where edge (row, col) exists (0 in padding)
    w*    : [*,  CP]   all heads' W^T concatenated along lanes (zero padded)
    a1b*  : [CP, CP]   a1b[hd*O + o, hd] = a1_hd[o]   (source-term packer)
    a2b*  : [8,  CP]   a2b[hd, hd*O + o] = a2_hd[o]   (target-term packer)
    x1    : [NP, CP]   relu(concat_h alpha1_h @ Wh1_h)   (layer-1 output)
    x2    : [NP, CP]   relu(concat_h alpha2_h @ Wh2_h)   (layer-2 output)
    attn* : [NP, NP]   mean_h alpha_h per layer
    """
    mask = mask_ref[...]
    n_pad = mask.shape[1]
    c_pad = x1_ref.shape[1]

    # Tiny, shared masks (computed once for both layers / all heads).
    col_ok = lax.broadcasted_iota(jnp.int32, (1, n_pad), 1) < n_valid   # [1, NP]
    lane = lax.broadcasted_iota(jnp.int32, (1, c_pad), 1)               # [1, CP]
    neg_big = jnp.float32(-1e30)

    def gat_layer(feat, w_ref, a1_ref, a2_ref, x_out_ref, attn_out_ref):
        # One lane-dense Wh for all heads, computed exactly once.
        wh = jnp.dot(feat, w_ref[...],
                     preferred_element_type=jnp.float32)                 # [NP, CP]
        # Source terms, all heads at once: f_cols[:, hd] = a1_hd . Wh_hd[i].
        f_cols = jnp.dot(wh, a1_ref[...],
                         preferred_element_type=jnp.float32)             # [NP, CP]
        # Target terms, produced directly as 128-wide rows (lane = node idx):
        #   g_rows[hd, j] = a2_hd . Wh_hd[j]   (trans-B matmul, no transpose).
        g_rows = lax.dot_general(a2_ref[...], wh, (((1,), (1,)), ((), ())),
                                 preferred_element_type=jnp.float32)     # [8, NP]

        # Accumulate straight into the output VMEM refs (review: avoid two
        # live [NP,*] f32 accumulators across the unrolled head loop).
        x_out_ref[...] = jnp.zeros_like(x_out_ref)
        attn_out_ref[...] = jnp.zeros_like(attn_out_ref)

        for hd in range(heads):            # static unroll; heads is small (4)
            s = f_cols[:, hd:hd + 1] + g_rows[hd:hd + 1, :]              # [NP, NP]
            e = jnp.where(s > 0, s, 0.2 * s)                             # LeakyReLU(0.2)
            # Dense scatter: edges keep e, everything else (non-edges AND
            # padding) stays exactly 0 — matches `alpha[row, col] = e` on a
            # zero matrix.
            raw = mask * e
            # Row softmax over the FULL real row (zeros for non-edges
            # included), restricted to the N real columns.
            m = jnp.max(jnp.where(col_ok, raw, neg_big), axis=1, keepdims=True)
            p = jnp.exp(jnp.where(col_ok, raw - m, neg_big))             # exp(-1e30)==0
            denom = jnp.sum(p, axis=1, keepdims=True)
            inv = pl.reciprocal(denom, approx=True)                      # EUP slot
            inv = inv * (2.0 - denom * inv)                              # 1 Newton step
            alpha = p * inv

            attn_out_ref[...] += alpha

            # Lane-dense epilogue matmul: mask Wh to this head's columns so
            # alpha_h @ Wh_h lands directly in its slot of the concat layout.
            head_sel = ((lane >= hd * head_dim) &
                        (lane < (hd + 1) * head_dim)).astype(jnp.float32)  # [1, CP]
            x_out_ref[...] += jnp.dot(alpha, wh * head_sel,
                                      preferred_element_type=jnp.float32)

        x_out_ref[...] = jnp.maximum(x_out_ref[...], 0.0)        # F.relu(concat)
        attn_out_ref[...] = attn_out_ref[...] * jnp.float32(1.0 / heads)

    # gat1 on Z, then gat2 on gat1's (already-VMEM-resident) output.
    gat_layer(z_ref[...], w1_ref, a1b1_ref, a2b1_ref, x1_ref, attn1_ref)
    gat_layer(x1_ref[...], w2_ref, a1b2_ref, a2b2_ref, x2_ref, attn2_ref)


def _pack_head_params(w_heads, a_heads, in_pad, c_pad, o_dim):
    """Pack per-head (W, a) into lane-dense block operands (host side, tiny)."""
    heads = len(w_heads)
    in_dim = w_heads[0].shape[1]
    w_all = np.zeros((in_pad, c_pad), np.float32)
    a1_blk = np.zeros((c_pad, c_pad), np.float32)
    a2_blk = np.zeros((SUBLANE, c_pad), np.float32)
    for hd in range(heads):
        w_hd = np.asarray(w_heads[hd], np.float32)            # [O, in]
        a_hd = np.asarray(a_heads[hd], np.float32)            # [2O, 1]
        w_all[:in_dim, hd * o_dim:(hd + 1) * o_dim] = w_hd.T
        a1_blk[hd * o_dim:(hd + 1) * o_dim, hd] = a_hd[:o_dim, 0]
        a2_blk[hd, hd * o_dim:(hd + 1) * o_dim] = a_hd[o_dim:, 0]
    return jnp.asarray(w_all), jnp.asarray(a1_blk), jnp.asarray(a2_blk)


def fused_two_layer_gat(z, w_heads1, a_heads1, w_heads2, a_heads2, adj_mask):
    """gat1 -> gat2 (PyTorch MultiHeadGATLayer x2) as one Pallas call.

    z         : [N, I]   pooled node features (Z from the mincut layer)
    w_heads*  : list of H arrays, each [O, in]   (nn.Linear weight, bias=False)
    a_heads*  : list of H arrays, each [2*O, 1]
    adj_mask  : [N, N]   1.0 where edge (row, col) exists

    Returns (x1 [N, H*O], x2 [N, H*O], attn1 [N, N], attn2 [N, N]).
    """
    n, i_dim = z.shape
    heads = len(w_heads1)
    o_dim = w_heads1[0].shape[0]
    c_dim = heads * o_dim
    assert heads <= SUBLANE, "a2 packing assumes heads <= 8"
    assert w_heads2[0].shape[1] == c_dim, "gat2 in_channels must equal hidden"

    n_pad = _round_up(max(n, SUBLANE), LANE)
    i_pad = _round_up(i_dim, LANE)
    c_pad = _round_up(c_dim, LANE)

    w1p, a1b1, a2b1 = _pack_head_params(w_heads1, a_heads1, i_pad, c_pad, o_dim)
    w2p, a1b2, a2b2 = _pack_head_params(w_heads2, a_heads2, c_pad, c_pad, o_dim)

    z_pad = jnp.zeros((n_pad, i_pad), jnp.float32).at[:n, :i_dim].set(z)
    mask_pad = jnp.zeros((n_pad, n_pad), jnp.float32).at[:n, :n].set(adj_mask)

    kernel = functools.partial(_fused_gat_kernel, heads=heads,
                               head_dim=o_dim, n_valid=n)

    full = lambda i: (0, 0)   # grid == (1,): everything VMEM-resident once
    x1p, x2p, at1p, at2p = pl.pallas_call(
        kernel,
        out_shape=(jax.ShapeDtypeStruct((n_pad, c_pad), jnp.float32),
                   jax.ShapeDtypeStruct((n_pad, c_pad), jnp.float32),
                   jax.ShapeDtypeStruct((n_pad, n_pad), jnp.float32),
                   jax.ShapeDtypeStruct((n_pad, n_pad), jnp.float32)),
        grid=(1,),
        in_specs=[
            pl.BlockSpec((n_pad, i_pad), full),      # Z
            pl.BlockSpec((n_pad, n_pad), full),      # adjacency mask
            pl.BlockSpec((i_pad, c_pad), full),      # W (layer 1, all heads)
            pl.BlockSpec((c_pad, c_pad), full),      # a1 block (layer 1)
            pl.BlockSpec((SUBLANE, c_pad), full),    # a2 block (layer 1)
            pl.BlockSpec((c_pad, c_pad), full),      # W (layer 2, all heads)
            pl.BlockSpec((c_pad, c_pad), full),      # a1 block (layer 2)
            pl.BlockSpec((SUBLANE, c_pad), full),    # a2 block (layer 2)
        ],
        out_specs=(
            pl.BlockSpec((n_pad, c_pad), full),
            pl.BlockSpec((n_pad, c_pad), full),
            pl.BlockSpec((n_pad, n_pad), full),
            pl.BlockSpec((n_pad, n_pad), full),
        ),
        compiler_params=pltpu.CompilerParams(
            dimension_semantics=("arbitrary",)),
    )(z_pad, mask_pad, w1p, a1b1, a2b1, w2p, a1b2, a2b2)

    return (x1p[:n, :c_dim], x2p[:n, :c_dim], at1p[:n, :n], at2p[:n, :n])


# ---------------------------------------------------------------------------
# MinCutPoolLayerSparse (plain JAX / XLA, dense stand-in for torch_sparse)
# ---------------------------------------------------------------------------
# TODO(synk): torch_sparse SparseTensor matmul, trace and Frobenius losses are
# plain dense XLA here (tiny), not Pallas.
def mincut_pool(x, adj, w_assign, b_assign, w_proj, b_proj, num_clusters):
    s = jax.nn.softmax(x @ w_assign.T + b_assign, axis=-1)
    x_proj = x @ w_proj.T + b_proj
    z = s.T @ x_proj
    adj_s = adj @ s
    adj_new = s.T @ adj_s
    deg = adj.sum(axis=1)
    d = deg[:, None] * jnp.ones_like(s)
    vol = jnp.trace(s.T @ d)
    cut = jnp.trace(adj_new)
    mincut_loss = -cut / (vol + 1e-9)
    ss = s.T @ s
    eye = jnp.eye(num_clusters, dtype=s.dtype)
    ortho_loss = jnp.sqrt(jnp.sum((ss - eye) ** 2))
    return z, adj_new, mincut_loss, ortho_loss, s


# ------------------------------ references --------------------------------
def _xavier_uniform(key, shape, gain=1.0):
    fan_in, fan_out = shape[1], shape[0]
    bound = gain * np.sqrt(6.0 / (fan_in + fan_out))
    return jax.random.uniform(key, shape, jnp.float32, -bound, bound)


def _gat_head_ref(h, w, a, edge_index, n):
    wh = h @ w.T
    row, col = edge_index[0], edge_index[1]
    a_in = jnp.concatenate([wh[row], wh[col]], axis=1)
    e = a_in @ a
    e = jnp.where(e > 0, e, 0.2 * e)[:, 0]
    alpha = jnp.zeros((n, n), jnp.float32).at[row, col].set(e)
    alpha = jax.nn.softmax(alpha, axis=1)
    return alpha @ wh, alpha


def _multi_head_ref(h, w_heads, a_heads, edge_index, n):
    outs, alphas = zip(*[_gat_head_ref(h, w, a, edge_index, n)
                         for w, a in zip(w_heads, a_heads)])
    return jax.nn.relu(jnp.concatenate(outs, axis=1)), jnp.stack(alphas).mean(0)


def _check_gat(z, w1, a1, w2, a2, mask, x1, x2, attn1, attn2, n):
    rows, cols = np.nonzero(np.asarray(mask) > 0)
    edge_index = jnp.array([rows, cols], dtype=jnp.int32)
    x1_ref, attn1_ref = _multi_head_ref(z, w1, a1, edge_index, n)
    # Layer-2 reference is fed the kernel's x1 so per-layer error doesn't compound.
    x2_ref, attn2_ref = _multi_head_ref(x1, w2, a2, edge_index, n)
    np.testing.assert_allclose(np.asarray(x1), np.asarray(x1_ref),
                               rtol=1e-4, atol=1e-5)
    np.testing.assert_allclose(np.asarray(attn1), np.asarray(attn1_ref),
                               rtol=1e-4, atol=1e-5)
    np.testing.assert_allclose(np.asarray(x2), np.asarray(x2_ref),
                               rtol=1e-4, atol=1e-5)
    np.testing.assert_allclose(np.asarray(attn2), np.asarray(attn2_ref),
                               rtol=1e-4, atol=1e-5)


# -------------------------------- driver -----------------------------------
if __name__ == "__main__":
    N_NODES = 64          # original graph nodes
    IN_C = 8              # in_channels
    HIDDEN = 32           # hidden_channels
    OUT_C = 4             # out_channels
    NUM_CLUSTERS = 16     # pooled graph nodes
    HEADS = 4
    HEAD_OUT = HIDDEN // HEADS   # 8

    key = jax.random.PRNGKey(0)
    k_feat, k_mc, k_g1, k_g2, k_lin = jax.random.split(key, 5)

    # Node features + deterministic synthetic undirected graph (ring + chords).
    x = jax.random.normal(k_feat, (N_NODES, IN_C), jnp.float32)
    src = list(range(N_NODES)) + [0, 5, 11, 17, 23, 31, 40, 50]
    dst = [(i + 1) % N_NODES for i in range(N_NODES)] + [32, 20, 45, 60, 2, 8, 13, 27]
    adj = (jnp.zeros((N_NODES, N_NODES), jnp.float32)
           .at[jnp.array(src), jnp.array(dst)].set(1.0)
           .at[jnp.array(dst), jnp.array(src)].set(1.0))

    # --- MinCutPoolLayerSparse (plain JAX) ---
    k_a, k_p = jax.random.split(k_mc)
    w_assign = _xavier_uniform(k_a, (NUM_CLUSTERS, IN_C))
    b_assign = jnp.zeros((NUM_CLUSTERS,), jnp.float32)
    w_proj = _xavier_uniform(k_p, (IN_C, IN_C))
    b_proj = jnp.zeros((IN_C,), jnp.float32)
    z, adj_pooled, mincut_loss, ortho_loss, s_assign = mincut_pool(
        x, adj, w_assign, b_assign, w_proj, b_proj, NUM_CLUSTERS)

    # edge_index_pooled = (adj_pooled > 0) as a dense 0/1 mask.
    adj_mask_pooled = (adj_pooled > 0).astype(jnp.float32)

    # --- GAT head parameters ---
    def make_head_params(k, in_c, out_c):
        kw, ka = jax.random.split(k)
        w = _xavier_uniform(kw, (out_c, in_c), gain=1.0)      # Linear.weight [out, in]
        a = _xavier_uniform(ka, (2 * out_c, 1), gain=1.414)
        return w, a

    w1, a1 = zip(*[make_head_params(k, IN_C, HEAD_OUT)
                   for k in jax.random.split(k_g1, HEADS)])
    w2, a2 = zip(*[make_head_params(k, HIDDEN, HEAD_OUT)
                   for k in jax.random.split(k_g2, HEADS)])

    # --- gat1 + gat2 in ONE fused Pallas kernel ---
    x1, x2, attn1, attn2 = fused_two_layer_gat(z, w1, a1, w2, a2, adj_mask_pooled)

    # --- final nn.Linear (plain JAX) + module outputs ---
    w_lin = _xavier_uniform(jax.random.split(k_lin)[0], (OUT_C, HIDDEN))
    b_lin = jnp.zeros((OUT_C,), jnp.float32)
    out = x2 @ w_lin.T + b_lin
    attn_avg = (attn1 + attn2) / 2

    out = jax.block_until_ready(out)
    x1 = jax.block_until_ready(x1)
    x2 = jax.block_until_ready(x2)
    attn_avg = jax.block_until_ready(attn_avg)
    mincut_loss = jax.block_until_ready(mincut_loss)
    ortho_loss = jax.block_until_ready(ortho_loss)

    # --- verify the fused Pallas kernel against the pure-JAX PyTorch mirror ---
    _check_gat(z, w1, a1, w2, a2, adj_mask_pooled, x1, x2, attn1, attn2,
               NUM_CLUSTERS)

    # Extra check on a SPARSE pooled mask, exercising the non-edge
    # softmax-over-zeros quirk (the mincut-produced mask is fully dense).
    src2 = list(range(NUM_CLUSTERS)) + [0, 3, 7, 11]
    dst2 = [(i + 1) % NUM_CLUSTERS for i in range(NUM_CLUSTERS)] + [8, 12, 2, 5]
    sparse_mask = (jnp.zeros((NUM_CLUSTERS, NUM_CLUSTERS), jnp.float32)
                   .at[jnp.array(src2), jnp.array(dst2)].set(1.0))
    x1s, x2s, at1s, at2s = fused_two_layer_gat(z, w1, a1, w2, a2, sparse_mask)
    jax.block_until_ready(x2s)
    _check_gat(z, w1, a1, w2, a2, sparse_mask, x1s, x2s, at1s, at2s,
               NUM_CLUSTERS)

    print("KERNEL_OK")
</pallas_src>

<mosaic_0001>
module attributes {stable_mosaic.version = 11 : i64} {
  func.func @_fused_gat_kernel(%arg0: i32, %arg1: memref<128x128xf32, #tpu.memory_space<vmem>>, %arg2: memref<128x128xf32, #tpu.memory_space<vmem>>, %arg3: memref<128x128xf32, #tpu.memory_space<vmem>>, %arg4: memref<128x128xf32, #tpu.memory_space<vmem>>, %arg5: memref<8x128xf32, #tpu.memory_space<vmem>>, %arg6: memref<128x128xf32, #tpu.memory_space<vmem>>, %arg7: memref<128x128xf32, #tpu.memory_space<vmem>>, %arg8: memref<8x128xf32, #tpu.memory_space<vmem>>, %arg9: memref<128x128xf32, #tpu.memory_space<vmem>>, %arg10: memref<128x128xf32, #tpu.memory_space<vmem>>, %arg11: memref<128x128xf32, #tpu.memory_space<vmem>>, %arg12: memref<128x128xf32, #tpu.memory_space<vmem>>) attributes {dimension_semantics = [#tpu.dimension_semantics<arbitrary>], iteration_bounds = array<i64: 1>, scalar_prefetch = 0 : i64, scratch_operands = 0 : i64, tpu.core_type = #tpu.core_type<tc>, window_params = [{pipeline_mode = #tpu.pipeline_mode<synchronous>, transform_indices = @transform_0, window_bounds = array<i64: 128, 128>}, {pipeline_mode = #tpu.pipeline_mode<synchronous>, transform_indices = @transform_1, window_bounds = array<i64: 128, 128>}, {pipeline_mode = #tpu.pipeline_mode<synchronous>, transform_indices = @transform_2, window_bounds = array<i64: 128, 128>}, {pipeline_mode = #tpu.pipeline_mode<synchronous>, transform_indices = @transform_3, window_bounds = array<i64: 128, 128>}, {pipeline_mode = #tpu.pipeline_mode<synchronous>, transform_indices = @transform_4, window_bounds = array<i64: 8, 128>}, {pipeline_mode = #tpu.pipeline_mode<synchronous>, transform_indices = @transform_5, window_bounds = array<i64: 128, 128>}, {pipeline_mode = #tpu.pipeline_mode<synchronous>, transform_indices = @transform_6, window_bounds = array<i64: 128, 128>}, {pipeline_mode = #tpu.pipeline_mode<synchronous>, transform_indices = @transform_7, window_bounds = array<i64: 8, 128>}, {pipeline_mode = #tpu.pipeline_mode<synchronous>, transform_indices = @transform_8, window_bounds = array<i64: 128, 128>}, {pipeline_mode = #tpu.pipeline_mode<synchronous>, transform_indices = @transform_9, window_bounds = array<i64: 128, 128>}, {pipeline_mode = #tpu.pipeline_mode<synchronous>, transform_indices = @transform_10, window_bounds = array<i64: 128, 128>}, {pipeline_mode = #tpu.pipeline_mode<synchronous>, transform_indices = @transform_11, window_bounds = array<i64: 128, 128>}]} {
    %c0 = arith.constant 0 : index
    %c0_0 = arith.constant 0 : index
    %0 = vector.load %arg2[%c0, %c0_0] : memref<128x128xf32, #tpu.memory_space<vmem>>, vector<128x128xf32>
    %1 = tpu.iota {dimensions = array<i32: 1>} : vector<1x128xi32>
    %c16_i32 = arith.constant 16 : i32
    %2 = vector.broadcast %c16_i32 : i32 to vector<1x128xi32>
    %3 = arith.cmpi slt, %1, %2 : vector<1x128xi32>
    %4 = tpu.iota {dimensions = array<i32: 1>} : vector<1x128xi32>
    %c0_1 = arith.constant 0 : index
    %c0_2 = arith.constant 0 : index
    %5 = vector.load %arg1[%c0_1, %c0_2] : memref<128x128xf32, #tpu.memory_space<vmem>>, vector<128x128xf32>
    %c0_3 = arith.constant 0 : index
    %c0_4 = arith.constant 0 : index
    %6 = vector.load %arg3[%c0_3, %c0_4] : memref<128x128xf32, #tpu.memory_space<vmem>>, vector<128x128xf32>
    %cst = arith.constant dense<0.000000e+00> : vector<128x128xf32>
    %7 = tpu.matmul %5, %6, %cst {dimension_numbers = #tpu.dot_dimension_numbers<[1], [0], [0], [1], [0, 0, 1, 1], [], []>} : vector<128x128xf32>, vector<128x128xf32>, vector<128x128xf32> -> vector<128x128xf32>
    %c0_5 = arith.constant 0 : index
    %c0_6 = arith.constant 0 : index
    %8 = vector.load %arg4[%c0_5, %c0_6] : memref<128x128xf32, #tpu.memory_space<vmem>>, vector<128x128xf32>
    %cst_7 = arith.constant dense<0.000000e+00> : vector<128x128xf32>
    %9 = tpu.matmul %7, %8, %cst_7 {dimension_numbers = #tpu.dot_dimension_numbers<[1], [0], [0], [1], [0, 0, 1, 1], [], []>} : vector<128x128xf32>, vector<128x128xf32>, vector<128x128xf32> -> vector<128x128xf32>
    %c0_8 = arith.constant 0 : index
    %c0_9 = arith.constant 0 : index
    %10 = vector.load %arg5[%c0_8, %c0_9] : memref<8x128xf32, #tpu.memory_space<vmem>>, vector<8x128xf32>
    %cst_10 = arith.constant dense<0.000000e+00> : vector<8x128xf32>
    %11 = tpu.matmul %10, %7, %cst_10 {dimension_numbers = #tpu.dot_dimension_numbers<[1], [1], [0], [0], [0, 0, 1, 0], [], []>} : vector<8x128xf32>, vector<128x128xf32>, vector<8x128xf32> -> vector<8x128xf32>
    %cst_11 = arith.constant 0.000000e+00 : f32
    %12 = vector.broadcast %cst_11 : f32 to vector<128x128xf32>
    %c0_12 = arith.constant 0 : index
    %c0_13 = arith.constant 0 : index
    %13 = vector.load %arg9[%c0_12, %c0_13] : memref<128x128xf32, #tpu.memory_space<vmem>>, vector<128x128xf32>
    tpu.vector_store %arg9[%c0_12, %c0_13], %12 {strides = array<i32>} : memref<128x128xf32, #tpu.memory_space<vmem>>, vector<128x128xf32>,
    %cst_14 = arith.constant 0.000000e+00 : f32
    %14 = vector.broadcast %cst_14 : f32 to vector<128x128xf32>
    %c0_15 = arith.constant 0 : index
    %c0_16 = arith.constant 0 : index
    %15 = vector.load %arg11[%c0_15, %c0_16] : memref<128x128xf32, #tpu.memory_space<vmem>>, vector<128x128xf32>
    tpu.vector_store %arg11[%c0_15, %c0_16], %14 {strides = array<i32>} : memref<128x128xf32, #tpu.memory_space<vmem>>, vector<128x128xf32>,
    %16 = vector.extract_strided_slice %9 {offsets = [0, 0], sizes = [128, 1], strides = [1, 1]} : vector<128x128xf32> to vector<128x1xf32>
    %17 = vector.extract_strided_slice %11 {offsets = [0, 0], sizes = [1, 128], strides = [1, 1]} : vector<8x128xf32> to vector<1x128xf32>
    %18 = vector.broadcast %16 : vector<128x1xf32> to vector<128x128xf32>
    %19 = vector.broadcast %17 : vector<1x128xf32> to vector<128x128xf32>
    %20 = arith.addf %18, %19 : vector<128x128xf32>
    %cst_17 = arith.constant 0.000000e+00 : f32
    %21 = vector.broadcast %cst_17 : f32 to vector<128x128xf32>
    %22 = arith.cmpf ogt, %20, %21 : vector<128x128xf32>
    %cst_18 = arith.constant 2.000000e-01 : f32
    %23 = vector.broadcast %cst_18 : f32 to vector<128x128xf32>
    %24 = arith.mulf %23, %20 : vector<128x128xf32>
    %25 = arith.select %22, %20, %24 : vector<128x128xi1>, vector<128x128xf32>
    %26 = arith.mulf %0, %25 : vector<128x128xf32>
    %cst_19 = arith.constant -1.000000e+30 : f32
    %27 = vector.shape_cast %3 : vector<1x128xi1> to vector<1x128xi1>
    %28 = vector.broadcast %27 : vector<1x128xi1> to vector<128x128xi1>
    %29 = vector.broadcast %cst_19 : f32 to vector<128x128xf32>
    %30 = arith.select %28, %26, %29 : vector<128x128xi1>, vector<128x128xf32>
    %cst_20 = arith.constant dense<0xFF800000> : vector<128xf32>
    %31 = vector.multi_reduction <maximumf>, %30, %cst_20 [1] : vector<128x128xf32> to vector<128xf32>
    %32 = vector.shape_cast %31 : vector<128xf32> to vector<128x1xf32>
    %33 = vector.broadcast %32 : vector<128x1xf32> to vector<128x128xf32>
    %34 = arith.subf %26, %33 : vector<128x128xf32>
    %cst_21 = arith.constant -1.000000e+30 : f32
    %35 = vector.shape_cast %3 : vector<1x128xi1> to vector<1x128xi1>
    %36 = vector.broadcast %35 : vector<1x128xi1> to vector<128x128xi1>
    %37 = vector.broadcast %cst_21 : f32 to vector<128x128xf32>
    %38 = arith.select %36, %34, %37 : vector<128x128xi1>, vector<128x128xf32>
    %39 = math.exp %38 : vector<128x128xf32>
    %cst_22 = arith.constant dense<0.000000e+00> : vector<128xf32>
    %40 = vector.multi_reduction <add>, %39, %cst_22 [1] : vector<128x128xf32> to vector<128xf32>
    %41 = vector.shape_cast %40 : vector<128xf32> to vector<128x1xf32>
    %42 = tpu.reciprocal %41 {approx = true} : vector<128x1xf32> -> vector<128x1xf32>
    %43 = arith.mulf %41, %42 : vector<128x1xf32>
    %cst_23 = arith.constant 2.000000e+00 : f32
    %44 = vector.broadcast %cst_23 : f32 to vector<128x1xf32>
    %45 = arith.subf %44, %43 : vector<128x1xf32>
    %46 = arith.mulf %42, %45 : vector<128x1xf32>
    %47 = vector.broadcast %46 : vector<128x1xf32> to vector<128x128xf32>
    %48 = arith.mulf %39, %47 : vector<128x128xf32>
    %c0_24 = arith.constant 0 : index
    %c0_25 = arith.constant 0 : index
    %49 = vector.load %arg11[%c0_24, %c0_25] : memref<128x128xf32, #tpu.memory_space<vmem>>, vector<128x128xf32>
    %50 = arith.addf %49, %48 : vector<128x128xf32>
    %c0_26 = arith.constant 0 : index
    %c0_27 = arith.constant 0 : index
    %51 = vector.load %arg11[%c0_26, %c0_27] : memref<128x128xf32, #tpu.memory_space<vmem>>, vector<128x128xf32>
    tpu.vector_store %arg11[%c0_26, %c0_27], %50 {strides = array<i32>} : memref<128x128xf32, #tpu.memory_space<vmem>>, vector<128x128xf32>,
    %c0_i32 = arith.constant 0 : i32
    %52 = vector.broadcast %c0_i32 : i32 to vector<1x128xi32>
    %53 = arith.cmpi sge, %4, %52 : vector<1x128xi32>
    %c8_i32 = arith.constant 8 : i32
    %54 = vector.broadcast %c8_i32 : i32 to vector<1x128xi32>
    %55 = arith.cmpi slt, %4, %54 : vector<1x128xi32>
    %56 = arith.andi %53, %55 : vector<1x128xi1>
    %57 = arith.extui %56 : vector<1x128xi1> to vector<1x128xi32>
    %58 = arith.sitofp %57 : vector<1x128xi32> to vector<1x128xf32>
    %c0_28 = arith.constant 0 : index
    %c0_29 = arith.constant 0 : index
    %59 = vector.load %arg9[%c0_28, %c0_29] : memref<128x128xf32, #tpu.memory_space<vmem>>, vector<128x128xf32>
    %60 = vector.broadcast %58 : vector<1x128xf32> to vector<128x128xf32>
    %61 = arith.mulf %7, %60 : vector<128x128xf32>
    %cst_30 = arith.constant dense<0.000000e+00> : vector<128x128xf32>
    %62 = tpu.matmul %48, %61, %cst_30 {dimension_numbers = #tpu.dot_dimension_numbers<[1], [0], [0], [1], [0, 0, 1, 1], [], []>} : vector<128x128xf32>, vector<128x128xf32>, vector<128x128xf32> -> vector<128x128xf32>
    %63 = arith.addf %59, %62 : vector<128x128xf32>
    %c0_31 = arith.constant 0 : index
    %c0_32 = arith.constant 0 : index
    %64 = vector.load %arg9[%c0_31, %c0_32] : memref<128x128xf32, #tpu.memory_space<vmem>>, vector<128x128xf32>
    tpu.vector_store %arg9[%c0_31, %c0_32], %63 {strides = array<i32>} : memref<128x128xf32, #tpu.memory_space<vmem>>, vector<128x128xf32>,
    %65 = vector.extract_strided_slice %9 {offsets = [0, 1], sizes = [128, 1], strides = [1, 1]} : vector<128x128xf32> to vector<128x1xf32>
    %66 = vector.extract_strided_slice %11 {offsets = [1, 0], sizes = [1, 128], strides = [1, 1]} : vector<8x128xf32> to vector<1x128xf32>
    %67 = vector.broadcast %65 : vector<128x1xf32> to vector<128x128xf32>
    %68 = vector.broadcast %66 : vector<1x128xf32> to vector<128x128xf32>
    %69 = arith.addf %67, %68 : vector<128x128xf32>
    %cst_33 = arith.constant 0.000000e+00 : f32
    %70 = vector.broadcast %cst_33 : f32 to vector<128x128xf32>
    %71 = arith.cmpf ogt, %69, %70 : vector<128x128xf32>
    %cst_34 = arith.constant 2.000000e-01 : f32
    %72 = vector.broadcast %cst_34 : f32 to vector<128x128xf32>
    %73 = arith.mulf %72, %69 : vector<128x128xf32>
    %74 = arith.select %71, %69, %73 : vector<128x128xi1>, vector<128x128xf32>
    %75 = arith.mulf %0, %74 : vector<128x128xf32>
    %cst_35 = arith.constant -1.000000e+30 : f32
    %76 = vector.shape_cast %3 : vector<1x128xi1> to vector<1x128xi1>
    %77 = vector.broadcast %76 : vector<1x128xi1> to vector<128x128xi1>
    %78 = vector.broadcast %cst_35 : f32 to vector<128x128xf32>
    %79 = arith.select %77, %75, %78 : vector<128x128xi1>, vector<128x128xf32>
    %cst_36 = arith.constant dense<0xFF800000> : vector<128xf32>
    %80 = vector.multi_reduction <maximumf>, %79, %cst_36 [1] : vector<128x128xf32> to vector<128xf32>
    %81 = vector.shape_cast %80 : vector<128xf32> to vector<128x1xf32>
    %82 = vector.broadcast %81 : vector<128x1xf32> to vector<128x128xf32>
    %83 = arith.subf %75, %82 : vector<128x128xf32>
    %cst_37 = arith.constant -1.000000e+30 : f32
    %84 = vector.shape_cast %3 : vector<1x128xi1> to vector<1x128xi1>
    %85 = vector.broadcast %84 : vector<1x128xi1> to vector<128x128xi1>
    %86 = vector.broadcast %cst_37 : f32 to vector<128x128xf32>
    %87 = arith.select %85, %83, %86 : vector<128x128xi1>, vector<128x128xf32>
    %88 = math.exp %87 : vector<128x128xf32>
    %cst_38 = arith.constant dense<0.000000e+00> : vector<128xf32>
    %89 = vector.multi_reduction <add>, %88, %cst_38 [1] : vector<128x128xf32> to vector<128xf32>
    %90 = vector.shape_cast %89 : vector<128xf32> to vector<128x1xf32>
    %91 = tpu.reciprocal %90 {approx = true} : vector<128x1xf32> -> vector<128x1xf32>
    %92 = arith.mulf %90, %91 : vector<128x1xf32>
    %cst_39 = arith.constant 2.000000e+00 : f32
    %93 = vector.broadcast %cst_39 : f32 to vector<128x1xf32>
    %94 = arith.subf %93, %92 : vector<128x1xf32>
    %95 = arith.mulf %91, %94 : vector<128x1xf32>
    %96 = vector.broadcast %95 : vector<128x1xf32> to vector<128x128xf32>
    %97 = arith.mulf %88, %96 : vector<128x128xf32>
    %c0_40 = arith.constant 0 : index
    %c0_41 = arith.constant 0 : index
    %98 = vector.load %arg11[%c0_40, %c0_41] : memref<128x128xf32, #tpu.memory_space<vmem>>, vector<128x128xf32>
    %99 = arith.addf %98, %97 : vector<128x128xf32>
    %c0_42 = arith.constant 0 : index
    %c0_43 = arith.constant 0 : index
    %100 = vector.load %arg11[%c0_42, %c0_43] : memref<128x128xf32, #tpu.memory_space<vmem>>, vector<128x128xf32>
    tpu.vector_store %arg11[%c0_42, %c0_43], %99 {strides = array<i32>} : memref<128x128xf32, #tpu.memory_space<vmem>>, vector<128x128xf32>,
    %c8_i32_44 = arith.constant 8 : i32
    %101 = vector.broadcast %c8_i32_44 : i32 to vector<1x128xi32>
    %102 = arith.cmpi sge, %4, %101 : vector<1x128xi32>
    %c16_i32_45 = arith.constant 16 : i32
    %103 = vector.broadcast %c16_i32_45 : i32 to vector<1x128xi32>
    %104 = arith.cmpi slt, %4, %103 : vector<1x128xi32>
    %105 = arith.andi %102, %104 : vector<1x128xi1>
    %106 = arith.extui %105 : vector<1x128xi1> to vector<1x128xi32>
    %107 = arith.sitofp %106 : vector<1x128xi32> to vector<1x128xf32>
    %c0_46 = arith.constant 0 : index
    %c0_47 = arith.constant 0 : index
    %108 = vector.load %arg9[%c0_46, %c0_47] : memref<128x128xf32, #tpu.memory_space<vmem>>, vector<128x128xf32>
    %109 = vector.broadcast %107 : vector<1x128xf32> to vector<128x128xf32>
    %110 = arith.mulf %7, %109 : vector<128x128xf32>
    %cst_48 = arith.constant dense<0.000000e+00> : vector<128x128xf32>
    %111 = tpu.matmul %97, %110, %cst_48 {dimension_numbers = #tpu.dot_dimension_numbers<[1], [0], [0], [1], [0, 0, 1, 1], [], []>} : vector<128x128xf32>, vector<128x128xf32>, vector<128x128xf32> -> vector<128x128xf32>
    %112 = arith.addf %108, %111 : vector<128x128xf32>
    %c0_49 = arith.constant 0 : index
    %c0_50 = arith.constant 0 : index
    %113 = vector.load %arg9[%c0_49, %c0_50] : memref<128x128xf32, #tpu.memory_space<vmem>>, vector<128x128xf32>
    tpu.vector_store %arg9[%c0_49, %c0_50], %112 {strides = array<i32>} : memref<128x128xf32, #tpu.memory_space<vmem>>, vector<128x128xf32>,
    %114 = vector.extract_strided_slice %9 {offsets = [0, 2], sizes = [128, 1], strides = [1, 1]} : vector<128x128xf32> to vector<128x1xf32>
    %115 = vector.extract_strided_slice %11 {offsets = [2, 0], sizes = [1, 128], strides = [1, 1]} : vector<8x128xf32> to vector<1x128xf32>
    %116 = vector.broadcast %114 : vector<128x1xf32> to vector<128x128xf32>
    %117 = vector.broadcast %115 : vector<1x128xf32> to vector<128x128xf32>
    %118 = arith.addf %116, %117 : vector<128x128xf32>
    %cst_51 = arith.constant 0.000000e+00 : f32
    %119 = vector.broadcast %cst_51 : f32 to vector<128x128xf32>
    %120 = arith.cmpf ogt, %118, %119 : vector<128x128xf32>
    %cst_52 = arith.constant 2.000000e-01 : f32
    %121 = vector.broadcast %cst_52 : f32 to vector<128x128xf32>
    %122 = arith.mulf %121, %118 : vector<128x128xf32>
    %123 = arith.select %120, %118, %122 : vector<128x128xi1>, vector<128x128xf32>
    %124 = arith.mulf %0, %123 : vector<128x128xf32>
    %cst_53 = arith.constant -1.000000e+30 : f32
    %125 = vector.shape_cast %3 : vector<1x128xi1> to vector<1x128xi1>
    %126 = vector.broadcast %125 : vector<1x128xi1> to vector<128x128xi1>
    %127 = vector.broadcast %cst_53 : f32 to vector<128x128xf32>
    %128 = arith.select %126, %124, %127 : vector<128x128xi1>, vector<128x128xf32>
    %cst_54 = arith.constant dense<0xFF800000> : vector<128xf32>
    %129 = vector.multi_reduction <maximumf>, %128, %cst_54 [1] : vector<128x128xf32> to vector<128xf32>
    %130 = vector.shape_cast %129 : vector<128xf32> to vector<128x1xf32>
    %131 = vector.broadcast %130 : vector<128x1xf32> to vector<128x128xf32>
    %132 = arith.subf %124, %131 : vector<128x128xf32>
    %cst_55 = arith.constant -1.000000e+30 : f32
    %133 = vector.shape_cast %3 : vector<1x128xi1> to vector<1x128xi1>
    %134 = vector.broadcast %133 : vector<1x128xi1> to vector<128x128xi1>
    %135 = vector.broadcast %cst_55 : f32 to vector<128x128xf32>
    %136 = arith.select %134, %132, %135 : vector<128x128xi1>, vector<128x128xf32>
    %137 = math.exp %136 : vector<128x128xf32>
    %cst_56 = arith.constant dense<0.000000e+00> : vector<128xf32>
    %138 = vector.multi_reduction <add>, %137, %cst_56 [1] : vector<128x128xf32> to vector<128xf32>
    %139 = vector.shape_cast %138 : vector<128xf32> to vector<128x1xf32>
    %140 = tpu.reciprocal %139 {approx = true} : vector<128x1xf32> -> vector<128x1xf32>
    %141 = arith.mulf %139, %140 : vector<128x1xf32>
    %cst_57 = arith.constant 2.000000e+00 : f32
    %142 = vector.broadcast %cst_57 : f32 to vector<128x1xf32>
    %143 = arith.subf %142, %141 : vector<128x1xf32>
    %144 = arith.mulf %140, %143 : vector<128x1xf32>
    %145 = vector.broadcast %144 : vector<128x1xf32> to vector<128x128xf32>
    %146 = arith.mulf %137, %145 : vector<128x128xf32>
    %c0_58 = arith.constant 0 : index
    %c0_59 = arith.constant 0 : index
    %147 = vector.load %arg11[%c0_58, %c0_59] : memref<128x128xf32, #tpu.memory_space<vmem>>, vector<128x128xf32>
    %148 = arith.addf %147, %146 : vector<128x128xf32>
    %c0_60 = arith.constant 0 : index
    %c0_61 = arith.constant 0 : index
    %149 = vector.load %arg11[%c0_60, %c0_61] : memref<128x128xf32, #tpu.memory_space<vmem>>, vector<128x128xf32>
    tpu.vector_store %arg11[%c0_60, %c0_61], %148 {strides = array<i32>} : memref<128x128xf32, #tpu.memory_space<vmem>>, vector<128x128xf32>,
    %c16_i32_62 = arith.constant 16 : i32
    %150 = vector.broadcast %c16_i32_62 : i32 to vector<1x128xi32>
    %151 = arith.cmpi sge, %4, %150 : vector<1x128xi32>
    %c24_i32 = arith.constant 24 : i32
    %152 = vector.broadcast %c24_i32 : i32 to vector<1x128xi32>
    %153 = arith.cmpi slt, %4, %152 : vector<1x128xi32>
    %154 = arith.andi %151, %153 : vector<1x128xi1>
    %155 = arith.extui %154 : vector<1x128xi1> to vector<1x128xi32>
    %156 = arith.sitofp %155 : vector<1x128xi32> to vector<1x128xf32>
    %c0_63 = arith.constant 0 : index
    %c0_64 = arith.constant 0 : index
    %157 = vector.load %arg9[%c0_63, %c0_64] : memref<128x128xf32, #tpu.memory_space<vmem>>, vector<128x128xf32>
    %158 = vector.broadcast %156 : vector<1x128xf32> to vector<128x128xf32>
    %159 = arith.mulf %7, %158 : vector<128x128xf32>
    %cst_65 = arith.constant dense<0.000000e+00> : vector<128x128xf32>
    %160 = tpu.matmul %146, %159, %cst_65 {dimension_numbers = #tpu.dot_dimension_numbers<[1], [0], [0], [1], [0, 0, 1, 1], [], []>} : vector<128x128xf32>, vector<128x128xf32>, vector<128x128xf32> -> vector<128x128xf32>
    %161 = arith.addf %157, %160 : vector<128x128xf32>
    %c0_66 = arith.constant 0 : index
    %c0_67 = arith.constant 0 : index
    %162 = vector.load %arg9[%c0_66, %c0_67] : memref<128x128xf32, #tpu.memory_space<vmem>>, vector<128x128xf32>
    tpu.vector_store %arg9[%c0_66, %c0_67], %161 {strides = array<i32>} : memref<128x128xf32, #tpu.memory_space<vmem>>, vector<128x128xf32>,
    %163 = vector.extract_strided_slice %9 {offsets = [0, 3], sizes = [128, 1], strides = [1, 1]} : vector<128x128xf32> to vector<128x1xf32>
    %164 = vector.extract_strided_slice %11 {offsets = [3, 0], sizes = [1, 128], strides = [1, 1]} : vector<8x128xf32> to vector<1x128xf32>
    %165 = vector.broadcast %163 : vector<128x1xf32> to vector<128x128xf32>
    %166 = vector.broadcast %164 : vector<1x128xf32> to vector<128x128xf32>
    %167 = arith.addf %165, %166 : vector<128x128xf32>
    %cst_68 = arith.constant 0.000000e+00 : f32
    %168 = vector.broadcast %cst_68 : f32 to vector<128x128xf32>
    %169 = arith.cmpf ogt, %167, %168 : vector<128x128xf32>
    %cst_69 = arith.constant 2.000000e-01 : f32
    %170 = vector.broadcast %cst_69 : f32 to vector<128x128xf32>
    %171 = arith.mulf %170, %167 : vector<128x128xf32>
    %172 = arith.select %169, %167, %171 : vector<128x128xi1>, vector<128x128xf32>
    %173 = arith.mulf %0, %172 : vector<128x128xf32>
    %cst_70 = arith.constant -1.000000e+30 : f32
    %174 = vector.shape_cast %3 : vector<1x128xi1> to vector<1x128xi1>
    %175 = vector.broadcast %174 : vector<1x128xi1> to vector<128x128xi1>
    %176 = vector.broadcast %cst_70 : f32 to vector<128x128xf32>
    %177 = arith.select %175, %173, %176 : vector<128x128xi1>, vector<128x128xf32>
    %cst_71 = arith.constant dense<0xFF800000> : vector<128xf32>
    %178 = vector.multi_reduction <maximumf>, %177, %cst_71 [1] : vector<128x128xf32> to vector<128xf32>
    %179 = vector.shape_cast %178 : vector<128xf32> to vector<128x1xf32>
    %180 = vector.broadcast %179 : vector<128x1xf32> to vector<128x128xf32>
    %181 = arith.subf %173, %180 : vector<128x128xf32>
    %cst_72 = arith.constant -1.000000e+30 : f32
    %182 = vector.shape_cast %3 : vector<1x128xi1> to vector<1x128xi1>
    %183 = vector.broadcast %182 : vector<1x128xi1> to vector<128x128xi1>
    %184 = vector.broadcast %cst_72 : f32 to vector<128x128xf32>
    %185 = arith.select %183, %181, %184 : vector<128x128xi1>, vector<128x128xf32>
    %186 = math.exp %185 : vector<128x128xf32>
    %cst_73 = arith.constant dense<0.000000e+00> : vector<128xf32>
    %187 = vector.multi_reduction <add>, %186, %cst_73 [1] : vector<128x128xf32> to vector<128xf32>
    %188 = vector.shape_cast %187 : vector<128xf32> to vector<128x1xf32>
    %189 = tpu.reciprocal %188 {approx = true} : vector<128x1xf32> -> vector<128x1xf32>
    %190 = arith.mulf %188, %189 : vector<128x1xf32>
    %cst_74 = arith.constant 2.000000e+00 : f32
    %191 = vector.broadcast %cst_74 : f32 to vector<128x1xf32>
    %192 = arith.subf %191, %190 : vector<128x1xf32>
    %193 = arith.mulf %189, %192 : vector<128x1xf32>
    %194 = vector.broadcast %193 : vector<128x1xf32> to vector<128x128xf32>
    %195 = arith.mulf %186, %194 : vector<128x128xf32>
    %c0_75 = arith.constant 0 : index
    %c0_76 = arith.constant 0 : index
    %196 = vector.load %arg11[%c0_75, %c0_76] : memref<128x128xf32, #tpu.memory_space<vmem>>, vector<128x128xf32>
    %197 = arith.addf %196, %195 : vector<128x128xf32>
    %c0_77 = arith.constant 0 : index
    %c0_78 = arith.constant 0 : index
    %198 = vector.load %arg11[%c0_77, %c0_78] : memref<128x128xf32, #tpu.memory_space<vmem>>, vector<128x128xf32>
    tpu.vector_store %arg11[%c0_77, %c0_78], %197 {strides = array<i32>} : memref<128x128xf32, #tpu.memory_space<vmem>>, vector<128x128xf32>,
    %c24_i32_79 = arith.constant 24 : i32
    %199 = vector.broadcast %c24_i32_79 : i32 to vector<1x128xi32>
    %200 = arith.cmpi sge, %4, %199 : vector<1x128xi32>
    %c32_i32 = arith.constant 32 : i32
    %201 = vector.broadcast %c32_i32 : i32 to vector<1x128xi32>
    %202 = arith.cmpi slt, %4, %201 : vector<1x128xi32>
    %203 = arith.andi %200, %202 : vector<1x128xi1>
    %204 = arith.extui %203 : vector<1x128xi1> to vector<1x128xi32>
    %205 = arith.sitofp %204 : vector<1x128xi32> to vector<1x128xf32>
    %c0_80 = arith.constant 0 : index
    %c0_81 = arith.constant 0 : index
    %206 = vector.load %arg9[%c0_80, %c0_81] : memref<128x128xf32, #tpu.memory_space<vmem>>, vector<128x128xf32>
    %207 = vector.broadcast %205 : vector<1x128xf32> to vector<128x128xf32>
    %208 = arith.mulf %7, %207 : vector<128x128xf32>
    %cst_82 = arith.constant dense<0.000000e+00> : vector<128x128xf32>
    %209 = tpu.matmul %195, %208, %cst_82 {dimension_numbers = #tpu.dot_dimension_numbers<[1], [0], [0], [1], [0, 0, 1, 1], [], []>} : vector<128x128xf32>, vector<128x128xf32>, vector<128x128xf32> -> vector<128x128xf32>
    %210 = arith.addf %206, %209 : vector<128x128xf32>
    %c0_83 = arith.constant 0 : index
    %c0_84 = arith.constant 0 : index
    %211 = vector.load %arg9[%c0_83, %c0_84] : memref<128x128xf32, #tpu.memory_space<vmem>>, vector<128x128xf32>
    tpu.vector_store %arg9[%c0_83, %c0_84], %210 {strides = array<i32>} : memref<128x128xf32, #tpu.memory_space<vmem>>, vector<128x128xf32>,
    %c0_85 = arith.constant 0 : index
    %c0_86 = arith.constant 0 : index
    %212 = vector.load %arg9[%c0_85, %c0_86] : memref<128x128xf32, #tpu.memory_space<vmem>>, vector<128x128xf32>
    %cst_87 = arith.constant 0.000000e+00 : f32
    %213 = vector.broadcast %cst_87 : f32 to vector<128x128xf32>
    %214 = arith.maximumf %212, %213 : vector<128x128xf32>
    %c0_88 = arith.constant 0 : index
    %c0_89 = arith.constant 0 : index
    %215 = vector.load %arg9[%c0_88, %c0_89] : memref<128x128xf32, #tpu.memory_space<vmem>>, vector<128x128xf32>
    tpu.vector_store %arg9[%c0_88, %c0_89], %214 {strides = array<i32>} : memref<128x128xf32, #tpu.memory_space<vmem>>, vector<128x128xf32>,
    %c0_90 = arith.constant 0 : index
    %c0_91 = arith.constant 0 : index
    %216 = vector.load %arg11[%c0_90, %c0_91] : memref<128x128xf32, #tpu.memory_space<vmem>>, vector<128x128xf32>
    %cst_92 = arith.constant 2.500000e-01 : f32
    %217 = vector.broadcast %cst_92 : f32 to vector<128x128xf32>
    %218 = arith.mulf %216, %217 : vector<128x128xf32>
    %c0_93 = arith.constant 0 : index
    %c0_94 = arith.constant 0 : index
    %219 = vector.load %arg11[%c0_93, %c0_94] : memref<128x128xf32, #tpu.memory_space<vmem>>, vector<128x128xf32>
    tpu.vector_store %arg11[%c0_93, %c0_94], %218 {strides = array<i32>} : memref<128x128xf32, #tpu.memory_space<vmem>>, vector<128x128xf32>,
    %c0_95 = arith.constant 0 : index
    %c0_96 = arith.constant 0 : index
    %220 = vector.load %arg9[%c0_95, %c0_96] : memref<128x128xf32, #tpu.memory_space<vmem>>, vector<128x128xf32>
    %c0_97 = arith.constant 0 : index
    %c0_98 = arith.constant 0 : index
    %221 = vector.load %arg6[%c0_97, %c0_98] : memref<128x128xf32, #tpu.memory_space<vmem>>, vector<128x128xf32>
    %cst_99 = arith.constant dense<0.000000e+00> : vector<128x128xf32>
    %222 = tpu.matmul %220, %221, %cst_99 {dimension_numbers = #tpu.dot_dimension_numbers<[1], [0], [0], [1], [0, 0, 1, 1], [], []>} : vector<128x128xf32>, vector<128x128xf32>, vector<128x128xf32> -> vector<128x128xf32>
    %c0_100 = arith.constant 0 : index
    %c0_101 = arith.constant 0 : index
    %223 = vector.load %arg7[%c0_100, %c0_101] : memref<128x128xf32, #tpu.memory_space<vmem>>, vector<128x128xf32>
    %cst_102 = arith.constant dense<0.000000e+00> : vector<128x128xf32>
    %224 = tpu.matmul %222, %223, %cst_102 {dimension_numbers = #tpu.dot_dimension_numbers<[1], [0], [0], [1], [0, 0, 1, 1], [], []>} : vector<128x128xf32>, vector<128x128xf32>, vector<128x128xf32> -> vector<128x128xf32>
    %c0_103 = arith.constant 0 : index
    %c0_104 = arith.constant 0 : index
    %225 = vector.load %arg8[%c0_103, %c0_104] : memref<8x128xf32, #tpu.memory_space<vmem>>, vector<8x128xf32>
    %cst_105 = arith.constant dense<0.000000e+00> : vector<8x128xf32>
    %226 = tpu.matmul %225, %222, %cst_105 {dimension_numbers = #tpu.dot_dimension_numbers<[1], [1], [0], [0], [0, 0, 1, 0], [], []>} : vector<8x128xf32>, vector<128x128xf32>, vector<8x128xf32> -> vector<8x128xf32>
    %cst_106 = arith.constant 0.000000e+00 : f32
    %227 = vector.broadcast %cst_106 : f32 to vector<128x128xf32>
    %c0_107 = arith.constant 0 : index
    %c0_108 = arith.constant 0 : index
    %228 = vector.load %arg10[%c0_107, %c0_108] : memref<128x128xf32, #tpu.memory_space<vmem>>, vector<128x128xf32>
    tpu.vector_store %arg10[%c0_107, %c0_108], %227 {strides = array<i32>} : memref<128x128xf32, #tpu.memory_space<vmem>>, vector<128x128xf32>,
    %cst_109 = arith.constant 0.000000e+00 : f32
    %229 = vector.broadcast %cst_109 : f32 to vector<128x128xf32>
    %c0_110 = arith.constant 0 : index
    %c0_111 = arith.constant 0 : index
    %230 = vector.load %arg12[%c0_110, %c0_111] : memref<128x128xf32, #tpu.memory_space<vmem>>, vector<128x128xf32>
    tpu.vector_store %arg12[%c0_110, %c0_111], %229 {strides = array<i32>} : memref<128x128xf32, #tpu.memory_space<vmem>>, vector<128x128xf32>,
    %231 = vector.extract_strided_slice %224 {offsets = [0, 0], sizes = [128, 1], strides = [1, 1]} : vector<128x128xf32> to vector<128x1xf32>
    %232 = vector.extract_strided_slice %226 {offsets = [0, 0], sizes = [1, 128], strides = [1, 1]} : vector<8x128xf32> to vector<1x128xf32>
    %233 = vector.broadcast %231 : vector<128x1xf32> to vector<128x128xf32>
    %234 = vector.broadcast %232 : vector<1x128xf32> to vector<128x128xf32>
    %235 = arith.addf %233, %234 : vector<128x128xf32>
    %cst_112 = arith.constant 0.000000e+00 : f32
    %236 = vector.broadcast %cst_112 : f32 to vector<128x128xf32>
    %237 = arith.cmpf ogt, %235, %236 : vector<128x128xf32>
    %cst_113 = arith.constant 2.000000e-01 : f32
    %238 = vector.broadcast %cst_113 : f32 to vector<128x128xf32>
    %239 = arith.mulf %238, %235 : vector<128x128xf32>
    %240 = arith.select %237, %235, %239 : vector<128x128xi1>, vector<128x128xf32>
    %241 = arith.mulf %0, %240 : vector<128x128xf32>
    %cst_114 = arith.constant -1.000000e+30 : f32
    %242 = vector.shape_cast %3 : vector<1x128xi1> to vector<1x128xi1>
    %243 = vector.broadcast %242 : vector<1x128xi1> to vector<128x128xi1>
    %244 = vector.broadcast %cst_114 : f32 to vector<128x128xf32>
    %245 = arith.select %243, %241, %244 : vector<128x128xi1>, vector<128x128xf32>
    %cst_115 = arith.constant dense<0xFF800000> : vector<128xf32>
    %246 = vector.multi_reduction <maximumf>, %245, %cst_115 [1] : vector<128x128xf32> to vector<128xf32>
    %247 = vector.shape_cast %246 : vector<128xf32> to vector<128x1xf32>
    %248 = vector.broadcast %247 : vector<128x1xf32> to vector<128x128xf32>
    %249 = arith.subf %241, %248 : vector<128x128xf32>
    %cst_116 = arith.constant -1.000000e+30 : f32
    %250 = vector.shape_cast %3 : vector<1x128xi1> to vector<1x128xi1>
    %251 = vector.broadcast %250 : vector<1x128xi1> to vector<128x128xi1>
    %252 = vector.broadcast %cst_116 : f32 to vector<128x128xf32>
    %253 = arith.select %251, %249, %252 : vector<128x128xi1>, vector<128x128xf32>
    %254 = math.exp %253 : vector<128x128xf32>
    %cst_117 = arith.constant dense<0.000000e+00> : vector<128xf32>
    %255 = vector.multi_reduction <add>, %254, %cst_117 [1] : vector<128x128xf32> to vector<128xf32>
    %256 = vector.shape_cast %255 : vector<128xf32> to vector<128x1xf32>
    %257 = tpu.reciprocal %256 {approx = true} : vector<128x1xf32> -> vector<128x1xf32>
    %258 = arith.mulf %256, %257 : vector<128x1xf32>
    %cst_118 = arith.constant 2.000000e+00 : f32
    %259 = vector.broadcast %cst_118 : f32 to vector<128x1xf32>
    %260 = arith.subf %259, %258 : vector<128x1xf32>
    %261 = arith.mulf %257, %260 : vector<128x1xf32>
    %262 = vector.broadcast %261 : vector<128x1xf32> to vector<128x128xf32>
    %263 = arith.mulf %254, %262 : vector<128x128xf32>
    %c0_119 = arith.constant 0 : index
    %c0_120 = arith.constant 0 : index
    %264 = vector.load %arg12[%c0_119, %c0_120] : memref<128x128xf32, #tpu.memory_space<vmem>>, vector<128x128xf32>
    %265 = arith.addf %264, %263 : vector<128x128xf32>
    %c0_121 = arith.constant 0 : index
    %c0_122 = arith.constant 0 : index
    %266 = vector.load %arg12[%c0_121, %c0_122] : memref<128x128xf32, #tpu.memory_space<vmem>>, vector<128x128xf32>
    tpu.vector_store %arg12[%c0_121, %c0_122], %265 {strides = array<i32>} : memref<128x128xf32, #tpu.memory_space<vmem>>, vector<128x128xf32>,
    %c0_i32_123 = arith.constant 0 : i32
    %267 = vector.broadcast %c0_i32_123 : i32 to vector<1x128xi32>
    %268 = arith.cmpi sge, %4, %267 : vector<1x128xi32>
    %c8_i32_124 = arith.constant 8 : i32
    %269 = vector.broadcast %c8_i32_124 : i32 to vector<1x128xi32>
    %270 = arith.cmpi slt, %4, %269 : vector<1x128xi32>
    %271 = arith.andi %268, %270 : vector<1x128xi1>
    %272 = arith.extui %271 : vector<1x128xi1> to vector<1x128xi32>
    %273 = arith.sitofp %272 : vector<1x128xi32> to vector<1x128xf32>
    %c0_125 = arith.constant 0 : index
    %c0_126 = arith.constant 0 : index
    %274 = vector.load %arg10[%c0_125, %c0_126] : memref<128x128xf32, #tpu.memory_space<vmem>>, vector<128x128xf32>
    %275 = vector.broadcast %273 : vector<1x128xf32> to vector<128x128xf32>
    %276 = arith.mulf %222, %275 : vector<128x128xf32>
    %cst_127 = arith.constant dense<0.000000e+00> : vector<128x128xf32>
    %277 = tpu.matmul %263, %276, %cst_127 {dimension_numbers = #tpu.dot_dimension_numbers<[1], [0], [0], [1], [0, 0, 1, 1], [], []>} : vector<128x128xf32>, vector<128x128xf32>, vector<128x128xf32> -> vector<128x128xf32>
    %278 = arith.addf %274, %277 : vector<128x128xf32>
    %c0_128 = arith.constant 0 : index
    %c0_129 = arith.constant 0 : index
    %279 = vector.load %arg10[%c0_128, %c0_129] : memref<128x128xf32, #tpu.memory_space<vmem>>, vector<128x128xf32>
    tpu.vector_store %arg10[%c0_128, %c0_129], %278 {strides = array<i32>} : memref<128x128xf32, #tpu.memory_space<vmem>>, vector<128x128xf32>,
    %280 = vector.extract_strided_slice %224 {offsets = [0, 1], sizes = [128, 1], strides = [1, 1]} : vector<128x128xf32> to vector<128x1xf32>
    %281 = vector.extract_strided_slice %226 {offsets = [1, 0], sizes = [1, 128], strides = [1, 1]} : vector<8x128xf32> to vector<1x128xf32>
    %282 = vector.broadcast %280 : vector<128x1xf32> to vector<128x128xf32>
    %283 = vector.broadcast %281 : vector<1x128xf32> to vector<128x128xf32>
    %284 = arith.addf %282, %283 : vector<128x128xf32>
    %cst_130 = arith.constant 0.000000e+00 : f32
    %285 = vector.broadcast %cst_130 : f32 to vector<128x128xf32>
    %286 = arith.cmpf ogt, %284, %285 : vector<128x128xf32>
    %cst_131 = arith.constant 2.000000e-01 : f32
    %287 = vector.broadcast %cst_131 : f32 to vector<128x128xf32>
    %288 = arith.mulf %287, %284 : vector<128x128xf32>
    %289 = arith.select %286, %284, %288 : vector<128x128xi1>, vector<128x128xf32>
    %290 = arith.mulf %0, %289 : vector<128x128xf32>
    %cst_132 = arith.constant -1.000000e+30 : f32
    %291 = vector.shape_cast %3 : vector<1x128xi1> to vector<1x128xi1>
    %292 = vector.broadcast %291 : vector<1x128xi1> to vector<128x128xi1>
    %293 = vector.broadcast %cst_132 : f32 to vector<128x128xf32>
    %294 = arith.select %292, %290, %293 : vector<128x128xi1>, vector<128x128xf32>
    %cst_133 = arith.constant dense<0xFF800000> : vector<128xf32>
    %295 = vector.multi_reduction <maximumf>, %294, %cst_133 [1] : vector<128x128xf32> to vector<128xf32>
    %296 = vector.shape_cast %295 : vector<128xf32> to vector<128x1xf32>
    %297 = vector.broadcast %296 : vector<128x1xf32> to vector<128x128xf32>
    %298 = arith.subf %290, %297 : vector<128x128xf32>
    %cst_134 = arith.constant -1.000000e+30 : f32
    %299 = vector.shape_cast %3 : vector<1x128xi1> to vector<1x128xi1>
    %300 = vector.broadcast %299 : vector<1x128xi1> to vector<128x128xi1>
    %301 = vector.broadcast %cst_134 : f32 to vector<128x128xf32>
    %302 = arith.select %300, %298, %301 : vector<128x128xi1>, vector<128x128xf32>
    %303 = math.exp %302 : vector<128x128xf32>
    %cst_135 = arith.constant dense<0.000000e+00> : vector<128xf32>
    %304 = vector.multi_reduction <add>, %303, %cst_135 [1] : vector<128x128xf32> to vector<128xf32>
    %305 = vector.shape_cast %304 : vector<128xf32> to vector<128x1xf32>
    %306 = tpu.reciprocal %305 {approx = true} : vector<128x1xf32> -> vector<128x1xf32>
    %307 = arith.mulf %305, %306 : vector<128x1xf32>
    %cst_136 = arith.constant 2.000000e+00 : f32
    %308 = vector.broadcast %cst_136 : f32 to vector<128x1xf32>
    %309 = arith.subf %308, %307 : vector<128x1xf32>
    %310 = arith.mulf %306, %309 : vector<128x1xf32>
    %311 = vector.broadcast %310 : vector<128x1xf32> to vector<128x128xf32>
    %312 = arith.mulf %303, %311 : vector<128x128xf32>
    %c0_137 = arith.constant 0 : index
    %c0_138 = arith.constant 0 : index
    %313 = vector.load %arg12[%c0_137, %c0_138] : memref<128x128xf32, #tpu.memory_space<vmem>>, vector<128x128xf32>
    %314 = arith.addf %313, %312 : vector<128x128xf32>
    %c0_139 = arith.constant 0 : index
    %c0_140 = arith.constant 0 : index
    %315 = vector.load %arg12[%c0_139, %c0_140] : memref<128x128xf32, #tpu.memory_space<vmem>>, vector<128x128xf32>
    tpu.vector_store %arg12[%c0_139, %c0_140], %314 {strides = array<i32>} : memref<128x128xf32, #tpu.memory_space<vmem>>, vector<128x128xf32>,
    %c8_i32_141 = arith.constant 8 : i32
    %316 = vector.broadcast %c8_i32_141 : i32 to vector<1x128xi32>
    %317 = arith.cmpi sge, %4, %316 : vector<1x128xi32>
    %c16_i32_142 = arith.constant 16 : i32
    %318 = vector.broadcast %c16_i32_142 : i32 to vector<1x128xi32>
    %319 = arith.cmpi slt, %4, %318 : vector<1x128xi32>
    %320 = arith.andi %317, %319 : vector<1x128xi1>
    %321 = arith.extui %320 : vector<1x128xi1> to vector<1x128xi32>
    %322 = arith.sitofp %321 : vector<1x128xi32> to vector<1x128xf32>
    %c0_143 = arith.constant 0 : index
    %c0_144 = arith.constant 0 : index
    %323 = vector.load %arg10[%c0_143, %c0_144] : memref<128x128xf32, #tpu.memory_space<vmem>>, vector<128x128xf32>
    %324 = vector.broadcast %322 : vector<1x128xf32> to vector<128x128xf32>
    %325 = arith.mulf %222, %324 : vector<128x128xf32>
    %cst_145 = arith.constant dense<0.000000e+00> : vector<128x128xf32>
    %326 = tpu.matmul %312, %325, %cst_145 {dimension_numbers = #tpu.dot_dimension_numbers<[1], [0], [0], [1], [0, 0, 1, 1], [], []>} : vector<128x128xf32>, vector<128x128xf32>, vector<128x128xf32> -> vector<128x128xf32>
    %327 = arith.addf %323, %326 : vector<128x128xf32>
    %c0_146 = arith.constant 0 : index
    %c0_147 = arith.constant 0 : index
    %328 = vector.load %arg10[%c0_146, %c0_147] : memref<128x128xf32, #tpu.memory_space<vmem>>, vector<128x128xf32>
    tpu.vector_store %arg10[%c0_146, %c0_147], %327 {strides = array<i32>} : memref<128x128xf32, #tpu.memory_space<vmem>>, vector<128x128xf32>,
    %329 = vector.extract_strided_slice %224 {offsets = [0, 2], sizes = [128, 1], strides = [1, 1]} : vector<128x128xf32> to vector<128x1xf32>
    %330 = vector.extract_strided_slice %226 {offsets = [2, 0], sizes = [1, 128], strides = [1, 1]} : vector<8x128xf32> to vector<1x128xf32>
    %331 = vector.broadcast %329 : vector<128x1xf32> to vector<128x128xf32>
    %332 = vector.broadcast %330 : vector<1x128xf32> to vector<128x128xf32>
    %333 = arith.addf %331, %332 : vector<128x128xf32>
    %cst_148 = arith.constant 0.000000e+00 : f32
    %334 = vector.broadcast %cst_148 : f32 to vector<128x128xf32>
    %335 = arith.cmpf ogt, %333, %334 : vector<128x128xf32>
    %cst_149 = arith.constant 2.000000e-01 : f32
    %336 = vector.broadcast %cst_149 : f32 to vector<128x128xf32>
    %337 = arith.mulf %336, %333 : vector<128x128xf32>
    %338 = arith.select %335, %333, %337 : vector<128x128xi1>, vector<128x128xf32>
    %339 = arith.mulf %0, %338 : vector<128x128xf32>
    %cst_150 = arith.constant -1.000000e+30 : f32
    %340 = vector.shape_cast %3 : vector<1x128xi1> to vector<1x128xi1>
    %341 = vector.broadcast %340 : vector<1x128xi1> to vector<128x128xi1>
    %342 = vector.broadcast %cst_150 : f32 to vector<128x128xf32>
    %343 = arith.select %341, %339, %342 : vector<128x128xi1>, vector<128x128xf32>
    %cst_151 = arith.constant dense<0xFF800000> : vector<128xf32>
    %344 = vector.multi_reduction <maximumf>, %343, %cst_151 [1] : vector<128x128xf32> to vector<128xf32>
    %345 = vector.shape_cast %344 : vector<128xf32> to vector<128x1xf32>
    %346 = vector.broadcast %345 : vector<128x1xf32> to vector<128x128xf32>
    %347 = arith.subf %339, %346 : vector<128x128xf32>
    %cst_152 = arith.constant -1.000000e+30 : f32
    %348 = vector.shape_cast %3 : vector<1x128xi1> to vector<1x128xi1>
    %349 = vector.broadcast %348 : vector<1x128xi1> to vector<128x128xi1>
    %350 = vector.broadcast %cst_152 : f32 to vector<128x128xf32>
    %351 = arith.select %349, %347, %350 : vector<128x128xi1>, vector<128x128xf32>
    %352 = math.exp %351 : vector<128x128xf32>
    %cst_153 = arith.constant dense<0.000000e+00> : vector<128xf32>
    %353 = vector.multi_reduction <add>, %352, %cst_153 [1] : vector<128x128xf32> to vector<128xf32>
    %354 = vector.shape_cast %353 : vector<128xf32> to vector<128x1xf32>
    %355 = tpu.reciprocal %354 {approx = true} : vector<128x1xf32> -> vector<128x1xf32>
    %356 = arith.mulf %354, %355 : vector<128x1xf32>
    %cst_154 = arith.constant 2.000000e+00 : f32
    %357 = vector.broadcast %cst_154 : f32 to vector<128x1xf32>
    %358 = arith.subf %357, %356 : vector<128x1xf32>
    %359 = arith.mulf %355, %358 : vector<128x1xf32>
    %360 = vector.broadcast %359 : vector<128x1xf32> to vector<128x128xf32>
    %361 = arith.mulf %352, %360 : vector<128x128xf32>
    %c0_155 = arith.constant 0 : index
    %c0_156 = arith.constant 0 : index
    %362 = vector.load %arg12[%c0_155, %c0_156] : memref<128x128xf32, #tpu.memory_space<vmem>>, vector<128x128xf32>
    %363 = arith.addf %362, %361 : vector<128x128xf32>
    %c0_157 = arith.constant 0 : index
    %c0_158 = arith.constant 0 : index
    %364 = vector.load %arg12[%c0_157, %c0_158] : memref<128x128xf32, #tpu.memory_space<vmem>>, vector<128x128xf32>
    tpu.vector_store %arg12[%c0_157, %c0_158], %363 {strides = array<i32>} : memref<128x128xf32, #tpu.memory_space<vmem>>, vector<128x128xf32>,
    %c16_i32_159 = arith.constant 16 : i32
    %365 = vector.broadcast %c16_i32_159 : i32 to vector<1x128xi32>
    %366 = arith.cmpi sge, %4, %365 : vector<1x128xi32>
    %c24_i32_160 = arith.constant 24 : i32
    %367 = vector.broadcast %c24_i32_160 : i32 to vector<1x128xi32>
    %368 = arith.cmpi slt, %4, %367 : vector<1x128xi32>
    %369 = arith.andi %366, %368 : vector<1x128xi1>
    %370 = arith.extui %369 : vector<1x128xi1> to vector<1x128xi32>
    %371 = arith.sitofp %370 : vector<1x128xi32> to vector<1x128xf32>
    %c0_161 = arith.constant 0 : index
    %c0_162 = arith.constant 0 : index
    %372 = vector.load %arg10[%c0_161, %c0_162] : memref<128x128xf32, #tpu.memory_space<vmem>>, vector<128x128xf32>
    %373 = vector.broadcast %371 : vector<1x128xf32> to vector<128x128xf32>
    %374 = arith.mulf %222, %373 : vector<128x128xf32>
    %cst_163 = arith.constant dense<0.000000e+00> : vector<128x128xf32>
    %375 = tpu.matmul %361, %374, %cst_163 {dimension_numbers = #tpu.dot_dimension_numbers<[1], [0], [0], [1], [0, 0, 1, 1], [], []>} : vector<128x128xf32>, vector<128x128xf32>, vector<128x128xf32> -> vector<128x128xf32>
    %376 = arith.addf %372, %375 : vector<128x128xf32>
    %c0_164 = arith.constant 0 : index
    %c0_165 = arith.constant 0 : index
    %377 = vector.load %arg10[%c0_164, %c0_165] : memref<128x128xf32, #tpu.memory_space<vmem>>, vector<128x128xf32>
    tpu.vector_store %arg10[%c0_164, %c0_165], %376 {strides = array<i32>} : memref<128x128xf32, #tpu.memory_space<vmem>>, vector<128x128xf32>,
    %378 = vector.extract_strided_slice %224 {offsets = [0, 3], sizes = [128, 1], strides = [1, 1]} : vector<128x128xf32> to vector<128x1xf32>
    %379 = vector.extract_strided_slice %226 {offsets = [3, 0], sizes = [1, 128], strides = [1, 1]} : vector<8x128xf32> to vector<1x128xf32>
    %380 = vector.broadcast %378 : vector<128x1xf32> to vector<128x128xf32>
    %381 = vector.broadcast %379 : vector<1x128xf32> to vector<128x128xf32>
    %382 = arith.addf %380, %381 : vector<128x128xf32>
    %cst_166 = arith.constant 0.000000e+00 : f32
    %383 = vector.broadcast %cst_166 : f32 to vector<128x128xf32>
    %384 = arith.cmpf ogt, %382, %383 : vector<128x128xf32>
    %cst_167 = arith.constant 2.000000e-01 : f32
    %385 = vector.broadcast %cst_167 : f32 to vector<128x128xf32>
    %386 = arith.mulf %385, %382 : vector<128x128xf32>
    %387 = arith.select %384, %382, %386 : vector<128x128xi1>, vector<128x128xf32>
    %388 = arith.mulf %0, %387 : vector<128x128xf32>
    %cst_168 = arith.constant -1.000000e+30 : f32
    %389 = vector.shape_cast %3 : vector<1x128xi1> to vector<1x128xi1>
    %390 = vector.broadcast %389 : vector<1x128xi1> to vector<128x128xi1>
    %391 = vector.broadcast %cst_168 : f32 to vector<128x128xf32>
    %392 = arith.select %390, %388, %391 : vector<128x128xi1>, vector<128x128xf32>
    %cst_169 = arith.constant dense<0xFF800000> : vector<128xf32>
    %393 = vector.multi_reduction <maximumf>, %392, %cst_169 [1] : vector<128x128xf32> to vector<128xf32>
    %394 = vector.shape_cast %393 : vector<128xf32> to vector<128x1xf32>
    %395 = vector.broadcast %394 : vector<128x1xf32> to vector<128x128xf32>
    %396 = arith.subf %388, %395 : vector<128x128xf32>
    %cst_170 = arith.constant -1.000000e+30 : f32
    %397 = vector.shape_cast %3 : vector<1x128xi1> to vector<1x128xi1>
    %398 = vector.broadcast %397 : vector<1x128xi1> to vector<128x128xi1>
    %399 = vector.broadcast %cst_170 : f32 to vector<128x128xf32>
    %400 = arith.select %398, %396, %399 : vector<128x128xi1>, vector<128x128xf32>
    %401 = math.exp %400 : vector<128x128xf32>
    %cst_171 = arith.constant dense<0.000000e+00> : vector<128xf32>
    %402 = vector.multi_reduction <add>, %401, %cst_171 [1] : vector<128x128xf32> to vector<128xf32>
    %403 = vector.shape_cast %402 : vector<128xf32> to vector<128x1xf32>
    %404 = tpu.reciprocal %403 {approx = true} : vector<128x1xf32> -> vector<128x1xf32>
    %405 = arith.mulf %403, %404 : vector<128x1xf32>
    %cst_172 = arith.constant 2.000000e+00 : f32
    %406 = vector.broadcast %cst_172 : f32 to vector<128x1xf32>
    %407 = arith.subf %406, %405 : vector<128x1xf32>
    %408 = arith.mulf %404, %407 : vector<128x1xf32>
    %409 = vector.broadcast %408 : vector<128x1xf32> to vector<128x128xf32>
    %410 = arith.mulf %401, %409 : vector<128x128xf32>
    %c0_173 = arith.constant 0 : index
    %c0_174 = arith.constant 0 : index
    %411 = vector.load %arg12[%c0_173, %c0_174] : memref<128x128xf32, #tpu.memory_space<vmem>>, vector<128x128xf32>
    %412 = arith.addf %411, %410 : vector<128x128xf32>
    %c0_175 = arith.constant 0 : index
    %c0_176 = arith.constant 0 : index
    %413 = vector.load %arg12[%c0_175, %c0_176] : memref<128x128xf32, #tpu.memory_space<vmem>>, vector<128x128xf32>
    tpu.vector_store %arg12[%c0_175, %c0_176], %412 {strides = array<i32>} : memref<128x128xf32, #tpu.memory_space<vmem>>, vector<128x128xf32>,
    %c24_i32_177 = arith.constant 24 : i32
    %414 = vector.broadcast %c24_i32_177 : i32 to vector<1x128xi32>
    %415 = arith.cmpi sge, %4, %414 : vector<1x128xi32>
    %c32_i32_178 = arith.constant 32 : i32
    %416 = vector.broadcast %c32_i32_178 : i32 to vector<1x128xi32>
    %417 = arith.cmpi slt, %4, %416 : vector<1x128xi32>
    %418 = arith.andi %415, %417 : vector<1x128xi1>
    %419 = arith.extui %418 : vector<1x128xi1> to vector<1x128xi32>
    %420 = arith.sitofp %419 : vector<1x128xi32> to vector<1x128xf32>
    %c0_179 = arith.constant 0 : index
    %c0_180 = arith.constant 0 : index
    %421 = vector.load %arg10[%c0_179, %c0_180] : memref<128x128xf32, #tpu.memory_space<vmem>>, vector<128x128xf32>
    %422 = vector.broadcast %420 : vector<1x128xf32> to vector<128x128xf32>
    %423 = arith.mulf %222, %422 : vector<128x128xf32>
    %cst_181 = arith.constant dense<0.000000e+00> : vector<128x128xf32>
    %424 = tpu.matmul %410, %423, %cst_181 {dimension_numbers = #tpu.dot_dimension_numbers<[1], [0], [0], [1], [0, 0, 1, 1], [], []>} : vector<128x128xf32>, vector<128x128xf32>, vector<128x128xf32> -> vector<128x128xf32>
    %425 = arith.addf %421, %424 : vector<128x128xf32>
    %c0_182 = arith.constant 0 : index
    %c0_183 = arith.constant 0 : index
    %426 = vector.load %arg10[%c0_182, %c0_183] : memref<128x128xf32, #tpu.memory_space<vmem>>, vector<128x128xf32>
    tpu.vector_store %arg10[%c0_182, %c0_183], %425 {strides = array<i32>} : memref<128x128xf32, #tpu.memory_space<vmem>>, vector<128x128xf32>,
    %c0_184 = arith.constant 0 : index
    %c0_185 = arith.constant 0 : index
    %427 = vector.load %arg10[%c0_184, %c0_185] : memref<128x128xf32, #tpu.memory_space<vmem>>, vector<128x128xf32>
    %cst_186 = arith.constant 0.000000e+00 : f32
    %428 = vector.broadcast %cst_186 : f32 to vector<128x128xf32>
    %429 = arith.maximumf %427, %428 : vector<128x128xf32>
    %c0_187 = arith.constant 0 : index
    %c0_188 = arith.constant 0 : index
    %430 = vector.load %arg10[%c0_187, %c0_188] : memref<128x128xf32, #tpu.memory_space<vmem>>, vector<128x128xf32>
    tpu.vector_store %arg10[%c0_187, %c0_188], %429 {strides = array<i32>} : memref<128x128xf32, #tpu.memory_space<vmem>>, vector<128x128xf32>,
    %c0_189 = arith.constant 0 : index
    %c0_190 = arith.constant 0 : index
    %431 = vector.load %arg12[%c0_189, %c0_190] : memref<128x128xf32, #tpu.memory_space<vmem>>, vector<128x128xf32>
    %cst_191 = arith.constant 2.500000e-01 : f32
    %432 = vector.broadcast %cst_191 : f32 to vector<128x128xf32>
    %433 = arith.mulf %431, %432 : vector<128x128xf32>
    %c0_192 = arith.constant 0 : index
    %c0_193 = arith.constant 0 : index
    %434 = vector.load %arg12[%c0_192, %c0_193] : memref<128x128xf32, #tpu.memory_space<vmem>>, vector<128x128xf32>
    tpu.vector_store %arg12[%c0_192, %c0_193], %433 {strides = array<i32>} : memref<128x128xf32, #tpu.memory_space<vmem>>, vector<128x128xf32>,
    return
  }
  func.func @transform_0(%arg0: i32) -> (i32, i32) {
    %c0_i32 = arith.constant 0 : i32
    %c0_i32_0 = arith.constant 0 : i32
    %c0_i32_1 = arith.constant 0 : i32
    return %c0_i32, %c0_i32_0 : i32, i32
  }
  func.func @transform_1(%arg0: i32) -> (i32, i32) {
    %c0_i32 = arith.constant 0 : i32
    %c0_i32_0 = arith.constant 0 : i32
    %c0_i32_1 = arith.constant 0 : i32
    return %c0_i32, %c0_i32_0 : i32, i32
  }
  func.func @transform_2(%arg0: i32) -> (i32, i32) {
    %c0_i32 = arith.constant 0 : i32
    %c0_i32_0 = arith.constant 0 : i32
    %c0_i32_1 = arith.constant 0 : i32
    return %c0_i32, %c0_i32_0 : i32, i32
  }
  func.func @transform_3(%arg0: i32) -> (i32, i32) {
    %c0_i32 = arith.constant 0 : i32
    %c0_i32_0 = arith.constant 0 : i32
    %c0_i32_1 = arith.constant 0 : i32
    return %c0_i32, %c0_i32_0 : i32, i32
  }
  func.func @transform_4(%arg0: i32) -> (i32, i32) {
    %c0_i32 = arith.constant 0 : i32
    %c0_i32_0 = arith.constant 0 : i32
    %c0_i32_1 = arith.constant 0 : i32
    return %c0_i32, %c0_i32_0 : i32, i32
  }
  func.func @transform_5(%arg0: i32) -> (i32, i32) {
    %c0_i32 = arith.constant 0 : i32
    %c0_i32_0 = arith.constant 0 : i32
    %c0_i32_1 = arith.constant 0 : i32
    return %c0_i32, %c0_i32_0 : i32, i32
  }
  func.func @transform_6(%arg0: i32) -> (i32, i32) {
    %c0_i32 = arith.constant 0 : i32
    %c0_i32_0 = arith.constant 0 : i32
    %c0_i32_1 = arith.constant 0 : i32
    return %c0_i32, %c0_i32_0 : i32, i32
  }
  func.func @transform_7(%arg0: i32) -> (i32, i32) {
    %c0_i32 = arith.constant 0 : i32
    %c0_i32_0 = arith.constant 0 : i32
    %c0_i32_1 = arith.constant 0 : i32
    return %c0_i32, %c0_i32_0 : i32, i32
  }
  func.func @transform_8(%arg0: i32) -> (i32, i32) {
    %c0_i32 = arith.constant 0 : i32
    %c0_i32_0 = arith.constant 0 : i32
    %c0_i32_1 = arith.constant 0 : i32
    return %c0_i32, %c0_i32_0 : i32, i32
  }
  func.func @transform_9(%arg0: i32) -> (i32, i32) {
    %c0_i32 = arith.constant 0 : i32
    %c0_i32_0 = arith.constant 0 : i32
    %c0_i32_1 = arith.constant 0 : i32
    return %c0_i32, %c0_i32_0 : i32, i32
  }
  func.func @transform_10(%arg0: i32) -> (i32, i32) {
    %c0_i32 = arith.constant 0 : i32
    %c0_i32_0 = arith.constant 0 : i32
    %c0_i32_1 = arith.constant 0 : i32
    return %c0_i32, %c0_i32_0 : i32, i32
  }
  func.func @transform_11(%arg0: i32) -> (i32, i32) {
    %c0_i32 = arith.constant 0 : i32
    %c0_i32_0 = arith.constant 0 : i32
    %c0_i32_1 = arith.constant 0 : i32
    return %c0_i32, %c0_i32_0 : i32, i32
  }
}

</mosaic_0001>

<bundles_post_ra>
// kernel: tpu_custom_call.1
= control target key start
LH: loop header
LB: loop body
LE: loop exit
PB: predicated region body
PF: predicated region fallthrough
CT: control target
= control target key end

     0   :  { %17 = vsyncpa [#allocation3], 0  ;;  %s12865_s0 = inlined_call_operand.hbm [shape: f32[128,128], index: 0, kind: input, shape index: {}]   ;;  %s12866_s1 = inlined_call_operand.hbm [shape: f32[128,128], index: 1, kind: input, shape index: {}]   ;;  %s12867_s2 = inlined_call_operand.hbm [shape: f32[128,128], index: 2, kind: input, shape index: {}]   ;;  %s12868_s3 = inlined_call_operand.hbm [shape: f32[128,128], index: 3, kind: input, shape index: {}]   ;;  %s12869_s4 = inlined_call_operand.vmem [shape: f32[8,128], index: 4, kind: input, shape index: {}]   ;;  %s12870_s5 = inlined_call_operand.hbm [shape: f32[128,128], index: 5, kind: input, shape index: {}]   ;;  %s12871_s6 = inlined_call_operand.hbm [shape: f32[128,128], index: 6, kind: input, shape index: {}]   ;;  %s12872_s7 = inlined_call_operand.vmem [shape: f32[8,128], index: 7, kind: input, shape index: {}]   ;;  %s12873_s8 = inlined_call_operand.hbm [shape: f32[128,128], index: 8, kind: output, shape index: {0}]   ;;  %s12874_s9 = inlined_call_operand.hbm [shape: f32[128,128], index: 9, kind: output, shape index: {1}]   ;;  %s12875_s10 = inlined_call_operand.hbm [shape: f32[128,128], index: 10, kind: output, shape index: {2}]   ;;  %s12876_s11 = inlined_call_operand.hbm [shape: f32[128,128], index: 11, kind: output, shape index: {3}]  }
   0x1   :  { %18 = vsyncpa [#allocation6], 0 }
   0x2   :  { %19 = vsyncpa [#allocation9], 0 }
   0x3   :  { %20 = vsyncpa [#allocation12], 0 }
   0x4   :  { %21 = vsyncpa [#allocation4], 0 }
   0x5   :  { %22 = vsyncpa [#allocation15], 0 }
   0x6   :  { %23 = vsyncpa [#allocation18], 0  ;;  %s9055_s17 = smov [#allocation5]   ;;  %s9056_s19 = smov [#allocation8]  }
   0x7   :  { %s41_s18 = sshll.u32 %s9055_s17, 4  ;;  %s65_s20 = sshll.u32 %s9056_s19, 4  ;;  %s42_s18 = int_to_ptr.vmem [resolvable:$true] %s41_s18  ;;  %s9134_s20 = int_to_ptr.vmem [resolvable:$true] %s65_s20 }
   0x8   :  { %s8821_s23 = scalar_lea.hbm %s12866_s1, 2048 }
   0x9   :  { %p8822_p0 = scmp.ne.s32.totalorder %s12866_s1, %s8821_s23  ;;  %p8825_p1 = scmp.lt.u32.totalorder %s8821_s23, %s12866_s1 }
   0xb   :  { %p8827_p2 = pnand %p8825_p1, %p8822_p0 }
   0xd   :  { %8830 = shalt.err (!%p8827_p2)
}
   0xe   :  { %s8831_s28 = scalar_lea.vmem %s42_s18, 2048  ;;  %p8836_p4 = scmp.lt.s32.totalorder %s42_s18, %s42_s18 }
   0xf   :  { %p8832_p3 = scmp.ne.s32.totalorder %s42_s18, %s8831_s28  ;;  %p8837_p5 = scmp.lt.s32.totalorder %s8831_s28, %s8831_s28 }
  0x11   :  { %p8838_p6 = por %p8837_p5, %p8836_p4 }
  0x13   :  { %p8839_p7 = pnand %p8838_p6, %p8832_p3 }
  0x15   :  { %8842 = shalt.err (!%p8839_p7)
}
  0x16   :  { %s9057_s29 = smov 128   ;;  %s9058_s30 = smov 8  }
  0x17   :  { %47 = dma.hbm_to_vmem [thread:$0]  %s12866_s1, 2048, %s42_s18, [#allocation6], %s9057_s29, %s9057_s29, %s9058_s30  }
  0x18   :  { %s8843_s16 = scalar_lea.hbm %s12868_s3, 2048 }
  0x19   :  { %p8844_p8 = scmp.ne.s32.totalorder %s12868_s3, %s8843_s16  ;;  %p8847_p9 = scmp.lt.u32.totalorder %s8843_s16, %s12868_s3 }
  0x1b   :  { %p8849_p10 = pnand %p8847_p9, %p8844_p8 }
  0x1d   :  { %8852 = shalt.err (!%p8849_p10)
}
  0x1e   :  { %s8853_s23 = scalar_lea.vmem %s9134_s20, 2048  ;;  %p8858_p12 = scmp.lt.s32.totalorder %s9134_s20, %s9134_s20 }
  0x1f   :  { %p8854_p11 = scmp.ne.s32.totalorder %s9134_s20, %s8853_s23  ;;  %p8859_p13 = scmp.lt.s32.totalorder %s8853_s23, %s8853_s23 }
  0x21   :  { %p8860_p0 = por %p8859_p13, %p8858_p12 }
  0x23   :  { %p8861_p1 = pnand %p8860_p0, %p8854_p11 }
  0x25   :  { %8864 = shalt.err (!%p8861_p1)
}
  0x26   :  { %71 = dma.hbm_to_vmem [thread:$0]  %s12868_s3, 2048, %s9134_s20, [#allocation9], %s9057_s29, %s9057_s29, %s9058_s30  }
  0x27   :  { %s9059_s24 = smov [#allocation2]   ;;  %s9060_s26 = smov [#allocation7]  }
  0x28   :  { %s29_s25 = sshll.u32 %s9059_s24, 4  ;;  %s53_s27 = sshll.u32 %s9060_s26, 4  ;;  %s30_s25 = int_to_ptr.vmem [resolvable:$true] %s29_s25  ;;  %s9171_s27 = int_to_ptr.vmem [resolvable:$true] %s53_s27 }
  0x29   :  { %s8865_s13 = scalar_lea.hbm %s12865_s0, 2048 }
  0x2a   :  { %p8866_p2 = scmp.ne.s32.totalorder %s12865_s0, %s8865_s13  ;;  %p8869_p3 = scmp.lt.u32.totalorder %s8865_s13, %s12865_s0 }
  0x2c   :  { %p8871_p4 = pnand %p8869_p3, %p8866_p2 }
  0x2e   :  { %8874 = shalt.err (!%p8871_p4)
}
  0x2f   :  { %s8875_s3 = scalar_lea.vmem %s30_s25, 2048  ;;  %p8880_p6 = scmp.lt.s32.totalorder %s30_s25, %s30_s25 }
  0x30   :  { %p8876_p5 = scmp.ne.s32.totalorder %s30_s25, %s8875_s3  ;;  %p8881_p7 = scmp.lt.s32.totalorder %s8875_s3, %s8875_s3 }
  0x32   :  { %p8882_p8 = por %p8881_p7, %p8880_p6 }
  0x34   :  { %p8883_p9 = pnand %p8882_p8, %p8876_p5 }
  0x36   :  { %8886 = shalt.err (!%p8883_p9)
}
  0x37   :  { %35 = dma.hbm_to_vmem [thread:$0]  %s12865_s0, 2048, %s30_s25, [#allocation3], %s9057_s29, %s9057_s29, %s9058_s30  }
  0x38   :  { %s8887_s23 = scalar_lea.hbm %s12867_s2, 2048 }
  0x39   :  { %p8888_p10 = scmp.ne.s32.totalorder %s12867_s2, %s8887_s23  ;;  %p8891_p11 = scmp.lt.u32.totalorder %s8887_s23, %s12867_s2 }
  0x3b   :  { %p8893_p12 = pnand %p8891_p11, %p8888_p10 }
  0x3d   :  { %8896 = shalt.err (!%p8893_p12)
}
  0x3e   :  { %s8897_s28 = scalar_lea.vmem %s9171_s27, 2048  ;;  %p8902_p0 = scmp.lt.s32.totalorder %s9171_s27, %s9171_s27 }
  0x3f   :  { %p8898_p13 = scmp.ne.s32.totalorder %s9171_s27, %s8897_s28  ;;  %p8903_p1 = scmp.lt.s32.totalorder %s8897_s28, %s8897_s28 }
  0x41   :  { %p8904_p2 = por %p8903_p1, %p8902_p0 }
  0x43   :  { %p8905_p3 = pnand %p8904_p2, %p8898_p13 }
  0x45   :  { %8908 = shalt.err (!%p8905_p3)
}
  0x46   :  { %59 = dma.hbm_to_vmem [thread:$0]  %s12867_s2, 2048, %s9171_s27, [#allocation6], %s9057_s29, %s9057_s29, %s9058_s30  }
  0x47   :  { %s9061_s12 = smov [#allocation10]   ;;  %s9062_s14 = smov [#allocation11]  }
  0x48   :  { %s79_s13 = sshll.u32 %s9061_s12, 4  ;;  %s91_s15 = sshll.u32 %s9062_s14, 4  ;;  %s80_s13 = int_to_ptr.vmem [resolvable:$true] %s79_s13  ;;  %s9208_s15 = int_to_ptr.vmem [resolvable:$true] %s91_s15 }
  0x49   :  { %s8909_s3 = scalar_lea.hbm %s12870_s5, 2048 }
  0x4a   :  { %p8910_p4 = scmp.ne.s32.totalorder %s12870_s5, %s8909_s3  ;;  %p8913_p5 = scmp.lt.u32.totalorder %s8909_s3, %s12870_s5 }
  0x4c   :  { %p8915_p6 = pnand %p8913_p5, %p8910_p4 }
  0x4e   :  { %8918 = shalt.err (!%p8915_p6)
}
  0x4f   :  { %s8919_s2 = scalar_lea.vmem %s80_s13, 2048  ;;  %p8924_p8 = scmp.lt.s32.totalorder %s80_s13, %s80_s13 }
  0x50   :  { %p8920_p7 = scmp.ne.s32.totalorder %s80_s13, %s8919_s2  ;;  %p8925_p9 = scmp.lt.s32.totalorder %s8919_s2, %s8919_s2 }
  0x52   :  { %p8926_p10 = por %p8925_p9, %p8924_p8 }
  0x54   :  { %p8927_p11 = pnand %p8926_p10, %p8920_p7 }
  0x56   :  { %8930 = shalt.err (!%p8927_p11)
}
  0x57   :  { %85 = dma.hbm_to_vmem [thread:$0]  %s12870_s5, 2048, %s80_s13, [#allocation9], %s9057_s29, %s9057_s29, %s9058_s30  }
  0x58   :  { %s8931_s24 = scalar_lea.hbm %s12871_s6, 2048 }
  0x59   :  { %p8932_p12 = scmp.ne.s32.totalorder %s12871_s6, %s8931_s24  ;;  %p8935_p13 = scmp.lt.u32.totalorder %s8931_s24, %s12871_s6 }
  0x5b   :  { %p8937_p0 = pnand %p8935_p13, %p8932_p12 }
  0x5d   :  { %8940 = shalt.err (!%p8937_p0)
}
  0x5e   :  { %s8941_s12 = scalar_lea.vmem %s9208_s15, 2048  ;;  %p8946_p2 = scmp.lt.s32.totalorder %s9208_s15, %s9208_s15 }
  0x5f   :  { %p8942_p1 = scmp.ne.s32.totalorder %s9208_s15, %s8941_s12  ;;  %p8947_p3 = scmp.lt.s32.totalorder %s8941_s12, %s8941_s12 }
  0x61   :  { %p8948_p4 = por %p8947_p3, %p8946_p2 }
  0x63   :  { %p8949_p5 = pnand %p8948_p4, %p8942_p1 }
  0x65   :  { %8952 = shalt.err (!%p8949_p5)
}
  0x66   :  { %97 = dma.hbm_to_vmem [thread:$0]  %s12871_s6, 2048, %s9208_s15, [#allocation12], %s9057_s29, %s9057_s29, %s9058_s30  }
  0x67   :  { %9041 = dma.done.wait [#allocation3], 2048  }
  0x68   :  { %9042 = vsyncadd [#allocation3], 4294965248 }
  0x69   :  { %9043 = dma.done.wait [#allocation6], 4096  }
  0x6a   :  { %9044 = vsyncadd [#allocation6], 4294963200 }
  0x6b   :  { %9045 = dma.done.wait [#allocation9], 4096  }
  0x6c   :  { %9046 = vsyncadd [#allocation9], 4294963200 }
  0x6d   :  { %9047 = dma.done.wait [#allocation12], 2048  }
  0x6e   :  { %9048 = vsyncadd [#allocation12], 4294965248  ;;  %v153_v0 = vld [vmem:[#allocation7] sm:$0xff]  ;;  %v154_v1 = vld [vmem:[#allocation7 + $0x8] sm:$0xff]  ;;  %vm9067_vm10 = vmmov 0  }
  0x6f   :  { %v155_v2 = vld [vmem:[#allocation7 + $0x10] sm:$0xff]  ;;  %v7527_v3 = vpack.c.bf16 %v154_v1, %v153_v0  ;;  %v156_v4 = vld [vmem:[#allocation7 + $0x18] sm:$0xff]  ;;  %v157_v6 = vld [vmem:[#allocation7 + $0x20] sm:$0xff]  ;;  %v12880_v0 = vmov 0.0|0.0   ;;  %v12888_v1 = vmov 1  }
  0x70   :  { %v7531_v5 = vpack.c.bf16 %v156_v4, %v155_v2  ;;  %v158_v7 = vld [vmem:[#allocation7 + $0x28] sm:$0xff]  ;;  %v137_v9 = vld [vmem:[#allocation2] sm:$0xff]  ;;  %v159_v10 = vld [vmem:[#allocation7 + $0x30] sm:$0xff]  ;;  %8171 = vset.pattern.permute.xlu1 %v12888_v1  ;;  %v12884_v2 = vmov 0  }
  0x71   :  { %7528 = vmatprep.subr.bf16.mxu0 %v7527_v3  ;;  %v7535_v8 = vpack.c.bf16 %v158_v7, %v157_v6  ;;  %v160_v11 = vld [vmem:[#allocation7 + $0x38] sm:$0xff]  ;;  %6817 = vmatprep.mubr.f32.mxu0 %v137_v9  ;;  %v161_v13 = vld [vmem:[#allocation7 + $0x40] sm:$0xff]  ;;  %v162_v14 = vld [vmem:[#allocation7 + $0x48] sm:$0xff] }
  0x72   :  { %7530 = vmatpush3.bf16.msra.mxu0 %v7527_v3  ;;  %v7539_v12 = vpack.c.bf16 %v160_v11, %v159_v10  ;;  %v7543_v15 = vpack.c.bf16 %v162_v14, %v161_v13  ;;  %v163_v16 = vld [vmem:[#allocation7 + $0x50] sm:$0xff]  ;;  %v164_v17 = vld [vmem:[#allocation7 + $0x58] sm:$0xff]  ;;  %v165_v19 = vld [vmem:[#allocation7 + $0x60] sm:$0xff]  ;;  %8170 = vset.pattern.permute.xlu0 %v12884_v2  ;;  %v134_v3 = vlaneseq }
  0x73   :  { %7532 = vmatprep.subr.bf16.mxu0 %v7531_v5  ;;  %v7547_v18 = vpack.c.bf16 %v164_v17, %v163_v16  ;;  %v166_v20 = vld [vmem:[#allocation7 + $0x68] sm:$0xff]  ;;  %v167_v22 = vld [vmem:[#allocation7 + $0x70] sm:$0xff]  ;;  %v168_v23 = vld [vmem:[#allocation7 + $0x78] sm:$0xff] }
  0x74   :  { %v7551_v21 = vpack.c.bf16 %v166_v20, %v165_v19  ;;  %v7555_v24 = vpack.c.bf16 %v168_v23, %v167_v22  ;;  %v314_v25 = vld [vmem:[#allocation8] sm:$0xff]  ;;  %v315_v26 = vld [vmem:[#allocation8 + $0x8] sm:$0xff]  ;;  %v316_v28 = vld [vmem:[#allocation8 + $0x10] sm:$0xff]  ;;  %v9249_v4 = vand.u32 127, %v134_v3 }
  0x75   :  { %v7559_v27 = vpack.c.bf16 %v315_v26, %v314_v25  ;;  %v317_v29 = vld [vmem:[#allocation8 + $0x18] sm:$0xff]  ;;  %v138_v30 = vld [vmem:[#allocation2 + $0x8] sm:$0xff]  ;;  %v139_v31 = vld [vmem:[#allocation2 + $0x10] sm:$0xff] }
  0x76   :  { %7534 = vmatpush3.bf16.msra.mxu0 %v7531_v5  ;;  %v7563_v32 = vpack.c.bf16 %v317_v29, %v316_v28  ;;  %v318_v33 = vld [vmem:[#allocation8 + $0x20] sm:$0xff]  ;;  %v319_v34 = vld [vmem:[#allocation8 + $0x28] sm:$0xff]  ;;  %v140_v35 = vld [vmem:[#allocation2 + $0x18] sm:$0xff]  ;;  %13094 = vst [vmem:[#allocation26_spill] sm:$0xff] %v9249_v4  ;;  %vm136_vm0 = vcmp.lt.s32.totalorder %v9249_v4, 16  ;;  %vm1650_vm1 = vcmp.ge.s32.totalorder %v9249_v4, 8 }
  0x77   :  { %7536 = vmatprep.subr.bf16.mxu0 %v7535_v8  ;;  %v141_v36 = vld [vmem:[#allocation2 + $0x20] sm:$0xff]  ;;  %v7567_v37 = vpack.c.bf16 %v319_v34, %v318_v33  ;;  %v320_v38 = vld [vmem:[#allocation8 + $0x30] sm:$0xff]  ;;  %v321_v39 = vld [vmem:[#allocation8 + $0x38] sm:$0xff]  ;;  %vm2283_vm2 = vcmp.ge.s32.totalorder %v9249_v4, 16  ;;  %vm2284_vm3 = vcmp.lt.s32.totalorder %v9249_v4, 24  ;;  %vm2917_vm4 = vcmp.ge.s32.totalorder %v9249_v4, 24 }
  0x78   :  { %v142_v40 = vld [vmem:[#allocation2 + $0x28] sm:$0xff]  ;;  %v143_v41 = vld [vmem:[#allocation2 + $0x30] sm:$0xff]  ;;  %v7571_v42 = vpack.c.bf16 %v321_v39, %v320_v38  ;;  %v322_v43 = vld [vmem:[#allocation8 + $0x40] sm:$0xff]  ;;  %vm2918_vm5 = vcmp.lt.s32.totalorder %v9249_v4, 32  ;;  %vm1017_vm8 = vcmp.lt.s32.totalorder %v9249_v4, 8  ;;  %v12879_v5 = vmov 0.0  }
  0x79   :  { %v323_v44 = vld [vmem:[#allocation8 + $0x48] sm:$0xff]  ;;  %v144_v45 = vld [vmem:[#allocation2 + $0x38] sm:$0xff]  ;;  %v145_v46 = vld [vmem:[#allocation2 + $0x40] sm:$0xff]  ;;  %v9261_v6 = vsel %vm1017_vm8, 1.0, %v12879_v5 }
  0x7a   :  { %7538 = vmatpush3.bf16.msra.mxu0 %v7535_v8  ;;  %v7575_v47 = vpack.c.bf16 %v323_v44, %v322_v43  ;;  %v324_v48 = vld [vmem:[#allocation8 + $0x50] sm:$0xff]  ;;  %v325_v49 = vld [vmem:[#allocation8 + $0x58] sm:$0xff]  ;;  %v146_v50 = vld [vmem:[#allocation2 + $0x48] sm:$0xff]  ;;  %13095 = vst [vmem:[#allocation27_spill] sm:$0xff] %v9261_v6 }
  0x7b   :  { %7540 = vmatprep.subr.bf16.mxu0 %v7539_v12  ;;  %v147_v51 = vld [vmem:[#allocation2 + $0x50] sm:$0xff]  ;;  %v7579_v52 = vpack.c.bf16 %v325_v49, %v324_v48  ;;  %v326_v53 = vld [vmem:[#allocation8 + $0x60] sm:$0xff]  ;;  %v327_v54 = vld [vmem:[#allocation8 + $0x68] sm:$0xff] }
  0x7c   :  { %v148_v55 = vld [vmem:[#allocation2 + $0x58] sm:$0xff]  ;;  %v149_v56 = vld [vmem:[#allocation2 + $0x60] sm:$0xff]  ;;  %v7583_v57 = vpack.c.bf16 %v327_v54, %v326_v53  ;;  %v328_v58 = vld [vmem:[#allocation8 + $0x70] sm:$0xff] }
  0x7d   :  { %v329_v59 = vld [vmem:[#allocation8 + $0x78] sm:$0xff]  ;;  %v150_v60 = vld [vmem:[#allocation2 + $0x68] sm:$0xff]  ;;  %v151_v61 = vld [vmem:[#allocation2 + $0x70] sm:$0xff] }
  0x7e   :  { %7542 = vmatpush3.bf16.msra.mxu0 %v7539_v12  ;;  %v7587_v62 = vpack.c.bf16 %v329_v59, %v328_v58  ;;  %v152_v63 = vld [vmem:[#allocation2 + $0x78] sm:$0xff]  ;;  %vm1651_vm6 = vmand %vm1650_vm1, %vm136_vm0 }
  0x7f   :  { %7544 = vmatprep.subr.bf16.mxu0 %v7543_v15  ;;  %vm2285_vm7 = vmand %vm2283_vm2, %vm2284_vm3  ;;  %v9264_v7 = vsel %vm1651_vm6, 1.0, %v12879_v5 }
  0x80   :  { %vm2919_vm9 = vmand %vm2917_vm4, %vm2918_vm5  ;;  %13096 = vst [vmem:[#allocation28_spill] sm:$0xff] %v9264_v7  ;;  %v9267_v8 = vsel %vm2285_vm7, 1.0, %v12879_v5 }
  0x81   :  { %13097 = vst [vmem:[#allocation29_spill] sm:$0xff] %v9267_v8  ;;  %v9270_v9 = vsel %vm2919_vm9, 1.0, %v12879_v5 }
  0x82   :  { %7546 = vmatpush3.bf16.msra.mxu0 %v7543_v15  ;;  %13098 = vst [vmem:[#allocation30_spill] sm:$0xff] %v9270_v9 }
  0x83   :  { %7548 = vmatprep.subr.bf16.mxu0 %v7547_v18 }
  0x86   :  { %7550 = vmatpush3.bf16.msra.mxu0 %v7547_v18 }
  0x87   :  { %7552 = vmatprep.subr.bf16.mxu0 %v7551_v21 }
  0x8a   :  { %7554 = vmatpush3.bf16.msra.mxu0 %v7551_v21 }
  0x8b   :  { %7556 = vmatprep.subr.bf16.mxu0 %v7555_v24 }
  0x8e   :  { %7558 = vmatpush3.bf16.msra.mxu0 %v7555_v24 }
  0x8f   :  { %7560 = vmatprep.subr.bf16.mxu0 %v7559_v27 }
  0x91   :  { %6818 = vmatmul.mubr.f32.vlgmr.msra.gmra.mrb[0].mxu0 %v138_v30 }
  0x92   :  { %6820 = vmatprep.mubr.f32.mxu0 %v139_v31  ;;  %7562 = vmatpush3.bf16.msra.mxu0 %v7559_v27 }
  0x93   :  { %7564 = vmatprep.subr.bf16.mxu0 %v7563_v32 }
  0x95   :  { %6821 = vmatmul.mubr.f32.gmra.mrb[2].mxu0 %v140_v35 }
  0x96   :  { %6823 = vmatprep.mubr.f32.mxu0 %v141_v36  ;;  %7566 = vmatpush3.bf16.msra.mxu0 %v7563_v32 }
  0x97   :  { %7568 = vmatprep.subr.bf16.mxu0 %v7567_v37 }
  0x99   :  { %6824 = vmatmul.mubr.f32.gmra.mrb[4].mxu0 %v142_v40 }
  0x9a   :  { %6826 = vmatprep.mubr.f32.mxu0 %v143_v41  ;;  %7570 = vmatpush3.bf16.msra.mxu0 %v7567_v37 }
  0x9b   :  { %7572 = vmatprep.subr.bf16.mxu0 %v7571_v42 }
  0x9d   :  { %6827 = vmatmul.mubr.f32.gmra.mrb[6].mxu0 %v144_v45 }
  0x9e   :  { %6829 = vmatprep.mubr.f32.mxu0 %v145_v46  ;;  %7574 = vmatpush3.bf16.msra.mxu0 %v7571_v42 }
  0x9f   :  { %7576 = vmatprep.subr.bf16.mxu0 %v7575_v47 }
  0xa1   :  { %6830 = vmatmul.mubr.f32.gmra.mrb[8].mxu0 %v146_v50 }
  0xa2   :  { %6832 = vmatprep.mubr.f32.mxu0 %v147_v51  ;;  %7578 = vmatpush3.bf16.msra.mxu0 %v7575_v47 }
  0xa3   :  { %7580 = vmatprep.subr.bf16.mxu0 %v7579_v52 }
  0xa5   :  { %6833 = vmatmul.mubr.f32.gmra.mrb[10].mxu0 %v148_v55 }
  0xa6   :  { %6835 = vmatprep.mubr.f32.mxu0 %v149_v56  ;;  %7582 = vmatpush3.bf16.msra.mxu0 %v7579_v52 }
  0xa7   :  { %7584 = vmatprep.subr.bf16.mxu0 %v7583_v57 }
  0xa9   :  { %6836 = vmatmul.mubr.f32.gmra.mrb[12].mxu0 %v150_v60 }
  0xaa   :  { %6838 = vmatprep.mubr.f32.mxu0 %v151_v61  ;;  %7586 = vmatpush3.bf16.msra.mxu0 %v7583_v57 }
  0xab   :  { %7588 = vmatprep.subr.bf16.mxu0 %v7587_v62 }
  0xad   :  { %6839 = vmatmul.mubr.f32.gmra.mrb[14].mxu0 %v152_v63 }
  0xae   :  { %7590 = vmatpush3.bf16.msra.mxu0 %v7587_v62 }
  0xaf   :  { %7591 = vmatprep.subr.bf16.mxu0 %v12880_v0 }
 0x164   :  { %v6819_v10 = vpop.f32.mrb[0].mxu0 }
 0x165   :  { %v235_v11 = vpop.f32.mrb[1].mxu0  ;;  %v1038_v12 = vmul.f32 %v6819_v10, %v9261_v6  ;;  %v1671_v13 = vmul.f32 %v6819_v10, %v9264_v7  ;;  %v2305_v14 = vmul.f32 %v6819_v10, %v9267_v8  ;;  %v2939_v15 = vmul.f32 %v6819_v10, %v9270_v9 }
 0x166   :  { %6873 = vmatprep.mubr.f32.mxu0 %v235_v11  ;;  %v7592_v16 = vpack.c.bf16 %v6819_v10, %v235_v11  ;;  %v1037_v17 = vmul.f32 %v9261_v6, %v235_v11  ;;  %v1670_v18 = vmul.f32 %v9264_v7, %v235_v11  ;;  %v2304_v19 = vmul.f32 %v9267_v8, %v235_v11 }
 0x167   :  { %6874 = vmatmul.mubr.f32.vlgmr.msra.gmra.mrb[16].mxu0 %v6819_v10  ;;  %v2938_v20 = vmul.f32 %v9270_v9, %v235_v11 }
 0x168   :  { %v6822_v21 = vpop.f32.mrb[2].mxu0  ;;  %7593 = vmatpush3.bf16.xpose.msra.mxu0 %v7592_v16  ;;  %v7615_v22 = vpack.c.bf16 %v1038_v12, %v1037_v17  ;;  %v9280_v23 = vpack.c.bf16 %v1671_v13, %v1670_v18  ;;  %v9282_v24 = vpack.c.bf16 %v2305_v14, %v2304_v19 }
 0x169   :  { %v245_v25 = vpop.f32.mrb[3].mxu0  ;;  %v1040_v26 = vmul.f32 %v6822_v21, %v9261_v6  ;;  %7594 = vmatprep.subr.bf16.mxu0 %v12880_v0  ;;  %v1673_v27 = vmul.f32 %v6822_v21, %v9264_v7  ;;  %v2307_v28 = vmul.f32 %v6822_v21, %v9267_v8  ;;  %v9288_v29 = vpack.c.bf16 %v2939_v15, %v2938_v20 }
 0x16a   :  { %13099 = vst [vmem:[#allocation31_spill] sm:$0xff] %v9280_v23  ;;  %13100 = vst [vmem:[#allocation32_spill] sm:$0xff] %v9282_v24  ;;  %7616 = vmatprep.subr.bf16.mxu1 %v7615_v22  ;;  %v1039_v30 = vmul.f32 %v9261_v6, %v245_v25  ;;  %6876 = vmatprep.mubr.f32.mxu0 %v245_v25  ;;  %v7595_v31 = vpack.c.bf16 %v6822_v21, %v245_v25 }
 0x16b   :  { %13101 = vst [vmem:[#allocation33_spill] sm:$0xff] %v9288_v29  ;;  %v1672_v32 = vmul.f32 %v9264_v7, %v245_v25  ;;  %7618 = vmatpush3.bf16.msra.mxu1 %v7615_v22  ;;  %6877 = vmatmul.mubr.f32.gmra.mrb[18].mxu0 %v6822_v21  ;;  %v2306_v33 = vmul.f32 %v9267_v8, %v245_v25 }
 0x16c   :  { %v2940_v34 = vmul.f32 %v9270_v9, %v245_v25  ;;  %v2941_v35 = vmul.f32 %v6822_v21, %v9270_v9  ;;  %v6825_v36 = vpop.f32.mrb[4].mxu0  ;;  %v7619_v37 = vpack.c.bf16 %v1040_v26, %v1039_v30 }
 0x16d   :  { %v9295_v38 = vpack.c.bf16 %v1673_v27, %v1672_v32  ;;  %v255_v39 = vpop.f32.mrb[5].mxu0  ;;  %v1042_v40 = vmul.f32 %v6825_v36, %v9261_v6  ;;  %v1675_v41 = vmul.f32 %v6825_v36, %v9264_v7  ;;  %v9299_v42 = vpack.c.bf16 %v2307_v28, %v2306_v33 }
 0x16e   :  { %v2309_v43 = vmul.f32 %v6825_v36, %v9267_v8  ;;  %7620 = vmatprep.subr.bf16.mxu1 %v7619_v37  ;;  %v1041_v44 = vmul.f32 %v9261_v6, %v255_v39  ;;  %6879 = vmatprep.mubr.f32.mxu0 %v255_v39  ;;  %v7598_v45 = vpack.c.bf16 %v6825_v36, %v255_v39 }
 0x16f   :  { %13102 = vst [vmem:[#allocation34_spill] sm:$0xff] %v9295_v38  ;;  %13103 = vst [vmem:[#allocation35_spill] sm:$0xff] %v9299_v42  ;;  %v1674_v46 = vmul.f32 %v9264_v7, %v255_v39  ;;  %7622 = vmatpush3.bf16.msra.mxu1 %v7619_v37  ;;  %6880 = vmatmul.mubr.f32.gmra.mrb[20].mxu0 %v6825_v36  ;;  %v2308_v47 = vmul.f32 %v9267_v8, %v255_v39 }
 0x170   :  { %v9305_v48 = vpack.c.bf16 %v2941_v35, %v2940_v34  ;;  %v2942_v49 = vmul.f32 %v9270_v9, %v255_v39  ;;  %v9308_v50 = vpop.f32.mrb[6].mxu0  ;;  %v7623_v51 = vpack.c.bf16 %v1042_v40, %v1041_v44  ;;  %7596 = vmatpush3.bf16.xpose.msra.mxu0 %v7595_v31  ;;  %v2943_v53 = vmul.f32 %v6825_v36, %v9270_v9 }
 0x171   :  { %v9310_v52 = vpack.c.bf16 %v1675_v41, %v1674_v46  ;;  %v9313_v54 = vpop.f32.mrb[7].mxu0  ;;  %v1044_v55 = vmul.f32 %v9308_v50, %v9261_v6  ;;  %7597 = vmatprep.subr.bf16.mxu0 %v12880_v0  ;;  %v1677_v56 = vmul.f32 %v9308_v50, %v9264_v7  ;;  %v9320_v57 = vpack.c.bf16 %v2309_v43, %v2308_v47 }
 0x172   :  { %13104 = vst [vmem:[#allocation36_spill] sm:$0xff] %v9305_v48  ;;  %v2311_v58 = vmul.f32 %v9308_v50, %v9267_v8  ;;  %7624 = vmatprep.subr.bf16.mxu1 %v7623_v51  ;;  %v1043_v59 = vmul.f32 %v9261_v6, %v9313_v54  ;;  %6882 = vmatprep.mubr.f32.mxu0 %v9313_v54 }
 0x173   :  { %13105 = vst [vmem:[#allocation37_spill] sm:$0xff] %v9310_v52  ;;  %13106 = vst [vmem:[#allocation38_spill] sm:$0xff] %v9320_v57  ;;  %v7601_v60 = vpack.c.bf16 %v9308_v50, %v9313_v54  ;;  %v1676_v61 = vmul.f32 %v9264_v7, %v9313_v54  ;;  %7626 = vmatpush3.bf16.msra.mxu1 %v7623_v51  ;;  %6883 = vmatmul.mubr.f32.gmra.mrb[22].mxu0 %v9308_v50 }
 0x174   :  { %v2310_v62 = vmul.f32 %v9267_v8, %v9313_v54  ;;  %v9334_v63 = vpack.c.bf16 %v2943_v53, %v2942_v49  ;;  %v2944_v10 = vmul.f32 %v9270_v9, %v9313_v54  ;;  %v9338_v11 = vpop.f32.mrb[8].mxu0  ;;  %v7627_v12 = vpack.c.bf16 %v1044_v55, %v1043_v59 }
 0x175   :  { %v9340_v13 = vpack.c.bf16 %v1677_v56, %v1676_v61  ;;  %v2945_v14 = vmul.f32 %v9308_v50, %v9270_v9  ;;  %v9344_v15 = vpop.f32.mrb[9].mxu0  ;;  %v1046_v16 = vmul.f32 %v9338_v11, %v9261_v6  ;;  %v1679_v17 = vmul.f32 %v9338_v11, %v9264_v7 }
 0x176   :  { %13107 = vst [vmem:[#allocation39_spill] sm:$0xff] %v9334_v63  ;;  %v9350_v18 = vpack.c.bf16 %v2311_v58, %v2310_v62  ;;  %v2313_v19 = vmul.f32 %v9338_v11, %v9267_v8  ;;  %7628 = vmatprep.subr.bf16.mxu1 %v7627_v12  ;;  %v1045_v20 = vmul.f32 %v9261_v6, %v9344_v15 }
 0x177   :  { %13108 = vst [vmem:[#allocation40_spill] sm:$0xff] %v9340_v13  ;;  %6885 = vmatprep.mubr.f32.mxu0 %v9344_v15  ;;  %v7604_v21 = vpack.c.bf16 %v9338_v11, %v9344_v15  ;;  %v1678_v22 = vmul.f32 %v9264_v7, %v9344_v15  ;;  %7630 = vmatpush3.bf16.msra.mxu1 %v7627_v12 }
 0x178   :  { %13109 = vst [vmem:[#allocation41_spill] sm:$0xff] %v9350_v18  ;;  %6886 = vmatmul.mubr.f32.gmra.mrb[24].mxu0 %v9338_v11  ;;  %v2312_v25 = vmul.f32 %v9267_v8, %v9344_v15  ;;  %v9364_v26 = vpack.c.bf16 %v2945_v14, %v2944_v10  ;;  %v2946_v27 = vmul.f32 %v9270_v9, %v9344_v15  ;;  %v9368_v28 = vpop.f32.mrb[10].mxu0  ;;  %v475_v15 = vld [vmem:[%s12869_s4] sm:$0xff] }
 0x179   :  { %v7631_v30 = vpack.c.bf16 %v1046_v16, %v1045_v20  ;;  %7599 = vmatpush3.bf16.xpose.msra.mxu0 %v7598_v45  ;;  %v9370_v31 = vpack.c.bf16 %v1679_v17, %v1678_v22  ;;  %v2947_v32 = vmul.f32 %v9338_v11, %v9270_v9  ;;  %v9374_v33 = vpop.f32.mrb[11].mxu0  ;;  %v1048_v34 = vmul.f32 %v9368_v28, %v9261_v6 }
 0x17a   :  { %13110 = vst [vmem:[#allocation42_spill] sm:$0xff] %v9364_v26  ;;  %7600 = vmatprep.subr.bf16.mxu0 %v12880_v0  ;;  %v1681_v35 = vmul.f32 %v9368_v28, %v9264_v7  ;;  %v9381_v36 = vpack.c.bf16 %v2313_v19, %v2312_v25  ;;  %v2315_v37 = vmul.f32 %v9368_v28, %v9267_v8  ;;  %v9667_v26 = vld [vmem:[#allocation5 + $0x20] sm:$0xff] }
 0x17b   :  { %13111 = vst [vmem:[#allocation43_spill] sm:$0xff] %v9370_v31  ;;  %7632 = vmatprep.subr.bf16.mxu1 %v7631_v30  ;;  %v1047_v39 = vmul.f32 %v9261_v6, %v9374_v33  ;;  %6888 = vmatprep.mubr.f32.mxu0 %v9374_v33  ;;  %v7607_v40 = vpack.c.bf16 %v9368_v28, %v9374_v33 }
 0x17c   :  { %13112 = vst [vmem:[#allocation44_spill] sm:$0xff] %v9381_v36  ;;  %v1680_v41 = vmul.f32 %v9264_v7, %v9374_v33  ;;  %7634 = vmatpush3.bf16.msra.mxu1 %v7631_v30  ;;  %6889 = vmatmul.mubr.f32.gmra.mrb[26].mxu0 %v9368_v28  ;;  %v2314_v43 = vmul.f32 %v9267_v8, %v9374_v33  ;;  %v6837_v46 = vpop.f32.mrb[12].mxu0 }
 0x17d   :  { %v9395_v44 = vpack.c.bf16 %v2947_v32, %v2946_v27  ;;  %v2948_v45 = vmul.f32 %v9270_v9, %v9374_v33  ;;  %v7635_v47 = vpack.c.bf16 %v1048_v34, %v1047_v39  ;;  %v2949_v51 = vmul.f32 %v9368_v28, %v9270_v9  ;;  %v295_v53 = vpop.f32.mrb[13].mxu0 }
 0x17e   :  { %v9399_v49 = vpack.c.bf16 %v1681_v35, %v1680_v41  ;;  %v1050_v55 = vmul.f32 %v6837_v46, %v9261_v6  ;;  %v1683_v56 = vmul.f32 %v6837_v46, %v9264_v7  ;;  %v9405_v58 = vpack.c.bf16 %v2315_v37, %v2314_v43  ;;  %6891 = vmatprep.mubr.f32.mxu0 %v295_v53 }
 0x17f   :  { %13113 = vst [vmem:[#allocation45_spill] sm:$0xff] %v9395_v44  ;;  %v2317_v59 = vmul.f32 %v6837_v46, %v9267_v8  ;;  %7636 = vmatprep.subr.bf16.mxu1 %v7635_v47  ;;  %v1049_v61 = vmul.f32 %v9261_v6, %v295_v53  ;;  %v7610_v62 = vpack.c.bf16 %v6837_v46, %v295_v53 }
 0x180   :  { %13114 = vst [vmem:[#allocation46_spill] sm:$0xff] %v9399_v49  ;;  %13115 = vst [vmem:[#allocation47_spill] sm:$0xff] %v9405_v58  ;;  %v1682_v10 = vmul.f32 %v9264_v7, %v295_v53  ;;  %7638 = vmatpush3.bf16.msra.mxu1 %v7635_v47  ;;  %6892 = vmatmul.mubr.f32.gmra.mrb[28].mxu0 %v6837_v46  ;;  %v2316_v12 = vmul.f32 %v9267_v8, %v295_v53  ;;  %v6840_v17 = vpop.f32.mrb[14].mxu0  ;;  %v12886_v47 = vmov 2  }
 0x181   :  { %v9411_v14 = vpack.c.bf16 %v2949_v51, %v2948_v45  ;;  %v2950_v16 = vmul.f32 %v9270_v9, %v295_v53  ;;  %v7639_v19 = vpack.c.bf16 %v1050_v55, %v1049_v61  ;;  %7602 = vmatpush3.bf16.xpose.msra.mxu0 %v7601_v60  ;;  %v2951_v22 = vmul.f32 %v6837_v46, %v9270_v9  ;;  %v305_v25 = vpop.f32.mrb[15].mxu0 }
 0x182   :  { %v9417_v20 = vpack.c.bf16 %v1683_v56, %v1682_v10  ;;  %v1052_v27 = vmul.f32 %v6840_v17, %v9261_v6  ;;  %7603 = vmatprep.subr.bf16.mxu0 %v12880_v0  ;;  %v9422_v28 = vpack.c.bf16 %v2317_v59, %v2316_v12  ;;  %v1051_v30 = vmul.f32 %v9261_v6, %v305_v25 }
 0x183   :  { %13116 = vst [vmem:[#allocation48_spill] sm:$0xff] %v9411_v14  ;;  %7640 = vmatprep.subr.bf16.mxu1 %v7639_v19  ;;  %6894 = vmatprep.mubr.f32.mxu0 %v305_v25  ;;  %v7613_v32 = vpack.c.bf16 %v6840_v17, %v305_v25  ;;  %v9425_v33 = vpack.c.bf16 %v2951_v22, %v2950_v16  ;;  %v12882_v55 = vmov 3  }
 0x184   :  { %13117 = vst [vmem:[#allocation49_spill] sm:$0xff] %v9417_v20  ;;  %13118 = vst [vmem:[#allocation50_spill] sm:$0xff] %v9422_v28  ;;  %7642 = vmatpush3.bf16.msra.mxu1 %v7639_v19  ;;  %6895 = vmatmul.mubr.f32.gmra.mrb[30].mxu0 %v6840_v17  ;;  %v7643_v50 = vpack.c.bf16 %v1052_v27, %v1051_v30  ;;  %v1684_v54 = vmul.f32 %v9264_v7, %v305_v25 }
 0x185   :  { %13119 = vst [vmem:[#allocation51_spill] sm:$0xff] %v9425_v33  ;;  %6929 = vmatprep.mubr.msk.f32.mxu0 %vm9067_vm10, %v12879_v5  ;;  %v1685_v60 = vmul.f32 %v6840_v17, %v9264_v7  ;;  %v2318_v34 = vmul.f32 %v9267_v8, %v305_v25  ;;  %v2319_v35 = vmul.f32 %v6840_v17, %v9267_v8  ;;  %v9649_v33 = vld [vmem:[#allocation5 + $0x28] sm:$0xff] }
 0x186   :  { %7644 = vmatprep.subr.bf16.mxu1 %v7643_v50  ;;  %v2952_v37 = vmul.f32 %v9270_v9, %v305_v25  ;;  %v2953_v39 = vmul.f32 %v6840_v17, %v9270_v9 }
 0x187   :  { %v9440_v41 = vpack.c.bf16 %v1685_v60, %v1684_v54  ;;  %v9442_v43 = vpack.c.bf16 %v2319_v35, %v2318_v34  ;;  %v9547_v60 = vshrl.u32 %v134_v3, 7 }
 0x188   :  { %7646 = vmatpush3.bf16.msra.mxu1 %v7643_v50  ;;  %v9444_v11 = vpack.c.bf16 %v2953_v39, %v2952_v37 }
 0x189   :  { %7648 = vmatprep.subr.bf16.mxu1 %v9280_v23  ;;  %7605 = vmatpush3.bf16.xpose.msra.mxu0 %v7604_v21  ;;  %13120 = vst [vmem:[#allocation52_spill] sm:$0xff] %v9440_v41  ;;  %13121 = vst [vmem:[#allocation53_spill] sm:$0xff] %v9442_v43  ;;  %v12877_v34 = vsub.s32 1, %v9547_v60 }
 0x18a   :  { %7606 = vmatprep.subr.bf16.mxu0 %v12880_v0  ;;  %13122 = vst [vmem:[#allocation54_spill] sm:$0xff] %v9444_v11  ;;  %13123 = vst [vmem:[#allocation55_spill] sm:$0xff] %v9547_v60 }
 0x191   :  { %7608 = vmatpush3.bf16.xpose.msra.mxu0 %v7607_v40 }
 0x192   :  { %7609 = vmatprep.subr.bf16.mxu0 %v12880_v0 }
 0x199   :  { %7611 = vmatpush3.bf16.xpose.msra.mxu0 %v7610_v62 }
 0x19a   :  { %7612 = vmatprep.subr.bf16.mxu0 %v12880_v0 }
 0x1a1   :  { %7614 = vmatpush3.bf16.xpose.msra.mxu0 %v7613_v32 }
 0x1a8   :  { %6930 = vmatmul.mubr.f32.vlgmr.msra.gmra.mrb[32].mxu0 %v475_v15 }
 0x23a   :  { %v6875_v21 = vpop.f32.mrb[16].mxu0 }
 0x23b   :  { %1235 = vperm.xlu1 %8171, %v6875_v21   ;;  %585 = vperm.xlu0 %8170, %v6875_v21   ;;  %v396_v45 = vpop.f32.mrb[17].mxu0 }
 0x23e   :  { %v6878_v46 = vpop.f32.mrb[18].mxu0 }
 0x23f   :  { %8176 = vset.pattern.permute.xlu1 %v12886_v47  ;;  %8172 = vset.pattern.permute.xlu0 %v12886_v47  ;;  %v406_v40 = vpop.f32.mrb[19].mxu0 }
 0x240   :  { %1868 = vperm.xlu0 %8172, %v6875_v21   ;;  %1864 = vperm.xlu1 %8176, %v396_v45  }
 0x242   :  { %v6881_v51 = vpop.f32.mrb[20].mxu0 }
 0x243   :  { %v416_v53 = vpop.f32.mrb[21].mxu0 }
 0x244   :  { %8173 = vset.pattern.permute.xlu0 %v12882_v55  ;;  %8177 = vset.pattern.permute.xlu1 %v12882_v55 }
 0x245   :  { %2502 = vperm.xlu0 %8173, %v6875_v21   ;;  %2498 = vperm.xlu1 %8177, %v396_v45   ;;  %v12878_v21 = vsub.s32 0, %v9547_v60 }
 0x246   :  { %v6884_v56 = vpop.f32.mrb[22].mxu0 }
 0x247   :  { %v426_v59 = vpop.f32.mrb[23].mxu0 }
 0x249   :  { %8174 = vset.pattern.permute.xlu0 %v12884_v2  ;;  %8178 = vset.pattern.permute.xlu1 %v12884_v2 }
 0x24a   :  { %580 = vperm.xlu0 %8174, %v396_v45   ;;  %595 = vperm.xlu1 %8178, %v6878_v46  }
 0x24b   :  { %v9457_v61 = vpop.f32.mrb[24].mxu0 }
 0x24c   :  { %v9459_v62 = vpop.f32.mrb[25].mxu0 }
 0x24e   :  { %8175 = vset.pattern.permute.xlu0 %v12888_v1  ;;  %8179 = vset.pattern.permute.xlu1 %v12886_v47 }
 0x24f   :  { %v9463_v10 = vpop.f32.mrb[26].mxu0  ;;  %1231 = vperm.xlu0 %8175, %v396_v45   ;;  %1876 = vperm.xlu1 %8179, %v6878_v46  }
 0x250   :  { %v9465_v12 = vpop.f32.mrb[27].mxu0 }
 0x253   :  { %v9467_v16 = vpop.f32.mrb[28].mxu0  ;;  %1243 = vperm.xlu0 %8175, %v6878_v46   ;;  %8180 = vset.pattern.permute.xlu1 %v12882_v55 }
 0x254   :  { %v9470_v17 = vpop.f32.mrb[29].mxu0  ;;  %2510 = vperm.xlu1 %8180, %v6878_v46  }
 0x257   :  { %v9472_v19 = vpop.f32.mrb[30].mxu0  ;;  %1251 = vperm.xlu0 %8175, %v6881_v51  }
 0x258   :  { %v9474_v22 = vpop.f32.mrb[31].mxu0  ;;  %8181 = vset.pattern.permute.xlu1 %v12884_v2 }
 0x259   :  { %590 = vperm.xlu1 %8181, %v406_v40  }
 0x25b   :  { %8186 = vset.pattern.permute.xlu0 %v12886_v47 }
 0x25c   :  { %1884 = vperm.xlu0 %8186, %v6881_v51  }
 0x25d   :  { %8182 = vset.pattern.permute.xlu1 %v12888_v1 }
 0x25e   :  { %1239 = vperm.xlu1 %8182, %v406_v40  }
 0x260   :  { %8187 = vset.pattern.permute.xlu0 %v12882_v55 }
 0x261   :  { %2518 = vperm.xlu0 %8187, %v6881_v51  }
 0x262   :  { %8183 = vset.pattern.permute.xlu1 %v12886_v47 }
 0x263   :  { %1872 = vperm.xlu1 %8183, %v406_v40  }
 0x265   :  { %8188 = vset.pattern.permute.xlu0 %v12884_v2 }
 0x266   :  { %600 = vperm.xlu0 %8188, %v416_v53  }
 0x267   :  { %8184 = vset.pattern.permute.xlu1 %v12882_v55 }
 0x268   :  { %2506 = vperm.xlu1 %8184, %v406_v40  }
 0x26a   :  { %8190 = vset.pattern.permute.xlu0 %v12886_v47 }
 0x26b   :  { %1880 = vperm.xlu0 %8190, %v416_v53  }
 0x26c   :  { %8185 = vset.pattern.permute.xlu1 %v12884_v2 }
 0x26d   :  { %605 = vperm.xlu1 %8185, %v6881_v51  }
 0x26f   :  { %8191 = vset.pattern.permute.xlu0 %v12882_v55 }
 0x270   :  { %2514 = vperm.xlu0 %8191, %v416_v53  }
 0x271   :  { %8189 = vset.pattern.permute.xlu1 %v12888_v1 }
 0x272   :  { %1247 = vperm.xlu1 %8189, %v416_v53  }
 0x274   :  { %8193 = vset.pattern.permute.xlu0 %v12888_v1 }
 0x275   :  { %1259 = vperm.xlu0 %8193, %v6884_v56  }
 0x276   :  { %8192 = vset.pattern.permute.xlu1 %v12884_v2 }
 0x277   :  { %615 = vperm.xlu1 %8192, %v6884_v56  }
 0x279   :  { %8194 = vset.pattern.permute.xlu0 %v12886_v47 }
 0x27a   :  { %1892 = vperm.xlu0 %8194, %v6884_v56  }
 0x27b   :  { %v9490_v25 = vpop.f32.mrb[32].mxu0  ;;  %8197 = vset.pattern.permute.xlu1 %v12888_v1 }
 0x27c   :  { %v6931_v27 = vpop.f32.mrb[33].mxu0  ;;  %1255 = vperm.xlu1 %8197, %v426_v59   ;;  %v9560_v39 = vrot.slane %v9490_v25, %v12877_v34  ;;  %v9569_v46 = vrot.slane %v9490_v25, %v12878_v21 }
 0x27e   :  { %8195 = vset.pattern.permute.xlu0 %v12882_v55 }
 0x27f   :  { %2526 = vperm.xlu0 %8195, %v6884_v56  }
 0x280   :  { %8198 = vset.pattern.permute.xlu1 %v12886_v47 }
 0x281   :  { %1888 = vperm.xlu1 %8198, %v426_v59  }
 0x283   :  { %8196 = vset.pattern.permute.xlu0 %v12884_v2 }
 0x284   :  { %610 = vperm.xlu0 %8196, %v426_v59  }
 0x285   :  { %8200 = vset.pattern.permute.xlu1 %v12884_v2 }
 0x286   :  { %625 = vperm.xlu1 %8200, %v9457_v61  }
 0x288   :  { %8199 = vset.pattern.permute.xlu0 %v12882_v55 }
 0x289   :  { %2522 = vperm.xlu0 %8199, %v426_v59  }
 0x28a   :  { %8202 = vset.pattern.permute.xlu1 %v12886_v47 }
 0x28b   :  { %1900 = vperm.xlu1 %8202, %v9457_v61  }
 0x28d   :  { %8201 = vset.pattern.permute.xlu0 %v12888_v1 }
 0x28e   :  { %1267 = vperm.xlu0 %8201, %v9457_v61  }
 0x28f   :  { %8205 = vset.pattern.permute.xlu1 %v12888_v1 }
 0x290   :  { %1263 = vperm.xlu1 %8205, %v9459_v62  }
 0x292   :  { %8203 = vset.pattern.permute.xlu0 %v12882_v55 }
 0x293   :  { %2534 = vperm.xlu0 %8203, %v9457_v61  }
 0x294   :  { %8208 = vset.pattern.permute.xlu1 %v12884_v2 }
 0x295   :  { %635 = vperm.xlu1 %8208, %v9463_v10  }
 0x297   :  { %8204 = vset.pattern.permute.xlu0 %v12884_v2 }
 0x298   :  { %620 = vperm.xlu0 %8204, %v9459_v62  }
 0x299   :  { %8213 = vset.pattern.permute.xlu1 %v12888_v1 }
 0x29a   :  { %1271 = vperm.xlu1 %8213, %v9465_v12  }
 0x29c   :  { %8206 = vset.pattern.permute.xlu0 %v12886_v47 }
 0x29d   :  { %1896 = vperm.xlu0 %8206, %v9459_v62  }
 0x29e   :  { %8216 = vset.pattern.permute.xlu1 %v12884_v2 }
 0x29f   :  { %645 = vperm.xlu1 %8216, %v9467_v16  }
 0x2a1   :  { %8207 = vset.pattern.permute.xlu0 %v12882_v55 }
 0x2a2   :  { %2530 = vperm.xlu0 %8207, %v9459_v62  }
 0x2a3   :  { %8221 = vset.pattern.permute.xlu1 %v12888_v1 }
 0x2a4   :  { %1279 = vperm.xlu1 %8221, %v9470_v17  }
 0x2a6   :  { %8209 = vset.pattern.permute.xlu0 %v12888_v1 }
 0x2a7   :  { %1275 = vperm.xlu0 %8209, %v9463_v10  }
 0x2a8   :  { %8222 = vset.pattern.permute.xlu1 %v12886_v47 }
 0x2a9   :  { %1912 = vperm.xlu1 %8222, %v9470_v17  }
 0x2ab   :  { %8210 = vset.pattern.permute.xlu0 %v12886_v47 }
 0x2ac   :  { %1908 = vperm.xlu0 %8210, %v9463_v10  }
 0x2ad   :  { %8224 = vset.pattern.permute.xlu1 %v12884_v2 }
 0x2ae   :  { %655 = vperm.xlu1 %8224, %v9472_v19  }
 0x2b0   :  { %8211 = vset.pattern.permute.xlu0 %v12882_v55 }
 0x2b1   :  { %2542 = vperm.xlu0 %8211, %v9463_v10  }
 0x2b2   :  { %8228 = vset.pattern.permute.xlu1 %v12888_v1 }
 0x2b3   :  { %1287 = vperm.xlu1 %8228, %v9474_v22  }
 0x2b5   :  { %8212 = vset.pattern.permute.xlu0 %v12884_v2 }
 0x2b6   :  { %630 = vperm.xlu0 %8212, %v9465_v12  }
 0x2b7   :  { %8229 = vset.pattern.permute.xlu1 %v12886_v47 }
 0x2b8   :  { %1920 = vperm.xlu1 %8229, %v9474_v22  }
 0x2ba   :  { %v1236_v30 = vpop.permute.xlu1 %1235  ;;  %v9537_v32 = vpop.permute.xlu0 %585  ;;  %8214 = vset.pattern.permute.xlu0 %v12886_v47 }
 0x2bb   :  { %1904 = vperm.xlu0 %8214, %v9465_v12   ;;  %v1299_v45 = vadd.f32 %v9560_v39, %v1236_v30 }
 0x2bd   :  { %v1331_v53 = vmul.f32 0.2, %v1299_v45  ;;  %vm1315_vm11 = vcmp.gt.f32.partialorder %v1299_v45, 0.0 }
 0x2bf   :  { %v9541_v50 = vpop.permute.xlu0 %1868  ;;  %v9543_v54 = vpop.permute.xlu1 %1864  ;;  %8215 = vset.pattern.permute.xlu0 %v12882_v55  ;;  %v1347_v27 = vsel %vm1315_vm11, %v1299_v45, %v1331_v53 }
 0x2c0   :  { %2538 = vperm.xlu0 %8215, %v9465_v12   ;;  %v9581_v12 = vld [vmem:[#allocation5 + $0x8] sm:$0xff] }
 0x2c4   :  { %v9551_v35 = vpop.permute.xlu0 %2502  ;;  %8217 = vset.pattern.permute.xlu0 %v12888_v1  ;;  %v9554_v37 = vpop.permute.xlu1 %2498 }
 0x2c5   :  { %1283 = vperm.xlu0 %8217, %v9467_v16  }
 0x2c9   :  { %v581_v15 = vpop.permute.xlu0 %580  ;;  %8218 = vset.pattern.permute.xlu0 %v12886_v47  ;;  %v596_v3 = vpop.permute.xlu1 %595 }
 0x2ca   :  { %1916 = vperm.xlu0 %8218, %v9467_v16   ;;  %v662_v56 = vadd.f32 %v9569_v46, %v581_v15  ;;  %v665_v15 = vadd.f32 %v9569_v46, %v596_v3 }
 0x2cc   :  { %v694_v62 = vmul.f32 0.2, %v662_v56  ;;  %vm678_vm12 = vcmp.gt.f32.partialorder %v662_v56, 0.0  ;;  %v697_v3 = vmul.f32 0.2, %v665_v15  ;;  %vm681_vm14 = vcmp.gt.f32.partialorder %v665_v15, 0.0 }
 0x2ce   :  { %v1232_v40 = vpop.permute.xlu0 %1231  ;;  %v9571_v51 = vpop.permute.xlu1 %1876  ;;  %8219 = vset.pattern.permute.xlu0 %v12882_v55  ;;  %v710_v5 = vsel %vm678_vm12, %v662_v56, %v694_v62 }
 0x2cf   :  { %2550 = vperm.xlu0 %8219, %v9467_v16   ;;  %v1298_v10 = vadd.f32 %v9560_v39, %v1232_v40  ;;  %v9584_v16 = vmul.f32 %v1347_v27, %v9581_v12  ;;  %v9591_v40 = vld [vmem:[#allocation5] sm:$0xff] }
 0x2d0   :  { %v9599_v53 = vmul.f32 %v710_v5, %v9591_v40 }
 0x2d1   :  { %v1330_v34 = vmul.f32 0.2, %v1298_v10  ;;  %vm1314_vm13 = vcmp.gt.f32.partialorder %v1298_v10, 0.0  ;;  %v1379_v45 = vsel %vm136_vm0, %v9584_v16, -1e+30 }
 0x2d2   :  { %v1244_v59 = vpop.permute.xlu0 %1243 }
 0x2d3   :  { %v9576_v61 = vpop.permute.xlu1 %2510  ;;  %8220 = vset.pattern.permute.xlu0 %v12884_v2  ;;  %v1301_v27 = vadd.f32 %v9560_v39, %v1244_v59  ;;  %v713_v59 = vsel %vm681_vm14, %v665_v15, %v697_v3 }
 0x2d4   :  { %640 = vperm.xlu0 %8220, %v9470_v17  }
 0x2d5   :  { %v1333_v5 = vmul.f32 0.2, %v1301_v27  ;;  %vm1317_vm15 = vcmp.gt.f32.partialorder %v1301_v27, 0.0 }
 0x2d6   :  { %v1252_v30 = vpop.permute.xlu0 %1251 }
 0x2d7   :  { %v1349_v9 = vsel %vm1317_vm15, %v1301_v27, %v1333_v5  ;;  %v9640_v5 = vld [vmem:[#allocation5 + $0x10] sm:$0xff] }
 0x2d8   :  { %v9587_v21 = vpop.permute.xlu1 %590  ;;  %8223 = vset.pattern.permute.xlu0 %v12882_v55  ;;  %v1346_v55 = vsel %vm1314_vm13, %v1298_v10, %v1330_v34  ;;  %v9613_v34 = vld [vmem:[#allocation5 + $0x18] sm:$0xff] }
 0x2d9   :  { %2546 = vperm.xlu0 %8223, %v9470_v17   ;;  %v744_v17 = vsel %vm136_vm0, %v9599_v53, -1e+30  ;;  %v9608_v62 = vmul.f32 %v1346_v55, %v9591_v40  ;;  %v9635_v7 = vmul.f32 %v1349_v9, %v9613_v34  ;;  %v13128_v9 = vmov 3  }
 0x2da   :  { %v664_v58 = vadd.f32 %v9569_v46, %v9587_v21 }
 0x2db   :  { %v9593_v0 = vpop.permute.xlu0 %1884  ;;  %v1378_v55 = vsel %vm136_vm0, %v9608_v62, -1e+30  ;;  %13126 = vst [vmem:[#allocation56_spill] sm:$0xff] %v9635_v7 }
 0x2dc   :  { %1396 = vmax.xlane.f32.xlu1 %v1379_v45  ;;  %v13124_v45 = vmov 2   ;;  %vm680_vm6 = vcmp.gt.f32.partialorder %v664_v58, 0.0 }
 0x2dd   :  { %v1240_v56 = vpop.permute.xlu1 %1239  ;;  %8225 = vset.pattern.permute.xlu0 %v12888_v1  ;;  %v9623_v1 = vmul.f32 %v713_v59, %v9613_v34 }
 0x2de   :  { %1291 = vperm.xlu0 %8225, %v9472_v19   ;;  %v1300_v2 = vadd.f32 %v9560_v39, %v1240_v56  ;;  %v1303_v56 = vadd.f32 %v9560_v39, %v1252_v30 }
 0x2df   :  { %v747_v8 = vsel %vm136_vm0, %v9623_v1, -1e+30 }
 0x2e0   :  { %v9611_v47 = vpop.permute.xlu0 %2518  ;;  %760 = vmax.xlane.f32.xlu1 %v744_v17  ;;  %v1332_v17 = vmul.f32 0.2, %v1300_v2  ;;  %vm1316_vm1 = vcmp.gt.f32.partialorder %v1300_v2, 0.0  ;;  %v1335_v59 = vmul.f32 0.2, %v1303_v56  ;;  %vm1319_vm2 = vcmp.gt.f32.partialorder %v1303_v56, 0.0 }
 0x2e2   :  { %v9615_v10 = vpop.permute.xlu1 %1872  ;;  %8226 = vset.pattern.permute.xlu0 %v13124_v45  ;;  %v13125_v45 = vmov 0   ;;  %v1348_v30 = vsel %vm1316_vm1, %v1300_v2, %v1332_v17 }
 0x2e3   :  { %1924 = vperm.xlu0 %8226, %v9472_v19   ;;  %v9646_v6 = vmul.f32 %v1348_v30, %v9640_v5 }
 0x2e4   :  { %1394 = vmax.xlane.f32.xlu1 %v1378_v55  ;;  %v1381_v55 = vsel %vm136_vm0, %v9635_v7, -1e+30 }
 0x2e5   :  { %v9626_v15 = vpop.permute.xlu0 %600  ;;  %13127 = vst [vmem:[#allocation57_spill] sm:$0xff] %v9646_v6  ;;  %v1380_v17 = vsel %vm136_vm0, %v9646_v6, -1e+30 }
 0x2e6   :  { %v666_v24 = vadd.f32 %v9569_v46, %v9626_v15 }
 0x2e7   :  { %v9628_v3 = vpop.permute.xlu1 %2506  ;;  %8227 = vset.pattern.permute.xlu0 %v13125_v45 }
 0x2e8   :  { %650 = vperm.xlu0 %8227, %v9474_v22   ;;  %766 = vmax.xlane.f32.xlu1 %v747_v8  ;;  %v1351_v8 = vsel %vm1319_vm2, %v1303_v56, %v1335_v59  ;;  %vm682_vm11 = vcmp.gt.f32.partialorder %v666_v24, 0.0 }
 0x2e9   :  { %v9658_v14 = vmul.f32 %v1351_v8, %v9649_v33 }
 0x2ea   :  { %v9638_v27 = vpop.permute.xlu0 %1880 }
 0x2eb   :  { %13129 = vst [vmem:[#allocation58_spill] sm:$0xff] %v9658_v14 }
 0x2ec   :  { %v606_v11 = vpop.permute.xlu1 %605  ;;  %8230 = vset.pattern.permute.xlu0 %v13128_v9  ;;  %1400 = vmax.xlane.f32.xlu1 %v1381_v55  ;;  %v1383_v55 = vsel %vm136_vm0, %v9658_v14, -1e+30  ;;  %v9806_v14 = vld [vmem:[#allocation5 + $0x68] sm:$0xff] }
 0x2ed   :  { %2554 = vperm.xlu0 %8230, %v9474_v22   ;;  %v667_v36 = vadd.f32 %v9569_v46, %v606_v11  ;;  %v9705_v11 = vld [vmem:[#allocation5 + $0x30] sm:$0xff] }
 0x2ef   :  { %v9652_v2 = vpop.permute.xlu0 %2514  ;;  %v699_v41 = vmul.f32 0.2, %v667_v36  ;;  %vm683_vm9 = vcmp.gt.f32.partialorder %v667_v36, 0.0 }
 0x2f0   :  { %1398 = vmax.xlane.f32.xlu1 %v1380_v17 }
 0x2f1   :  { %v1248_v30 = vpop.permute.xlu1 %1247 }
 0x2f2   :  { %v1302_v44 = vadd.f32 %v9560_v39, %v1248_v30  ;;  %v9672_v30 = vld [vmem:[#allocation5 + $0x38] sm:$0xff] }
 0x2f4   :  { %v1334_v56 = vmul.f32 0.2, %v1302_v44  ;;  %v1260_v59 = vpop.permute.xlu0 %1259  ;;  %1404 = vmax.xlane.f32.xlu1 %v1383_v55  ;;  %vm1318_vm3 = vcmp.gt.f32.partialorder %v1302_v44, 0.0 }
 0x2f5   :  { %v1305_v22 = vadd.f32 %v9560_v39, %v1260_v59 }
 0x2f6   :  { %v9665_v9 = vpop.permute.xlu1 %615  ;;  %v1350_v8 = vsel %vm1318_vm3, %v1302_v44, %v1334_v56  ;;  %v663_v44 = vadd.f32 %v9569_v46, %v9537_v32 }
 0x2f7   :  { %v1337_v63 = vmul.f32 0.2, %v1305_v22  ;;  %v9670_v17 = vmul.f32 %v1350_v8, %v9667_v26  ;;  %vm1321_vm4 = vcmp.gt.f32.partialorder %v1305_v22, 0.0 }
 0x2f8   :  { %v695_v28 = vmul.f32 0.2, %v663_v44  ;;  %vm679_vm5 = vcmp.gt.f32.partialorder %v663_v44, 0.0 }
 0x2f9   :  { %13130 = vst [vmem:[#allocation59_spill] sm:$0xff] %v9670_v17  ;;  %v9674_v48 = vpop.permute.xlu0 %1892  ;;  %v1382_v55 = vsel %vm136_vm0, %v9670_v17, -1e+30  ;;  %v1353_v29 = vsel %vm1321_vm4, %v1305_v22, %v1337_v63  ;;  %v9776_v17 = vld [vmem:[#allocation5 + $0x58] sm:$0xff] }
 0x2fa   :  { %1402 = vmax.xlane.f32.xlu1 %v1382_v55  ;;  %v9680_v59 = vmul.f32 %v1353_v29, %v9672_v30  ;;  %v696_v29 = vmul.f32 0.2, %v664_v58  ;;  %v711_v32 = vsel %vm679_vm5, %v663_v44, %v695_v28 }
 0x2fb   :  { %v1256_v56 = vpop.permute.xlu1 %1255  ;;  %v9699_v21 = vmul.f32 %v711_v32, %v9581_v12 }
 0x2fc   :  { %13131 = vst [vmem:[#allocation60_spill] sm:$0xff] %v9680_v59  ;;  %v1385_v8 = vsel %vm136_vm0, %v9680_v59, -1e+30  ;;  %v1304_v63 = vadd.f32 %v9560_v39, %v1256_v56  ;;  %v712_v56 = vsel %vm680_vm6, %v664_v58, %v696_v29 }
 0x2fd   :  { %v745_v58 = vsel %vm136_vm0, %v9699_v21, -1e+30  ;;  %v9719_v29 = vmul.f32 %v712_v56, %v9640_v5 }
 0x2fe   :  { %v9687_v43 = vpop.permute.xlu0 %2526  ;;  %1408 = vmax.xlane.f32.xlu1 %v1385_v8  ;;  %v1336_v18 = vmul.f32 0.2, %v1304_v63  ;;  %vm1320_vm7 = vcmp.gt.f32.partialorder %v1304_v63, 0.0 }
 0x2ff   :  { %13133 = vst [vmem:[#allocation62_spill] sm:$0xff] %v9719_v29 }
 0x300   :  { %v9692_v22 = vpop.permute.xlu1 %1888 }
 0x303   :  { %v611_v55 = vpop.permute.xlu0 %610 }
 0x304   :  { %v668_v57 = vadd.f32 %v9569_v46, %v611_v55  ;;  %v1352_v55 = vsel %vm1320_vm7, %v1304_v63, %v1336_v18  ;;  %v698_v18 = vmul.f32 0.2, %v666_v24  ;;  %v715_v63 = vsel %vm683_vm9, %v667_v36, %v699_v41 }
 0x305   :  { %v9696_v42 = vpop.permute.xlu1 %625  ;;  %v9732_v31 = vmul.f32 %v715_v63, %v9649_v33 }
 0x306   :  { %v700_v8 = vmul.f32 0.2, %v668_v57  ;;  %vm684_vm8 = vcmp.gt.f32.partialorder %v668_v57, 0.0  ;;  %v714_v36 = vsel %vm682_vm11, %v666_v24, %v698_v18 }
 0x307   :  { %13135 = vst [vmem:[#allocation64_spill] sm:$0xff] %v9732_v31  ;;  %v749_v13 = vsel %vm136_vm0, %v9732_v31, -1e+30  ;;  %v9745_v63 = vmul.f32 %v714_v36, %v9667_v26 }
 0x308   :  { %v9703_v28 = vpop.permute.xlu0 %2522  ;;  %v716_v44 = vsel %vm684_vm8, %v668_v57, %v700_v8  ;;  %v9722_v57 = vmul.f32 %v1352_v55, %v9705_v11 }
 0x309   :  { %v9708_v20 = vmul.f32 %v716_v44, %v9705_v11  ;;  %v746_v44 = vsel %vm136_vm0, %v9719_v29, -1e+30  ;;  %13138 = vst [vmem:[#allocation67_spill] sm:$0xff] %v9745_v63 }
 0x30a   :  { %v9710_v49 = vpop.permute.xlu1 %1900  ;;  %13134 = vst [vmem:[#allocation63_spill] sm:$0xff] %v9722_v57  ;;  %v1384_v56 = vsel %vm136_vm0, %v9722_v57, -1e+30 }
 0x30b   :  { %13132 = vst [vmem:[#allocation61_spill] sm:$0xff] %v9708_v20  ;;  %v750_v15 = vsel %vm136_vm0, %v9708_v20, -1e+30 }
 0x30c   :  { %762 = vmax.xlane.f32.xlu0 %v745_v58  ;;  %772 = vmax.xlane.f32.xlu1 %v750_v15  ;;  %v9736_v15 = vld [vmem:[#allocation5 + $0x48] sm:$0xff] }
 0x30d   :  { %v1268_v32 = vpop.permute.xlu0 %1267 }
 0x30e   :  { %v1307_v8 = vadd.f32 %v9560_v39, %v1268_v32 }
 0x30f   :  { %v1264_v41 = vpop.permute.xlu1 %1263 }
 0x310   :  { %v1339_v55 = vmul.f32 0.2, %v1307_v8  ;;  %764 = vmax.xlane.f32.xlu0 %v746_v44  ;;  %1406 = vmax.xlane.f32.xlu1 %v1384_v56  ;;  %vm1323_vm12 = vcmp.gt.f32.partialorder %v1307_v8, 0.0  ;;  %v1306_v44 = vadd.f32 %v9560_v39, %v1264_v41 }
 0x312   :  { %v9734_v58 = vpop.permute.xlu0 %2534  ;;  %v1355_v32 = vsel %vm1323_vm12, %v1307_v8, %v1339_v55  ;;  %v748_v8 = vsel %vm136_vm0, %v9745_v63, -1e+30  ;;  %v1338_v56 = vmul.f32 0.2, %v1306_v44  ;;  %vm1322_vm13 = vcmp.gt.f32.partialorder %v1306_v44, 0.0 }
 0x313   :  { %13136 = vst [vmem:[#allocation65_spill] sm:$0xff] %v9734_v58  ;;  %v9742_v52 = vmul.f32 %v1355_v32, %v9736_v15 }
 0x314   :  { %770 = vmax.xlane.f32.xlu0 %v749_v13  ;;  %v9757_v13 = vld [vmem:[#allocation5 + $0x40] sm:$0xff]  ;;  %v1354_v38 = vsel %vm1322_vm13, %v1306_v44, %v1338_v56  ;;  %v636_v44 = vpop.permute.xlu1 %635 }
 0x315   :  { %13137 = vst [vmem:[#allocation66_spill] sm:$0xff] %v9742_v52  ;;  %v1387_v24 = vsel %vm136_vm0, %v9742_v52, -1e+30  ;;  %v9766_v57 = vmul.f32 %v1354_v38, %v9757_v13 }
 0x316   :  { %1412 = vmax.xlane.f32.xlu1 %v1387_v24 }
 0x317   :  { %v621_v18 = vpop.permute.xlu0 %620  ;;  %13140 = vst [vmem:[#allocation69_spill] sm:$0xff] %v9766_v57 }
 0x318   :  { %v670_v55 = vadd.f32 %v9569_v46, %v621_v18  ;;  %768 = vmax.xlane.f32.xlu0 %v748_v8  ;;  %v1386_v8 = vsel %vm136_vm0, %v9766_v57, -1e+30 }
 0x319   :  { %v1272_v7 = vpop.permute.xlu1 %1271 }
 0x31a   :  { %v702_v36 = vmul.f32 0.2, %v670_v55  ;;  %vm686_vm14 = vcmp.gt.f32.partialorder %v670_v55, 0.0 }
 0x31c   :  { %v9755_v32 = vpop.permute.xlu0 %1896  ;;  %v718_v41 = vsel %vm686_vm14, %v670_v55, %v702_v36 }
 0x31d   :  { %v9760_v24 = vmul.f32 %v718_v41, %v9757_v13 }
 0x31e   :  { %v646_v6 = vpop.permute.xlu1 %645 }
 0x31f   :  { %13139 = vst [vmem:[#allocation68_spill] sm:$0xff] %v9760_v24  ;;  %v752_v23 = vsel %vm136_vm0, %v9760_v24, -1e+30 }
 0x320   :  { %776 = vmax.xlane.f32.xlu1 %v752_v23 }
 0x321   :  { %v9768_v18 = vpop.permute.xlu0 %2530 }
 0x322   :  { %13141 = vst [vmem:[#allocation70_spill] sm:$0xff] %v9768_v18 }
 0x324   :  { %1410 = vmax.xlane.f32.xlu1 %v1386_v8 }
 0x326   :  { %v1276_v55 = vpop.permute.xlu0 %1275 }
 0x327   :  { %v1309_v56 = vadd.f32 %v9560_v39, %v1276_v55  ;;  %v1308_v55 = vadd.f32 %v9560_v39, %v1272_v7 }
 0x329   :  { %v1341_v36 = vmul.f32 0.2, %v1309_v56  ;;  %vm1325_vm15 = vcmp.gt.f32.partialorder %v1309_v56, 0.0  ;;  %vm1324_vm1 = vcmp.gt.f32.partialorder %v1308_v55, 0.0 }
 0x32b   :  { %v9774_v41 = vpop.permute.xlu0 %1908  ;;  %v1357_v38 = vsel %vm1325_vm15, %v1309_v56, %v1341_v36  ;;  %v1340_v56 = vmul.f32 0.2, %v1308_v55  ;;  %v675_v36 = vadd.f32 %v9569_v46, %v646_v6 }
 0x32c   :  { %v9779_v23 = vmul.f32 %v1357_v38, %v9776_v17 }
 0x32d   :  { %v707_v20 = vmul.f32 0.2, %v675_v36  ;;  %v1356_v59 = vsel %vm1324_vm1, %v1308_v55, %v1340_v56  ;;  %vm691_vm3 = vcmp.gt.f32.partialorder %v675_v36, 0.0  ;;  %v9812_v56 = vpop.permute.xlu1 %1279 }
 0x32e   :  { %13142 = vst [vmem:[#allocation71_spill] sm:$0xff] %v9779_v23  ;;  %2558 = vperm.xlu0 %8230, %v9472_v19   ;;  %v1389_v8 = vsel %vm136_vm0, %v9779_v23, -1e+30 }
 0x32f   :  { %1416 = vmax.xlane.f32.xlu1 %v1389_v8  ;;  %v9793_v8 = vld [vmem:[#allocation5 + $0x50] sm:$0xff] }
 0x330   :  { %v9785_v57 = vpop.permute.xlu0 %2542 }
 0x331   :  { %13143 = vst [vmem:[#allocation72_spill] sm:$0xff] %v9785_v57  ;;  %v723_v57 = vsel %vm691_vm3, %v675_v36, %v707_v20  ;;  %v673_v20 = vadd.f32 %v9569_v46, %v636_v44 }
 0x332   :  { %8231 = vset.pattern.permute.xlu0 %v13125_v45  ;;  %v669_v45 = vadd.f32 %v9569_v46, %v9665_v9 }
 0x333   :  { %vm689_vm6 = vcmp.gt.f32.partialorder %v673_v20, 0.0 }
 0x334   :  { %v701_v55 = vmul.f32 0.2, %v669_v45  ;;  %vm685_vm4 = vcmp.gt.f32.partialorder %v669_v45, 0.0 }
 0x335   :  { %v631_v24 = vpop.permute.xlu0 %630 }
 0x336   :  { %v672_v38 = vadd.f32 %v9569_v46, %v631_v24  ;;  %v9804_v24 = vmul.f32 %v1356_v59, %v9793_v8 }
 0x338   :  { %v704_v19 = vmul.f32 0.2, %v672_v38  ;;  %vm688_vm2 = vcmp.gt.f32.partialorder %v672_v38, 0.0  ;;  %13145 = vst [vmem:[#allocation74_spill] sm:$0xff] %v9804_v24  ;;  %v1388_v9 = vsel %vm136_vm0, %v9804_v24, -1e+30 }
 0x33a   :  { %v9791_v52 = vpop.permute.xlu0 %1904  ;;  %v720_v23 = vsel %vm688_vm2, %v672_v38, %v704_v19  ;;  %v9818_v19 = vmul.f32 %v723_v57, %v9806_v14  ;;  %v705_v57 = vmul.f32 0.2, %v673_v20 }
 0x33b   :  { %v9796_v7 = vmul.f32 %v720_v23, %v9793_v8  ;;  %v671_v23 = vadd.f32 %v9569_v46, %v9696_v42  ;;  %v717_v42 = vsel %vm685_vm4, %v669_v45, %v701_v55 }
 0x33c   :  { %13147 = vst [vmem:[#allocation76_spill] sm:$0xff] %v9818_v19  ;;  %v757_v36 = vsel %vm136_vm0, %v9818_v19, -1e+30  ;;  %v9827_v24 = vmul.f32 %v717_v42, %v9672_v30  ;;  %v721_v55 = vsel %vm689_vm6, %v673_v20, %v705_v57 }
 0x33d   :  { %13144 = vst [vmem:[#allocation73_spill] sm:$0xff] %v9796_v7  ;;  %v754_v6 = vsel %vm136_vm0, %v9796_v7, -1e+30  ;;  %vm687_vm5 = vcmp.gt.f32.partialorder %v671_v23, 0.0  ;;  %v9824_v7 = vpop.permute.xlu1 %1912 }
 0x33e   :  { %780 = vmax.xlane.f32.xlu1 %v754_v6  ;;  %v703_v6 = vmul.f32 0.2, %v671_v23  ;;  %13148 = vst [vmem:[#allocation77_spill] sm:$0xff] %v9827_v24  ;;  %v751_v44 = vsel %vm136_vm0, %v9827_v24, -1e+30 }
 0x33f   :  { %v9808_v38 = vpop.permute.xlu0 %2538 }
 0x340   :  { %13146 = vst [vmem:[#allocation75_spill] sm:$0xff] %v9808_v38 }
 0x341   :  { %v656_v45 = vpop.permute.xlu1 %655 }
 0x342   :  { %1414 = vmax.xlane.f32.xlu1 %v1388_v9  ;;  %v719_v9 = vsel %vm687_vm5, %v671_v23, %v703_v6  ;;  %v677_v42 = vadd.f32 %v9569_v46, %v656_v45  ;;  %v9844_v23 = vmul.f32 %v721_v55, %v9776_v17  ;;  %v12942_v6 = vsub.s32 2, %v9547_v60 }
 0x343   :  { %v9835_v38 = vmul.f32 %v719_v9, %v9736_v15 }
 0x344   :  { %v1284_v59 = vpop.permute.xlu0 %1283  ;;  %13151 = vst [vmem:[#allocation80_spill] sm:$0xff] %v9844_v23  ;;  %v709_v9 = vmul.f32 0.2, %v677_v42  ;;  %v755_v57 = vsel %vm136_vm0, %v9844_v23, -1e+30  ;;  %vm693_vm7 = vcmp.gt.f32.partialorder %v677_v42, 0.0 }
 0x345   :  { %13149 = vst [vmem:[#allocation78_spill] sm:$0xff] %v9835_v38  ;;  %v753_v19 = vsel %vm136_vm0, %v9835_v38, -1e+30  ;;  %v1311_v31 = vadd.f32 %v9560_v39, %v1284_v59  ;;  %v9859_v38 = vld [vmem:[#allocation5 + $0x60] sm:$0xff] }
 0x346   :  { %786 = vmax.xlane.f32.xlu1 %v757_v36 }
 0x347   :  { %v1343_v45 = vmul.f32 0.2, %v1311_v31  ;;  %vm1327_vm9 = vcmp.gt.f32.partialorder %v1311_v31, 0.0 }
 0x349   :  { %v9829_v63 = vpop.permute.xlu0 %1916  ;;  %v1359_v58 = vsel %vm1327_vm9, %v1311_v31, %v1343_v45 }
 0x34d   :  { %774 = vmax.xlane.f32.xlu0 %v751_v44 }
 0x34e   :  { %v9837_v36 = vpop.permute.xlu0 %2550 }
 0x34f   :  { %13150 = vst [vmem:[#allocation79_spill] sm:$0xff] %v9837_v36  ;;  %v725_v36 = vsel %vm693_vm7, %v677_v42, %v709_v9 }
 0x351   :  { %778 = vmax.xlane.f32.xlu0 %v753_v19  ;;  %v9855_v19 = vrot.slane %v9490_v25, %v12942_v6 }
 0x353   :  { %v641_v24 = vpop.permute.xlu0 %640  ;;  %v1932_v42 = vadd.f32 %v9855_v19, %v9541_v50  ;;  %v1933_v50 = vadd.f32 %v9855_v19, %v9615_v10 }
 0x354   :  { %v674_v20 = vadd.f32 %v9569_v46, %v641_v24  ;;  %v9861_v24 = vld [vmem:[#allocation5 + $0x78] sm:$0xff] }
 0x355   :  { %782 = vmax.xlane.f32.xlu0 %v755_v57  ;;  %v9870_v6 = vmul.f32 %v725_v36, %v9861_v24  ;;  %vm1948_vm13 = vcmp.gt.f32.partialorder %v1932_v42, 0.0  ;;  %v1965_v10 = vmul.f32 0.2, %v1933_v50  ;;  %vm1949_vm14 = vcmp.gt.f32.partialorder %v1933_v50, 0.0 }
 0x356   :  { %v706_v44 = vmul.f32 0.2, %v674_v20  ;;  %vm690_vm8 = vcmp.gt.f32.partialorder %v674_v20, 0.0 }
 0x357   :  { %13154 = vst [vmem:[#allocation83_spill] sm:$0xff] %v9870_v6 }
 0x358   :  { %v9857_v55 = vpop.permute.xlu0 %2546  ;;  %v722_v59 = vsel %vm690_vm8, %v674_v20, %v706_v44  ;;  %v759_v44 = vsel %vm136_vm0, %v9870_v6, -1e+30  ;;  %v1934_v6 = vadd.f32 %v9855_v19, %v9571_v51 }
 0x359   :  { %13152 = vst [vmem:[#allocation81_spill] sm:$0xff] %v9857_v55  ;;  %v9864_v23 = vmul.f32 %v722_v59, %v9859_v38  ;;  %v1931_v55 = vadd.f32 %v9855_v19, %v9543_v54  ;;  %v9881_v59 = vmul.f32 %v1359_v58, %v9806_v14  ;;  %v1964_v54 = vmul.f32 0.2, %v1932_v42 }
 0x35a   :  { %vm1950_vm15 = vcmp.gt.f32.partialorder %v1934_v6, 0.0  ;;  %v1966_v51 = vmul.f32 0.2, %v1934_v6 }
 0x35b   :  { %13153 = vst [vmem:[#allocation82_spill] sm:$0xff] %v9864_v23  ;;  %v756_v57 = vsel %vm136_vm0, %v9864_v23, -1e+30  ;;  %13155 = vst [vmem:[#allocation84_spill] sm:$0xff] %v9881_v59  ;;  %v1963_v36 = vmul.f32 0.2, %v1931_v55 }
 0x35c   :  { %784 = vmax.xlane.f32.xlu1 %v756_v57  ;;  %vm1947_vm12 = vcmp.gt.f32.partialorder %v1931_v55, 0.0  ;;  %v1391_v57 = vsel %vm136_vm0, %v9881_v59, -1e+30 }
 0x35d   :  { %v1292_v20 = vpop.permute.xlu0 %1291 }
 0x35e   :  { %v1313_v9 = vadd.f32 %v9560_v39, %v1292_v20  ;;  %v1310_v20 = vadd.f32 %v9560_v39, %v9812_v56 }
 0x360   :  { %v1345_v23 = vmul.f32 0.2, %v1313_v9  ;;  %790 = vmax.xlane.f32.xlu1 %v759_v44  ;;  %vm1329_vm11 = vcmp.gt.f32.partialorder %v1313_v9, 0.0  ;;  %v1979_v44 = vsel %vm1947_vm12, %v1931_v55, %v1963_v36  ;;  %v1342_v56 = vmul.f32 0.2, %v1310_v20 }
 0x361   :  { %vm1326_vm1 = vcmp.gt.f32.partialorder %v1310_v20, 0.0 }
 0x362   :  { %v9883_v31 = vpop.permute.xlu0 %1924  ;;  %v1361_v45 = vsel %vm1329_vm11, %v1313_v9, %v1345_v23  ;;  %v1936_v23 = vadd.f32 %v9855_v19, %v9593_v0  ;;  %v1980_v9 = vsel %vm1948_vm13, %v1932_v42, %v1964_v54  ;;  %v1935_v42 = vadd.f32 %v9855_v19, %v9638_v27 }
 0x363   :  { %v9891_v58 = vmul.f32 %v1361_v45, %v9861_v24  ;;  %v9903_v45 = vmul.f32 %v1979_v44, %v9591_v40  ;;  %v9907_v36 = vmul.f32 %v1980_v9, %v9581_v12  ;;  %v1358_v9 = vsel %vm1326_vm1, %v1310_v20, %v1342_v56 }
 0x364   :  { %1420 = vmax.xlane.f32.xlu1 %v1391_v57  ;;  %v1968_v0 = vmul.f32 0.2, %v1936_v23  ;;  %v1938_v57 = vadd.f32 %v9855_v19, %v9674_v48  ;;  %vm1952_vm3 = vcmp.gt.f32.partialorder %v1936_v23, 0.0  ;;  %v1982_v48 = vsel %vm1950_vm15, %v1934_v6, %v1966_v51 }
 0x365   :  { %13156 = vst [vmem:[#allocation85_spill] sm:$0xff] %v9891_v58  ;;  %v1393_v59 = vsel %vm136_vm0, %v9891_v58, -1e+30  ;;  %13157 = vst [vmem:[#allocation86_spill] sm:$0xff] %v9903_v45  ;;  %v2012_v27 = vsel %vm136_vm0, %v9907_v36, -1e+30  ;;  %v9934_v56 = vmul.f32 %v1358_v9, %v9859_v38  ;;  %v1940_v6 = vadd.f32 %v9855_v19, %v9710_v49 }
 0x366   :  { %vm1951_vm4 = vcmp.gt.f32.partialorder %v1935_v42, 0.0  ;;  %v1967_v18 = vmul.f32 0.2, %v1935_v42  ;;  %vm1954_vm5 = vcmp.gt.f32.partialorder %v1938_v57, 0.0  ;;  %v1942_v9 = vadd.f32 %v9855_v19, %v9774_v41 }
 0x367   :  { %v651_v29 = vpop.permute.xlu0 %650  ;;  %v1390_v49 = vsel %vm136_vm0, %v9934_v56, -1e+30  ;;  %vm1956_vm7 = vcmp.gt.f32.partialorder %v1940_v6, 0.0 }
 0x368   :  { %v676_v55 = vadd.f32 %v9569_v46, %v651_v29  ;;  %1424 = vmax.xlane.f32.xlu1 %v1393_v59  ;;  %v2011_v46 = vsel %vm136_vm0, %v9903_v45, -1e+30  ;;  %v1981_v29 = vsel %vm1949_vm14, %v1933_v50, %v1965_v10  ;;  %v9916_v59 = vld [vmem:[#allocation5 + $0x70] sm:$0xff]  ;;  %v1984_v50 = vsel %vm1952_vm3, %v1936_v23, %v1968_v0 }
 0x369   :  { %v9926_v45 = vmul.f32 %v1981_v29, %v9640_v5  ;;  %v1970_v10 = vmul.f32 0.2, %v1938_v57  ;;  %v9942_v51 = vmul.f32 %v1984_v50, %v9649_v33  ;;  %v1983_v0 = vsel %vm1951_vm4, %v1935_v42, %v1967_v18 }
 0x36a   :  { %v708_v54 = vmul.f32 0.2, %v676_v55  ;;  %vm692_vm2 = vcmp.gt.f32.partialorder %v676_v55, 0.0  ;;  %vm1958_vm9 = vcmp.gt.f32.partialorder %v1942_v9, 0.0 }
 0x36b   :  { %v2013_v23 = vsel %vm136_vm0, %v9926_v45, -1e+30  ;;  %v1986_v29 = vsel %vm1954_vm5, %v1938_v57, %v1970_v10  ;;  %v1943_v57 = vadd.f32 %v9855_v19, %v9824_v7  ;;  %v2016_v41 = vsel %vm136_vm0, %v9942_v51, -1e+30 }
 0x36c   :  { %2027 = vmax.xlane.f32.xlu1 %v2011_v46  ;;  %v724_v44 = vsel %vm692_vm2, %v676_v55, %v708_v54  ;;  %v1937_v55 = vadd.f32 %v9855_v19, %v9692_v22  ;;  %v9945_v22 = vmul.f32 %v1982_v48, %v9613_v34  ;;  %v1939_v46 = vadd.f32 %v9855_v19, %v9755_v32  ;;  %v1288_v48 = vpop.permute.xlu1 %1287 }
 0x36d   :  { %v9919_v58 = vmul.f32 %v724_v44, %v9916_v59  ;;  %v1972_v44 = vmul.f32 0.2, %v1940_v6  ;;  %v9958_v42 = vmul.f32 %v1986_v29, %v9672_v30  ;;  %v9961_v32 = vmul.f32 %v1983_v0, %v9667_v26 }
 0x36e   :  { %v1969_v54 = vmul.f32 0.2, %v1937_v55  ;;  %vm1953_vm6 = vcmp.gt.f32.partialorder %v1937_v55, 0.0  ;;  %v2014_v18 = vsel %vm136_vm0, %v9945_v22, -1e+30  ;;  %vm1955_vm8 = vcmp.gt.f32.partialorder %v1939_v46, 0.0 }
 0x36f   :  { %v758_v20 = vsel %vm136_vm0, %v9919_v58, -1e+30  ;;  %13158 = vst [vmem:[#allocation87_spill] sm:$0xff] %v9961_v32  ;;  %v1974_v10 = vmul.f32 0.2, %v1942_v9  ;;  %vm1959_vm11 = vcmp.gt.f32.partialorder %v1943_v57, 0.0  ;;  %v1312_v29 = vadd.f32 %v9560_v39, %v1288_v48 }
 0x370   :  { %788 = vmax.xlane.f32.xlu0 %v758_v20  ;;  %2029 = vmax.xlane.f32.xlu1 %v2012_v27  ;;  %v1971_v27 = vmul.f32 0.2, %v1939_v46  ;;  %v1985_v50 = vsel %vm1953_vm6, %v1937_v55, %v1969_v54  ;;  %v1941_v20 = vadd.f32 %v9855_v19, %v9791_v52  ;;  %v2018_v7 = vsel %vm136_vm0, %v9958_v42, -1e+30  ;;  %v9986_v0 = vpop.permute.xlu1 %1920 }
 0x371   :  { %v9978_v55 = vmul.f32 %v1985_v50, %v9705_v11  ;;  %v1975_v54 = vmul.f32 0.2, %v1943_v57  ;;  %v13159_v50 = vsub.s32 3, %v9547_v60  ;;  %v1344_v48 = vmul.f32 0.2, %v1312_v29 }
 0x372   :  { %vm1957_vm12 = vcmp.gt.f32.partialorder %v1941_v20, 0.0  ;;  %vm1328_vm13 = vcmp.gt.f32.partialorder %v1312_v29, 0.0 }
 0x374   :  { %1418 = vmax.xlane.f32.xlu0 %v1390_v49  ;;  %2031 = vmax.xlane.f32.xlu1 %v2013_v23  ;;  %v1988_v23 = vsel %vm1956_vm7, %v1940_v6, %v1972_v44  ;;  %v2015_v49 = vsel %vm136_vm0, %v9961_v32, -1e+30  ;;  %v1987_v6 = vsel %vm1955_vm8, %v1939_v46, %v1971_v27  ;;  %v1973_v44 = vmul.f32 0.2, %v1941_v20 }
 0x375   :  { %v9981_v52 = vmul.f32 %v1988_v23, %v9736_v15  ;;  %v9991_v32 = vrot.slane %v9490_v25, %v13159_v50  ;;  %v2017_v46 = vsel %vm136_vm0, %v9978_v55, -1e+30  ;;  %v1991_v27 = vsel %vm1959_vm11, %v1943_v57, %v1975_v54 }
 0x376   :  { %v1946_v25 = vadd.f32 %v9855_v19, %v9883_v31  ;;  %v1989_v23 = vsel %vm1957_vm12, %v1941_v20, %v1973_v44  ;;  %v10017_v54 = vmul.f32 %v1991_v27, %v9859_v38 }
 0x377   :  { %v2020_v39 = vsel %vm136_vm0, %v9981_v52, -1e+30  ;;  %v10020_v31 = vmul.f32 %v1989_v23, %v9793_v8  ;;  %v2565_v20 = vadd.f32 %v9991_v32, %v9554_v37 }
 0x378   :  { %2037 = vmax.xlane.f32.xlu0 %v2016_v41  ;;  %2033 = vmax.xlane.f32.xlu1 %v2014_v18  ;;  %v1944_v18 = vadd.f32 %v9855_v19, %v9829_v63  ;;  %v1990_v41 = vsel %vm1958_vm9, %v1942_v9, %v1974_v10  ;;  %v10003_v9 = vmul.f32 %v1987_v6, %v9757_v13  ;;  %v1978_v6 = vmul.f32 0.2, %v1946_v25 }
 0x379   :  { %v10000_v63 = vmul.f32 %v1990_v41, %v9776_v17  ;;  %v1360_v41 = vsel %vm1328_vm13, %v1312_v29, %v1344_v48  ;;  %vm1962_vm15 = vcmp.gt.f32.partialorder %v1946_v25, 0.0  ;;  %v2566_v29 = vadd.f32 %v9991_v32, %v9551_v35 }
 0x37a   :  { %v1976_v10 = vmul.f32 0.2, %v1944_v18  ;;  %vm1960_vm14 = vcmp.gt.f32.partialorder %v1944_v18, 0.0  ;;  %v2019_v57 = vsel %vm136_vm0, %v10003_v9, -1e+30  ;;  %v10036_v37 = vmul.f32 %v1360_v41, %v9916_v59 }
 0x37b   :  { %v1994_v48 = vsel %vm1962_vm15, %v1946_v25, %v1978_v6  ;;  %vm2581_vm1 = vcmp.gt.f32.partialorder %v2565_v20, 0.0  ;;  %v2567_v35 = vadd.f32 %v9991_v32, %v9628_v3  ;;  %vm2582_vm2 = vcmp.gt.f32.partialorder %v2566_v29, 0.0 }
 0x37c   :  { %2041 = vmax.xlane.f32.xlu0 %v2018_v7  ;;  %2035 = vmax.xlane.f32.xlu1 %v2015_v49  ;;  %v10008_v7 = vpop.xlane.xlu1 %1396  ;;  %v2022_v49 = vsel %vm136_vm0, %v10000_v63, -1e+30  ;;  %v1992_v44 = vsel %vm1960_vm14, %v1944_v18, %v1976_v10  ;;  %v2597_v18 = vmul.f32 0.2, %v2565_v20  ;;  %v1392_v23 = vsel %vm136_vm0, %v10036_v37, -1e+30 }
 0x37d   :  { %v10033_v27 = vmul.f32 %v1992_v44, %v9806_v14  ;;  %v2568_v6 = vadd.f32 %v9991_v32, %v9576_v61  ;;  %vm2583_vm3 = vcmp.gt.f32.partialorder %v2567_v35, 0.0 }
 0x37e   :  { %v2613_v44 = vsel %vm2581_vm1, %v2565_v20, %v2597_v18  ;;  %v2569_v18 = vadd.f32 %v9991_v32, %v9652_v2 }
 0x37f   :  { %v2024_v10 = vsel %vm136_vm0, %v10033_v27, -1e+30  ;;  %v2600_v3 = vmul.f32 0.2, %v2568_v6  ;;  %vm2584_vm4 = vcmp.gt.f32.partialorder %v2568_v6, 0.0 }
 0x380   :  { %2045 = vmax.xlane.f32.xlu0 %v2020_v39  ;;  %2039 = vmax.xlane.f32.xlu1 %v2017_v46  ;;  %v10024_v50 = vpop.xlane.xlu1 %760  ;;  %v2023_v46 = vsel %vm136_vm0, %v10017_v54, -1e+30  ;;  %v2021_v39 = vsel %vm136_vm0, %v10020_v31, -1e+30  ;;  %vm2585_vm5 = vcmp.gt.f32.partialorder %v2569_v18, 0.0 }
 0x384   :  { %2049 = vmax.xlane.f32.xlu0 %v2022_v49  ;;  %2043 = vmax.xlane.f32.xlu1 %v2019_v57  ;;  %v10047_v49 = vmul.f32 %v1994_v48, %v9861_v24  ;;  %v2598_v57 = vmul.f32 0.2, %v2566_v29  ;;  %v1395_v25 = vpop.xlane.xlu1 %1394 }
 0x386   :  { %v2026_v41 = vsel %vm136_vm0, %v10047_v49, -1e+30  ;;  %v2614_v48 = vsel %vm2582_vm2, %v2566_v29, %v2598_v57  ;;  %v2570_v29 = vadd.f32 %v9991_v32, %v9611_v47 }
 0x387   :  { %v10065_v61 = vmul.f32 %v2614_v48, %v9581_v12  ;;  %v2616_v12 = vsel %vm2584_vm4, %v2568_v6, %v2600_v3  ;;  %v1427_v48 = vsub.f32 %v9584_v16, %v10008_v7  ;;  %v792_v7 = vsub.f32 %v9599_v53, %v10024_v50 }
 0x388   :  { %2051 = vmax.xlane.f32.xlu0 %v2023_v46  ;;  %2047 = vmax.xlane.f32.xlu1 %v2021_v39  ;;  %v10057_v46 = vmul.f32 %v2613_v44, %v9591_v40  ;;  %v2599_v39 = vmul.f32 0.2, %v2567_v35  ;;  %vm2586_vm6 = vcmp.gt.f32.partialorder %v2570_v29, 0.0  ;;  %v1945_v53 = vadd.f32 %v9855_v19, %v9986_v0 }
 0x389   :  { %v2646_v57 = vsel %vm136_vm0, %v10065_v61, -1e+30  ;;  %v1443_v16 = vsel %vm136_vm0, %v1427_v48, -1e+30  ;;  %v808_v50 = vsel %vm136_vm0, %v792_v7, -1e+30 }
 0x38a   :  { %v2645_v20 = vsel %vm136_vm0, %v10057_v46, -1e+30  ;;  %v2615_v40 = vsel %vm2583_vm3, %v2567_v35, %v2599_v39  ;;  %v2602_v39 = vmul.f32 0.2, %v2570_v29  ;;  %v1977_v0 = vmul.f32 0.2, %v1945_v53 }
 0x38b   :  { %v10077_v44 = vmul.f32 %v2615_v40, %v9640_v5  ;;  %v2571_v5 = vadd.f32 %v9991_v32, %v9703_v28  ;;  %vm1961_vm8 = vcmp.gt.f32.partialorder %v1945_v53, 0.0 }
 0x38c   :  { %2053 = vmax.xlane.f32.xlu0 %v2024_v10  ;;  %1422 = vmax.xlane.f32.xlu1 %v1392_v23  ;;  %v10059_v10 = vpop.xlane.xlu1 %766  ;;  %v10069_v23 = vpop.permute.xlu0 %2554  ;;  %v2618_v40 = vsel %vm2586_vm6, %v2570_v29, %v2602_v39  ;;  %v2572_v29 = vadd.f32 %v9991_v32, %v9687_v43 }
 0x38d   :  { %v2647_v6 = vsel %vm136_vm0, %v10077_v44, -1e+30  ;;  %vm2587_vm7 = vcmp.gt.f32.partialorder %v2571_v5, 0.0  ;;  %v10114_v39 = vmul.f32 %v2618_v40, %v9649_v33 }
 0x38e   :  { %v2604_v33 = vmul.f32 0.2, %v2572_v29  ;;  %vm2588_vm9 = vcmp.gt.f32.partialorder %v2572_v29, 0.0 }
 0x390   :  { %2057 = vmax.xlane.f32.xlu0 %v2026_v41  ;;  %v2601_v41 = vmul.f32 0.2, %v2569_v18  ;;  %v10081_v2 = vpop.xlane.xlu1 %1400 }
 0x394   :  { %2661 = vmax.xlane.f32.xlu0 %v2645_v20  ;;  %v10085_v20 = vmul.f32 %v2616_v12, %v9613_v34  ;;  %v2617_v34 = vsel %vm2585_vm5, %v2569_v18, %v2601_v41  ;;  %v1460_v12 = vmul.f32 1.442695, %v1443_v16  ;;  %v1426_v18 = vsub.f32 %v9608_v62, %v1395_v25 }
 0x395   :  { %v10104_v48 = vmul.f32 %v2617_v34, %v9667_v26  ;;  %v824_v26 = vmul.f32 1.442695, %v808_v50  ;;  %v795_v62 = vsub.f32 %v9623_v1, %v10059_v10  ;;  %v13161_v10 = vld [vmem:[#allocation62_spill] sm:$0xff]  ;;  %v13162_v50 = vld [vmem:[#allocation65_spill] sm:$0xff] }
 0x396   :  { %v2648_v28 = vsel %vm136_vm0, %v10085_v20, -1e+30 }
 0x397   :  { %v811_v1 = vsel %vm136_vm0, %v795_v62, -1e+30 }
 0x398   :  { %2663 = vmax.xlane.f32.xlu0 %v2646_v57  ;;  %v2603_v57 = vmul.f32 0.2, %v2571_v5 }
 0x399   :  { %v763_v35 = vpop.xlane.xlu0 %762 }
 0x39a   :  { %v793_v47 = vsub.f32 %v9699_v21, %v763_v35  ;;  %v10101_v35 = vpop.xlane.xlu1 %1398  ;;  %v2619_v19 = vsel %vm2587_vm7, %v2571_v5, %v2603_v57  ;;  %v2650_v5 = vsel %vm136_vm0, %v10114_v39, -1e+30 }
 0x39b   :  { %v10126_v25 = vmul.f32 %v2619_v19, %v9705_v11  ;;  %v13163_v19 = vld [vmem:[#allocation64_spill] sm:$0xff] }
 0x39c   :  { %v809_v21 = vsel %vm136_vm0, %v793_v47, -1e+30  ;;  %2665 = vmax.xlane.f32.xlu0 %v2647_v6  ;;  %v2649_v47 = vsel %vm136_vm0, %v10104_v48, -1e+30  ;;  %v1442_v6 = vsel %vm136_vm0, %v1426_v18, -1e+30  ;;  %v2574_v18 = vadd.f32 %v9991_v32, %v13162_v50 }
 0x39d   :  { %v826_v3 = vmul.f32 1.442695, %v809_v21  ;;  %v765_v41 = vpop.xlane.xlu0 %764  ;;  %v1458_v16 = vmul.f32 1.442695, %v1442_v6  ;;  %v13160_v21 = vld [vmem:[#allocation70_spill] sm:$0xff] }
 0x39e   :  { %v10123_v43 = vpop.xlane.xlu1 %1404  ;;  %v2573_v34 = vadd.f32 %v9991_v32, %v13160_v21  ;;  %v2651_v57 = vsel %vm136_vm0, %v10126_v25, -1e+30  ;;  %vm2590_vm12 = vcmp.gt.f32.partialorder %v2574_v18, 0.0 }
 0x39f   :  { %8293 = vpow2.f32 %v826_v3  ;;  %v794_v3 = vsub.f32 %v13161_v10, %v765_v41 }
 0x3a0   :  { %2667 = vmax.xlane.f32.xlu0 %v2648_v28  ;;  %8295 = vpow2.f32 %v1460_v12  ;;  %v1993_v28 = vsel %vm1961_vm8, %v1945_v53, %v1977_v0  ;;  %v2620_v12 = vsel %vm2588_vm9, %v2572_v29, %v2604_v33  ;;  %v2605_v53 = vmul.f32 0.2, %v2573_v34 }
 0x3a1   :  { %8297 = vpow2.f32 %v824_v26  ;;  %v771_v7 = vpop.xlane.xlu0 %770  ;;  %v830_v26 = vmul.f32 1.442695, %v811_v1  ;;  %v10147_v41 = vmul.f32 %v1993_v28, %v9916_v59  ;;  %vm2589_vm11 = vcmp.gt.f32.partialorder %v2573_v34, 0.0 }
 0x3a2   :  { %v10138_v40 = vpop.xlane.xlu1 %1402  ;;  %8299 = vpow2.f32 %v1458_v16  ;;  %v797_v0 = vsub.f32 %v13163_v19, %v771_v7  ;;  %v10156_v29 = vmul.f32 %v2620_v12, %v9672_v30  ;;  %v2606_v33 = vmul.f32 0.2, %v2574_v18  ;;  %v13165_v7 = vld [vmem:[#allocation75_spill] sm:$0xff]  ;;  %v13167_v19 = vld [vmem:[#allocation72_spill] sm:$0xff] }
 0x3a3   :  { %8301 = vpow2.f32 %v830_v26  ;;  %v2025_v21 = vsel %vm136_vm0, %v10147_v41, -1e+30  ;;  %v2575_v1 = vadd.f32 %v9991_v32, %v13165_v7  ;;  %v2621_v30 = vsel %vm2589_vm11, %v2573_v34, %v2605_v53 }
 0x3a4   :  { %2669 = vmax.xlane.f32.xlu0 %v2649_v47  ;;  %v810_v47 = vsel %vm136_vm0, %v794_v3, -1e+30  ;;  %v813_v10 = vsel %vm136_vm0, %v797_v0, -1e+30  ;;  %v13166_v3 = vld [vmem:[#allocation67_spill] sm:$0xff]  ;;  %v2576_v0 = vadd.f32 %v9991_v32, %v13167_v19 }
 0x3a5   :  { %v769_v62 = vpop.xlane.xlu0 %768  ;;  %v834_v50 = vmul.f32 1.442695, %v813_v10  ;;  %v2652_v26 = vsel %vm136_vm0, %v10156_v29, -1e+30  ;;  %v2607_v34 = vmul.f32 0.2, %v2575_v1 }
 0x3a6   :  { %v10158_v16 = vpop.xlane.xlu1 %1408  ;;  %v796_v28 = vsub.f32 %v13166_v3, %v769_v62  ;;  %v2622_v62 = vsel %vm2590_vm12, %v2574_v18, %v2606_v33  ;;  %vm2591_vm13 = vcmp.gt.f32.partialorder %v2575_v1, 0.0  ;;  %v2608_v10 = vmul.f32 0.2, %v2576_v0  ;;  %v13169_v3 = vld [vmem:[#allocation81_spill] sm:$0xff] }
 0x3a7   :  { %v10190_v7 = vmul.f32 %v2622_v62, %v9736_v15  ;;  %v2623_v18 = vsel %vm2591_vm13, %v2575_v1, %v2607_v34  ;;  %vm2592_vm14 = vcmp.gt.f32.partialorder %v2576_v0, 0.0 }
 0x3a8   :  { %2671 = vmax.xlane.f32.xlu0 %v2650_v5  ;;  %v828_v5 = vmul.f32 1.442695, %v810_v47  ;;  %v10177_v47 = vmul.f32 %v2621_v30, %v9757_v13  ;;  %v812_v53 = vsel %vm136_vm0, %v796_v28, -1e+30  ;;  %v2577_v28 = vadd.f32 %v9991_v32, %v13169_v3 }
 0x3a9   :  { %v10136_v11 = vpop.eup %8293  ;;  %v10203_v15 = vmul.f32 %v2623_v18, %v9793_v8  ;;  %v2624_v1 = vsel %vm2592_vm14, %v2576_v0, %v2608_v10  ;;  %v2579_v3 = vadd.f32 %v9991_v32, %v10069_v23 }
 0x3aa   :  { %858 = vadd.xlane.f32.xlu1 %v10136_v11  ;;  %v10152_v6 = vpop.eup %8295  ;;  %v10171_v12 = vpop.xlane.xlu1 %772  ;;  %8303 = vpow2.f32 %v828_v5  ;;  %v832_v5 = vmul.f32 1.442695, %v812_v53  ;;  %v2653_v13 = vsel %vm136_vm0, %v10177_v47, -1e+30  ;;  %v2609_v53 = vmul.f32 0.2, %v2577_v28 }
 0x3ab   :  { %13164 = vst [vmem:[#allocation70_spill] sm:$0xff] %v10152_v6  ;;  %8305 = vpow2.f32 %v834_v50  ;;  %v2654_v50 = vsel %vm136_vm0, %v10190_v7, -1e+30  ;;  %vm2593_vm15 = vcmp.gt.f32.partialorder %v2577_v28, 0.0  ;;  %v2611_v23 = vmul.f32 0.2, %v2579_v3 }
 0x3ac   :  { %2673 = vmax.xlane.f32.xlu0 %v2651_v57  ;;  %v10168_v57 = vpop.eup %8297  ;;  %8307 = vpow2.f32 %v832_v5  ;;  %v2655_v5 = vsel %vm136_vm0, %v10203_v15, -1e+30  ;;  %v2625_v18 = vsel %vm2593_vm15, %v2577_v28, %v2609_v53  ;;  %vm2595_vm2 = vcmp.gt.f32.partialorder %v2579_v3, 0.0 }
 0x3ad   :  { %v2559_v10 = vpop.permute.xlu0 %2558 }
 0x3ae   :  { %1492 = vadd.xlane.f32.xlu1 %v10152_v6  ;;  %v10196_v30 = vpop.xlane.xlu1 %1406  ;;  %v2580_v28 = vadd.f32 %v9991_v32, %v2559_v10 }
 0x3b0   :  { %2055 = vmax.xlane.f32.xlu0 %v2025_v21  ;;  %v10183_v21 = vpop.eup %8299  ;;  %vm2596_vm3 = vcmp.gt.f32.partialorder %v2580_v28, 0.0 }
 0x3b1   :  { %13168 = vst [vmem:[#allocation62_spill] sm:$0xff] %v10183_v21  ;;  %v10194_v33 = vpop.eup %8301 }
 0x3b2   :  { %856 = vadd.xlane.f32.xlu1 %v10168_v57  ;;  %v1413_v62 = vpop.xlane.xlu1 %1412 }
 0x3b4   :  { %2675 = vmax.xlane.f32.xlu0 %v2652_v26  ;;  %v13170_v26 = vld [vmem:[#allocation79_spill] sm:$0xff]  ;;  %v10207_v34 = vpop.eup %8303 }
 0x3b5   :  { %v2578_v19 = vadd.f32 %v9991_v32, %v13170_v26  ;;  %v10218_v0 = vpop.eup %8305  ;;  %v13172_v26 = vld [vmem:[#allocation58_spill] sm:$0xff] }
 0x3b6   :  { %1490 = vadd.xlane.f32.xlu1 %v10183_v21  ;;  %13171 = vst [vmem:[#allocation65_spill] sm:$0xff] %v10218_v0  ;;  %v1431_v60 = vsub.f32 %v13172_v26, %v10123_v43  ;;  %v13173_v26 = vld [vmem:[#allocation60_spill] sm:$0xff] }
 0x3b7   :  { %v2610_v8 = vmul.f32 0.2, %v2578_v19  ;;  %vm2594_vm1 = vcmp.gt.f32.partialorder %v2578_v19, 0.0  ;;  %v1433_v6 = vsub.f32 %v13173_v26, %v10158_v16  ;;  %v13174_v16 = vld [vmem:[#allocation66_spill] sm:$0xff] }
 0x3b8   :  { %2677 = vmax.xlane.f32.xlu0 %v2653_v13  ;;  %v10214_v13 = vmul.f32 %v2624_v1, %v9776_v17  ;;  %v10229_v1 = vmul.f32 %v2625_v18, %v9859_v38  ;;  %v1447_v43 = vsel %vm136_vm0, %v1431_v60, -1e+30  ;;  %v1435_v10 = vsub.f32 %v13174_v16, %v1413_v62 }
 0x3b9   :  { %v2626_v53 = vsel %vm2594_vm1, %v2578_v19, %v2610_v8  ;;  %v2612_v19 = vmul.f32 0.2, %v2580_v28  ;;  %v2627_v8 = vsel %vm2595_vm2, %v2579_v3, %v2611_v23  ;;  %v1468_v18 = vmul.f32 1.442695, %v1447_v43  ;;  %v13175_v23 = vld [vmem:[#allocation71_spill] sm:$0xff] }
 0x3ba   :  { %862 = vadd.xlane.f32.xlu1 %v10194_v33  ;;  %v2656_v17 = vsel %vm136_vm0, %v10214_v13, -1e+30  ;;  %v2657_v38 = vsel %vm136_vm0, %v10229_v1, -1e+30  ;;  %v10245_v32 = vmul.f32 %v2626_v53, %v9806_v14  ;;  %v1449_v60 = vsel %vm136_vm0, %v1433_v6, -1e+30 }
 0x3bb   :  { %v2628_v14 = vsel %vm2596_vm3, %v2580_v28, %v2612_v19  ;;  %8309 = vpow2.f32 %v1468_v18  ;;  %v1472_v53 = vmul.f32 1.442695, %v1449_v60  ;;  %v1451_v3 = vsel %vm136_vm0, %v1435_v10, -1e+30 }
 0x3bc   :  { %2679 = vmax.xlane.f32.xlu0 %v2654_v50  ;;  %v10220_v50 = vpop.xlane.xlu1 %776  ;;  %v2658_v26 = vsel %vm136_vm0, %v10245_v32, -1e+30  ;;  %v10263_v62 = vmul.f32 %v2628_v14, %v9861_v24  ;;  %v13177_v24 = vld [vmem:[#allocation61_spill] sm:$0xff] }
 0x3bd   :  { %8311 = vpow2.f32 %v1472_v53  ;;  %v798_v18 = vsub.f32 %v13177_v24, %v10171_v12 }
 0x3be   :  { %860 = vadd.xlane.f32.xlu1 %v10207_v34 }
 0x3bf   :  { %v814_v14 = vsel %vm136_vm0, %v798_v18, -1e+30 }
 0x3c0   :  { %2681 = vmax.xlane.f32.xlu0 %v2655_v5  ;;  %v10232_v5 = vpop.eup %8307  ;;  %v10239_v21 = vpop.xlane.xlu1 %1410 }
 0x3c2   :  { %866 = vadd.xlane.f32.xlu1 %v10218_v0  ;;  %v10254_v0 = vmul.f32 %v2627_v8, %v9916_v59  ;;  %v1476_v59 = vmul.f32 1.442695, %v1451_v3 }
 0x3c4   :  { %2683 = vmax.xlane.f32.xlu0 %v2656_v17  ;;  %v1417_v17 = vpop.xlane.xlu1 %1416  ;;  %v2659_v6 = vsel %vm136_vm0, %v10254_v0, -1e+30  ;;  %8313 = vpow2.f32 %v1476_v59 }
 0x3c5   :  { %v1437_v43 = vsub.f32 %v13175_v23, %v1417_v17  ;;  %v10270_v8 = vpop.eup %8309  ;;  %v13179_v17 = vld [vmem:[#allocation77_spill] sm:$0xff] }
 0x3c6   :  { %864 = vadd.xlane.f32.xlu1 %v10232_v5  ;;  %13176 = vst [vmem:[#allocation64_spill] sm:$0xff] %v10270_v8 }
 0x3c7   :  { %v1453_v28 = vsel %vm136_vm0, %v1437_v43, -1e+30  ;;  %v10275_v10 = vpop.eup %8311 }
 0x3c8   :  { %2685 = vmax.xlane.f32.xlu0 %v2657_v38  ;;  %v2660_v38 = vsel %vm136_vm0, %v10263_v62, -1e+30  ;;  %v1480_v19 = vmul.f32 1.442695, %v1453_v28  ;;  %13178 = vst [vmem:[#allocation75_spill] sm:$0xff] %v10275_v10 }
 0x3c9   :  { %v836_v28 = vmul.f32 1.442695, %v814_v14 }
 0x3ca   :  { %8315 = vpow2.f32 %v1480_v19 }
 0x3cb   :  { %v781_v60 = vpop.xlane.xlu1 %780 }
 0x3cc   :  { %2687 = vmax.xlane.f32.xlu0 %v2658_v26 }
 0x3ce   :  { %v10283_v43 = vpop.eup %8313 }
 0x3cf   :  { %13180 = vst [vmem:[#allocation67_spill] sm:$0xff] %v10283_v43  ;;  %v10285_v12 = vpop.xlane.xlu1 %1414 }
 0x3d0   :  { %2689 = vmax.xlane.f32.xlu0 %v2659_v6  ;;  %v13181_v6 = vld [vmem:[#allocation78_spill] sm:$0xff] }
 0x3d3   :  { %v787_v14 = vpop.xlane.xlu1 %786 }
 0x3d4   :  { %2691 = vmax.xlane.f32.xlu0 %v2660_v38  ;;  %v13182_v38 = vld [vmem:[#allocation68_spill] sm:$0xff] }
 0x3d5   :  { %v800_v19 = vsub.f32 %v13182_v38, %v10220_v50 }
 0x3d8   :  { %1500 = vadd.xlane.f32.xlu0 %v10270_v8 }
 0x3da   :  { %v775_v16 = vpop.xlane.xlu0 %774 }
 0x3db   :  { %v799_v26 = vsub.f32 %v13179_v17, %v775_v16  ;;  %v10293_v16 = vpop.eup %8315 }
 0x3dc   :  { %1504 = vadd.xlane.f32.xlu0 %v10275_v10  ;;  %13183 = vst [vmem:[#allocation72_spill] sm:$0xff] %v10293_v16 }
 0x3dd   :  { %v815_v53 = vsel %vm136_vm0, %v799_v26, -1e+30  ;;  %v816_v26 = vsel %vm136_vm0, %v800_v19, -1e+30 }
 0x3de   :  { %v838_v3 = vmul.f32 1.442695, %v815_v53  ;;  %v779_v23 = vpop.xlane.xlu0 %778  ;;  %v13184_v53 = vld [vmem:[#allocation80_spill] sm:$0xff] }
 0x3df   :  { %v801_v59 = vsub.f32 %v13181_v6, %v779_v23  ;;  %v840_v23 = vmul.f32 1.442695, %v816_v26  ;;  %v13185_v6 = vld [vmem:[#allocation73_spill] sm:$0xff] }
 0x3e0   :  { %8317 = vpow2.f32 %v838_v3  ;;  %1508 = vadd.xlane.f32.xlu0 %v10283_v43  ;;  %v802_v50 = vsub.f32 %v13185_v6, %v781_v60 }
 0x3e1   :  { %v817_v24 = vsel %vm136_vm0, %v801_v59, -1e+30  ;;  %8319 = vpow2.f32 %v836_v28 }
 0x3e2   :  { %v783_v18 = vpop.xlane.xlu0 %782  ;;  %v842_v17 = vmul.f32 1.442695, %v817_v24  ;;  %v818_v19 = vsel %vm136_vm0, %v802_v50, -1e+30  ;;  %v13187_v24 = vld [vmem:[#allocation76_spill] sm:$0xff] }
 0x3e3   :  { %v803_v3 = vsub.f32 %v13184_v53, %v783_v18  ;;  %v844_v60 = vmul.f32 1.442695, %v818_v19  ;;  %v13188_v53 = vld [vmem:[#allocation82_spill] sm:$0xff]  ;;  %v13190_v19 = vld [vmem:[#allocation83_spill] sm:$0xff] }
 0x3e4   :  { %1512 = vadd.xlane.f32.xlu0 %v10293_v16  ;;  %8321 = vpow2.f32 %v842_v17  ;;  %v805_v16 = vsub.f32 %v13187_v24, %v787_v14 }
 0x3e5   :  { %v819_v59 = vsel %vm136_vm0, %v803_v3, -1e+30  ;;  %8323 = vpow2.f32 %v840_v23 }
 0x3e6   :  { %v846_v28 = vmul.f32 1.442695, %v819_v59  ;;  %v821_v17 = vsel %vm136_vm0, %v805_v16, -1e+30  ;;  %v13189_v59 = vld [vmem:[#allocation84_spill] sm:$0xff] }
 0x3e7   :  { %v850_v14 = vmul.f32 1.442695, %v821_v17 }
 0x3e8   :  { %8325 = vpow2.f32 %v846_v28 }
 0x3e9   :  { %v785_v38 = vpop.xlane.xlu1 %784  ;;  %8327 = vpow2.f32 %v844_v60 }
 0x3ea   :  { %v10302_v43 = vpop.eup %8317  ;;  %v804_v3 = vsub.f32 %v13188_v53, %v785_v38  ;;  %v13191_v53 = vld [vmem:[#allocation85_spill] sm:$0xff] }
 0x3eb   :  { %13186 = vst [vmem:[#allocation81_spill] sm:$0xff] %v10302_v43  ;;  %870 = vadd.xlane.f32.xlu1 %v10302_v43  ;;  %v10308_v26 = vpop.eup %8319 }
 0x3ec   :  { %v820_v28 = vsel %vm136_vm0, %v804_v3, -1e+30 }
 0x3ed   :  { %v791_v18 = vpop.xlane.xlu1 %790  ;;  %v848_v60 = vmul.f32 1.442695, %v820_v28 }
 0x3ee   :  { %v10314_v23 = vpop.eup %8321  ;;  %v807_v24 = vsub.f32 %v13190_v19, %v791_v18 }
 0x3ef   :  { %868 = vadd.xlane.f32.xlu1 %v10308_v26  ;;  %v10323_v38 = vpop.eup %8323 }
 0x3f1   :  { %v1421_v6 = vpop.xlane.xlu1 %1420 }
 0x3f2   :  { %v1439_v10 = vsub.f32 %v13189_v59, %v1421_v6  ;;  %v10333_v18 = vpop.eup %8325  ;;  %v13192_v59 = vld [vmem:[#allocation57_spill] sm:$0xff] }
 0x3f3   :  { %874 = vadd.xlane.f32.xlu1 %v10314_v23  ;;  %v10338_v19 = vpop.eup %8327 }
 0x3f4   :  { %v1455_v50 = vsel %vm136_vm0, %v1439_v10, -1e+30  ;;  %v823_v10 = vsel %vm136_vm0, %v807_v24, -1e+30 }
 0x3f5   :  { %v1484_v16 = vmul.f32 1.442695, %v1455_v50  ;;  %v1425_v8 = vpop.xlane.xlu1 %1424 }
 0x3f6   :  { %v1441_v43 = vsub.f32 %v13191_v53, %v1425_v8  ;;  %v854_v8 = vmul.f32 1.442695, %v823_v10 }
 0x3f7   :  { %8329 = vpow2.f32 %v1484_v16  ;;  %872 = vadd.xlane.f32.xlu1 %v10323_v38  ;;  %v13193_v16 = vld [vmem:[#allocation56_spill] sm:$0xff] }
 0x3f8   :  { %8331 = vpow2.f32 %v850_v14  ;;  %v1457_v17 = vsel %vm136_vm0, %v1441_v43, -1e+30  ;;  %v1428_v14 = vsub.f32 %v13192_v59, %v10101_v35  ;;  %v1429_v53 = vsub.f32 %v13193_v16, %v10081_v2 }
 0x3f9   :  { %v1488_v3 = vmul.f32 1.442695, %v1457_v17  ;;  %v10331_v6 = vpop.xlane.xlu1 %2027 }
 0x3fa   :  { %v1444_v10 = vsel %vm136_vm0, %v1428_v14, -1e+30  ;;  %v1445_v2 = vsel %vm136_vm0, %v1429_v53, -1e+30  ;;  %v13198_v53 = vld [vmem:[#allocation63_spill] sm:$0xff] }
 0x3fb   :  { %8333 = vpow2.f32 %v1488_v3  ;;  %878 = vadd.xlane.f32.xlu1 %v10333_v18 }
 0x3fc   :  { %8335 = vpow2.f32 %v848_v60 }
 0x3fd   :  { %v789_v50 = vpop.xlane.xlu0 %788  ;;  %v2030_v28 = vpop.xlane.xlu1 %2029  ;;  %8337 = vpow2.f32 %v854_v8  ;;  %v1462_v8 = vmul.f32 1.442695, %v1444_v10  ;;  %v1432_v10 = vsub.f32 %v13198_v53, %v10196_v30 }
 0x3fe   :  { %v806_v43 = vsub.f32 %v9919_v58, %v789_v50  ;;  %v2060_v24 = vsub.f32 %v9907_v36, %v2030_v28  ;;  %v13196_v28 = vld [vmem:[#allocation59_spill] sm:$0xff] }
 0x3ff   :  { %876 = vadd.xlane.f32.xlu1 %v10338_v19  ;;  %v1430_v14 = vsub.f32 %v13196_v28, %v10138_v40  ;;  %v1448_v30 = vsel %vm136_vm0, %v1432_v10, -1e+30  ;;  %v13200_v10 = vld [vmem:[#allocation74_spill] sm:$0xff] }
 0x400   :  { %v822_v60 = vsel %vm136_vm0, %v806_v43, -1e+30  ;;  %v2076_v35 = vsel %vm136_vm0, %v2060_v24, -1e+30 }
 0x401   :  { %v10349_v17 = vpop.eup %8329  ;;  %v852_v58 = vmul.f32 1.442695, %v822_v60  ;;  %v2093_v3 = vmul.f32 1.442695, %v2076_v35  ;;  %v10353_v36 = vpop.xlane.xlu0 %1418  ;;  %v1446_v40 = vsel %vm136_vm0, %v1430_v14, -1e+30 }
 0x402   :  { %13194 = vst [vmem:[#allocation79_spill] sm:$0xff] %v10349_v17  ;;  %v10355_v59 = vpop.xlane.xlu1 %2031  ;;  %v10357_v50 = vpop.eup %8331  ;;  %1516 = vadd.xlane.f32.xlu0 %v10349_v17  ;;  %v1464_v17 = vmul.f32 1.442695, %v1445_v2  ;;  %v13199_v14 = vld [vmem:[#allocation69_spill] sm:$0xff] }
 0x403   :  { %13195 = vst [vmem:[#allocation58_spill] sm:$0xff] %v10357_v50  ;;  %8339 = vpow2.f32 %v852_v58  ;;  %882 = vadd.xlane.f32.xlu1 %v10357_v50 }
 0x404   :  { %8341 = vpow2.f32 %v2093_v3 }
 0x405   :  { %v10365_v43 = vpop.eup %8333  ;;  %v2038_v24 = vpop.xlane.xlu0 %2037  ;;  %8343 = vpow2.f32 %v1462_v8 }
 0x406   :  { %13197 = vst [vmem:[#allocation60_spill] sm:$0xff] %v10365_v43  ;;  %v2034_v16 = vpop.xlane.xlu1 %2033  ;;  %v10367_v60 = vpop.eup %8335  ;;  %v2064_v35 = vsub.f32 %v9942_v51, %v2038_v24  ;;  %1520 = vadd.xlane.f32.xlu0 %v10365_v43  ;;  %8345 = vpow2.f32 %v1464_v17 }
 0x407   :  { %v2062_v58 = vsub.f32 %v9945_v22, %v2034_v16  ;;  %880 = vadd.xlane.f32.xlu1 %v10367_v60  ;;  %v10383_v2 = vpop.eup %8337  ;;  %v1466_v16 = vmul.f32 1.442695, %v1446_v40  ;;  %v1470_v40 = vmul.f32 1.442695, %v1448_v30 }
 0x408   :  { %v2080_v51 = vsel %vm136_vm0, %v2064_v35, -1e+30 }
 0x409   :  { %v2078_v3 = vsel %vm136_vm0, %v2062_v58, -1e+30  ;;  %v2042_v22 = vpop.xlane.xlu0 %2041  ;;  %v1434_v58 = vsub.f32 %v13199_v14, %v10239_v21  ;;  %v2101_v53 = vmul.f32 1.442695, %v2080_v51  ;;  %v1436_v51 = vsub.f32 %v13200_v10, %v10285_v12 }
 0x40a   :  { %v2097_v28 = vmul.f32 1.442695, %v2078_v3  ;;  %v10381_v24 = vpop.xlane.xlu1 %2035  ;;  %v2066_v8 = vsub.f32 %v9958_v42, %v2042_v22 }
 0x40b   :  { %886 = vadd.xlane.f32.xlu1 %v10383_v2  ;;  %v1450_v21 = vsel %vm136_vm0, %v1434_v58, -1e+30  ;;  %v1452_v30 = vsel %vm136_vm0, %v1436_v51, -1e+30 }
 0x40c   :  { %8347 = vpow2.f32 %v2097_v28  ;;  %v2082_v3 = vsel %vm136_vm0, %v2066_v8, -1e+30 }
 0x40d   :  { %v10391_v35 = vpop.eup %8339  ;;  %v2046_v43 = vpop.xlane.xlu0 %2045  ;;  %8349 = vpow2.f32 %v1466_v16  ;;  %v2105_v28 = vmul.f32 1.442695, %v2082_v3  ;;  %v1474_v16 = vmul.f32 1.442695, %v1450_v21  ;;  %v1478_v21 = vmul.f32 1.442695, %v1452_v30 }
 0x40e   :  { %v10395_v50 = vpop.xlane.xlu1 %2039  ;;  %v10397_v42 = vpop.eup %8341  ;;  %v2068_v17 = vsub.f32 %v9981_v52, %v2046_v43  ;;  %8351 = vpow2.f32 %v2101_v53  ;;  %v1438_v53 = vsub.f32 %v9934_v56, %v10353_v36 }
 0x40f   :  { %2125 = vadd.xlane.f32.xlu0 %v10397_v42  ;;  %884 = vadd.xlane.f32.xlu1 %v10391_v35  ;;  %v10410_v52 = vpop.eup %8343  ;;  %8353 = vpow2.f32 %v1470_v40 }
 0x410   :  { %v2084_v22 = vsel %vm136_vm0, %v2068_v17, -1e+30  ;;  %8355 = vpow2.f32 %v2105_v28  ;;  %v10416_v58 = vpop.eup %8345  ;;  %v1454_v56 = vsel %vm136_vm0, %v1438_v53, -1e+30  ;;  %v13202_v53 = vld [vmem:[#allocation86_spill] sm:$0xff] }
 0x411   :  { %v2050_v8 = vpop.xlane.xlu0 %2049  ;;  %v2109_v12 = vmul.f32 1.442695, %v2084_v22  ;;  %8357 = vpow2.f32 %v1474_v16  ;;  %v1482_v16 = vmul.f32 1.442695, %v1454_v56 }
 0x412   :  { %v10408_v14 = vpop.xlane.xlu1 %2043  ;;  %v2070_v43 = vsub.f32 %v10000_v63, %v2050_v8 }
 0x413   :  { %1494 = vadd.xlane.f32.xlu1 %v10410_v52  ;;  %8359 = vpow2.f32 %v2109_v12 }
 0x414   :  { %v2086_v3 = vsel %vm136_vm0, %v2070_v43, -1e+30  ;;  %8361 = vpow2.f32 %v1478_v21 }
 0x415   :  { %v10422_v17 = vpop.xlane.xlu0 %2051  ;;  %v2113_v10 = vmul.f32 1.442695, %v2086_v3  ;;  %v2059_v3 = vsub.f32 %v13202_v53, %v10331_v6 }
 0x416   :  { %v10424_v63 = vpop.xlane.xlu1 %2047  ;;  %v10426_v40 = vpop.eup %8347 }
 0x417   :  { %13201 = vst [vmem:[#allocation66_spill] sm:$0xff] %v10426_v40  ;;  %2129 = vadd.xlane.f32.xlu0 %v10426_v40  ;;  %1496 = vadd.xlane.f32.xlu1 %v10416_v58  ;;  %v10430_v51 = vpop.eup %8349  ;;  %8363 = vpow2.f32 %v2113_v10 }
 0x418   :  { %v10434_v22 = vpop.eup %8351 }
 0x419   :  { %v2054_v36 = vpop.xlane.xlu0 %2053  ;;  %v10442_v12 = vpop.eup %8353 }
 0x41a   :  { %v1423_v28 = vpop.xlane.xlu1 %1422  ;;  %v2072_v8 = vsub.f32 %v10033_v27, %v2054_v36  ;;  %v10448_v21 = vpop.eup %8355 }
 0x41b   :  { %v1440_v43 = vsub.f32 %v10036_v37, %v1423_v28  ;;  %2133 = vadd.xlane.f32.xlu0 %v10434_v22  ;;  %1498 = vadd.xlane.f32.xlu1 %v10430_v51  ;;  %v10455_v6 = vpop.eup %8357  ;;  %v2075_v28 = vsel %vm136_vm0, %v2059_v3, -1e+30  ;;  %v13203_v3 = vld [vmem:[#allocation87_spill] sm:$0xff] }
 0x41c   :  { %v2088_v30 = vsel %vm136_vm0, %v2072_v8, -1e+30  ;;  %v2061_v8 = vsub.f32 %v9926_v45, %v10355_v59  ;;  %v2063_v45 = vsub.f32 %v13203_v3, %v10381_v24  ;;  %v2065_v24 = vsub.f32 %v9978_v55, %v10395_v50 }
 0x41d   :  { %v2117_v40 = vmul.f32 1.442695, %v2088_v30  ;;  %v1456_v27 = vsel %vm136_vm0, %v1440_v43, -1e+30  ;;  %v2058_v37 = vpop.xlane.xlu0 %2057  ;;  %v2067_v55 = vsub.f32 %v10003_v9, %v10408_v14  ;;  %v2069_v9 = vsub.f32 %v10020_v31, %v10424_v63 }
 0x41e   :  { %v2074_v36 = vsub.f32 %v10047_v49, %v2058_v37  ;;  %v1486_v10 = vmul.f32 1.442695, %v1456_v27  ;;  %v2077_v53 = vsel %vm136_vm0, %v2061_v8, -1e+30  ;;  %v2081_v3 = vsel %vm136_vm0, %v2065_v24, -1e+30 }
 0x41f   :  { %8365 = vpow2.f32 %v2117_v40  ;;  %2137 = vadd.xlane.f32.xlu0 %v10448_v21  ;;  %1502 = vadd.xlane.f32.xlu1 %v10442_v12  ;;  %v10463_v40 = vpop.eup %8359 }
 0x420   :  { %8367 = vpow2.f32 %v1482_v16  ;;  %v2090_v56 = vsel %vm136_vm0, %v2074_v36, -1e+30  ;;  %v2091_v16 = vmul.f32 1.442695, %v2075_v28  ;;  %v10467_v30 = vpop.eup %8361  ;;  %v2095_v36 = vmul.f32 1.442695, %v2077_v53 }
 0x421   :  { %v2121_v43 = vmul.f32 1.442695, %v2090_v56  ;;  %v10461_v49 = vpop.xlane.xlu0 %2661  ;;  %v10473_v27 = vpop.eup %8363  ;;  %v2079_v28 = vsel %vm136_vm0, %v2063_v45, -1e+30 }
 0x422   :  { %13204 = vst [vmem:[#allocation71_spill] sm:$0xff] %v10473_v27 }
 0x423   :  { %8369 = vpow2.f32 %v2121_v43  ;;  %2141 = vadd.xlane.f32.xlu0 %v10463_v40  ;;  %1506 = vadd.xlane.f32.xlu1 %v10455_v6 }
 0x424   :  { %8371 = vpow2.f32 %v1486_v10 }
 0x425   :  { %v2664_v59 = vpop.xlane.xlu0 %2663  ;;  %8373 = vpow2.f32 %v2091_v16  ;;  %v2099_v16 = vmul.f32 1.442695, %v2079_v28 }
 0x426   :  { %v2694_v37 = vsub.f32 %v10065_v61, %v2664_v59 }
 0x427   :  { %2145 = vadd.xlane.f32.xlu0 %v10473_v27  ;;  %1510 = vadd.xlane.f32.xlu1 %v10467_v30 }
 0x428   :  { %v2710_v10 = vsel %vm136_vm0, %v2694_v37, -1e+30  ;;  %v2103_v37 = vmul.f32 1.442695, %v2081_v3  ;;  %v2085_v3 = vsel %vm136_vm0, %v2069_v9, -1e+30 }
 0x429   :  { %v10480_v56 = vpop.eup %8365  ;;  %v2727_v8 = vmul.f32 1.442695, %v2710_v10  ;;  %v10486_v43 = vpop.xlane.xlu0 %2665  ;;  %v2083_v10 = vsel %vm136_vm0, %v2067_v55, -1e+30 }
 0x42a   :  { %13205 = vst [vmem:[#allocation61_spill] sm:$0xff] %v10480_v56  ;;  %v10488_v61 = vpop.eup %8367 }
 0x42b   :  { %8375 = vpow2.f32 %v2727_v8  ;;  %2149 = vadd.xlane.f32.xlu0 %v10480_v56  ;;  %1514 = vadd.xlane.f32.xlu1 %v10488_v61  ;;  %v2071_v8 = vsub.f32 %v10017_v54, %v10422_v17  ;;  %v2111_v54 = vmul.f32 1.442695, %v2085_v3 }
 0x42c   :  { %8377 = vpow2.f32 %v2095_v36 }
 0x42d   :  { %v10492_v53 = vpop.eup %8369  ;;  %v2668_v50 = vpop.xlane.xlu0 %2667  ;;  %8379 = vpow2.f32 %v2099_v16 }
 0x42e   :  { %13206 = vst [vmem:[#allocation77_spill] sm:$0xff] %v10492_v53  ;;  %v10498_v45 = vpop.eup %8371  ;;  %v2696_v59 = vsub.f32 %v10085_v20, %v2668_v50  ;;  %v2107_v20 = vmul.f32 1.442695, %v2083_v10 }
 0x42f   :  { %2153 = vadd.xlane.f32.xlu0 %v10492_v53  ;;  %1518 = vadd.xlane.f32.xlu1 %v10498_v45  ;;  %v10509_v24 = vpop.eup %8373 }
 0x430   :  { %v2712_v36 = vsel %vm136_vm0, %v2696_v59, -1e+30  ;;  %v2087_v59 = vsel %vm136_vm0, %v2071_v8, -1e+30 }
 0x431   :  { %v2731_v14 = vmul.f32 1.442695, %v2712_v36  ;;  %v2670_v28 = vpop.xlane.xlu0 %2669  ;;  %v2115_v9 = vmul.f32 1.442695, %v2087_v59 }
 0x433   :  { %8381 = vpow2.f32 %v2731_v14  ;;  %2123 = vadd.xlane.f32.xlu1 %v10509_v24 }
 0x434   :  { %8383 = vpow2.f32 %v2103_v37 }
 0x435   :  { %v10514_v16 = vpop.eup %8375  ;;  %v2672_v55 = vpop.xlane.xlu0 %2671  ;;  %8385 = vpow2.f32 %v2107_v20 }
 0x436   :  { %v10518_v50 = vpop.eup %8377  ;;  %v2698_v31 = vsub.f32 %v10114_v39, %v2672_v55  ;;  %2759 = vadd.xlane.f32.xlu0 %v10514_v16  ;;  %v2693_v39 = vsub.f32 %v10057_v46, %v10461_v49  ;;  %v2695_v49 = vsub.f32 %v10077_v44, %v10486_v43 }
 0x437   :  { %2127 = vadd.xlane.f32.xlu1 %v10518_v50  ;;  %v859_v63 = vpop.xlane.xlu1 %858  ;;  %v10527_v10 = vpop.eup %8379 }
 0x438   :  { %v2714_v17 = vsel %vm136_vm0, %v2698_v31, -1e+30  ;;  %8387 = vrcp.f32 %v859_v63  ;;  %v2709_v31 = vsel %vm136_vm0, %v2693_v39, -1e+30  ;;  %v2697_v39 = vsub.f32 %v10104_v48, %v2670_v28 }
 0x439   :  { %v2735_v37 = vmul.f32 1.442695, %v2714_v17  ;;  %v2674_v36 = vpop.xlane.xlu0 %2673  ;;  %v2711_v44 = vsel %vm136_vm0, %v2695_v49, -1e+30 }
 0x43a   :  { %v2729_v48 = vmul.f32 1.442695, %v2711_v44  ;;  %v2713_v28 = vsel %vm136_vm0, %v2697_v39, -1e+30 }
 0x43b   :  { %8389 = vpow2.f32 %v2735_v37  ;;  %2131 = vadd.xlane.f32.xlu1 %v10527_v10  ;;  %v10532_v14 = vpop.xlane.xlu1 %1492  ;;  %v2733_v27 = vmul.f32 1.442695, %v2713_v28 }
 0x43c   :  { %8391 = vpow2.f32 %v2111_v54 }
 0x43d   :  { %v10534_v20 = vpop.eup %8381  ;;  %v2056_v8 = vpop.xlane.xlu0 %2055  ;;  %8393 = vpow2.f32 %v2115_v9 }
 0x43e   :  { %v10536_v3 = vpop.eup %8383  ;;  %v2073_v55 = vsub.f32 %v10147_v41, %v2056_v8  ;;  %2763 = vadd.xlane.f32.xlu0 %v10534_v20  ;;  %v2725_v41 = vmul.f32 1.442695, %v2709_v31 }
 0x43f   :  { %2135 = vadd.xlane.f32.xlu1 %v10536_v3  ;;  %v857_v46 = vpop.xlane.xlu1 %856  ;;  %v10547_v37 = vpop.eup %8385 }
 0x440   :  { %v2089_v59 = vsel %vm136_vm0, %v2073_v55, -1e+30  ;;  %8395 = vrcp.f32 %v857_v46 }
 0x441   :  { %v2119_v54 = vmul.f32 1.442695, %v2089_v59  ;;  %v2676_v17 = vpop.xlane.xlu0 %2675 }
 0x442   :  { %v2700_v9 = vsub.f32 %v10156_v29, %v2676_v17  ;;  %v8388_v8 = vpop.eup %8387 }
 0x443   :  { %8397 = vpow2.f32 %v2119_v54  ;;  %2139 = vadd.xlane.f32.xlu1 %v10547_v37  ;;  %v10552_v53 = vpop.xlane.xlu1 %1490  ;;  %v905_v29 = vmul.f32 %v8388_v8, %v859_v63  ;;  %v2699_v54 = vsub.f32 %v10126_v25, %v2674_v36 }
 0x444   :  { %v2716_v43 = vsel %vm136_vm0, %v2700_v9, -1e+30  ;;  %8399 = vpow2.f32 %v2725_v41 }
 0x445   :  { %v10558_v55 = vpop.eup %8389  ;;  %v2739_v59 = vmul.f32 1.442695, %v2716_v43  ;;  %v2678_v31 = vpop.xlane.xlu0 %2677  ;;  %v921_v41 = vsub.f32 2.0, %v905_v29 }
 0x446   :  { %13207 = vst [vmem:[#allocation78_spill] sm:$0xff] %v10558_v55  ;;  %v10560_v56 = vpop.eup %8391  ;;  %2767 = vadd.xlane.f32.xlu0 %v10558_v55  ;;  %v2701_v28 = vsub.f32 %v10177_v47, %v2678_v31 }
 0x447   :  { %13208 = vst [vmem:[#allocation68_spill] sm:$0xff] %v10560_v56  ;;  %8401 = vpow2.f32 %v2739_v59  ;;  %2143 = vadd.xlane.f32.xlu1 %v10560_v56  ;;  %v863_v49 = vpop.xlane.xlu1 %862  ;;  %v10567_v17 = vpop.eup %8393  ;;  %v2715_v59 = vsel %vm136_vm0, %v2699_v54, -1e+30 }
 0x448   :  { %8403 = vrcp.f32 %v863_v49 }
 0x449   :  { %v2680_v9 = vpop.xlane.xlu0 %2679  ;;  %8405 = vpow2.f32 %v2729_v48 }
 0x44a   :  { %v8396_v43 = vpop.eup %8395  ;;  %v2702_v63 = vsub.f32 %v10190_v7, %v2680_v9  ;;  %v937_v7 = vmul.f32 %v8388_v8, %v921_v41 }
 0x44b   :  { %v904_v44 = vmul.f32 %v8396_v43, %v857_v46  ;;  %2147 = vadd.xlane.f32.xlu1 %v10567_v17  ;;  %v861_v39 = vpop.xlane.xlu1 %860  ;;  %v2737_v46 = vmul.f32 1.442695, %v2715_v59 }
 0x44c   :  { %v2718_v25 = vsel %vm136_vm0, %v2702_v63, -1e+30  ;;  %8407 = vrcp.f32 %v861_v39 }
 0x44d   :  { %v10575_v36 = vpop.eup %8397  ;;  %v920_v56 = vsub.f32 2.0, %v904_v44  ;;  %v2743_v29 = vmul.f32 1.442695, %v2718_v25  ;;  %v2682_v55 = vpop.xlane.xlu0 %2681  ;;  %8409 = vpow2.f32 %v2733_v27  ;;  %v2717_v44 = vsel %vm136_vm0, %v2701_v28, -1e+30  ;;  %v13212_v25 = vld [vmem:[#allocation31_spill] sm:$0xff] }
 0x44e   :  { %v10579_v54 = vpop.eup %8399  ;;  %v2703_v47 = vsub.f32 %v10203_v15, %v2682_v55  ;;  %v2741_v15 = vmul.f32 1.442695, %v2717_v44 }
 0x44f   :  { %8411 = vpow2.f32 %v2743_v29  ;;  %2151 = vadd.xlane.f32.xlu1 %v10575_v36  ;;  %v867_v48 = vpop.xlane.xlu1 %866  ;;  %v936_v9 = vmul.f32 %v8396_v43, %v920_v56  ;;  %13209 = vst [vmem:[#allocation80_spill] sm:$0xff] %v10579_v54  ;;  %v10592_v56 = vmul.f32 %v10136_v11, %v937_v7 }
 0x450   :  { %8413 = vrcp.f32 %v867_v48  ;;  %v2719_v11 = vsel %vm136_vm0, %v2703_v47, -1e+30 }
 0x451   :  { %v10581_v63 = vpop.eup %8401  ;;  %v2684_v31 = vpop.xlane.xlu0 %2683  ;;  %v10587_v27 = vmul.f32 %v10168_v57, %v936_v9  ;;  %8415 = vpow2.f32 %v2737_v46  ;;  %v13213_v46 = vld [vmem:[#allocation34_spill] sm:$0xff] }
 0x452   :  { %13210 = vst [vmem:[#allocation73_spill] sm:$0xff] %v10581_v63  ;;  %v8404_v8 = vpop.eup %8403  ;;  %v2704_v41 = vsub.f32 %v10214_v13, %v2684_v31  ;;  %2771 = vadd.xlane.f32.xlu0 %v10581_v63  ;;  %v2745_v31 = vmul.f32 1.442695, %v2719_v11 }
 0x453   :  { %v907_v43 = vmul.f32 %v8404_v8, %v863_v49  ;;  %2757 = vadd.xlane.f32.xlu1 %v10579_v54  ;;  %6964 = vmatprep.mubr.f32.mxu1 %v10587_v27  ;;  %v865_v59 = vpop.xlane.xlu1 %864  ;;  %v10599_v13 = vpop.eup %8405 }
 0x454   :  { %v2720_v57 = vsel %vm136_vm0, %v2704_v41, -1e+30  ;;  %8417 = vrcp.f32 %v865_v59  ;;  %6965 = vmatmul.mubr.f32.vlgmr.msra.gmra.mrb[0].mxu1 %v10592_v56  ;;  %13211 = vst [vmem:[#allocation76_spill] sm:$0xff] %v10599_v13 }
 0x455   :  { %v2747_v55 = vmul.f32 1.442695, %v2720_v57  ;;  %7650 = vmatpush3.bf16.msra.mxu1 %v13212_v25  ;;  %v2686_v49 = vpop.xlane.xlu0 %2685  ;;  %v923_v29 = vsub.f32 2.0, %v907_v43 }
 0x456   :  { %v8408_v28 = vpop.eup %8407  ;;  %v2705_v7 = vsub.f32 %v10229_v1, %v2686_v49  ;;  %7652 = vmatprep.subr.bf16.mxu1 %v13213_v46 }
 0x457   :  { %v906_v9 = vmul.f32 %v8408_v28, %v861_v39  ;;  %8419 = vpow2.f32 %v2747_v55  ;;  %2761 = vadd.xlane.f32.xlu1 %v10599_v13  ;;  %v10607_v44 = vpop.eup %8409  ;;  %v13216_v39 = vld [vmem:[#allocation37_spill] sm:$0xff]  ;;  %v939_v55 = vmul.f32 %v8404_v8, %v923_v29  ;;  %v13219_v29 = vld [vmem:[#allocation40_spill] sm:$0xff] }
 0x458   :  { %13214 = vst [vmem:[#allocation82_spill] sm:$0xff] %v10607_v44  ;;  %8421 = vpow2.f32 %v2741_v15  ;;  %v2721_v57 = vsel %vm136_vm0, %v2705_v7, -1e+30  ;;  %v3245_v13 = vld [vmem:[#allocation10 + $0x10] sm:$0xff] }
 0x459   :  { %v10609_v41 = vpop.eup %8411  ;;  %v922_v47 = vsub.f32 2.0, %v906_v9  ;;  %7654 = vmatpush3.bf16.msra.mxu1 %v13213_v46  ;;  %v2688_v43 = vpop.xlane.xlu0 %2687  ;;  %8423 = vpow2.f32 %v2745_v31  ;;  %v2749_v11 = vmul.f32 1.442695, %v2721_v57 }
 0x45a   :  { %13215 = vst [vmem:[#allocation84_spill] sm:$0xff] %v10609_v41  ;;  %v8414_v1 = vpop.eup %8413  ;;  %v2706_v25 = vsub.f32 %v10245_v32, %v2688_v43  ;;  %7656 = vmatprep.subr.bf16.mxu1 %v13216_v39  ;;  %2775 = vadd.xlane.f32.xlu0 %v10609_v41 }
 0x45b   :  { %v909_v49 = vmul.f32 %v8414_v1, %v867_v48  ;;  %2765 = vadd.xlane.f32.xlu1 %v10607_v44  ;;  %v938_v15 = vmul.f32 %v8408_v28, %v922_v47  ;;  %v10620_v9 = vpop.eup %8415  ;;  %v10629_v28 = vmul.f32 %v10194_v33, %v939_v55 }
 0x45c   :  { %v2722_v7 = vsel %vm136_vm0, %v2706_v25, -1e+30  ;;  %13217 = vst [vmem:[#allocation83_spill] sm:$0xff] %v10620_v9 }
 0x45d   :  { %v2751_v46 = vmul.f32 1.442695, %v2722_v7  ;;  %7658 = vmatpush3.bf16.msra.mxu1 %v13216_v39  ;;  %v2690_v32 = vpop.xlane.xlu0 %2689  ;;  %v10624_v43 = vmul.f32 %v10207_v34, %v938_v15  ;;  %v925_v8 = vsub.f32 2.0, %v909_v49  ;;  %v13222_v39 = vld [vmem:[#allocation43_spill] sm:$0xff] }
 0x45e   :  { %v8418_v41 = vpop.eup %8417  ;;  %v2707_v48 = vsub.f32 %v10254_v0, %v2690_v32  ;;  %7660 = vmatprep.subr.bf16.mxu1 %v13219_v29  ;;  %v13226_v32 = vld [vmem:[#allocation65_spill] sm:$0xff] }
 0x45f   :  { %13218 = vst [vmem:[#allocation85_spill] sm:$0xff] %v10624_v43  ;;  %v908_v31 = vmul.f32 %v8418_v41, %v865_v59  ;;  %8425 = vpow2.f32 %v2751_v46  ;;  %2769 = vadd.xlane.f32.xlu1 %v10620_v9  ;;  %6967 = vmatprep.mubr.f32.mxu1 %v10624_v43  ;;  %v941_v55 = vmul.f32 %v8414_v1, %v925_v8  ;;  %v13229_v1 = vld [vmem:[#allocation49_spill] sm:$0xff] }
 0x460   :  { %8427 = vpow2.f32 %v2749_v11  ;;  %v2723_v34 = vsel %vm136_vm0, %v2707_v48, -1e+30  ;;  %6968 = vmatmul.mubr.f32.gmra.mrb[2].mxu1 %v10629_v28  ;;  %v13235_v9 = vld [vmem:[#allocation81_spill] sm:$0xff] }
 0x461   :  { %v10636_v47 = vpop.eup %8419  ;;  %v924_v0 = vsub.f32 2.0, %v908_v31  ;;  %v2753_v57 = vmul.f32 1.442695, %v2723_v34  ;;  %7662 = vmatpush3.bf16.msra.mxu1 %v13219_v29  ;;  %v2692_v33 = vpop.xlane.xlu0 %2691  ;;  %v10655_v48 = vmul.f32 %v13226_v32, %v941_v55  ;;  %v13231_v29 = vld [vmem:[#allocation52_spill] sm:$0xff] }
 0x462   :  { %13220 = vst [vmem:[#allocation57_spill] sm:$0xff] %v10636_v47  ;;  %v10639_v25 = vpop.eup %8421  ;;  %v2708_v59 = vsub.f32 %v10263_v62, %v2692_v33  ;;  %7664 = vmatprep.subr.bf16.mxu1 %v13222_v39  ;;  %2779 = vadd.xlane.f32.xlu0 %v10636_v47  ;;  %v13225_v62 = vld [vmem:[#allocation46_spill] sm:$0xff]  ;;  %v13233_v34 = vld [vmem:[#allocation32_spill] sm:$0xff] }
 0x463   :  { %13221 = vst [vmem:[#allocation56_spill] sm:$0xff] %v10639_v25  ;;  %8429 = vpow2.f32 %v2753_v57  ;;  %2773 = vadd.xlane.f32.xlu1 %v10639_v25  ;;  %v940_v49 = vmul.f32 %v8418_v41, %v924_v0  ;;  %v10651_v46 = vpop.eup %8423 }
 0x464   :  { %v2724_v15 = vsel %vm136_vm0, %v2708_v59, -1e+30  ;;  %13224 = vst [vmem:[#allocation63_spill] sm:$0xff] %v10651_v46 }
 0x465   :  { %v2755_v11 = vmul.f32 1.442695, %v2724_v15  ;;  %7666 = vmatpush3.bf16.msra.mxu1 %v13222_v39  ;;  %v10649_v7 = vmul.f32 %v10232_v5, %v940_v49  ;;  %v10678_v33 = vpop.xlane.xlu0 %1500 }
 0x466   :  { %7668 = vmatprep.subr.bf16.mxu1 %v13225_v62 }
 0x467   :  { %13223 = vst [vmem:[#allocation59_spill] sm:$0xff] %v10649_v7  ;;  %8431 = vpow2.f32 %v2755_v11  ;;  %2777 = vadd.xlane.f32.xlu1 %v10651_v46  ;;  %6970 = vmatprep.mubr.f32.mxu1 %v10649_v7  ;;  %v3244_v7 = vld [vmem:[#allocation10 + $0x8] sm:$0xff] }
 0x468   :  { %6971 = vmatmul.mubr.f32.gmra.mrb[4].mxu1 %v10655_v48 }
 0x469   :  { %v10660_v41 = vpop.eup %8425  ;;  %7670 = vmatpush3.bf16.msra.mxu1 %v13225_v62  ;;  %v10680_v15 = vpop.xlane.xlu0 %1504 }
 0x46a   :  { %13227 = vst [vmem:[#allocation69_spill] sm:$0xff] %v10660_v41  ;;  %v10663_v5 = vpop.eup %8427  ;;  %7672 = vmatprep.subr.bf16.mxu1 %v13229_v1  ;;  %2783 = vadd.xlane.f32.xlu0 %v10660_v41 }
 0x46b   :  { %13228 = vst [vmem:[#allocation74_spill] sm:$0xff] %v10663_v5  ;;  %2781 = vadd.xlane.f32.xlu1 %v10663_v5 }
 0x46d   :  { %v10668_v8 = vpop.eup %8429  ;;  %7674 = vmatpush3.bf16.msra.mxu1 %v13229_v1 }
 0x46e   :  { %13230 = vst [vmem:[#allocation86_spill] sm:$0xff] %v10668_v8  ;;  %7676 = vmatprep.subr.bf16.mxu1 %v13231_v29 }
 0x46f   :  { %2785 = vadd.xlane.f32.xlu1 %v10668_v8  ;;  %v10682_v8 = vpop.xlane.xlu0 %1508 }
 0x471   :  { %v10673_v31 = vpop.eup %8431  ;;  %7678 = vmatpush3.bf16.msra.mxu1 %v13231_v29 }
 0x472   :  { %13232 = vst [vmem:[#allocation87_spill] sm:$0xff] %v10673_v31  ;;  %7680 = vmatprep.subr.bf16.mxu1 %v13233_v34  ;;  %2787 = vadd.xlane.f32.xlu0 %v10673_v31 }
 0x478   :  { %v871_v0 = vpop.xlane.xlu1 %870 }
 0x479   :  { %8433 = vrcp.f32 %v871_v0 }
 0x47c   :  { %v869_v57 = vpop.xlane.xlu1 %868 }
 0x47d   :  { %8435 = vrcp.f32 %v869_v57 }
 0x480   :  { %v875_v59 = vpop.xlane.xlu1 %874 }
 0x481   :  { %8437 = vrcp.f32 %v875_v59 }
 0x483   :  { %v8434_v39 = vpop.eup %8433 }
 0x484   :  { %v911_v55 = vmul.f32 %v8434_v39, %v871_v0  ;;  %v873_v49 = vpop.xlane.xlu1 %872 }
 0x485   :  { %8439 = vrcp.f32 %v873_v49 }
 0x486   :  { %v927_v62 = vsub.f32 2.0, %v911_v55 }
 0x487   :  { %v8436_v11 = vpop.eup %8435 }
 0x488   :  { %v910_v32 = vmul.f32 %v8436_v11, %v869_v57  ;;  %v879_v1 = vpop.xlane.xlu1 %878  ;;  %v943_v31 = vmul.f32 %v8434_v39, %v927_v62  ;;  %v10692_v39 = vpop.xlane.xlu0 %1512 }
 0x489   :  { %8441 = vrcp.f32 %v879_v1 }
 0x48a   :  { %v926_v29 = vsub.f32 2.0, %v910_v32  ;;  %v10688_v44 = vmul.f32 %v13235_v9, %v943_v31 }
 0x48b   :  { %v8438_v4 = vpop.eup %8437 }
 0x48c   :  { %v913_v5 = vmul.f32 %v8438_v4, %v875_v59  ;;  %v877_v41 = vpop.xlane.xlu1 %876  ;;  %v942_v46 = vmul.f32 %v8436_v11, %v926_v29 }
 0x48d   :  { %8443 = vrcp.f32 %v877_v41 }
 0x48e   :  { %v10685_v0 = vmul.f32 %v10308_v26, %v942_v46  ;;  %v929_v47 = vsub.f32 2.0, %v913_v5 }
 0x48f   :  { %v8440_v25 = vpop.eup %8439  ;;  %v10694_v5 = vpop.xlane.xlu0 %1516 }
 0x490   :  { %13234 = vst [vmem:[#allocation31_spill] sm:$0xff] %v10685_v0  ;;  %v912_v57 = vmul.f32 %v8440_v25, %v873_v49  ;;  %6973 = vmatprep.mubr.f32.mxu1 %v10685_v0  ;;  %v883_v55 = vpop.xlane.xlu1 %882  ;;  %v945_v62 = vmul.f32 %v8438_v4, %v929_v47  ;;  %v3243_v0 = vld [vmem:[#allocation10] sm:$0xff] }
 0x491   :  { %8445 = vrcp.f32 %v883_v55  ;;  %6974 = vmatmul.mubr.f32.gmra.mrb[6].mxu1 %v10688_v44 }
 0x492   :  { %v928_v59 = vsub.f32 2.0, %v912_v57  ;;  %v10700_v29 = vmul.f32 %v10314_v23, %v945_v62  ;;  %v3247_v57 = vld [vmem:[#allocation10 + $0x20] sm:$0xff] }
 0x493   :  { %v8442_v11 = vpop.eup %8441 }
 0x494   :  { %v915_v32 = vmul.f32 %v8442_v11, %v879_v1  ;;  %v881_v26 = vpop.xlane.xlu1 %880  ;;  %v944_v46 = vmul.f32 %v8440_v25, %v928_v59  ;;  %13237 = vst [vmem:[#allocation37_spill] sm:$0xff] %v10700_v29  ;;  %v7743_v25 = vpack.c.bf16 %v3244_v7, %v3243_v0  ;;  %v3246_v1 = vld [vmem:[#allocation10 + $0x18] sm:$0xff]  ;;  %v3248_v59 = vld [vmem:[#allocation10 + $0x28] sm:$0xff] }
 0x495   :  { %8447 = vrcp.f32 %v881_v26  ;;  %v7751_v7 = vpack.c.bf16 %v3248_v59, %v3247_v57 }
 0x496   :  { %v10697_v9 = vmul.f32 %v10323_v38, %v944_v46  ;;  %v931_v49 = vsub.f32 2.0, %v915_v32  ;;  %8449 = vrcp.f32 %v10552_v53  ;;  %v7747_v38 = vpack.c.bf16 %v3246_v1, %v3245_v13  ;;  %7744 = vmatprep.subr.bf16.mxu0 %v7743_v25 }
 0x497   :  { %v8444_v31 = vpop.eup %8443  ;;  %7746 = vmatpush3.bf16.msra.mxu0 %v7743_v25 }
 0x498   :  { %13236 = vst [vmem:[#allocation34_spill] sm:$0xff] %v10697_v9  ;;  %v914_v4 = vmul.f32 %v8444_v31, %v877_v41  ;;  %6976 = vmatprep.mubr.f32.mxu1 %v10697_v9  ;;  %v887_v47 = vpop.xlane.xlu1 %886  ;;  %v947_v62 = vmul.f32 %v8442_v11, %v931_v49  ;;  %v10706_v41 = vpop.xlane.xlu0 %1520  ;;  %7748 = vmatprep.subr.bf16.mxu0 %v7747_v38 }
 0x499   :  { %8451 = vrcp.f32 %v887_v47  ;;  %6977 = vmatmul.mubr.f32.gmra.mrb[8].mxu1 %v10700_v29 }
 0x49a   :  { %v930_v32 = vsub.f32 2.0, %v914_v4  ;;  %8453 = vrcp.f32 %v10532_v14  ;;  %v10712_v4 = vmul.f32 %v10333_v18, %v947_v62 }
 0x49b   :  { %v8446_v23 = vpop.eup %8445  ;;  %7750 = vmatpush3.bf16.msra.mxu0 %v7747_v38 }
 0x49c   :  { %v917_v46 = vmul.f32 %v8446_v23, %v883_v55  ;;  %v885_v9 = vpop.xlane.xlu1 %884  ;;  %v946_v43 = vmul.f32 %v8444_v31, %v930_v32  ;;  %13239 = vst [vmem:[#allocation43_spill] sm:$0xff] %v10712_v4  ;;  %v10714_v11 = vpop.xlane.xlu0 %2125  ;;  %7752 = vmatprep.subr.bf16.mxu0 %v7751_v7 }
 0x49d   :  { %8455 = vrcp.f32 %v885_v9 }
 0x49e   :  { %v10709_v0 = vmul.f32 %v10338_v19, %v946_v43  ;;  %v933_v1 = vsub.f32 2.0, %v917_v46 }
 0x49f   :  { %v8448_v13 = vpop.eup %8447  ;;  %7754 = vmatpush3.bf16.msra.mxu0 %v7751_v7 }
 0x4a0   :  { %13238 = vst [vmem:[#allocation40_spill] sm:$0xff] %v10709_v0  ;;  %v916_v29 = vmul.f32 %v8448_v13, %v881_v26  ;;  %6979 = vmatprep.mubr.f32.mxu1 %v10709_v0  ;;  %v1495_v55 = vpop.xlane.xlu1 %1494  ;;  %v8450_v31 = vpop.eup %8449  ;;  %v949_v43 = vmul.f32 %v8446_v23, %v933_v1 }
 0x4a1   :  { %8457 = vrcp.f32 %v1495_v55  ;;  %6980 = vmatmul.mubr.f32.gmra.mrb[10].mxu1 %v10712_v4  ;;  %v1538_v59 = vmul.f32 %v8450_v31, %v10552_v53 }
 0x4a2   :  { %v932_v49 = vsub.f32 2.0, %v916_v29  ;;  %8459 = vrcp.f32 %v10678_v33  ;;  %v13241_v29 = vld [vmem:[#allocation58_spill] sm:$0xff] }
 0x4a3   :  { %v8452_v19 = vpop.eup %8451  ;;  %v10727_v62 = vmul.f32 %v13241_v29, %v949_v43  ;;  %v1554_v1 = vsub.f32 2.0, %v1538_v59 }
 0x4a4   :  { %v919_v18 = vmul.f32 %v8452_v19, %v887_v47  ;;  %v10719_v25 = vpop.xlane.xlu0 %2129  ;;  %v1497_v26 = vpop.xlane.xlu1 %1496  ;;  %v948_v38 = vmul.f32 %v8448_v13, %v932_v49 }
 0x4a5   :  { %v8454_v57 = vpop.eup %8453  ;;  %8461 = vrcp.f32 %v1497_v26  ;;  %13242 = vst [vmem:[#allocation65_spill] sm:$0xff] %v10727_v62  ;;  %v1570_v54 = vmul.f32 %v8450_v31, %v1554_v1  ;;  %v13245_v31 = vld [vmem:[#allocation62_spill] sm:$0xff] }
 0x4a6   :  { %v10723_v32 = vmul.f32 %v10367_v60, %v948_v38  ;;  %8463 = vrcp.f32 %v10680_v15  ;;  %v1539_v23 = vmul.f32 %v8454_v57, %v10532_v14  ;;  %v935_v47 = vsub.f32 2.0, %v919_v18 }
 0x4a7   :  { %v8456_v46 = vpop.eup %8455  ;;  %8465 = vrcp.f32 %v10682_v8 }
 0x4a8   :  { %13240 = vst [vmem:[#allocation46_spill] sm:$0xff] %v10723_v32  ;;  %v10730_v7 = vpop.xlane.xlu0 %2133  ;;  %6982 = vmatprep.mubr.f32.mxu1 %v10723_v32  ;;  %v1499_v13 = vpop.xlane.xlu1 %1498  ;;  %v918_v53 = vmul.f32 %v8456_v46, %v885_v9  ;;  %v1555_v43 = vsub.f32 2.0, %v1539_v23  ;;  %v951_v18 = vmul.f32 %v8452_v19, %v935_v47  ;;  %v10749_v47 = vmul.f32 %v13245_v31, %v1570_v54 }
 0x4a9   :  { %6983 = vmatmul.mubr.f32.gmra.mrb[12].mxu1 %v10727_v62  ;;  %8467 = vrcp.f32 %v1499_v13 }
 0x4aa   :  { %v934_v49 = vsub.f32 2.0, %v918_v53  ;;  %v1571_v62 = vmul.f32 %v8454_v57, %v1555_v43  ;;  %v10745_v63 = vmul.f32 %v10383_v2, %v951_v18  ;;  %v13246_v2 = vld [vmem:[#allocation70_spill] sm:$0xff] }
 0x4ab   :  { %v8458_v60 = vpop.eup %8457 }
 0x4ac   :  { %v1540_v38 = vmul.f32 %v8458_v60, %v1495_v55  ;;  %v10735_v29 = vpop.xlane.xlu0 %2137  ;;  %v1503_v14 = vpop.xlane.xlu1 %1502  ;;  %v950_v4 = vmul.f32 %v8456_v46, %v934_v49  ;;  %13244 = vst [vmem:[#allocation52_spill] sm:$0xff] %v10745_v63  ;;  %v10755_v57 = vmul.f32 %v13246_v2, %v1571_v62 }
 0x4ad   :  { %v8460_v0 = vpop.eup %8459  ;;  %8469 = vrcp.f32 %v1503_v14 }
 0x4ae   :  { %v1556_v32 = vsub.f32 2.0, %v1540_v38  ;;  %8471 = vrcp.f32 %v10692_v39  ;;  %v10739_v9 = vmul.f32 %v10391_v35, %v950_v4  ;;  %v1543_v53 = vmul.f32 %v8460_v0, %v10678_v33 }
 0x4af   :  { %v8462_v59 = vpop.eup %8461 }
 0x4b0   :  { %13243 = vst [vmem:[#allocation49_spill] sm:$0xff] %v10739_v9  ;;  %v10742_v23 = vpop.xlane.xlu0 %2141  ;;  %v1507_v55 = vpop.xlane.xlu1 %1506  ;;  %v1541_v46 = vmul.f32 %v8462_v59, %v1497_v26  ;;  %6985 = vmatprep.mubr.f32.mxu1 %v10739_v9  ;;  %v1572_v1 = vmul.f32 %v8458_v60, %v1556_v32  ;;  %v1559_v26 = vsub.f32 2.0, %v1543_v53 }
 0x4b1   :  { %v8464_v19 = vpop.eup %8463  ;;  %8473 = vrcp.f32 %v1507_v55  ;;  %6986 = vmatmul.mubr.f32.gmra.mrb[14].mxu1 %v10745_v63 }
 0x4b2   :  { %v8466_v35 = vpop.eup %8465  ;;  %8475 = vrcp.f32 %v10694_v5  ;;  %v1557_v33 = vsub.f32 2.0, %v1541_v46  ;;  %7020 = vmatprep.mubr.f32.mxu1 %v10749_v47  ;;  %v1545_v49 = vmul.f32 %v8464_v19, %v10680_v15  ;;  %v10761_v60 = vmul.f32 %v10410_v52, %v1572_v1  ;;  %v13247_v52 = vld [vmem:[#allocation35_spill] sm:$0xff] }
 0x4b3   :  { %v8468_v4 = vpop.eup %8467  ;;  %v1547_v18 = vmul.f32 %v8466_v35, %v10682_v8  ;;  %v1575_v46 = vmul.f32 %v8460_v0, %v1559_v26 }
 0x4b4   :  { %v10758_v43 = vpop.xlane.xlu0 %2145  ;;  %v1511_v54 = vpop.xlane.xlu1 %1510  ;;  %v1542_v32 = vmul.f32 %v8468_v4, %v1499_v13  ;;  %v1573_v38 = vmul.f32 %v8462_v59, %v1557_v33  ;;  %v1561_v53 = vsub.f32 2.0, %v1545_v49 }
 0x4b5   :  { %8477 = vrcp.f32 %v1511_v54  ;;  %7021 = vmatmul.mubr.f32.vlgmr.msra.gmra.mrb[0].mxu1 %v10755_v57 }
 0x4b6   :  { %8479 = vrcp.f32 %v10706_v41  ;;  %v1558_v62 = vsub.f32 2.0, %v1542_v32  ;;  %7682 = vmatpush3.bf16.msra.mxu1 %v13233_v34  ;;  %7023 = vmatprep.mubr.f32.mxu1 %v10761_v60  ;;  %v10769_v15 = vmul.f32 %v10416_v58, %v1573_v38  ;;  %v1563_v34 = vsub.f32 2.0, %v1547_v18  ;;  %v13248_v38 = vld [vmem:[#allocation38_spill] sm:$0xff] }
 0x4b7   :  { %v8470_v13 = vpop.eup %8469  ;;  %8481 = vrcp.f32 %v10714_v11  ;;  %7684 = vmatprep.subr.bf16.mxu1 %v13247_v52 }
 0x4b8   :  { %v1515_v59 = vpop.xlane.xlu1 %1514  ;;  %v8472_v31 = vpop.eup %8471  ;;  %v1544_v8 = vmul.f32 %v8470_v13, %v1503_v14  ;;  %v1574_v33 = vmul.f32 %v8468_v4, %v1558_v62  ;;  %v13249_v14 = vld [vmem:[#allocation64_spill] sm:$0xff]  ;;  %v1577_v4 = vmul.f32 %v8464_v19, %v1561_v53 }
 0x4b9   :  { %v10773_v1 = vpop.xlane.xlu0 %2149  ;;  %8483 = vrcp.f32 %v1515_v59  ;;  %7024 = vmatmul.mubr.f32.gmra.mrb[2].mxu1 %v10769_v15  ;;  %v1549_v32 = vmul.f32 %v8472_v31, %v10692_v39  ;;  %v10783_v26 = vmul.f32 %v13249_v14, %v1575_v46  ;;  %v1579_v46 = vmul.f32 %v8466_v35, %v1563_v34  ;;  %v13253_v34 = vld [vmem:[#allocation67_spill] sm:$0xff] }
 0x4ba   :  { %v1560_v2 = vsub.f32 2.0, %v1544_v8  ;;  %7686 = vmatpush3.bf16.msra.mxu1 %v13247_v52  ;;  %v10778_v58 = vmul.f32 %v10430_v51, %v1574_v33  ;;  %8485 = vrcp.f32 %v10719_v25 }
 0x4bb   :  { %v8474_v49 = vpop.eup %8473  ;;  %7688 = vmatprep.subr.bf16.mxu1 %v13248_v38  ;;  %v1565_v53 = vsub.f32 2.0, %v1549_v32  ;;  %v10807_v32 = vmul.f32 %v13253_v34, %v1579_v46 }
 0x4bc   :  { %v1519_v0 = vpop.xlane.xlu1 %1518  ;;  %v8476_v62 = vpop.eup %8475  ;;  %v1546_v18 = vmul.f32 %v8474_v49, %v1507_v55  ;;  %7026 = vmatprep.mubr.f32.mxu1 %v10778_v58  ;;  %v1576_v52 = vmul.f32 %v8470_v13, %v1560_v2  ;;  %v13251_v55 = vld [vmem:[#allocation41_spill] sm:$0xff]  ;;  %v13252_v13 = vld [vmem:[#allocation75_spill] sm:$0xff] }
 0x4bd   :  { %8487 = vrcp.f32 %v1519_v0  ;;  %7027 = vmatmul.mubr.f32.gmra.mrb[4].mxu1 %v10783_v26  ;;  %v10788_v8 = vpop.xlane.xlu0 %2153  ;;  %v1551_v33 = vmul.f32 %v8476_v62, %v10694_v5  ;;  %v10797_v2 = vmul.f32 %v13252_v13, %v1577_v4  ;;  %v1581_v13 = vmul.f32 %v8472_v31, %v1565_v53 }
 0x4be   :  { %v1562_v51 = vsub.f32 2.0, %v1546_v18  ;;  %7690 = vmatpush3.bf16.msra.mxu1 %v13248_v38  ;;  %v10792_v39 = vmul.f32 %v10442_v12, %v1576_v52 }
 0x4bf   :  { %v8478_v19 = vpop.eup %8477  ;;  %7692 = vmatprep.subr.bf16.mxu1 %v13251_v55  ;;  %v1567_v4 = vsub.f32 2.0, %v1551_v33 }
 0x4c0   :  { %13250 = vst [vmem:[#allocation32_spill] sm:$0xff] %v10792_v39  ;;  %v2124_v14 = vpop.xlane.xlu1 %2123  ;;  %v8480_v63 = vpop.eup %8479  ;;  %v1548_v18 = vmul.f32 %v8478_v19, %v1511_v54  ;;  %7029 = vmatprep.mubr.f32.mxu1 %v10792_v39  ;;  %v1578_v38 = vmul.f32 %v8474_v49, %v1562_v51  ;;  %v13254_v49 = vld [vmem:[#allocation44_spill] sm:$0xff] }
 0x4c1   :  { %8489 = vrcp.f32 %v2124_v14  ;;  %v8482_v9 = vpop.eup %8481  ;;  %7030 = vmatmul.mubr.f32.gmra.mrb[6].mxu1 %v10797_v2  ;;  %v1553_v52 = vmul.f32 %v8480_v63, %v10706_v41 }
 0x4c2   :  { %8491 = vrcp.f32 %v10730_v7  ;;  %v1564_v12 = vsub.f32 2.0, %v1548_v18  ;;  %7694 = vmatpush3.bf16.msra.mxu1 %v13251_v55  ;;  %v10804_v35 = vmul.f32 %v10455_v6, %v1578_v38  ;;  %v2172_v18 = vmul.f32 %v8482_v9, %v10714_v11  ;;  %v13256_v11 = vld [vmem:[#allocation47_spill] sm:$0xff] }
 0x4c3   :  { %v2760_v5 = vpop.xlane.xlu0 %2759  ;;  %v8484_v54 = vpop.eup %8483  ;;  %7696 = vmatprep.subr.bf16.mxu1 %v13254_v49  ;;  %v1569_v53 = vsub.f32 2.0, %v1553_v52  ;;  %v1583_v38 = vmul.f32 %v8476_v62, %v1567_v4  ;;  %v13259_v4 = vld [vmem:[#allocation50_spill] sm:$0xff] }
 0x4c4   :  { %8493 = vrcp.f32 %v2760_v5  ;;  %v2128_v51 = vpop.xlane.xlu1 %2127  ;;  %v1550_v39 = vmul.f32 %v8484_v54, %v1515_v59  ;;  %7032 = vmatprep.mubr.f32.mxu1 %v10804_v35  ;;  %v1580_v6 = vmul.f32 %v8478_v19, %v1564_v12  ;;  %v10814_v46 = vpop.eup %8485  ;;  %v13257_v19 = vld [vmem:[#allocation72_spill] sm:$0xff]  ;;  %v2188_v12 = vsub.f32 2.0, %v2172_v18  ;;  %v13260_v18 = vld [vmem:[#allocation79_spill] sm:$0xff] }
 0x4c5   :  { %8495 = vrcp.f32 %v2128_v51  ;;  %7033 = vmatmul.mubr.f32.gmra.mrb[8].mxu1 %v10807_v32  ;;  %v10824_v55 = vmul.f32 %v13257_v19, %v1581_v13  ;;  %v2174_v52 = vmul.f32 %v10814_v46, %v10719_v25  ;;  %v1585_v25 = vmul.f32 %v8480_v63, %v1569_v53  ;;  %v13261_v53 = vld [vmem:[#allocation53_spill] sm:$0xff] }
 0x4c6   :  { %8497 = vrcp.f32 %v10735_v29  ;;  %v1566_v33 = vsub.f32 2.0, %v1550_v39  ;;  %7698 = vmatpush3.bf16.msra.mxu1 %v13254_v49  ;;  %v10819_v41 = vmul.f32 %v10467_v30, %v1580_v6  ;;  %v2204_v19 = vmul.f32 %v8482_v9, %v2188_v12 }
 0x4c7   :  { %v8488_v31 = vpop.eup %8487  ;;  %8499 = vrcp.f32 %v10742_v23  ;;  %7700 = vmatprep.subr.bf16.mxu1 %v13256_v11  ;;  %13258 = vst [vmem:[#allocation58_spill] sm:$0xff] %v10824_v55 }
 0x4c8   :  { %13255 = vst [vmem:[#allocation81_spill] sm:$0xff] %v10819_v41  ;;  %v2132_v59 = vpop.xlane.xlu1 %2131  ;;  %v1552_v34 = vmul.f32 %v8488_v31, %v1519_v0  ;;  %7035 = vmatprep.mubr.f32.mxu1 %v10819_v41  ;;  %v1582_v39 = vmul.f32 %v8484_v54, %v1566_v33  ;;  %v10841_v33 = vmul.f32 %v13260_v18, %v1583_v38  ;;  %v13262_v38 = vld [vmem:[#allocation60_spill] sm:$0xff] }
 0x4c9   :  { %8501 = vrcp.f32 %v2132_v59  ;;  %7036 = vmatmul.mubr.f32.gmra.mrb[10].mxu1 %v10824_v55  ;;  %v10856_v12 = vmul.f32 %v13262_v38, %v1585_v25 }
 0x4ca   :  { %v1568_v49 = vsub.f32 2.0, %v1552_v34  ;;  %7702 = vmatpush3.bf16.msra.mxu1 %v13256_v11  ;;  %v10834_v13 = vmul.f32 %v10488_v61, %v1582_v39  ;;  %v2190_v39 = vsub.f32 2.0, %v2174_v52  ;;  %v2220_v52 = vmul.f32 %v10397_v42, %v2204_v19 }
 0x4cb   :  { %v8490_v30 = vpop.eup %8489  ;;  %v10831_v6 = vpop.xlane.xlu0 %2763  ;;  %7704 = vmatprep.subr.bf16.mxu1 %v13259_v4 }
 0x4cc   :  { %v10836_v62 = vpop.eup %8491  ;;  %v2171_v0 = vmul.f32 %v8490_v30, %v2124_v14  ;;  %8503 = vrcp.f32 %v10831_v6  ;;  %v2136_v54 = vpop.xlane.xlu1 %2135  ;;  %7038 = vmatprep.mubr.f32.mxu1 %v10834_v13  ;;  %v1584_v11 = vmul.f32 %v8488_v31, %v1568_v49  ;;  %v2206_v25 = vmul.f32 %v10814_v46, %v2190_v39 }
 0x4cd   :  { %8505 = vrcp.f32 %v2136_v54  ;;  %7039 = vmatmul.mubr.f32.gmra.mrb[12].mxu1 %v10841_v33  ;;  %v2176_v41 = vmul.f32 %v10836_v62, %v10730_v7 }
 0x4ce   :  { %v8494_v34 = vpop.eup %8493  ;;  %8507 = vrcp.f32 %v10758_v43  ;;  %v2187_v61 = vsub.f32 2.0, %v2171_v0  ;;  %7706 = vmatpush3.bf16.msra.mxu1 %v13259_v4  ;;  %v10850_v63 = vmul.f32 %v10498_v45, %v1584_v11  ;;  %v1619_v4 = vadd.f32 %v10755_v57, %v10592_v56 }
 0x4cf   :  { %v8496_v14 = vpop.eup %8495  ;;  %v2806_v55 = vmul.f32 %v8494_v34, %v2760_v5  ;;  %7708 = vmatprep.subr.bf16.mxu1 %v13261_v53  ;;  %v2192_v42 = vsub.f32 2.0, %v2176_v41 }
 0x4d0   :  { %v2173_v9 = vmul.f32 %v8496_v14, %v2128_v51  ;;  %v10853_v31 = vpop.xlane.xlu1 %2139  ;;  %v2203_v49 = vmul.f32 %v8490_v30, %v2187_v61  ;;  %v10858_v0 = vpop.eup %8497  ;;  %7041 = vmatprep.mubr.f32.mxu1 %v10850_v63  ;;  %v13263_v61 = vld [vmem:[#allocation33_spill] sm:$0xff]  ;;  %v2252_v57 = vadd.f32 %v2220_v52, %v1619_v4  ;;  %v1621_v4 = vadd.f32 %v10769_v15, %v10629_v28 }
 0x4d1   :  { %v2822_v7 = vsub.f32 2.0, %v2806_v55  ;;  %8509 = vrcp.f32 %v10853_v31  ;;  %v10863_v45 = vpop.eup %8499  ;;  %7042 = vmatmul.mubr.f32.gmra.mrb[14].mxu1 %v10856_v12  ;;  %v2178_v19 = vmul.f32 %v10858_v0, %v10735_v29 }
 0x4d2   :  { %8511 = vrcp.f32 %v10773_v1  ;;  %v2189_v5 = vsub.f32 2.0, %v2173_v9  ;;  %v10868_v51 = vmul.f32 %v10509_v24, %v2203_v49  ;;  %7710 = vmatpush3.bf16.msra.mxu1 %v13261_v53  ;;  %v2180_v46 = vmul.f32 %v10863_v45, %v10742_v23  ;;  %v13264_v49 = vld [vmem:[#allocation36_spill] sm:$0xff] }
 0x4d3   :  { %v8502_v30 = vpop.eup %8501  ;;  %v2838_v55 = vmul.f32 %v8494_v34, %v2822_v7  ;;  %v10873_v18 = vpop.xlane.xlu0 %2767  ;;  %7712 = vmatprep.subr.bf16.mxu1 %v13263_v61  ;;  %v2194_v38 = vsub.f32 2.0, %v2178_v19 }
 0x4d4   :  { %v2175_v11 = vmul.f32 %v8502_v30, %v2132_v59  ;;  %8513 = vrcp.f32 %v10873_v18  ;;  %7076 = vmatprep.mubr.f32.mxu1 %v10868_v51  ;;  %v2144_v24 = vpop.xlane.xlu1 %2143  ;;  %v2205_v56 = vmul.f32 %v8496_v14, %v2189_v5 }
 0x4d5   :  { %v10882_v41 = vmul.f32 %v10514_v16, %v2838_v55  ;;  %8515 = vrcp.f32 %v2144_v24  ;;  %7077 = vmatmul.mubr.f32.vlgmr.msra.gmra.mrb[0].mxu1 %v2220_v52  ;;  %v2208_v16 = vmul.f32 %v10836_v62, %v2192_v42  ;;  %v13265_v52 = vld [vmem:[#allocation66_spill] sm:$0xff] }
 0x4d6   :  { %v8504_v34 = vpop.eup %8503  ;;  %v2191_v39 = vsub.f32 2.0, %v2175_v11  ;;  %v10887_v29 = vmul.f32 %v10518_v50, %v2205_v56  ;;  %8517 = vrcp.f32 %v10788_v8  ;;  %7714 = vmatpush3.bf16.msra.mxu1 %v13263_v61  ;;  %v2222_v7 = vmul.f32 %v13265_v52, %v2206_v25  ;;  %v13266_v61 = vld [vmem:[#allocation39_spill] sm:$0xff] }
 0x4d7   :  { %v8506_v59 = vpop.eup %8505  ;;  %v2886_v9 = vadd.f32 %v10882_v41, %v2252_v57  ;;  %v2808_v14 = vmul.f32 %v8504_v34, %v10831_v6  ;;  %7716 = vmatprep.subr.bf16.mxu1 %v13264_v49  ;;  %v2196_v11 = vsub.f32 2.0, %v2180_v46  ;;  %v2210_v57 = vmul.f32 %v10858_v0, %v2194_v38 }
 0x4d8   :  { %v10894_v53 = vpop.eup %8507  ;;  %v2177_v23 = vmul.f32 %v8506_v59, %v2136_v54  ;;  %7079 = vmatprep.mubr.f32.mxu1 %v10887_v29  ;;  %v2148_v50 = vpop.xlane.xlu1 %2147  ;;  %v2207_v5 = vmul.f32 %v8502_v30, %v2191_v39  ;;  %v2224_v30 = vmul.f32 %v10434_v22, %v2208_v16  ;;  %v2254_v46 = vadd.f32 %v2222_v7, %v1621_v4 }
 0x4d9   :  { %v3196_v6 = vmul.f32 0.25, %v2886_v9  ;;  %v2824_v55 = vsub.f32 2.0, %v2808_v14  ;;  %8519 = vrcp.f32 %v2148_v50  ;;  %7080 = vmatmul.mubr.f32.gmra.mrb[2].mxu1 %v2222_v7  ;;  %v2182_v19 = vmul.f32 %v10894_v53, %v10758_v43 }
 0x4da   :  { %v2193_v62 = vsub.f32 2.0, %v2177_v23  ;;  %v10902_v42 = vmul.f32 %v10527_v10, %v2207_v5  ;;  %7718 = vmatpush3.bf16.msra.mxu1 %v13264_v49  ;;  %v13267_v23 = vld [vmem:[#allocation42_spill] sm:$0xff]  ;;  %v1623_v7 = vadd.f32 %v10783_v26, %v10655_v48  ;;  %v13268_v26 = vld [vmem:[#allocation45_spill] sm:$0xff] }
 0x4db   :  { %v8510_v54 = vpop.eup %8509  ;;  %3212 = vst [vmem:[#allocation16 + $0x8] sm:$0xff] %v3196_v6  ;;  %v2840_v25 = vmul.f32 %v8504_v34, %v2824_v55  ;;  %7720 = vmatprep.subr.bf16.mxu1 %v13266_v61  ;;  %v2198_v14 = vsub.f32 2.0, %v2182_v19 }
 0x4dc   :  { %v8512_v28 = vpop.eup %8511  ;;  %v2179_v15 = vmul.f32 %v8510_v54, %v10853_v31  ;;  %7082 = vmatprep.mubr.f32.mxu1 %v10902_v42  ;;  %v2152_v56 = vpop.xlane.xlu1 %2151  ;;  %v2209_v10 = vmul.f32 %v8506_v59, %v2193_v62  ;;  %v2212_v31 = vmul.f32 %v10863_v45, %v2196_v11  ;;  %v10926_v45 = vmul.f32 %v10448_v21, %v2210_v57 }
 0x4dd   :  { %8521 = vrcp.f32 %v2152_v56  ;;  %v10913_v43 = vmul.f32 %v10534_v20, %v2840_v25  ;;  %7083 = vmatmul.mubr.f32.gmra.mrb[4].mxu1 %v2224_v30  ;;  %v2184_v16 = vmul.f32 %v8512_v28, %v10773_v1  ;;  %v2214_v55 = vmul.f32 %v10894_v53, %v2198_v14  ;;  %v13269_v25 = vld [vmem:[#allocation78_spill] sm:$0xff]  ;;  %v13270_v53 = vld [vmem:[#allocation68_spill] sm:$0xff] }
 0x4de   :  { %v8514_v39 = vpop.eup %8513  ;;  %v2195_v9 = vsub.f32 2.0, %v2179_v15  ;;  %v10916_v22 = vmul.f32 %v10536_v3, %v2209_v10  ;;  %7722 = vmatpush3.bf16.msra.mxu1 %v13266_v61  ;;  %v10936_v21 = vmul.f32 %v10463_v40, %v2212_v31  ;;  %v2256_v19 = vadd.f32 %v2224_v30, %v1623_v7  ;;  %v13272_v31 = vld [vmem:[#allocation48_spill] sm:$0xff] }
 0x4df   :  { %v8516_v34 = vpop.eup %8515  ;;  %v2810_v59 = vmul.f32 %v8514_v39, %v10873_v18  ;;  %v2772_v0 = vpop.xlane.xlu0 %2771  ;;  %v2888_v20 = vadd.f32 %v10913_v43, %v2254_v46  ;;  %7724 = vmatprep.subr.bf16.mxu1 %v13267_v23  ;;  %v2200_v6 = vsub.f32 2.0, %v2184_v16 }
 0x4e0   :  { %v2181_v38 = vmul.f32 %v8516_v34, %v2144_v24  ;;  %8523 = vrcp.f32 %v2772_v0  ;;  %7085 = vmatprep.mubr.f32.mxu1 %v10916_v22  ;;  %v2758_v3 = vpop.xlane.xlu1 %2757  ;;  %v2211_v49 = vmul.f32 %v8510_v54, %v2195_v9  ;;  %v8518_v52 = vpop.eup %8517 }
 0x4e1   :  { %v2826_v1 = vsub.f32 2.0, %v2810_v59  ;;  %8525 = vrcp.f32 %v2758_v3  ;;  %v3198_v18 = vmul.f32 0.25, %v2888_v20  ;;  %7086 = vmatmul.mubr.f32.gmra.mrb[6].mxu1 %v10926_v45  ;;  %v2186_v62 = vmul.f32 %v8518_v52, %v10788_v8 }
 0x4e2   :  { %v2197_v5 = vsub.f32 2.0, %v2181_v38  ;;  %v10932_v24 = vmul.f32 %v10547_v37, %v2211_v49  ;;  %7726 = vmatpush3.bf16.msra.mxu1 %v13267_v23  ;;  %v2216_v46 = vmul.f32 %v8512_v28, %v2200_v6 }
 0x4e3   :  { %v8520_v4 = vpop.eup %8519  ;;  %3214 = vst [vmem:[#allocation16 + $0x18] sm:$0xff] %v3198_v18  ;;  %v2842_v11 = vmul.f32 %v8514_v39, %v2826_v1  ;;  %7728 = vmatprep.subr.bf16.mxu1 %v13268_v26  ;;  %v2202_v39 = vsub.f32 2.0, %v2186_v62  ;;  %v13274_v18 = vld [vmem:[#allocation51_spill] sm:$0xff] }
 0x4e4   :  { %v2183_v48 = vmul.f32 %v8520_v4, %v2148_v50  ;;  %7088 = vmatprep.mubr.f32.mxu1 %v10932_v24  ;;  %v2762_v37 = vpop.xlane.xlu1 %2761  ;;  %v2213_v54 = vmul.f32 %v8516_v34, %v2197_v5  ;;  %v13271_v50 = vld [vmem:[#allocation71_spill] sm:$0xff] }
 0x4e5   :  { %8527 = vrcp.f32 %v2762_v37  ;;  %v10943_v15 = vmul.f32 %v13269_v25, %v2842_v11  ;;  %7089 = vmatmul.mubr.f32.gmra.mrb[8].mxu1 %v10936_v21  ;;  %v10951_v57 = vmul.f32 %v13271_v50, %v2214_v55  ;;  %v1618_v11 = vadd.f32 %v10749_v47, %v10587_v27  ;;  %v13277_v47 = vld [vmem:[#allocation73_spill] sm:$0xff] }
 0x4e6   :  { %v2199_v40 = vsub.f32 2.0, %v2183_v48  ;;  %v10947_v61 = vmul.f32 %v13270_v53, %v2213_v54  ;;  %7730 = vmatpush3.bf16.msra.mxu1 %v13268_v26  ;;  %v13275_v26 = vld [vmem:[#allocation54_spill] sm:$0xff]  ;;  %v13278_v53 = vld [vmem:[#allocation80_spill] sm:$0xff] }
 0x4e7   :  { %v8522_v10 = vpop.eup %8521  ;;  %v2776_v8 = vpop.xlane.xlu0 %2775  ;;  %v2890_v30 = vadd.f32 %v10943_v15, %v2256_v19  ;;  %7732 = vmatprep.subr.bf16.mxu1 %v13272_v31 }
 0x4e8   :  { %v2185_v9 = vmul.f32 %v8522_v10, %v2152_v56  ;;  %8529 = vrcp.f32 %v2776_v8  ;;  %7091 = vmatprep.mubr.f32.mxu1 %v10947_v61  ;;  %v2766_v34 = vpop.xlane.xlu1 %2765  ;;  %v2215_v14 = vmul.f32 %v8520_v4, %v2199_v40  ;;  %v13273_v56 = vld [vmem:[#allocation61_spill] sm:$0xff]  ;;  %v2218_v4 = vmul.f32 %v8518_v52, %v2202_v39 }
 0x4e9   :  { %8531 = vrcp.f32 %v2766_v34  ;;  %v3200_v16 = vmul.f32 0.25, %v2890_v30  ;;  %7092 = vmatmul.mubr.f32.gmra.mrb[10].mxu1 %v10951_v57  ;;  %v10962_v49 = vmul.f32 %v13273_v56, %v2216_v46  ;;  %v2251_v40 = vadd.f32 %v10868_v51, %v1618_v11  ;;  %v13279_v39 = vld [vmem:[#allocation85_spill] sm:$0xff] }
 0x4ea   :  { %v8524_v59 = vpop.eup %8523  ;;  %v2201_v20 = vsub.f32 2.0, %v2185_v9  ;;  %v10958_v38 = vmul.f32 %v10567_v17, %v2215_v14  ;;  %7734 = vmatpush3.bf16.msra.mxu1 %v13272_v31 }
 0x4eb   :  { %v8526_v28 = vpop.eup %8525  ;;  %v2812_v23 = vmul.f32 %v8524_v59, %v2772_v0  ;;  %3216 = vst [vmem:[#allocation16 + $0x28] sm:$0xff] %v3200_v16  ;;  %7736 = vmatprep.subr.bf16.mxu1 %v13274_v18 }
 0x4ec   :  { %v2805_v1 = vmul.f32 %v8526_v28, %v2758_v3  ;;  %7094 = vmatprep.mubr.f32.mxu1 %v10958_v38  ;;  %v2770_v7 = vpop.xlane.xlu1 %2769  ;;  %v2217_v5 = vmul.f32 %v8522_v10, %v2201_v20  ;;  %v1625_v3 = vadd.f32 %v10797_v2, %v10688_v44 }
 0x4ed   :  { %v2828_v6 = vsub.f32 2.0, %v2812_v23  ;;  %8533 = vrcp.f32 %v2770_v7  ;;  %7095 = vmatmul.mubr.f32.gmra.mrb[12].mxu1 %v10962_v49 }
 0x4ee   :  { %v2821_v17 = vsub.f32 2.0, %v2805_v1  ;;  %v10968_v0 = vmul.f32 %v10575_v36, %v2217_v5  ;;  %7738 = vmatpush3.bf16.msra.mxu1 %v13274_v18  ;;  %v13276_v36 = vld [vmem:[#allocation77_spill] sm:$0xff]  ;;  %v2258_v27 = vadd.f32 %v10926_v45, %v1625_v3  ;;  %v1620_v45 = vadd.f32 %v10761_v60, %v13279_v39  ;;  %v13281_v18 = vld [vmem:[#allocation59_spill] sm:$0xff]  ;;  %v13283_v3 = vld [vmem:[#allocation84_spill] sm:$0xff] }
 0x4ef   :  { %v8528_v55 = vpop.eup %8527  ;;  %v2780_v62 = vpop.xlane.xlu0 %2779  ;;  %v2844_v48 = vmul.f32 %v8524_v59, %v2828_v6  ;;  %7740 = vmatprep.subr.bf16.mxu1 %v13275_v26  ;;  %v10978_v19 = vmul.f32 %v13276_v36, %v2218_v4  ;;  %v1622_v60 = vadd.f32 %v10778_v58, %v13281_v18  ;;  %v13284_v36 = vld [vmem:[#allocation82_spill] sm:$0xff] }
 0x4f0   :  { %v2807_v52 = vmul.f32 %v8528_v55, %v2762_v37  ;;  %8535 = vrcp.f32 %v2780_v62  ;;  %7097 = vmatprep.mubr.f32.mxu1 %v10968_v0  ;;  %v2774_v54 = vpop.xlane.xlu1 %2773  ;;  %v2837_v25 = vmul.f32 %v8526_v28, %v2821_v17  ;;  %v2253_v20 = vadd.f32 %v10887_v29, %v1620_v45 }
 0x4f1   :  { %8537 = vrcp.f32 %v2774_v54  ;;  %v10982_v44 = vmul.f32 %v13277_v47, %v2844_v48  ;;  %7098 = vmatmul.mubr.f32.gmra.mrb[14].mxu1 %v10978_v19  ;;  %v2255_v58 = vadd.f32 %v10902_v42, %v1622_v60 }
 0x4f2   :  { %v8530_v2 = vpop.eup %8529  ;;  %v2823_v37 = vsub.f32 2.0, %v2807_v52  ;;  %v2853_v10 = vmul.f32 %v13278_v53, %v2837_v25  ;;  %7742 = vmatpush3.bf16.msra.mxu1 %v13275_v26 }
 0x4f3   :  { %v8532_v50 = vpop.eup %8531  ;;  %v2814_v46 = vmul.f32 %v8530_v2, %v2776_v8  ;;  %v2892_v30 = vadd.f32 %v10982_v44, %v2258_v27  ;;  %v13280_v8 = vld [vmem:[#allocation76_spill] sm:$0xff] }
 0x4f4   :  { %v2809_v9 = vmul.f32 %v8532_v50, %v2766_v34  ;;  %v2885_v31 = vadd.f32 %v2853_v10, %v2251_v40  ;;  %7132 = vmatprep.mubr.f32.mxu1 %v2853_v10  ;;  %v2778_v14 = vpop.xlane.xlu1 %2777  ;;  %v2839_v16 = vmul.f32 %v8528_v55, %v2823_v37  ;;  %v13282_v34 = vld [vmem:[#allocation37_spill] sm:$0xff]  ;;  %v13286_v40 = vld [vmem:[#allocation32_spill] sm:$0xff] }
 0x4f5   :  { %v2830_v51 = vsub.f32 2.0, %v2814_v46  ;;  %8539 = vrcp.f32 %v2778_v14  ;;  %v3202_v59 = vmul.f32 0.25, %v2892_v30  ;;  %7133 = vmatmul.mubr.f32.vlgmr.msra.gmra.mrb[0].mxu1 %v10882_v41  ;;  %v1627_v5 = vadd.f32 %v10807_v32, %v13282_v34 }
 0x4f6   :  { %v2825_v28 = vsub.f32 2.0, %v2809_v9  ;;  %v3195_v23 = vmul.f32 0.25, %v2885_v31  ;;  %v2855_v56 = vmul.f32 %v13280_v8, %v2839_v16  ;;  %v13288_v31 = vld [vmem:[#allocation34_spill] sm:$0xff]  ;;  %v13289_v16 = vld [vmem:[#allocation43_spill] sm:$0xff] }
 0x4f7   :  { %v8534_v1 = vpop.eup %8533  ;;  %v2784_v4 = vpop.xlane.xlu0 %2783  ;;  %3218 = vst [vmem:[#allocation16 + $0x38] sm:$0xff] %v3202_v59  ;;  %v2846_v6 = vmul.f32 %v8530_v2, %v2830_v51  ;;  %v2260_v41 = vadd.f32 %v10936_v21, %v1627_v5  ;;  %v13285_v2 = vld [vmem:[#allocation31_spill] sm:$0xff]  ;;  %v13290_v51 = vld [vmem:[#allocation58_spill] sm:$0xff]  ;;  %v13292_v5 = vld [vmem:[#allocation56_spill] sm:$0xff] }
 0x4f8   :  { %v2811_v17 = vmul.f32 %v8534_v1, %v2770_v7  ;;  %3211 = vst [vmem:[#allocation16] sm:$0xff] %v3195_v23  ;;  %8541 = vrcp.f32 %v2784_v4  ;;  %v2887_v29 = vadd.f32 %v2855_v56, %v2253_v20  ;;  %7135 = vmatprep.mubr.f32.mxu1 %v2855_v56  ;;  %v2782_v55 = vpop.xlane.xlu1 %2781  ;;  %v2841_v11 = vmul.f32 %v8532_v50, %v2825_v28  ;;  %v13291_v56 = vld [vmem:[#allocation57_spill] sm:$0xff] }
 0x4f9   :  { %8543 = vrcp.f32 %v2782_v55  ;;  %v2862_v48 = vmul.f32 %v13283_v3, %v2846_v6  ;;  %7136 = vmatmul.mubr.f32.gmra.mrb[2].mxu1 %v10913_v43  ;;  %v1624_v37 = vadd.f32 %v13286_v40, %v13285_v2  ;;  %v1629_v59 = vadd.f32 %v13290_v51, %v13289_v16 }
 0x4fa   :  { %v8536_v52 = vpop.eup %8535  ;;  %v2827_v26 = vsub.f32 2.0, %v2811_v17  ;;  %v3197_v32 = vmul.f32 0.25, %v2887_v29  ;;  %v2857_v7 = vmul.f32 %v13284_v36, %v2841_v11  ;;  %v13293_v11 = vld [vmem:[#allocation40_spill] sm:$0xff] }
 0x4fb   :  { %v8538_v25 = vpop.eup %8537  ;;  %v2816_v27 = vmul.f32 %v8536_v52, %v2780_v62  ;;  %v2894_v47 = vadd.f32 %v2862_v48, %v2260_v41  ;;  %v2257_v30 = vadd.f32 %v10916_v22, %v1624_v37  ;;  %v13287_v62 = vld [vmem:[#allocation83_spill] sm:$0xff]  ;;  %v13294_v41 = vld [vmem:[#allocation81_spill] sm:$0xff] }
 0x4fc   :  { %v2813_v53 = vmul.f32 %v8538_v25, %v2774_v54  ;;  %3213 = vst [vmem:[#allocation16 + $0x10] sm:$0xff] %v3197_v32  ;;  %v2889_v21 = vadd.f32 %v2857_v7, %v2255_v58  ;;  %7138 = vmatprep.mubr.f32.mxu1 %v2857_v7  ;;  %v2786_v10 = vpop.xlane.xlu1 %2785  ;;  %v2843_v50 = vmul.f32 %v8534_v1, %v2827_v26 }
 0x4fd   :  { %v2832_v46 = vsub.f32 2.0, %v2816_v27  ;;  %8545 = vrcp.f32 %v2786_v10  ;;  %v3204_v42 = vmul.f32 0.25, %v2894_v47  ;;  %7139 = vmatmul.mubr.f32.gmra.mrb[4].mxu1 %v10943_v15  ;;  %v1626_v54 = vadd.f32 %v10804_v35, %v13288_v31 }
 0x4fe   :  { %v2829_v43 = vsub.f32 2.0, %v2813_v53  ;;  %v3199_v39 = vmul.f32 0.25, %v2889_v21  ;;  %v2859_v45 = vmul.f32 %v13287_v62, %v2843_v50  ;;  %v2262_v15 = vadd.f32 %v10951_v57, %v1629_v59  ;;  %v13298_v50 = vld [vmem:[#allocation69_spill] sm:$0xff] }
 0x4ff   :  { %v8540_v9 = vpop.eup %8539  ;;  %v2788_v20 = vpop.xlane.xlu0 %2787  ;;  %3220 = vst [vmem:[#allocation16 + $0x48] sm:$0xff] %v3204_v42  ;;  %v2848_v28 = vmul.f32 %v8536_v52, %v2832_v46  ;;  %v2259_v60 = vadd.f32 %v10932_v24, %v1626_v54  ;;  %v1628_v3 = vadd.f32 %v13294_v41, %v13293_v11  ;;  %v3257_v41 = vld [vmem:[#allocation10 + $0x70] sm:$0xff] }
 0x500   :  { %v2815_v23 = vmul.f32 %v8540_v9, %v2778_v14  ;;  %3215 = vst [vmem:[#allocation16 + $0x20] sm:$0xff] %v3199_v39  ;;  %8547 = vrcp.f32 %v2788_v20  ;;  %v2891_v22 = vadd.f32 %v2859_v45, %v2257_v30  ;;  %7141 = vmatprep.mubr.f32.mxu1 %v2859_v45  ;;  %v2845_v8 = vmul.f32 %v8538_v25, %v2829_v43 }
 0x501   :  { %v2864_v1 = vmul.f32 %v13291_v56, %v2848_v28  ;;  %7142 = vmatmul.mubr.f32.gmra.mrb[6].mxu1 %v10982_v44  ;;  %v2261_v24 = vadd.f32 %v10947_v61, %v1628_v3  ;;  %v13295_v44 = vld [vmem:[#allocation63_spill] sm:$0xff]  ;;  %v13302_v28 = vld [vmem:[#allocation52_spill] sm:$0xff]  ;;  %v3258_v3 = vld [vmem:[#allocation10 + $0x78] sm:$0xff] }
 0x502   :  { %v8542_v18 = vpop.eup %8541  ;;  %v2831_v35 = vsub.f32 2.0, %v2815_v23  ;;  %v3201_v34 = vmul.f32 0.25, %v2891_v22  ;;  %v2861_v6 = vmul.f32 %v13292_v5, %v2845_v8  ;;  %v1633_v23 = vadd.f32 %v10856_v12, %v13302_v28  ;;  %v13303_v8 = vld [vmem:[#allocation87_spill] sm:$0xff]  ;;  %v3251_v12 = vld [vmem:[#allocation10 + $0x40] sm:$0xff] }
 0x503   :  { %v8544_v17 = vpop.eup %8543  ;;  %v2818_v14 = vmul.f32 %v8542_v18, %v2784_v4  ;;  %v2896_v29 = vadd.f32 %v2864_v1, %v2262_v15  ;;  %v13296_v4 = vld [vmem:[#allocation65_spill] sm:$0xff] }
 0x504   :  { %v2817_v52 = vmul.f32 %v8544_v17, %v2782_v55  ;;  %3217 = vst [vmem:[#allocation16 + $0x30] sm:$0xff] %v3201_v34  ;;  %v2893_v57 = vadd.f32 %v2861_v6, %v2259_v60  ;;  %7144 = vmatprep.mubr.f32.mxu1 %v2861_v6  ;;  %v2847_v58 = vmul.f32 %v8540_v9, %v2831_v35  ;;  %v13297_v55 = vld [vmem:[#allocation46_spill] sm:$0xff]  ;;  %v3250_v60 = vld [vmem:[#allocation10 + $0x38] sm:$0xff]  ;;  %v3252_v34 = vld [vmem:[#allocation10 + $0x48] sm:$0xff] }
 0x505   :  { %v2834_v26 = vsub.f32 2.0, %v2818_v14  ;;  %v3206_v32 = vmul.f32 0.25, %v2896_v29  ;;  %7145 = vmatmul.mubr.f32.gmra.mrb[8].mxu1 %v2862_v48  ;;  %v1631_v47 = vadd.f32 %v10841_v33, %v13296_v4  ;;  %v1630_v40 = vadd.f32 %v10834_v13, %v13297_v55  ;;  %v13299_v33 = vld [vmem:[#allocation74_spill] sm:$0xff]  ;;  %v13300_v13 = vld [vmem:[#allocation49_spill] sm:$0xff]  ;;  %v3253_v6 = vld [vmem:[#allocation10 + $0x50] sm:$0xff] }
 0x506   :  { %v2833_v36 = vsub.f32 2.0, %v2817_v52  ;;  %v3203_v7 = vmul.f32 0.25, %v2893_v57  ;;  %v2863_v25 = vmul.f32 %v13295_v44, %v2847_v58  ;;  %v7759_v5 = vpack.c.bf16 %v3252_v34, %v3251_v12  ;;  %v3255_v14 = vld [vmem:[#allocation10 + $0x60] sm:$0xff]  ;;  %v3256_v29 = vld [vmem:[#allocation10 + $0x68] sm:$0xff] }
 0x507   :  { %v8546_v27 = vpop.eup %8545  ;;  %3222 = vst [vmem:[#allocation16 + $0x58] sm:$0xff] %v3206_v32  ;;  %v2850_v2 = vmul.f32 %v8542_v18, %v2834_v26  ;;  %v2264_v61 = vadd.f32 %v10962_v49, %v1631_v47  ;;  %v2263_v42 = vadd.f32 %v10958_v38, %v1630_v40  ;;  %v13301_v38 = vld [vmem:[#allocation86_spill] sm:$0xff]  ;;  %v3249_v18 = vld [vmem:[#allocation10 + $0x30] sm:$0xff]  ;;  %v7767_v11 = vpack.c.bf16 %v3256_v29, %v3255_v14  ;;  %v3405_v58 = vld [vmem:[#allocation11 + $0x8] sm:$0xff] }
 0x508   :  { %v2819_v37 = vmul.f32 %v8546_v27, %v2786_v10  ;;  %3219 = vst [vmem:[#allocation16 + $0x40] sm:$0xff] %v3203_v7  ;;  %v2895_v53 = vadd.f32 %v2863_v25, %v2261_v24  ;;  %7147 = vmatprep.mubr.f32.mxu1 %v2863_v25  ;;  %v2849_v21 = vmul.f32 %v8544_v17, %v2833_v36  ;;  %v3404_v57 = vld [vmem:[#allocation11] sm:$0xff]  ;;  %v3406_v36 = vld [vmem:[#allocation11 + $0x10] sm:$0xff]  ;;  %v3407_v7 = vld [vmem:[#allocation11 + $0x18] sm:$0xff] }
 0x509   :  { %v2866_v48 = vmul.f32 %v13298_v50, %v2850_v2  ;;  %7148 = vmatmul.mubr.f32.gmra.mrb[10].mxu1 %v2864_v1  ;;  %v1632_v10 = vadd.f32 %v10850_v63, %v13300_v13  ;;  %v2266_v63 = vadd.f32 %v10978_v19, %v1633_v23  ;;  %v7755_v35 = vpack.c.bf16 %v3250_v60, %v3249_v18  ;;  %v3254_v19 = vld [vmem:[#allocation10 + $0x58] sm:$0xff]  ;;  %v3408_v2 = vld [vmem:[#allocation11 + $0x20] sm:$0xff]  ;;  %v3409_v55 = vld [vmem:[#allocation11 + $0x28] sm:$0xff] }
 0x50a   :  { %v8548_v46 = vpop.eup %8547  ;;  %v2835_v30 = vsub.f32 2.0, %v2819_v37  ;;  %v3205_v43 = vmul.f32 0.25, %v2895_v53  ;;  %v2865_v39 = vmul.f32 %v13299_v33, %v2849_v21  ;;  %v7763_v17 = vpack.c.bf16 %v3254_v19, %v3253_v6  ;;  %v3410_v50 = vld [vmem:[#allocation11 + $0x30] sm:$0xff]  ;;  %v3416_v23 = vld [vmem:[#allocation11 + $0x60] sm:$0xff]  ;;  %v13305_v29 = vld [vmem:[#allocation27_spill] sm:$0xff] }
 0x50b   :  { %v2820_v62 = vmul.f32 %v8548_v46, %v2788_v20  ;;  %v2898_v45 = vadd.f32 %v2866_v48, %v2264_v61  ;;  %v2265_v16 = vadd.f32 %v10968_v0, %v1632_v10  ;;  %7756 = vmatprep.subr.bf16.mxu0 %v7755_v35  ;;  %v7771_v52 = vpack.c.bf16 %v3258_v3, %v3257_v41  ;;  %v13306_v41 = vld [vmem:[#allocation28_spill] sm:$0xff] }
 0x50c   :  { %3221 = vst [vmem:[#allocation16 + $0x50] sm:$0xff] %v3205_v43  ;;  %v2897_v9 = vadd.f32 %v2865_v39, %v2263_v42  ;;  %7150 = vmatprep.mubr.f32.mxu1 %v2865_v39  ;;  %v2851_v31 = vmul.f32 %v8546_v27, %v2835_v30  ;;  %7758 = vmatpush3.bf16.msra.mxu0 %v7755_v35  ;;  %v3412_v39 = vld [vmem:[#allocation11 + $0x40] sm:$0xff]  ;;  %v13304_v19 = vmov 0.0|0.0  }
 0x50d   :  { %v2836_v49 = vsub.f32 2.0, %v2820_v62  ;;  %v3208_v54 = vmul.f32 0.25, %v2898_v45  ;;  %7151 = vmatmul.mubr.f32.gmra.mrb[12].mxu1 %v2866_v48  ;;  %7760 = vmatprep.subr.bf16.mxu0 %v7759_v5  ;;  %v7775_v26 = vpack.c.bf16 %v3405_v58, %v3404_v57  ;;  %v7779_v47 = vpack.c.bf16 %v3407_v7, %v3406_v36  ;;  %v3411_v48 = vld [vmem:[#allocation11 + $0x38] sm:$0xff]  ;;  %v3413_v62 = vld [vmem:[#allocation11 + $0x48] sm:$0xff]  ;;  %v13308_v58 = vld [vmem:[#allocation30_spill] sm:$0xff] }
 0x50e   :  { %v3207_v51 = vmul.f32 0.25, %v2897_v9  ;;  %v2867_v59 = vmul.f32 %v13301_v38, %v2851_v31  ;;  %v7783_v61 = vpack.c.bf16 %v3409_v55, %v3408_v2  ;;  %v7787_v33 = vpack.c.bf16 %v3411_v48, %v3410_v50 }
 0x50f   :  { %3224 = vst [vmem:[#allocation16 + $0x68] sm:$0xff] %v3208_v54  ;;  %v2852_v20 = vmul.f32 %v8548_v46, %v2836_v49  ;;  %v7791_v31 = vpack.c.bf16 %v3413_v62, %v3412_v39  ;;  %v3414_v49 = vld [vmem:[#allocation11 + $0x50] sm:$0xff]  ;;  %v3415_v54 = vld [vmem:[#allocation11 + $0x58] sm:$0xff] }
 0x510   :  { %3223 = vst [vmem:[#allocation16 + $0x60] sm:$0xff] %v3207_v51  ;;  %v2899_v22 = vadd.f32 %v2867_v59, %v2265_v16  ;;  %7153 = vmatprep.mubr.f32.mxu1 %v2867_v59  ;;  %7762 = vmatpush3.bf16.msra.mxu0 %v7759_v5  ;;  %v7795_v28 = vpack.c.bf16 %v3415_v54, %v3414_v49 }
 0x511   :  { %v2868_v15 = vmul.f32 %v13303_v8, %v2852_v20  ;;  %7764 = vmatprep.subr.bf16.mxu0 %v7763_v17  ;;  %v3417_v20 = vld [vmem:[#allocation11 + $0x68] sm:$0xff] }
 0x512   :  { %v3209_v56 = vmul.f32 0.25, %v2899_v22 }
 0x513   :  { %v2900_v1 = vadd.f32 %v2868_v15, %v2266_v63  ;;  %7154 = vmatmul.mubr.f32.gmra.mrb[14].mxu1 %v2868_v15 }
 0x514   :  { %3225 = vst [vmem:[#allocation16 + $0x70] sm:$0xff] %v3209_v56  ;;  %7766 = vmatpush3.bf16.msra.mxu0 %v7763_v17  ;;  %v7799_v56 = vpack.c.bf16 %v3417_v20, %v3416_v23 }
 0x515   :  { %v3210_v0 = vmul.f32 0.25, %v2900_v1  ;;  %7768 = vmatprep.subr.bf16.mxu0 %v7767_v11  ;;  %v3418_v1 = vld [vmem:[#allocation11 + $0x70] sm:$0xff] }
 0x517   :  { %3226 = vst [vmem:[#allocation16 + $0x78] sm:$0xff] %v3210_v0  ;;  %v3419_v0 = vld [vmem:[#allocation11 + $0x78] sm:$0xff] }
 0x518   :  { %7770 = vmatpush3.bf16.msra.mxu0 %v7767_v11  ;;  %v7803_v12 = vpack.c.bf16 %v3419_v0, %v3418_v1 }
 0x519   :  { %7772 = vmatprep.subr.bf16.mxu0 %v7771_v52 }
 0x51c   :  { %7774 = vmatpush3.bf16.msra.mxu0 %v7771_v52  ;;  %v13307_v52 = vld [vmem:[#allocation29_spill] sm:$0xff] }
 0x51d   :  { %7776 = vmatprep.subr.bf16.mxu0 %v7775_v26 }
 0x5c8   :  { %v7134_v32 = vpop.f32.mrb[0].mxu1 }
 0x5c9   :  { %v3020_v24 = vpop.f32.mrb[1].mxu1  ;;  %v3148_v44 = vmax.f32 %v7134_v32, 0.0 }
 0x5ca   :  { %v3147_v25 = vmax.f32 %v3020_v24, 0.0 }
 0x5cb   :  { %3164 = vst [vmem:[#allocation13 + $0x8] sm:$0xff] %v3148_v44 }
 0x5cc   :  { %v7137_v27 = vpop.f32.mrb[2].mxu1  ;;  %3163 = vst [vmem:[#allocation13] sm:$0xff] %v3147_v25  ;;  %7188 = vmatprep.mubr.f32.mxu0 %v3147_v25 }
 0x5cd   :  { %v3030_v4 = vpop.f32.mrb[3].mxu1  ;;  %v3150_v40 = vmax.f32 %v7137_v27, 0.0  ;;  %7189 = vmatmul.mubr.f32.vlgmr.msra.gmra.mrb[34].mxu0 %v3148_v44 }
 0x5ce   :  { %v3149_v37 = vmax.f32 %v3030_v4, 0.0  ;;  %7778 = vmatpush3.bf16.msra.mxu0 %v7775_v26 }
 0x5cf   :  { %3166 = vst [vmem:[#allocation13 + $0x18] sm:$0xff] %v3150_v40  ;;  %7780 = vmatprep.subr.bf16.mxu0 %v7779_v47 }
 0x5d0   :  { %v7140_v53 = vpop.f32.mrb[4].mxu1  ;;  %3165 = vst [vmem:[#allocation13 + $0x10] sm:$0xff] %v3149_v37  ;;  %7191 = vmatprep.mubr.f32.mxu0 %v3149_v37 }
 0x5d1   :  { %v3040_v21 = vpop.f32.mrb[5].mxu1  ;;  %v3152_v46 = vmax.f32 %v7140_v53, 0.0  ;;  %7192 = vmatmul.mubr.f32.gmra.mrb[36].mxu0 %v3150_v40 }
 0x5d2   :  { %v3151_v42 = vmax.f32 %v3040_v21, 0.0  ;;  %7782 = vmatpush3.bf16.msra.mxu0 %v7779_v47 }
 0x5d3   :  { %3168 = vst [vmem:[#allocation13 + $0x28] sm:$0xff] %v3152_v46  ;;  %7784 = vmatprep.subr.bf16.mxu0 %v7783_v61 }
 0x5d4   :  { %v7143_v30 = vpop.f32.mrb[6].mxu1  ;;  %3167 = vst [vmem:[#allocation13 + $0x20] sm:$0xff] %v3151_v42  ;;  %7194 = vmatprep.mubr.f32.mxu0 %v3151_v42 }
 0x5d5   :  { %v3050_v43 = vpop.f32.mrb[7].mxu1  ;;  %v3154_v45 = vmax.f32 %v7143_v30, 0.0  ;;  %7195 = vmatmul.mubr.f32.gmra.mrb[38].mxu0 %v3152_v46 }
 0x5d6   :  { %v3153_v13 = vmax.f32 %v3050_v43, 0.0  ;;  %7786 = vmatpush3.bf16.msra.mxu0 %v7783_v61 }
 0x5d7   :  { %3170 = vst [vmem:[#allocation13 + $0x38] sm:$0xff] %v3154_v45  ;;  %7788 = vmatprep.subr.bf16.mxu0 %v7787_v33 }
 0x5d8   :  { %v7146_v10 = vpop.f32.mrb[8].mxu1  ;;  %3169 = vst [vmem:[#allocation13 + $0x30] sm:$0xff] %v3153_v13  ;;  %7197 = vmatprep.mubr.f32.mxu0 %v3153_v13 }
 0x5d9   :  { %v3060_v9 = vpop.f32.mrb[9].mxu1  ;;  %v3156_v16 = vmax.f32 %v7146_v10, 0.0  ;;  %7198 = vmatmul.mubr.f32.gmra.mrb[40].mxu0 %v3154_v45 }
 0x5da   :  { %v3155_v51 = vmax.f32 %v3060_v9, 0.0  ;;  %7790 = vmatpush3.bf16.msra.mxu0 %v7787_v33 }
 0x5db   :  { %3172 = vst [vmem:[#allocation13 + $0x48] sm:$0xff] %v3156_v16  ;;  %7792 = vmatprep.subr.bf16.mxu0 %v7791_v31 }
 0x5dc   :  { %v7149_v38 = vpop.f32.mrb[10].mxu1  ;;  %3171 = vst [vmem:[#allocation13 + $0x40] sm:$0xff] %v3155_v51  ;;  %7200 = vmatprep.mubr.f32.mxu0 %v3155_v51 }
 0x5dd   :  { %v3070_v59 = vpop.f32.mrb[11].mxu1  ;;  %v3158_v22 = vmax.f32 %v7149_v38, 0.0  ;;  %7201 = vmatmul.mubr.f32.gmra.mrb[42].mxu0 %v3156_v16 }
 0x5de   :  { %v3157_v63 = vmax.f32 %v3070_v59, 0.0  ;;  %7794 = vmatpush3.bf16.msra.mxu0 %v7791_v31 }
 0x5df   :  { %3174 = vst [vmem:[#allocation13 + $0x58] sm:$0xff] %v3158_v22  ;;  %7796 = vmatprep.subr.bf16.mxu0 %v7795_v28 }
 0x5e0   :  { %v7152_v8 = vpop.f32.mrb[12].mxu1  ;;  %3173 = vst [vmem:[#allocation13 + $0x50] sm:$0xff] %v3157_v63  ;;  %7203 = vmatprep.mubr.f32.mxu0 %v3157_v63 }
 0x5e1   :  { %v3080_v15 = vpop.f32.mrb[13].mxu1  ;;  %v3160_v18 = vmax.f32 %v7152_v8, 0.0  ;;  %7204 = vmatmul.mubr.f32.gmra.mrb[44].mxu0 %v3158_v22 }
 0x5e2   :  { %v3159_v60 = vmax.f32 %v3080_v15, 0.0  ;;  %7798 = vmatpush3.bf16.msra.mxu0 %v7795_v28 }
 0x5e3   :  { %3176 = vst [vmem:[#allocation13 + $0x68] sm:$0xff] %v3160_v18  ;;  %7800 = vmatprep.subr.bf16.mxu0 %v7799_v56 }
 0x5e4   :  { %3175 = vst [vmem:[#allocation13 + $0x60] sm:$0xff] %v3159_v60  ;;  %7206 = vmatprep.mubr.f32.mxu0 %v3159_v60 }
 0x5e5   :  { %7207 = vmatmul.mubr.f32.gmra.mrb[46].mxu0 %v3160_v18 }
 0x5e6   :  { %v7155_v35 = vpop.f32.mrb[14].mxu1  ;;  %7802 = vmatpush3.bf16.msra.mxu0 %v7799_v56 }
 0x5e7   :  { %v3090_v34 = vpop.f32.mrb[15].mxu1  ;;  %v3162_v5 = vmax.f32 %v7155_v35, 0.0  ;;  %7804 = vmatprep.subr.bf16.mxu0 %v7803_v12 }
 0x5e8   :  { %v3161_v6 = vmax.f32 %v3090_v34, 0.0 }
 0x5e9   :  { %3178 = vst [vmem:[#allocation13 + $0x78] sm:$0xff] %v3162_v5 }
 0x5ea   :  { %3177 = vst [vmem:[#allocation13 + $0x70] sm:$0xff] %v3161_v6  ;;  %7209 = vmatprep.mubr.f32.mxu0 %v3161_v6  ;;  %7806 = vmatpush3.bf16.msra.mxu0 %v7803_v12 }
 0x5eb   :  { %7210 = vmatmul.mubr.f32.gmra.mrb[48].mxu0 %v3162_v5  ;;  %7807 = vmatprep.subr.bf16.mxu0 %v13304_v19 }
 0x6a0   :  { %v7190_v17 = vpop.f32.mrb[34].mxu0 }
 0x6a1   :  { %v3325_v14 = vpop.f32.mrb[35].mxu0  ;;  %v4121_v11 = vmul.f32 %v7190_v17, %v13305_v29  ;;  %v4750_v3 = vmul.f32 %v7190_v17, %v13306_v41  ;;  %v5379_v57 = vmul.f32 %v7190_v17, %v13307_v52  ;;  %v6008_v26 = vmul.f32 %v7190_v17, %v13308_v58 }
 0x6a2   :  { %7244 = vmatprep.mubr.f32.mxu0 %v3325_v14  ;;  %v7808_v32 = vpack.c.bf16 %v7190_v17, %v3325_v14  ;;  %v4120_v24 = vmul.f32 %v13305_v29, %v3325_v14  ;;  %v4749_v36 = vmul.f32 %v13306_v41, %v3325_v14  ;;  %v5378_v7 = vmul.f32 %v13307_v52, %v3325_v14 }
 0x6a3   :  { %7245 = vmatmul.mubr.f32.vlgmr.msra.gmra.mrb[50].mxu0 %v7190_v17  ;;  %v6007_v44 = vmul.f32 %v13308_v58, %v3325_v14 }
 0x6a4   :  { %v7193_v25 = vpop.f32.mrb[36].mxu0  ;;  %7809 = vmatpush3.bf16.xpose.msra.mxu0 %v7808_v32  ;;  %v7831_v27 = vpack.c.bf16 %v4121_v11, %v4120_v24  ;;  %v11046_v4 = vpack.c.bf16 %v4750_v3, %v4749_v36  ;;  %v11048_v47 = vpack.c.bf16 %v5379_v57, %v5378_v7 }
 0x6a5   :  { %v3335_v2 = vpop.f32.mrb[37].mxu0  ;;  %v4123_v55 = vmul.f32 %v7193_v25, %v13305_v29  ;;  %7810 = vmatprep.subr.bf16.mxu0 %v13304_v19  ;;  %v4752_v40 = vmul.f32 %v7193_v25, %v13306_v41  ;;  %v5381_v37 = vmul.f32 %v7193_v25, %v13307_v52  ;;  %v11054_v53 = vpack.c.bf16 %v6008_v26, %v6007_v44 }
 0x6a6   :  { %13309 = vst [vmem:[#allocation62_spill] sm:$0xff] %v11046_v4  ;;  %13310 = vst [vmem:[#allocation70_spill] sm:$0xff] %v11048_v47  ;;  %7247 = vmatprep.mubr.f32.mxu0 %v3335_v2  ;;  %7832 = vmatprep.subr.bf16.mxu1 %v7831_v27  ;;  %v4122_v21 = vmul.f32 %v13305_v29, %v3335_v2  ;;  %v7811_v61 = vpack.c.bf16 %v7193_v25, %v3335_v2 }
 0x6a7   :  { %13311 = vst [vmem:[#allocation35_spill] sm:$0xff] %v11054_v53  ;;  %v4751_v50 = vmul.f32 %v13306_v41, %v3335_v2  ;;  %7248 = vmatmul.mubr.f32.gmra.mrb[52].mxu0 %v7193_v25  ;;  %7834 = vmatpush3.bf16.msra.mxu1 %v7831_v27  ;;  %v5380_v48 = vmul.f32 %v13307_v52, %v3335_v2 }
 0x6a8   :  { %v6009_v46 = vmul.f32 %v13308_v58, %v3335_v2  ;;  %v6010_v42 = vmul.f32 %v7193_v25, %v13308_v58  ;;  %v7196_v30 = vpop.f32.mrb[38].mxu0  ;;  %v7835_v43 = vpack.c.bf16 %v4123_v55, %v4122_v21 }
 0x6a9   :  { %v11061_v33 = vpack.c.bf16 %v4752_v40, %v4751_v50  ;;  %v3345_v39 = vpop.f32.mrb[39].mxu0  ;;  %v4125_v62 = vmul.f32 %v7196_v30, %v13305_v29  ;;  %v4754_v45 = vmul.f32 %v7196_v30, %v13306_v41  ;;  %v11065_v13 = vpack.c.bf16 %v5381_v37, %v5380_v48 }
 0x6aa   :  { %v5383_v10 = vmul.f32 %v7196_v30, %v13307_v52  ;;  %7250 = vmatprep.mubr.f32.mxu0 %v3345_v39  ;;  %7836 = vmatprep.subr.bf16.mxu1 %v7835_v43  ;;  %v4124_v9 = vmul.f32 %v13305_v29, %v3345_v39  ;;  %v7814_v31 = vpack.c.bf16 %v7196_v30, %v3345_v39 }
 0x6ab   :  { %13312 = vst [vmem:[#allocation38_spill] sm:$0xff] %v11061_v33  ;;  %13313 = vst [vmem:[#allocation64_spill] sm:$0xff] %v11065_v13  ;;  %v4753_v49 = vmul.f32 %v13306_v41, %v3345_v39  ;;  %7251 = vmatmul.mubr.f32.gmra.mrb[54].mxu0 %v7196_v30  ;;  %7838 = vmatpush3.bf16.msra.mxu1 %v7835_v43  ;;  %v5382_v54 = vmul.f32 %v13307_v52, %v3345_v39 }
 0x6ac   :  { %v11071_v16 = vpack.c.bf16 %v6010_v42, %v6009_v46  ;;  %v6011_v51 = vmul.f32 %v13308_v58, %v3345_v39  ;;  %v11074_v38 = vpop.f32.mrb[40].mxu0  ;;  %7812 = vmatpush3.bf16.xpose.msra.mxu0 %v7811_v61  ;;  %v7839_v59 = vpack.c.bf16 %v4125_v62, %v4124_v9  ;;  %v6012_v23 = vmul.f32 %v7196_v30, %v13308_v58 }
 0x6ad   :  { %v11076_v28 = vpack.c.bf16 %v4754_v45, %v4753_v49  ;;  %v11079_v20 = vpop.f32.mrb[41].mxu0  ;;  %v4127_v22 = vmul.f32 %v11074_v38, %v13305_v29  ;;  %7813 = vmatprep.subr.bf16.mxu0 %v13304_v19  ;;  %v4756_v63 = vmul.f32 %v11074_v38, %v13306_v41  ;;  %v11086_v8 = vpack.c.bf16 %v5383_v10, %v5382_v54 }
 0x6ae   :  { %13314 = vst [vmem:[#allocation41_spill] sm:$0xff] %v11071_v16  ;;  %v5385_v15 = vmul.f32 %v11074_v38, %v13307_v52  ;;  %7253 = vmatprep.mubr.f32.mxu0 %v11079_v20  ;;  %7840 = vmatprep.subr.bf16.mxu1 %v7839_v59  ;;  %v4126_v56 = vmul.f32 %v13305_v29, %v11079_v20 }
 0x6af   :  { %13315 = vst [vmem:[#allocation75_spill] sm:$0xff] %v11076_v28  ;;  %13316 = vst [vmem:[#allocation67_spill] sm:$0xff] %v11086_v8  ;;  %v7817_v1 = vpack.c.bf16 %v11074_v38, %v11079_v20  ;;  %v4755_v0 = vmul.f32 %v13306_v41, %v11079_v20  ;;  %7254 = vmatmul.mubr.f32.gmra.mrb[56].mxu0 %v11074_v38  ;;  %7842 = vmatpush3.bf16.msra.mxu1 %v7839_v59 }
 0x6b0   :  { %v5384_v18 = vmul.f32 %v13307_v52, %v11079_v20  ;;  %v11100_v60 = vpack.c.bf16 %v6012_v23, %v6011_v51  ;;  %v6013_v35 = vmul.f32 %v13308_v58, %v11079_v20  ;;  %v11104_v12 = vpop.f32.mrb[42].mxu0  ;;  %v7843_v34 = vpack.c.bf16 %v4127_v22, %v4126_v56 }
 0x6b1   :  { %v11106_v5 = vpack.c.bf16 %v4756_v63, %v4755_v0  ;;  %v6014_v6 = vmul.f32 %v11074_v38, %v13308_v58  ;;  %v11110_v17 = vpop.f32.mrb[43].mxu0  ;;  %v4129_v14 = vmul.f32 %v11104_v12, %v13305_v29  ;;  %v4758_v11 = vmul.f32 %v11104_v12, %v13306_v41 }
 0x6b2   :  { %13317 = vst [vmem:[#allocation44_spill] sm:$0xff] %v11100_v60  ;;  %v11116_v3 = vpack.c.bf16 %v5385_v15, %v5384_v18  ;;  %v5387_v57 = vmul.f32 %v11104_v12, %v13307_v52  ;;  %7256 = vmatprep.mubr.f32.mxu0 %v11110_v17  ;;  %7844 = vmatprep.subr.bf16.mxu1 %v7843_v34 }
 0x6b3   :  { %13318 = vst [vmem:[#allocation47_spill] sm:$0xff] %v11106_v5  ;;  %v4128_v26 = vmul.f32 %v13305_v29, %v11110_v17  ;;  %v7820_v32 = vpack.c.bf16 %v11104_v12, %v11110_v17  ;;  %v4757_v24 = vmul.f32 %v13306_v41, %v11110_v17  ;;  %7257 = vmatmul.mubr.f32.gmra.mrb[58].mxu0 %v11104_v12  ;;  %v11506_v5 = vld [vmem:[#allocation5 + $0x38] sm:$0xff] }
 0x6b4   :  { %13319 = vst [vmem:[#allocation72_spill] sm:$0xff] %v11116_v3  ;;  %7846 = vmatpush3.bf16.msra.mxu1 %v7843_v34  ;;  %v5386_v36 = vmul.f32 %v13307_v52, %v11110_v17  ;;  %v11130_v7 = vpack.c.bf16 %v6014_v6, %v6013_v35  ;;  %v6015_v44 = vmul.f32 %v13308_v58, %v11110_v17  ;;  %v11134_v25 = vpop.f32.mrb[44].mxu0  ;;  %v13335_v17 = vmov 1  }
 0x6b5   :  { %7815 = vmatpush3.bf16.xpose.msra.mxu0 %v7814_v31  ;;  %v7847_v27 = vpack.c.bf16 %v4129_v14, %v4128_v26  ;;  %v11136_v2 = vpack.c.bf16 %v4758_v11, %v4757_v24  ;;  %v6016_v55 = vmul.f32 %v11104_v12, %v13308_v58  ;;  %v11140_v40 = vpop.f32.mrb[45].mxu0  ;;  %v4131_v37 = vmul.f32 %v11134_v25, %v13305_v29 }
 0x6b6   :  { %13320 = vst [vmem:[#allocation50_spill] sm:$0xff] %v11130_v7  ;;  %7816 = vmatprep.subr.bf16.mxu0 %v13304_v19  ;;  %v4760_v21 = vmul.f32 %v11134_v25, %v13306_v41  ;;  %v11147_v61 = vpack.c.bf16 %v5387_v57, %v5386_v36  ;;  %v5389_v50 = vmul.f32 %v11134_v25, %v13307_v52  ;;  %v13334_v12 = vmov 3  }
 0x6b7   :  { %13321 = vst [vmem:[#allocation79_spill] sm:$0xff] %v11136_v2  ;;  %7259 = vmatprep.mubr.f32.mxu0 %v11140_v40  ;;  %7848 = vmatprep.subr.bf16.mxu1 %v7847_v27  ;;  %v4130_v48 = vmul.f32 %v13305_v29, %v11140_v40  ;;  %v7823_v46 = vpack.c.bf16 %v11134_v25, %v11140_v40 }
 0x6b8   :  { %13322 = vst [vmem:[#allocation53_spill] sm:$0xff] %v11147_v61  ;;  %v4759_v42 = vmul.f32 %v13306_v41, %v11140_v40  ;;  %7260 = vmatmul.mubr.f32.gmra.mrb[60].mxu0 %v11134_v25  ;;  %7850 = vmatpush3.bf16.msra.mxu1 %v7847_v27  ;;  %v5388_v30 = vmul.f32 %v13307_v52, %v11140_v40  ;;  %v7208_v62 = vpop.f32.mrb[46].mxu0 }
 0x6b9   :  { %v11161_v43 = vpack.c.bf16 %v6016_v55, %v6015_v44  ;;  %v6017_v39 = vmul.f32 %v13308_v58, %v11140_v40  ;;  %v7851_v45 = vpack.c.bf16 %v4131_v37, %v4130_v48  ;;  %v6018_v9 = vmul.f32 %v11134_v25, %v13308_v58  ;;  %v3385_v31 = vpop.f32.mrb[47].mxu0 }
 0x6ba   :  { %v11165_v10 = vpack.c.bf16 %v4760_v21, %v4759_v42  ;;  %v4133_v49 = vmul.f32 %v7208_v62, %v13305_v29  ;;  %v4762_v54 = vmul.f32 %v7208_v62, %v13306_v41  ;;  %v11171_v51 = vpack.c.bf16 %v5389_v50, %v5388_v30  ;;  %7262 = vmatprep.mubr.f32.mxu0 %v3385_v31 }
 0x6bb   :  { %13323 = vst [vmem:[#allocation60_spill] sm:$0xff] %v11161_v43  ;;  %v5391_v59 = vmul.f32 %v7208_v62, %v13307_v52  ;;  %7852 = vmatprep.subr.bf16.mxu1 %v7851_v45  ;;  %v4132_v23 = vmul.f32 %v13305_v29, %v3385_v31  ;;  %v7826_v22 = vpack.c.bf16 %v7208_v62, %v3385_v31  ;;  %v13330_v40 = vmov 0.0  }
 0x6bc   :  { %13324 = vst [vmem:[#allocation33_spill] sm:$0xff] %v11165_v10  ;;  %13325 = vst [vmem:[#allocation36_spill] sm:$0xff] %v11171_v51  ;;  %v4761_v63 = vmul.f32 %v13306_v41, %v3385_v31  ;;  %7263 = vmatmul.mubr.f32.gmra.mrb[62].mxu0 %v7208_v62  ;;  %7854 = vmatpush3.bf16.msra.mxu1 %v7851_v45  ;;  %v5390_v15 = vmul.f32 %v13307_v52, %v3385_v31  ;;  %v13337_v42 = vmov 2  }
 0x6bd   :  { %v11177_v56 = vpack.c.bf16 %v6018_v9, %v6017_v39  ;;  %v6019_v0 = vmul.f32 %v13308_v58, %v3385_v31  ;;  %7818 = vmatpush3.bf16.xpose.msra.mxu0 %v7817_v1  ;;  %v7855_v18 = vpack.c.bf16 %v4133_v49, %v4132_v23  ;;  %v6020_v34 = vmul.f32 %v7208_v62, %v13308_v58 }
 0x6be   :  { %v11183_v35 = vpack.c.bf16 %v4762_v54, %v4761_v63  ;;  %v7211_v6 = vpop.f32.mrb[48].mxu0  ;;  %7819 = vmatprep.subr.bf16.mxu0 %v13304_v19  ;;  %v11187_v14 = vpack.c.bf16 %v5391_v59, %v5390_v15 }
 0x6bf   :  { %13326 = vst [vmem:[#allocation66_spill] sm:$0xff] %v11177_v56  ;;  %7856 = vmatprep.subr.bf16.mxu1 %v7855_v18  ;;  %v3395_v11 = vpop.f32.mrb[49].mxu0  ;;  %v4135_v57 = vmul.f32 %v7211_v6, %v13305_v29  ;;  %v4764_v26 = vmul.f32 %v7211_v6, %v13306_v41  ;;  %v5393_v24 = vmul.f32 %v7211_v6, %v13307_v52 }
 0x6c0   :  { %13327 = vst [vmem:[#allocation39_spill] sm:$0xff] %v11183_v35  ;;  %13328 = vst [vmem:[#allocation42_spill] sm:$0xff] %v11187_v14  ;;  %v11192_v38 = vpack.c.bf16 %v6020_v34, %v6019_v0  ;;  %7858 = vmatpush3.bf16.msra.mxu1 %v7855_v18  ;;  %7265 = vmatprep.mubr.f32.mxu0 %v3395_v11  ;;  %v4134_v20 = vmul.f32 %v13305_v29, %v3395_v11  ;;  %v3565_v29 = vld [vmem:[%s12872_s7] sm:$0xff]  ;;  %s9070_s7 = smov [#allocation13]  }
 0x6c1   :  { %v7829_v1 = vpack.c.bf16 %v7211_v6, %v3395_v11  ;;  %v4763_v36 = vmul.f32 %v13306_v41, %v3395_v11  ;;  %7266 = vmatmul.mubr.f32.gmra.mrb[64].mxu0 %v7211_v6  ;;  %v5392_v44 = vmul.f32 %v13307_v52, %v3395_v11  ;;  %v6021_v25 = vmul.f32 %v13308_v58, %v3395_v11  ;;  %s6301_s16 = sshll.u32 %s9070_s7, 4  ;;  %s6302_s16 = int_to_ptr.vmem [resolvable:$true] %s6301_s16 }
 0x6c2   :  { %13329 = vst [vmem:[#allocation45_spill] sm:$0xff] %v11192_v38  ;;  %v6022_v27 = vmul.f32 %v7211_v6, %v13308_v58  ;;  %v7859_v55 = vpack.c.bf16 %v4135_v57, %v4134_v20  ;;  %7300 = vmatprep.mubr.msk.f32.mxu0 %vm9067_vm10, %v13330_v40  ;;  %s8953_s17 = scalar_lea.vmem %s6302_s16, 2048  ;;  %p8958_p7 = scmp.lt.s32.totalorder %s6302_s16, %s6302_s16 }
 0x6c3   :  { %v11201_v37 = vpack.c.bf16 %v4764_v26, %v4763_v36  ;;  %v11203_v21 = vpack.c.bf16 %v5393_v24, %v5392_v44  ;;  %p8954_p6 = scmp.ne.s32.totalorder %s6302_s16, %s8953_s17  ;;  %p8959_p8 = scmp.lt.s32.totalorder %s8953_s17, %s8953_s17 }
 0x6c4   :  { %v11205_v50 = vpack.c.bf16 %v6022_v27, %v6021_v25  ;;  %7860 = vmatprep.subr.bf16.mxu1 %v7859_v55 }
 0x6c5   :  { %13331 = vst [vmem:[#allocation78_spill] sm:$0xff] %v11201_v37  ;;  %13332 = vst [vmem:[#allocation68_spill] sm:$0xff] %v11203_v21  ;;  %7821 = vmatpush3.bf16.xpose.msra.mxu0 %v7820_v32  ;;  %7862 = vmatpush3.bf16.msra.mxu1 %v7859_v55  ;;  %p8960_p9 = por %p8959_p8, %p8958_p7 }
 0x6c6   :  { %13333 = vst [vmem:[#allocation71_spill] sm:$0xff] %v11205_v50  ;;  %7864 = vmatprep.subr.bf16.mxu1 %v11046_v4  ;;  %7822 = vmatprep.subr.bf16.mxu0 %v13304_v19 }
 0x6c7   :  { %p8961_p10 = pnand %p8960_p9, %p8954_p6 }
 0x6cd   :  { %7824 = vmatpush3.bf16.xpose.msra.mxu0 %v7823_v46  ;;  %v13336_v46 = vmov 0  }
 0x6ce   :  { %7825 = vmatprep.subr.bf16.mxu0 %v13304_v19 }
 0x6d5   :  { %7827 = vmatpush3.bf16.xpose.msra.mxu0 %v7826_v22 }
 0x6d6   :  { %7828 = vmatprep.subr.bf16.mxu0 %v13304_v19 }
 0x6dd   :  { %7830 = vmatpush3.bf16.xpose.msra.mxu0 %v7829_v1  ;;  %v13338_v1 = vld [vmem:[#allocation55_spill] sm:$0xff] }
 0x6de   :  { %v13339_v36 = vsub.s32 0, %v13338_v1  ;;  %v13340_v55 = vsub.s32 1, %v13338_v1 }
 0x6e4   :  { %7301 = vmatmul.mubr.f32.vlgmr.msra.gmra.mrb[66].mxu0 %v3565_v29 }
 0x776   :  { %v7246_v41 = vpop.f32.mrb[50].mxu0 }
 0x777   :  { %4947 = vperm.xlu1 %8229, %v7246_v41   ;;  %3675 = vperm.xlu0 %8231, %v7246_v41   ;;  %v3486_v52 = vpop.f32.mrb[51].mxu0 }
 0x77a   :  { %v7249_v58 = vpop.f32.mrb[52].mxu0 }
 0x77b   :  { %8233 = vset.pattern.permute.xlu1 %v13334_v12  ;;  %8232 = vset.pattern.permute.xlu0 %v13335_v17  ;;  %v3496_v32 = vpop.f32.mrb[53].mxu0 }
 0x77c   :  { %5576 = vperm.xlu1 %8233, %v7246_v41   ;;  %4318 = vperm.xlu0 %8232, %v7246_v41  }
 0x77e   :  { %v7252_v48 = vpop.f32.mrb[54].mxu0 }
 0x77f   :  { %v11219_v19 = vpop.f32.mrb[55].mxu0 }
 0x780   :  { %8234 = vset.pattern.permute.xlu1 %v13336_v46  ;;  %8236 = vset.pattern.permute.xlu0 %v13337_v42 }
 0x781   :  { %4943 = vperm.xlu0 %8236, %v3486_v52   ;;  %3670 = vperm.xlu1 %8234, %v3486_v52  }
 0x782   :  { %v11223_v30 = vpop.f32.mrb[56].mxu0 }
 0x783   :  { %v11225_v39 = vpop.f32.mrb[57].mxu0 }
 0x785   :  { %8237 = vset.pattern.permute.xlu0 %v13334_v12  ;;  %8235 = vset.pattern.permute.xlu1 %v13335_v17 }
 0x786   :  { %5572 = vperm.xlu0 %8237, %v3486_v52   ;;  %4314 = vperm.xlu1 %8235, %v3486_v52   ;;  %v11229_v62 = vpop.f32.mrb[58].mxu0 }
 0x787   :  { %v11231_v45 = vpop.f32.mrb[59].mxu0 }
 0x78a   :  { %8240 = vset.pattern.permute.xlu0 %v13337_v42  ;;  %8238 = vset.pattern.permute.xlu1 %v13336_v46 }
 0x78b   :  { %v11235_v9 = vpop.f32.mrb[60].mxu0  ;;  %4955 = vperm.xlu0 %8240, %v7249_v58   ;;  %3685 = vperm.xlu1 %8238, %v7249_v58  }
 0x78c   :  { %v11237_v31 = vpop.f32.mrb[61].mxu0 }
 0x78f   :  { %v11239_v49 = vpop.f32.mrb[62].mxu0  ;;  %8241 = vset.pattern.permute.xlu0 %v13334_v12  ;;  %8239 = vset.pattern.permute.xlu1 %v13335_v17 }
 0x790   :  { %v11243_v54 = vpop.f32.mrb[63].mxu0  ;;  %5584 = vperm.xlu0 %8241, %v7249_v58   ;;  %4326 = vperm.xlu1 %8239, %v7249_v58  }
 0x794   :  { %v11245_v59 = vpop.f32.mrb[64].mxu0  ;;  %8251 = vset.pattern.permute.xlu0 %v13335_v17  ;;  %8242 = vset.pattern.permute.xlu1 %v13336_v46 }
 0x795   :  { %v11249_v23 = vpop.f32.mrb[65].mxu0  ;;  %3680 = vperm.xlu1 %8242, %v3496_v32   ;;  %4330 = vperm.xlu0 %8251, %v11219_v19  }
 0x799   :  { %8243 = vset.pattern.permute.xlu1 %v13335_v17  ;;  %8257 = vset.pattern.permute.xlu0 %v13334_v12 }
 0x79a   :  { %4322 = vperm.xlu1 %8243, %v3496_v32   ;;  %5600 = vperm.xlu0 %8257, %v11223_v30  }
 0x79e   :  { %8244 = vset.pattern.permute.xlu1 %v13337_v42  ;;  %8259 = vset.pattern.permute.xlu0 %v13335_v17 }
 0x79f   :  { %4951 = vperm.xlu1 %8244, %v3496_v32   ;;  %4338 = vperm.xlu0 %8259, %v11225_v39  }
 0x7a3   :  { %8245 = vset.pattern.permute.xlu1 %v13334_v12  ;;  %8260 = vset.pattern.permute.xlu0 %v13337_v42 }
 0x7a4   :  { %5580 = vperm.xlu1 %8245, %v3496_v32   ;;  %4967 = vperm.xlu0 %8260, %v11225_v39  }
 0x7a8   :  { %8246 = vset.pattern.permute.xlu1 %v13336_v46  ;;  %8261 = vset.pattern.permute.xlu0 %v13334_v12 }
 0x7a9   :  { %3695 = vperm.xlu1 %8246, %v7252_v48   ;;  %5596 = vperm.xlu0 %8261, %v11225_v39  }
 0x7ad   :  { %8247 = vset.pattern.permute.xlu1 %v13335_v17  ;;  %8262 = vset.pattern.permute.xlu0 %v13336_v46 }
 0x7ae   :  { %4334 = vperm.xlu1 %8247, %v7252_v48   ;;  %3715 = vperm.xlu0 %8262, %v11229_v62  }
 0x7b2   :  { %8248 = vset.pattern.permute.xlu1 %v13337_v42  ;;  %8264 = vset.pattern.permute.xlu0 %v13337_v42 }
 0x7b3   :  { %4963 = vperm.xlu1 %8248, %v7252_v48   ;;  %4979 = vperm.xlu0 %8264, %v11229_v62  }
 0x7b7   :  { %v11270_v22 = vpop.f32.mrb[66].mxu0  ;;  %8249 = vset.pattern.permute.xlu1 %v13334_v12  ;;  %8265 = vset.pattern.permute.xlu0 %v13334_v12 }
 0x7b8   :  { %v7302_v63 = vpop.f32.mrb[67].mxu0  ;;  %5592 = vperm.xlu1 %8249, %v7252_v48   ;;  %5608 = vperm.xlu0 %8265, %v11229_v62   ;;  %v11352_v44 = vrot.slane %v11270_v22, %v13339_v36  ;;  %v11362_v40 = vrot.slane %v11270_v22, %v13340_v55 }
 0x7bc   :  { %8250 = vset.pattern.permute.xlu1 %v13336_v46  ;;  %8267 = vset.pattern.permute.xlu0 %v13335_v17 }
 0x7bd   :  { %3690 = vperm.xlu1 %8250, %v11219_v19   ;;  %4346 = vperm.xlu0 %8267, %v11231_v45  }
 0x7c1   :  { %8252 = vset.pattern.permute.xlu1 %v13337_v42  ;;  %8269 = vset.pattern.permute.xlu0 %v13334_v12 }
 0x7c2   :  { %4959 = vperm.xlu1 %8252, %v11219_v19   ;;  %5604 = vperm.xlu0 %8269, %v11231_v45  }
 0x7c6   :  { %8253 = vset.pattern.permute.xlu1 %v13334_v12  ;;  %8270 = vset.pattern.permute.xlu0 %v13336_v46 }
 0x7c7   :  { %5588 = vperm.xlu1 %8253, %v11219_v19   ;;  %3725 = vperm.xlu0 %8270, %v11235_v9   ;;  %v11372_v19 = vld [vmem:[#allocation5] sm:$0xff] }
 0x7cb   :  { %8254 = vset.pattern.permute.xlu1 %v13336_v46  ;;  %8273 = vset.pattern.permute.xlu0 %v13334_v12 }
 0x7cc   :  { %3705 = vperm.xlu1 %8254, %v11223_v30   ;;  %5616 = vperm.xlu0 %8273, %v11235_v9  }
 0x7d0   :  { %8255 = vset.pattern.permute.xlu1 %v13335_v17  ;;  %8275 = vset.pattern.permute.xlu0 %v13335_v17 }
 0x7d1   :  { %4342 = vperm.xlu1 %8255, %v11223_v30   ;;  %4354 = vperm.xlu0 %8275, %v11237_v31  }
 0x7d5   :  { %8256 = vset.pattern.permute.xlu1 %v13337_v42  ;;  %8277 = vset.pattern.permute.xlu0 %v13334_v12 }
 0x7d6   :  { %4971 = vperm.xlu1 %8256, %v11223_v30   ;;  %5612 = vperm.xlu0 %8277, %v11237_v31  }
 0x7da   :  { %8258 = vset.pattern.permute.xlu1 %v13336_v46  ;;  %8278 = vset.pattern.permute.xlu0 %v13336_v46 }
 0x7db   :  { %3700 = vperm.xlu1 %8258, %v11225_v39   ;;  %3735 = vperm.xlu0 %8278, %v11239_v49  }
 0x7df   :  { %8263 = vset.pattern.permute.xlu1 %v13335_v17  ;;  %8281 = vset.pattern.permute.xlu0 %v13334_v12 }
 0x7e0   :  { %4350 = vperm.xlu1 %8263, %v11229_v62   ;;  %5624 = vperm.xlu0 %8281, %v11239_v49  }
 0x7e4   :  { %8266 = vset.pattern.permute.xlu1 %v13336_v46  ;;  %8283 = vset.pattern.permute.xlu0 %v13335_v17 }
 0x7e5   :  { %3710 = vperm.xlu1 %8266, %v11231_v45   ;;  %4362 = vperm.xlu0 %8283, %v11243_v54  }
 0x7e9   :  { %8268 = vset.pattern.permute.xlu1 %v13337_v42  ;;  %8284 = vset.pattern.permute.xlu0 %v13337_v42 }
 0x7ea   :  { %4975 = vperm.xlu1 %8268, %v11231_v45   ;;  %4991 = vperm.xlu0 %8284, %v11243_v54  }
 0x7ee   :  { %8271 = vset.pattern.permute.xlu1 %v13335_v17  ;;  %8285 = vset.pattern.permute.xlu0 %v13334_v12 }
 0x7ef   :  { %4358 = vperm.xlu1 %8271, %v11235_v9   ;;  %5620 = vperm.xlu0 %8285, %v11243_v54  }
 0x7f3   :  { %8272 = vset.pattern.permute.xlu1 %v13337_v42  ;;  %8286 = vset.pattern.permute.xlu0 %v13336_v46 }
 0x7f4   :  { %4987 = vperm.xlu1 %8272, %v11235_v9   ;;  %3745 = vperm.xlu0 %8286, %v11245_v59  }
 0x7f6   :  { %v11323_v15 = vpop.permute.xlu1 %4947  ;;  %v11329_v0 = vpop.permute.xlu0 %3675 }
 0x7f8   :  { %8274 = vset.pattern.permute.xlu1 %v13336_v46  ;;  %8290 = vset.pattern.permute.xlu0 %v13335_v17 }
 0x7f9   :  { %3720 = vperm.xlu1 %8274, %v11237_v31   ;;  %4370 = vperm.xlu0 %8290, %v11249_v23  }
 0x7fb   :  { %v11331_v18 = vpop.permute.xlu1 %5576  ;;  %v4319_v6 = vpop.permute.xlu0 %4318 }
 0x7fd   :  { %8276 = vset.pattern.permute.xlu1 %v13337_v42  ;;  %8291 = vset.pattern.permute.xlu0 %v13337_v42 }
 0x7fe   :  { %4983 = vperm.xlu1 %8276, %v11237_v31   ;;  %4999 = vperm.xlu0 %8291, %v11249_v23  }
 0x800   :  { %v3671_v34 = vpop.permute.xlu1 %3670  ;;  %v11341_v57 = vpop.permute.xlu0 %4943 }
 0x801   :  { %v3752_v25 = vadd.f32 %v11352_v44, %v3671_v34  ;;  %v11394_v34 = vld [vmem:[#allocation5 + $0x18] sm:$0xff] }
 0x802   :  { %8279 = vset.pattern.permute.xlu1 %v13335_v17  ;;  %8292 = vset.pattern.permute.xlu0 %v13334_v12 }
 0x803   :  { %4366 = vperm.xlu1 %8279, %v11239_v49   ;;  %5628 = vperm.xlu0 %8292, %v11249_v23   ;;  %v3784_v41 = vmul.f32 0.2, %v3752_v25  ;;  %vm3768_vm10 = vcmp.gt.f32.partialorder %v3752_v25, 0.0 }
 0x805   :  { %v4315_v11 = vpop.permute.xlu1 %4314  ;;  %v11346_v24 = vpop.permute.xlu0 %5572  ;;  %v3800_v48 = vsel %vm3768_vm10, %v3752_v25, %v3784_v41  ;;  %v3753_v41 = vadd.f32 %v11352_v44, %v11329_v0 }
 0x806   :  { %v4381_v52 = vadd.f32 %v11362_v40, %v4315_v11  ;;  %v11375_v30 = vmul.f32 %v11372_v19, %v3800_v48  ;;  %v4382_v48 = vadd.f32 %v11362_v40, %v4319_v6 }
 0x807   :  { %8280 = vset.pattern.permute.xlu1 %v13337_v42  ;;  %vm3769_vm6 = vcmp.gt.f32.partialorder %v3753_v41, 0.0 }
 0x808   :  { %4995 = vperm.xlu1 %8280, %v11239_v49   ;;  %vm4397_vm4 = vcmp.gt.f32.partialorder %v4381_v52, 0.0  ;;  %v3832_v31 = vsel %vm136_vm0, %v11375_v30, -1e+30  ;;  %vm4398_vm7 = vcmp.gt.f32.partialorder %v4382_v48, 0.0 }
 0x80a   :  { %v3686_v26 = vpop.permute.xlu1 %3685  ;;  %v11357_v27 = vpop.permute.xlu0 %4955 }
 0x80b   :  { %v3755_v32 = vadd.f32 %v11352_v44, %v3686_v26 }
 0x80c   :  { %8282 = vset.pattern.permute.xlu1 %v13336_v46 }
 0x80d   :  { %3730 = vperm.xlu1 %8282, %v11243_v54   ;;  %vm3771_vm5 = vcmp.gt.f32.partialorder %v3755_v32, 0.0 }
 0x80f   :  { %v4327_v20 = vpop.permute.xlu1 %4326  ;;  %v11367_v58 = vpop.permute.xlu0 %5584 }
 0x811   :  { %8287 = vset.pattern.permute.xlu1 %v13335_v17  ;;  %v4413_v17 = vmul.f32 0.2, %v4381_v52 }
 0x812   :  { %4374 = vperm.xlu1 %8287, %v11245_v59  }
 0x813   :  { %v4429_v62 = vsel %vm4397_vm4, %v4381_v52, %v4413_v17 }
 0x814   :  { %v3681_v29 = vpop.permute.xlu1 %3680  ;;  %v11379_v45 = vpop.permute.xlu0 %4330 }
 0x815   :  { %v3754_v38 = vadd.f32 %v11352_v44, %v3681_v29 }
 0x816   :  { %8288 = vset.pattern.permute.xlu1 %v13337_v42  ;;  %v3787_v42 = vmul.f32 0.2, %v3755_v32 }
 0x817   :  { %5003 = vperm.xlu1 %8288, %v11245_v59   ;;  %vm3770_vm9 = vcmp.gt.f32.partialorder %v3754_v38, 0.0 }
 0x818   :  { %v3803_v49 = vsel %vm3771_vm5, %v3755_v32, %v3787_v42  ;;  %v3785_v32 = vmul.f32 0.2, %v3753_v41 }
 0x819   :  { %v4323_v12 = vpop.permute.xlu1 %4322  ;;  %v11397_v11 = vmul.f32 %v11394_v34, %v3803_v49  ;;  %v4384_v49 = vadd.f32 %v11362_v40, %v4327_v20 }
 0x81b   :  { %8289 = vset.pattern.permute.xlu1 %v13336_v46  ;;  %v11385_v46 = vmul.f32 %v11372_v19, %v4429_v62  ;;  %v3835_v36 = vsel %vm136_vm0, %v11397_v11, -1e+30  ;;  %v4416_v50 = vmul.f32 0.2, %v4384_v49  ;;  %vm4400_vm8 = vcmp.gt.f32.partialorder %v4384_v49, 0.0 }
 0x81c   :  { %3740 = vperm.xlu1 %8289, %v11249_v23   ;;  %v11389_v23 = vpop.permute.xlu0 %5600 }
 0x81d   :  { %v4461_v63 = vsel %vm136_vm0, %v11385_v46, -1e+30 }
 0x81e   :  { %v11377_v39 = vpop.permute.xlu1 %4951 }
 0x820   :  { %v11402_v25 = vpop.permute.xlu0 %4338 }
 0x822   :  { %3848 = vmax.xlane.f32.xlu0 %v3832_v31  ;;  %v4414_v31 = vmul.f32 0.2, %v4382_v48 }
 0x823   :  { %v11387_v54 = vpop.permute.xlu1 %5580 }
 0x824   :  { %v11406_v52 = vpop.permute.xlu0 %4967  ;;  %v4430_v6 = vsel %vm4398_vm7, %v4382_v48, %v4414_v31 }
 0x826   :  { %4477 = vmax.xlane.f32.xlu0 %v4461_v63  ;;  %v3801_v63 = vsel %vm3769_vm6, %v3753_v41, %v3785_v32  ;;  %v3786_v41 = vmul.f32 0.2, %v3754_v38  ;;  %v4383_v32 = vadd.f32 %v11362_v40, %v4323_v12  ;;  %v11447_v12 = vld [vmem:[#allocation5 + $0x10] sm:$0xff] }
 0x828   :  { %v3696_v26 = vpop.permute.xlu1 %3695  ;;  %v11411_v42 = vpop.permute.xlu0 %5596  ;;  %v4415_v16 = vmul.f32 0.2, %v4383_v32  ;;  %v3802_v53 = vsel %vm3770_vm9, %v3754_v38, %v3786_v41  ;;  %vm4399_vm11 = vcmp.gt.f32.partialorder %v4383_v32, 0.0 }
 0x82a   :  { %3854 = vmax.xlane.f32.xlu0 %v3835_v36  ;;  %v11416_v36 = vld [vmem:[#allocation5 + $0x8] sm:$0xff]  ;;  %v4431_v14 = vsel %vm4399_vm11, %v4383_v32, %v4415_v16 }
 0x82b   :  { %v11419_v0 = vmul.f32 %v11416_v36, %v3801_v63  ;;  %v11428_v20 = vmul.f32 %v11416_v36, %v4430_v6  ;;  %v4432_v63 = vsel %vm4400_vm8, %v4384_v49, %v4416_v50  ;;  %v3757_v6 = vadd.f32 %v11352_v44, %v3696_v26  ;;  %v11467_v32 = vld [vmem:[#allocation5 + $0x28] sm:$0xff] }
 0x82c   :  { %v11439_v31 = vmul.f32 %v11394_v34, %v4432_v63  ;;  %v11450_v49 = vmul.f32 %v11447_v12, %v3802_v53 }
 0x82d   :  { %v4335_v55 = vpop.permute.xlu1 %4334  ;;  %v11422_v43 = vpop.permute.xlu0 %3715  ;;  %v3833_v7 = vsel %vm136_vm0, %v11419_v0, -1e+30  ;;  %v4462_v48 = vsel %vm136_vm0, %v11428_v20, -1e+30  ;;  %v3789_v21 = vmul.f32 0.2, %v3757_v6 }
 0x82e   :  { %13342 = vst [vmem:[#allocation48_spill] sm:$0xff] %v11439_v31  ;;  %v4464_v50 = vsel %vm136_vm0, %v11439_v31, -1e+30  ;;  %v4386_v63 = vadd.f32 %v11362_v40, %v4335_v55  ;;  %vm3773_vm12 = vcmp.gt.f32.partialorder %v3757_v6, 0.0  ;;  %v3834_v41 = vsel %vm136_vm0, %v11450_v49, -1e+30 }
 0x82f   :  { %v3805_v61 = vsel %vm3773_vm12, %v3757_v6, %v3789_v21 }
 0x830   :  { %v4418_v51 = vmul.f32 0.2, %v4386_v63  ;;  %vm4402_vm13 = vcmp.gt.f32.partialorder %v4386_v63, 0.0 }
 0x832   :  { %v11408_v17 = vpop.permute.xlu1 %4963  ;;  %v11433_v29 = vpop.permute.xlu0 %4979 }
 0x837   :  { %v11413_v62 = vpop.permute.xlu1 %5592  ;;  %v11453_v26 = vpop.permute.xlu0 %5608 }
 0x838   :  { %13343 = vst [vmem:[#allocation61_spill] sm:$0xff] %v11453_v26 }
 0x83c   :  { %v3691_v56 = vpop.permute.xlu1 %3690  ;;  %v11462_v55 = vpop.permute.xlu0 %4346 }
 0x83d   :  { %v3756_v53 = vadd.f32 %v11352_v44, %v3691_v56  ;;  %v4434_v56 = vsel %vm4402_vm13, %v4386_v63, %v4418_v51  ;;  %v11488_v63 = vld [vmem:[#allocation5 + $0x20] sm:$0xff] }
 0x83e   :  { %v11478_v6 = vmul.f32 %v11467_v32, %v4434_v56 }
 0x83f   :  { %v3788_v3 = vmul.f32 0.2, %v3756_v53  ;;  %vm3772_vm14 = vcmp.gt.f32.partialorder %v3756_v53, 0.0 }
 0x840   :  { %3850 = vmax.xlane.f32.xlu1 %v3833_v7  ;;  %13345 = vst [vmem:[#allocation54_spill] sm:$0xff] %v11478_v6  ;;  %v4466_v51 = vsel %vm136_vm0, %v11478_v6, -1e+30 }
 0x841   :  { %v11431_v60 = vpop.permute.xlu1 %4959  ;;  %v11481_v47 = vpop.permute.xlu0 %5604 }
 0x844   :  { %4479 = vmax.xlane.f32.xlu1 %v4462_v48  ;;  %v11459_v48 = vmul.f32 %v11447_v12, %v4431_v14  ;;  %v4385_v14 = vadd.f32 %v11362_v40, %v11379_v45 }
 0x846   :  { %v11442_v7 = vpop.permute.xlu1 %5588  ;;  %13344 = vst [vmem:[#allocation51_spill] sm:$0xff] %v11459_v48  ;;  %v4463_v16 = vsel %vm136_vm0, %v11459_v48, -1e+30  ;;  %vm4401_vm15 = vcmp.gt.f32.partialorder %v4385_v14, 0.0 }
 0x848   :  { %4483 = vmax.xlane.f32.xlu1 %v4464_v50  ;;  %v11470_v50 = vmul.f32 %v11467_v32, %v3805_v61  ;;  %v3804_v61 = vsel %vm3772_vm14, %v3756_v53, %v3788_v3  ;;  %v3726_v53 = vpop.permute.xlu0 %3725 }
 0x84a   :  { %v3837_v21 = vsel %vm136_vm0, %v11470_v50, -1e+30 }
 0x84b   :  { %v3706_v38 = vpop.permute.xlu1 %3705 }
 0x84c   :  { %3852 = vmax.xlane.f32.xlu1 %v3834_v41  ;;  %v4417_v41 = vmul.f32 0.2, %v4385_v14  ;;  %v3759_v13 = vadd.f32 %v11352_v44, %v3706_v38  ;;  %v11518_v33 = vpop.permute.xlu0 %5616 }
 0x84d   :  { %13349 = vst [vmem:[#allocation85_spill] sm:$0xff] %v11518_v33 }
 0x84e   :  { %v3791_v56 = vmul.f32 0.2, %v3759_v13  ;;  %v4433_v38 = vsel %vm4401_vm15, %v4385_v14, %v4417_v41  ;;  %vm3775_vm1 = vcmp.gt.f32.partialorder %v3759_v13, 0.0 }
 0x84f   :  { %v11499_v10 = vmul.f32 %v11488_v63, %v4433_v38 }
 0x850   :  { %v4343_v8 = vpop.permute.xlu1 %4342  ;;  %4481 = vmax.xlane.f32.xlu1 %v4463_v16  ;;  %v11491_v16 = vmul.f32 %v11488_v63, %v3804_v61  ;;  %v4387_v61 = vadd.f32 %v11362_v40, %v11402_v25  ;;  %v3761_v25 = vadd.f32 %v11352_v44, %v11422_v43  ;;  %v11531_v4 = vpop.permute.xlu0 %4354 }
 0x851   :  { %v4388_v37 = vadd.f32 %v11362_v40, %v4343_v8  ;;  %13346 = vst [vmem:[#allocation77_spill] sm:$0xff] %v11499_v10  ;;  %v3807_v8 = vsel %vm3775_vm1, %v3759_v13, %v3791_v56  ;;  %v11513_v13 = vld [vmem:[#allocation5 + $0x30] sm:$0xff] }
 0x852   :  { %v3836_v35 = vsel %vm136_vm0, %v11491_v16, -1e+30  ;;  %v11509_v38 = vmul.f32 %v11506_v5, %v3807_v8  ;;  %v4419_v28 = vmul.f32 0.2, %v4387_v61  ;;  %vm4403_vm10 = vcmp.gt.f32.partialorder %v4387_v61, 0.0 }
 0x853   :  { %v4420_v2 = vmul.f32 0.2, %v4388_v37  ;;  %vm4404_vm2 = vcmp.gt.f32.partialorder %v4388_v37, 0.0  ;;  %vm3777_vm4 = vcmp.gt.f32.partialorder %v3761_v25, 0.0 }
 0x854   :  { %3858 = vmax.xlane.f32.xlu1 %v3837_v21  ;;  %13347 = vst [vmem:[#allocation73_spill] sm:$0xff] %v11509_v38  ;;  %v3839_v8 = vsel %vm136_vm0, %v11509_v38, -1e+30 }
 0x855   :  { %v11483_v45 = vpop.permute.xlu1 %4971  ;;  %v4436_v56 = vsel %vm4404_vm2, %v4388_v37, %v4420_v2  ;;  %v4435_v2 = vsel %vm4403_vm10, %v4387_v61, %v4419_v28 }
 0x856   :  { %v11527_v43 = vmul.f32 %v11506_v5, %v4436_v56  ;;  %v11537_v56 = vmul.f32 %v11513_v13, %v4435_v2 }
 0x858   :  { %4487 = vmax.xlane.f32.xlu1 %v4466_v51  ;;  %v4465_v51 = vsel %vm136_vm0, %v11499_v10, -1e+30  ;;  %13350 = vst [vmem:[#allocation76_spill] sm:$0xff] %v11527_v43  ;;  %v4468_v31 = vsel %vm136_vm0, %v11527_v43, -1e+30  ;;  %13351 = vst [vmem:[#allocation59_spill] sm:$0xff] %v11537_v56 }
 0x859   :  { %v4467_v2 = vsel %vm136_vm0, %v11537_v56, -1e+30  ;;  %v11551_v43 = vld [vmem:[#allocation5 + $0x48] sm:$0xff] }
 0x85a   :  { %v3701_v3 = vpop.permute.xlu1 %3700 }
 0x85b   :  { %v3758_v21 = vadd.f32 %v11352_v44, %v3701_v3 }
 0x85c   :  { %3856 = vmax.xlane.f32.xlu1 %v3836_v35 }
 0x85d   :  { %vm3774_vm3 = vcmp.gt.f32.partialorder %v3758_v21, 0.0  ;;  %v3790_v14 = vmul.f32 0.2, %v3758_v21 }
 0x85f   :  { %v4351_v41 = vpop.permute.xlu1 %4350  ;;  %v3806_v3 = vsel %vm3774_vm3, %v3758_v21, %v3790_v14  ;;  %v3793_v14 = vmul.f32 0.2, %v3761_v25 }
 0x860   :  { %4485 = vmax.xlane.f32.xlu1 %v4465_v51  ;;  %v11516_v35 = vmul.f32 %v11513_v13, %v3806_v3  ;;  %v4390_v51 = vadd.f32 %v11362_v40, %v4351_v41  ;;  %v4389_v41 = vadd.f32 %v11362_v40, %v11462_v55 }
 0x861   :  { %v3809_v28 = vsel %vm3777_vm4, %v3761_v25, %v3793_v14  ;;  %v3763_v25 = vadd.f32 %v11352_v44, %v3726_v53 }
 0x862   :  { %13348 = vst [vmem:[#allocation80_spill] sm:$0xff] %v11516_v35  ;;  %v3838_v21 = vsel %vm136_vm0, %v11516_v35, -1e+30  ;;  %vm4406_vm6 = vcmp.gt.f32.partialorder %v4390_v51, 0.0  ;;  %v11554_v55 = vmul.f32 %v11551_v43, %v3809_v28  ;;  %vm4405_vm7 = vcmp.gt.f32.partialorder %v4389_v41, 0.0 }
 0x863   :  { %3860 = vmax.xlane.f32.xlu0 %v3838_v21  ;;  %v4422_v21 = vmul.f32 0.2, %v4390_v51  ;;  %v3795_v6 = vmul.f32 0.2, %v3763_v25  ;;  %vm3779_vm8 = vcmp.gt.f32.partialorder %v3763_v25, 0.0 }
 0x864   :  { %v3711_v3 = vpop.permute.xlu1 %3710  ;;  %3862 = vmax.xlane.f32.xlu1 %v3839_v8  ;;  %13353 = vst [vmem:[#allocation84_spill] sm:$0xff] %v11554_v55  ;;  %v3841_v56 = vsel %vm136_vm0, %v11554_v55, -1e+30 }
 0x865   :  { %v3760_v37 = vadd.f32 %v11352_v44, %v3711_v3  ;;  %v11543_v3 = vld [vmem:[#allocation5 + $0x40] sm:$0xff]  ;;  %v4438_v14 = vsel %vm4406_vm6, %v4390_v51, %v4422_v21  ;;  %v13356_v21 = vsub.s32 2, %v13338_v1 }
 0x866   :  { %v11566_v28 = vmul.f32 %v11551_v43, %v4438_v14 }
 0x867   :  { %vm3776_vm5 = vcmp.gt.f32.partialorder %v3760_v37, 0.0  ;;  %v3792_v10 = vmul.f32 0.2, %v3760_v37 }
 0x868   :  { %4491 = vmax.xlane.f32.xlu1 %v4468_v31  ;;  %v4421_v31 = vmul.f32 0.2, %v4389_v41  ;;  %13355 = vst [vmem:[#allocation31_spill] sm:$0xff] %v11566_v28  ;;  %v4470_v14 = vsel %vm136_vm0, %v11566_v28, -1e+30 }
 0x869   :  { %v11541_v61 = vpop.permute.xlu1 %4975  ;;  %v3808_v8 = vsel %vm3776_vm5, %v3760_v37, %v3792_v10  ;;  %v11557_v10 = vpop.permute.xlu0 %5612 }
 0x86a   :  { %v11546_v48 = vmul.f32 %v11543_v3, %v3808_v8  ;;  %13354 = vst [vmem:[#allocation82_spill] sm:$0xff] %v11557_v10  ;;  %v4437_v51 = vsel %vm4405_vm7, %v4389_v41, %v4421_v31  ;;  %v3811_v31 = vsel %vm3779_vm8, %v3763_v25, %v3795_v6 }
 0x86b   :  { %v11582_v55 = vmul.f32 %v11543_v3, %v4437_v51 }
 0x86c   :  { %13352 = vst [vmem:[#allocation37_spill] sm:$0xff] %v11546_v48  ;;  %4489 = vmax.xlane.f32.xlu1 %v4467_v2  ;;  %v3840_v37 = vsel %vm136_vm0, %v11546_v48, -1e+30  ;;  %v11572_v2 = vrot.slane %v11270_v22, %v13356_v21  ;;  %v11589_v21 = vld [vmem:[#allocation5 + $0x58] sm:$0xff] }
 0x86d   :  { %3864 = vmax.xlane.f32.xlu0 %v3840_v37  ;;  %v11574_v37 = vpop.permute.xlu0 %3735  ;;  %13357 = vst [vmem:[#allocation32_spill] sm:$0xff] %v11582_v55  ;;  %v11592_v33 = vmul.f32 %v11589_v21, %v3811_v31 }
 0x86e   :  { %v4359_v8 = vpop.permute.xlu1 %4358  ;;  %v5011_v51 = vadd.f32 %v11572_v2, %v11323_v15  ;;  %v5012_v15 = vadd.f32 %v11572_v2, %v11377_v39  ;;  %v5013_v39 = vadd.f32 %v11572_v2, %v11357_v27  ;;  %v5014_v27 = vadd.f32 %v11572_v2, %v11431_v60 }
 0x86f   :  { %v4392_v53 = vadd.f32 %v11362_v40, %v4359_v8  ;;  %v4469_v8 = vsel %vm136_vm0, %v11582_v55, -1e+30  ;;  %13358 = vst [vmem:[#allocation83_spill] sm:$0xff] %v11592_v33  ;;  %v3843_v55 = vsel %vm136_vm0, %v11592_v33, -1e+30 }
 0x870   :  { %3866 = vmax.xlane.f32.xlu1 %v3841_v56  ;;  %v5010_v56 = vadd.f32 %v11572_v2, %v11341_v57  ;;  %v5043_v26 = vmul.f32 0.2, %v5011_v51  ;;  %vm5027_vm13 = vcmp.gt.f32.partialorder %v5011_v51, 0.0  ;;  %vm5028_vm14 = vcmp.gt.f32.partialorder %v5012_v15, 0.0 }
 0x871   :  { %v4424_v41 = vmul.f32 0.2, %v4392_v53  ;;  %vm4408_vm9 = vcmp.gt.f32.partialorder %v4392_v53, 0.0  ;;  %vm5029_vm15 = vcmp.gt.f32.partialorder %v5013_v39, 0.0  ;;  %vm5030_vm1 = vcmp.gt.f32.partialorder %v5014_v27, 0.0 }
 0x872   :  { %v5042_v28 = vmul.f32 0.2, %v5010_v56  ;;  %vm5026_vm11 = vcmp.gt.f32.partialorder %v5010_v56, 0.0 }
 0x873   :  { %v11576_v48 = vpop.permute.xlu1 %4987  ;;  %v4440_v57 = vsel %vm4408_vm9, %v4392_v53, %v4424_v41 }
 0x874   :  { %4495 = vmax.xlane.f32.xlu1 %v4470_v14  ;;  %v11596_v14 = vpop.permute.xlu0 %5624  ;;  %v11603_v31 = vmul.f32 %v11589_v21, %v4440_v57  ;;  %v5058_v53 = vsel %vm5026_vm11, %v5010_v56, %v5042_v28  ;;  %v5059_v28 = vsel %vm5027_vm13, %v5011_v51, %v5043_v26 }
 0x875   :  { %13359 = vst [vmem:[#allocation34_spill] sm:$0xff] %v11596_v14  ;;  %v11620_v33 = vmul.f32 %v11372_v19, %v5058_v53  ;;  %v11631_v53 = vmul.f32 %v11416_v36, %v5059_v28  ;;  %v5046_v28 = vmul.f32 0.2, %v5014_v27 }
 0x876   :  { %13360 = vst [vmem:[#allocation43_spill] sm:$0xff] %v11603_v31  ;;  %v4472_v57 = vsel %vm136_vm0, %v11603_v31, -1e+30  ;;  %v4391_v31 = vadd.f32 %v11362_v40, %v11531_v4 }
 0x877   :  { %13362 = vst [vmem:[#allocation57_spill] sm:$0xff] %v11620_v33  ;;  %13363 = vst [vmem:[#allocation56_spill] sm:$0xff] %v11631_v53  ;;  %v5062_v35 = vsel %vm5030_vm1, %v5014_v27, %v5046_v28 }
 0x878   :  { %v3721_v10 = vpop.permute.xlu1 %3720  ;;  %4493 = vmax.xlane.f32.xlu1 %v4469_v8  ;;  %v11614_v38 = vpop.permute.xlu0 %4362  ;;  %vm4407_vm2 = vcmp.gt.f32.partialorder %v4391_v31, 0.0 }
 0x879   :  { %v3762_v6 = vadd.f32 %v11352_v44, %v3721_v10  ;;  %v11609_v10 = vld [vmem:[#allocation5 + $0x50] sm:$0xff] }
 0x87b   :  { %vm3778_vm12 = vcmp.gt.f32.partialorder %v3762_v6, 0.0  ;;  %v3794_v25 = vmul.f32 0.2, %v3762_v6 }
 0x87c   :  { %3870 = vmax.xlane.f32.xlu1 %v3843_v55  ;;  %v5044_v55 = vmul.f32 0.2, %v5012_v15  ;;  %v11635_v51 = vpop.permute.xlu0 %4991 }
 0x87d   :  { %v11607_v41 = vpop.permute.xlu1 %4983  ;;  %v3810_v8 = vsel %vm3778_vm12, %v3762_v6, %v3794_v25  ;;  %v5090_v25 = vsel %vm136_vm0, %v11620_v33, -1e+30 }
 0x87e   :  { %v11612_v14 = vmul.f32 %v11609_v10, %v3810_v8  ;;  %v5045_v8 = vmul.f32 0.2, %v5013_v39  ;;  %v5060_v26 = vsel %vm5028_vm14, %v5012_v15, %v5044_v55 }
 0x87f   :  { %v11643_v33 = vmul.f32 %v11447_v12, %v5060_v26 }
 0x880   :  { %13361 = vst [vmem:[#allocation58_spill] sm:$0xff] %v11612_v14  ;;  %4499 = vmax.xlane.f32.xlu1 %v4472_v57  ;;  %v3842_v56 = vsel %vm136_vm0, %v11612_v14, -1e+30  ;;  %v5061_v60 = vsel %vm5029_vm15, %v5013_v39, %v5045_v8  ;;  %v11647_v15 = vpop.permute.xlu0 %5620  ;;  %v11660_v39 = vmul.f32 %v11488_v63, %v5062_v35 }
 0x881   :  { %3868 = vmax.xlane.f32.xlu0 %v3842_v56  ;;  %v5091_v56 = vsel %vm136_vm0, %v11631_v53, -1e+30  ;;  %13364 = vst [vmem:[#allocation40_spill] sm:$0xff] %v11643_v33  ;;  %13365 = vst [vmem:[#allocation81_spill] sm:$0xff] %v11647_v15  ;;  %v5092_v55 = vsel %vm136_vm0, %v11643_v33, -1e+30 }
 0x882   :  { %v4367_v6 = vpop.permute.xlu1 %4366  ;;  %v4423_v53 = vmul.f32 0.2, %v4391_v31  ;;  %13367 = vst [vmem:[#allocation65_spill] sm:$0xff] %v11660_v39 }
 0x883   :  { %v4394_v26 = vadd.f32 %v11362_v40, %v4367_v6  ;;  %v5094_v6 = vsel %vm136_vm0, %v11660_v39, -1e+30 }
 0x884   :  { %5106 = vmax.xlane.f32.xlu1 %v5090_v25  ;;  %v11653_v25 = vmul.f32 %v11394_v34, %v5061_v60  ;;  %v4439_v60 = vsel %vm4407_vm2, %v4391_v31, %v4423_v53  ;;  %v3746_v33 = vpop.permute.xlu0 %3745  ;;  %v11675_v31 = vld [vmem:[#allocation5 + $0x68] sm:$0xff] }
 0x885   :  { %v4426_v8 = vmul.f32 0.2, %v4394_v26  ;;  %vm4410_vm3 = vcmp.gt.f32.partialorder %v4394_v26, 0.0  ;;  %v11667_v27 = vmul.f32 %v11609_v10, %v4439_v60  ;;  %v3767_v28 = vadd.f32 %v11352_v44, %v3746_v33 }
 0x886   :  { %13366 = vst [vmem:[#allocation63_spill] sm:$0xff] %v11653_v25  ;;  %v5093_v4 = vsel %vm136_vm0, %v11653_v25, -1e+30 }
 0x887   :  { %v11637_v57 = vpop.permute.xlu1 %4995  ;;  %13368 = vst [vmem:[#allocation46_spill] sm:$0xff] %v11667_v27  ;;  %v4442_v35 = vsel %vm4410_vm3, %v4394_v26, %v4426_v8  ;;  %vm3783_vm4 = vcmp.gt.f32.partialorder %v3767_v28, 0.0 }
 0x888   :  { %5108 = vmax.xlane.f32.xlu1 %v5091_v56  ;;  %v11678_v53 = vmul.f32 %v11675_v31, %v4442_v35 }
 0x88a   :  { %13369 = vst [vmem:[#allocation69_spill] sm:$0xff] %v11678_v53  ;;  %v4474_v8 = vsel %vm136_vm0, %v11678_v53, -1e+30 }
 0x88c   :  { %v3731_v14 = vpop.permute.xlu1 %3730  ;;  %5110 = vmax.xlane.f32.xlu1 %v5092_v55 }
 0x88d   :  { %v3764_v56 = vadd.f32 %v11352_v44, %v3731_v14  ;;  %v4471_v14 = vsel %vm136_vm0, %v11667_v27, -1e+30 }
 0x88f   :  { %v3796_v55 = vmul.f32 0.2, %v3764_v56  ;;  %vm3780_vm10 = vcmp.gt.f32.partialorder %v3764_v56, 0.0 }
 0x890   :  { %5112 = vmax.xlane.f32.xlu1 %v5093_v4  ;;  %v3799_v4 = vmul.f32 0.2, %v3767_v28 }
 0x891   :  { %v4375_v15 = vpop.permute.xlu1 %4374  ;;  %v3812_v33 = vsel %vm3780_vm10, %v3764_v56, %v3796_v55  ;;  %v11696_v55 = vld [vmem:[#allocation5 + $0x78] sm:$0xff] }
 0x892   :  { %v4396_v60 = vadd.f32 %v11362_v40, %v4375_v15  ;;  %v3815_v15 = vsel %vm3783_vm4, %v3767_v28, %v3799_v4  ;;  %v5018_v4 = vadd.f32 %v11572_v2, %v11541_v61  ;;  %v4371_v61 = vpop.permute.xlu0 %4370 }
 0x894   :  { %5114 = vmax.xlane.f32.xlu1 %v5094_v6  ;;  %v11685_v6 = vld [vmem:[#allocation5 + $0x60] sm:$0xff]  ;;  %v4428_v35 = vmul.f32 0.2, %v4396_v60  ;;  %vm4412_vm5 = vcmp.gt.f32.partialorder %v4396_v60, 0.0  ;;  %vm5034_vm8 = vcmp.gt.f32.partialorder %v5018_v4, 0.0 }
 0x895   :  { %v11688_v39 = vmul.f32 %v11685_v6, %v3812_v33 }
 0x896   :  { %v11670_v25 = vpop.permute.xlu1 %5003  ;;  %v4444_v53 = vsel %vm4412_vm5, %v4396_v60, %v4428_v35  ;;  %v11714_v35 = vld [vmem:[#allocation5 + $0x70] sm:$0xff] }
 0x897   :  { %5632 = vperm.xlu0 %8292, %v11245_v59   ;;  %13370 = vst [vmem:[#allocation74_spill] sm:$0xff] %v11688_v39  ;;  %v5016_v59 = vadd.f32 %v11572_v2, %v11406_v52  ;;  %v3844_v56 = vsel %vm136_vm0, %v11688_v39, -1e+30  ;;  %v11705_v52 = vmul.f32 %v11696_v55, %v4444_v53  ;;  %v5020_v39 = vadd.f32 %v11572_v2, %v11607_v41 }
 0x898   :  { %4497 = vmax.xlane.f32.xlu1 %v4471_v14  ;;  %v11699_v14 = vmul.f32 %v11696_v55, %v3815_v15  ;;  %v3765_v15 = vadd.f32 %v11352_v44, %v11574_v37 }
 0x899   :  { %vm5032_vm7 = vcmp.gt.f32.partialorder %v5016_v59, 0.0  ;;  %v4476_v60 = vsel %vm136_vm0, %v11705_v52, -1e+30  ;;  %vm5036_vm11 = vcmp.gt.f32.partialorder %v5020_v39, 0.0 }
 0x89a   :  { %13371 = vst [vmem:[#allocation49_spill] sm:$0xff] %v11699_v14  ;;  %v3847_v28 = vsel %vm136_vm0, %v11699_v14, -1e+30  ;;  %v5050_v14 = vmul.f32 0.2, %v5018_v4  ;;  %vm3781_vm9 = vcmp.gt.f32.partialorder %v3765_v15, 0.0 }
 0x89b   :  { %v3741_v26 = vpop.permute.xlu1 %3740 }
 0x89c   :  { %v3766_v27 = vadd.f32 %v11352_v44, %v3741_v26  ;;  %4503 = vmax.xlane.f32.xlu1 %v4474_v8  ;;  %v5048_v26 = vmul.f32 0.2, %v5016_v59  ;;  %v5015_v44 = vadd.f32 %v11572_v2, %v11408_v17  ;;  %v5066_v41 = vsel %vm5034_vm8, %v5018_v4, %v5050_v14 }
 0x89e   :  { %v3798_v33 = vmul.f32 0.2, %v3766_v27  ;;  %vm3782_vm6 = vcmp.gt.f32.partialorder %v3766_v27, 0.0  ;;  %v5064_v53 = vsel %vm5032_vm7, %v5016_v59, %v5048_v26  ;;  %v4395_v59 = vadd.f32 %v11362_v40, %v4371_v61 }
 0x89f   :  { %v11724_v37 = vmul.f32 %v11513_v13, %v5064_v53  ;;  %v5052_v26 = vmul.f32 0.2, %v5020_v39  ;;  %vm5031_vm12 = vcmp.gt.f32.partialorder %v5015_v44, 0.0 }
 0x8a0   :  { %3872 = vmax.xlane.f32.xlu1 %v3844_v56  ;;  %v3814_v8 = vsel %vm3782_vm6, %v3766_v27, %v3798_v33  ;;  %v3797_v27 = vmul.f32 0.2, %v3765_v15  ;;  %vm4411_vm13 = vcmp.gt.f32.partialorder %v4395_v59, 0.0 }
 0x8a1   :  { %v11717_v56 = vmul.f32 %v11714_v35, %v3814_v8  ;;  %13373 = vst [vmem:[#allocation52_spill] sm:$0xff] %v11724_v37  ;;  %v5096_v17 = vsel %vm136_vm0, %v11724_v37, -1e+30  ;;  %v4393_v8 = vadd.f32 %v11362_v40, %v11614_v38  ;;  %v5068_v61 = vsel %vm5036_vm11, %v5020_v39, %v5052_v26 }
 0x8a2   :  { %v3813_v53 = vsel %vm3781_vm9, %v3765_v15, %v3797_v27  ;;  %v11747_v38 = vmul.f32 %v11609_v10, %v5068_v61  ;;  %v5019_v39 = vadd.f32 %v11572_v2, %v11433_v29 }
 0x8a3   :  { %13372 = vst [vmem:[#allocation86_spill] sm:$0xff] %v11717_v56  ;;  %v3846_v33 = vsel %vm136_vm0, %v11717_v56, -1e+30  ;;  %v4427_v56 = vmul.f32 0.2, %v4395_v59  ;;  %v11739_v14 = vmul.f32 %v11675_v31, %v3813_v53  ;;  %vm4409_vm14 = vcmp.gt.f32.partialorder %v4393_v8, 0.0 }
 0x8a4   :  { %3878 = vmax.xlane.f32.xlu1 %v3847_v28  ;;  %v5047_v28 = vmul.f32 0.2, %v5015_v44  ;;  %v4425_v37 = vmul.f32 0.2, %v4393_v8  ;;  %v5100_v26 = vsel %vm136_vm0, %v11747_v38, -1e+30 }
 0x8a5   :  { %v4443_v15 = vsel %vm4411_vm13, %v4395_v59, %v4427_v56  ;;  %vm5035_vm1 = vcmp.gt.f32.partialorder %v5019_v39, 0.0 }
 0x8a6   :  { %v5063_v4 = vsel %vm5031_vm12, %v5015_v44, %v5047_v28  ;;  %v3845_v44 = vsel %vm136_vm0, %v11739_v14, -1e+30  ;;  %v4441_v56 = vsel %vm4409_vm14, %v4393_v8, %v4425_v37  ;;  %v5051_v28 = vmul.f32 0.2, %v5019_v39 }
 0x8a7   :  { %v11767_v59 = vmul.f32 %v11685_v6, %v4441_v56 }
 0x8a8   :  { %4507 = vmax.xlane.f32.xlu1 %v4476_v60  ;;  %v11736_v60 = vmul.f32 %v11543_v3, %v5066_v41  ;;  %v11761_v41 = vmul.f32 %v11714_v35, %v4443_v15  ;;  %v5067_v15 = vsel %vm5035_vm1, %v5019_v39, %v5051_v28 }
 0x8a9   :  { %v4473_v37 = vsel %vm136_vm0, %v11767_v59, -1e+30 }
 0x8aa   :  { %v5098_v40 = vsel %vm136_vm0, %v11736_v60, -1e+30  ;;  %v4475_v53 = vsel %vm136_vm0, %v11761_v41, -1e+30 }
 0x8ac   :  { %3876 = vmax.xlane.f32.xlu1 %v3846_v33  ;;  %v5017_v33 = vadd.f32 %v11572_v2, %v11483_v45  ;;  %v11755_v45 = vmul.f32 %v11467_v32, %v5063_v4  ;;  %v5022_v4 = vadd.f32 %v11572_v2, %v11635_v51 }
 0x8ae   :  { %v5049_v27 = vmul.f32 0.2, %v5017_v33  ;;  %vm5033_vm15 = vcmp.gt.f32.partialorder %v5017_v33, 0.0  ;;  %v5095_v29 = vsel %vm136_vm0, %v11755_v45, -1e+30  ;;  %vm5038_vm3 = vcmp.gt.f32.partialorder %v5022_v4, 0.0 }
 0x8b0   :  { %5118 = vmax.xlane.f32.xlu1 %v5096_v17  ;;  %v5021_v17 = vadd.f32 %v11572_v2, %v11576_v48  ;;  %v5065_v61 = vsel %vm5033_vm15, %v5017_v33, %v5049_v27  ;;  %v11782_v48 = vpop.permute.xlu0 %4999  ;;  %v5054_v27 = vmul.f32 0.2, %v5022_v4 }
 0x8b1   :  { %v11778_v8 = vmul.f32 %v11506_v5, %v5065_v61 }
 0x8b2   :  { %vm5037_vm2 = vcmp.gt.f32.partialorder %v5021_v17, 0.0  ;;  %v5070_v61 = vsel %vm5038_vm3, %v5022_v4, %v5054_v27 }
 0x8b3   :  { %v5097_v33 = vsel %vm136_vm0, %v11778_v8, -1e+30 }
 0x8b4   :  { %5122 = vmax.xlane.f32.xlu1 %v5098_v40  ;;  %v5053_v40 = vmul.f32 0.2, %v5021_v17  ;;  %v11792_v51 = vpop.permute.xlu0 %5628 }
 0x8b6   :  { %3874 = vmax.xlane.f32.xlu0 %v3845_v44  ;;  %v11788_v44 = vmul.f32 %v11551_v43, %v5067_v15  ;;  %v5069_v56 = vsel %vm5037_vm2, %v5021_v17, %v5053_v40  ;;  %v11811_v15 = vmul.f32 %v11685_v6, %v5070_v61 }
 0x8b8   :  { %5126 = vmax.xlane.f32.xlu1 %v5100_v26  ;;  %v5023_v26 = vadd.f32 %v11572_v2, %v11637_v57  ;;  %v5099_v39 = vsel %vm136_vm0, %v11788_v44, -1e+30  ;;  %v13374_v57 = vsub.s32 3, %v13338_v1  ;;  %13375 = vst [vmem:[#allocation87_spill] sm:$0xff] %v11811_v15 }
 0x8ba   :  { %5116 = vmax.xlane.f32.xlu0 %v5095_v29  ;;  %v11798_v29 = vmul.f32 %v11589_v21, %v5069_v56  ;;  %v5055_v28 = vmul.f32 0.2, %v5023_v26  ;;  %vm5039_vm10 = vcmp.gt.f32.partialorder %v5023_v26, 0.0  ;;  %v11805_v17 = vrot.slane %v11270_v22, %v13374_v57 }
 0x8bb   :  { %v5102_v22 = vsel %vm136_vm0, %v11811_v15, -1e+30 }
 0x8bc   :  { %4505 = vmax.xlane.f32.xlu1 %v4475_v53  ;;  %v5025_v53 = vadd.f32 %v11572_v2, %v11670_v25  ;;  %v5101_v40 = vsel %vm136_vm0, %v11798_v29, -1e+30  ;;  %v5071_v4 = vsel %vm5039_vm10, %v5023_v26, %v5055_v28 }
 0x8bd   :  { %v11820_v56 = vmul.f32 %v11675_v31, %v5071_v4 }
 0x8be   :  { %4501 = vmax.xlane.f32.xlu0 %v4473_v37  ;;  %v3849_v37 = vpop.xlane.xlu0 %3848  ;;  %v5057_v25 = vmul.f32 0.2, %v5025_v53  ;;  %vm5041_vm4 = vcmp.gt.f32.partialorder %v5025_v53, 0.0 }
 0x8bf   :  { %v3880_v26 = vsub.f32 %v11375_v30, %v3849_v37  ;;  %v5103_v4 = vsel %vm136_vm0, %v11820_v56, -1e+30 }
 0x8c1   :  { %v3896_v37 = vsel %vm136_vm0, %v3880_v26, -1e+30 }
 0x8c2   :  { %5120 = vmax.xlane.f32.xlu0 %v5097_v33  ;;  %v5639_v33 = vadd.f32 %v11805_v17, %v11346_v24  ;;  %v4478_v57 = vpop.xlane.xlu0 %4477  ;;  %v5073_v24 = vsel %vm5041_vm4, %v5025_v53, %v5057_v25  ;;  %v5641_v53 = vadd.f32 %v11805_v17, %v11387_v54  ;;  %v3912_v26 = vmul.f32 1.442695, %v3896_v37 }
 0x8c4   :  { %v5671_v61 = vmul.f32 0.2, %v5639_v33  ;;  %vm5655_vm5 = vcmp.gt.f32.partialorder %v5639_v33, 0.0  ;;  %vm5657_vm7 = vcmp.gt.f32.partialorder %v5641_v53, 0.0 }
 0x8c6   :  { %5124 = vmax.xlane.f32.xlu0 %v5099_v39  ;;  %v5640_v39 = vadd.f32 %v11805_v17, %v11331_v18  ;;  %v11832_v18 = vmul.f32 %v11696_v55, %v5073_v24  ;;  %v5687_v30 = vsel %vm5655_vm5, %v5639_v33, %v5671_v61  ;;  %v5673_v61 = vmul.f32 0.2, %v5641_v53 }
 0x8c7   :  { %v11849_v33 = vmul.f32 %v11372_v19, %v5687_v30 }
 0x8c8   :  { %v5672_v15 = vmul.f32 0.2, %v5640_v39  ;;  %vm5656_vm6 = vcmp.gt.f32.partialorder %v5640_v39, 0.0  ;;  %v5105_v54 = vsel %vm136_vm0, %v11832_v18, -1e+30 }
 0x8ca   :  { %5128 = vmax.xlane.f32.xlu0 %v5101_v40 }
 0x8cd   :  { %v3851_v27 = vpop.xlane.xlu1 %3850 }
 0x8ce   :  { %v3881_v1 = vsub.f32 %v11419_v0, %v3851_v27  ;;  %5130 = vmax.xlane.f32.xlu0 %v5102_v22 }
 0x8d0   :  { %v3897_v0 = vsel %vm136_vm0, %v3881_v1, -1e+30  ;;  %v3855_v1 = vpop.xlane.xlu0 %3854 }
 0x8d1   :  { %v3914_v28 = vmul.f32 1.442695, %v3897_v0  ;;  %v4480_v40 = vpop.xlane.xlu1 %4479  ;;  %v5642_v0 = vadd.f32 %v11805_v17, %v11367_v58 }
 0x8d2   :  { %v4510_v27 = vsub.f32 %v11428_v20, %v4480_v40  ;;  %5132 = vmax.xlane.f32.xlu0 %v5103_v4  ;;  %v4509_v20 = vsub.f32 %v11385_v46, %v4478_v57  ;;  %v5688_v46 = vsel %vm5656_vm6, %v5640_v39, %v5672_v15  ;;  %v5643_v4 = vadd.f32 %v11805_v17, %v11442_v7 }
 0x8d3   :  { %8549 = vpow2.f32 %v3914_v28  ;;  %v3883_v28 = vsub.f32 %v11397_v11, %v3855_v1  ;;  %vm5658_vm8 = vcmp.gt.f32.partialorder %v5642_v0, 0.0  ;;  %v5674_v58 = vmul.f32 0.2, %v5642_v0 }
 0x8d4   :  { %v4526_v25 = vsel %vm136_vm0, %v4510_v27, -1e+30  ;;  %v4525_v57 = vsel %vm136_vm0, %v4509_v20, -1e+30  ;;  %v5719_v27 = vsel %vm136_vm0, %v11849_v33, -1e+30  ;;  %v11858_v19 = vmul.f32 %v11416_v36, %v5688_v46 }
 0x8d5   :  { %v4543_v22 = vmul.f32 1.442695, %v4526_v25  ;;  %v11841_v24 = vpop.xlane.xlu1 %4483  ;;  %v4541_v15 = vmul.f32 1.442695, %v4525_v57  ;;  %v5689_v39 = vsel %vm5657_vm7, %v5641_v53, %v5673_v61  ;;  %v3899_v11 = vsel %vm136_vm0, %v3883_v28, -1e+30 }
 0x8d6   :  { %5136 = vmax.xlane.f32.xlu0 %v5105_v54  ;;  %v5720_v36 = vsel %vm136_vm0, %v11858_v19, -1e+30  ;;  %v11874_v7 = vmul.f32 %v11447_v12, %v5689_v39  ;;  %v5690_v53 = vsel %vm5658_vm8, %v5642_v0, %v5674_v58  ;;  %v5644_v25 = vadd.f32 %v11805_v17, %v11413_v62 }
 0x8d7   :  { %8551 = vpow2.f32 %v4543_v22  ;;  %v5675_v1 = vmul.f32 0.2, %v5643_v4  ;;  %vm5659_vm9 = vcmp.gt.f32.partialorder %v5643_v4, 0.0  ;;  %v5645_v12 = vadd.f32 %v11805_v17, %v11411_v42 }
 0x8d8   :  { %8553 = vpow2.f32 %v3912_v26  ;;  %v5721_v62 = vsel %vm136_vm0, %v11874_v7, -1e+30  ;;  %v11891_v0 = vmul.f32 %v11394_v34, %v5690_v53  ;;  %v5676_v46 = vmul.f32 0.2, %v5644_v25 }
 0x8d9   :  { %v3853_v40 = vpop.xlane.xlu1 %3852  ;;  %8555 = vpow2.f32 %v4541_v15  ;;  %v5691_v28 = vsel %vm5659_vm9, %v5643_v4, %v5675_v1  ;;  %vm5660_vm11 = vcmp.gt.f32.partialorder %v5644_v25, 0.0  ;;  %v5677_v58 = vmul.f32 0.2, %v5645_v12 }
 0x8da   :  { %5735 = vmax.xlane.f32.xlu0 %v5719_v27  ;;  %v3882_v30 = vsub.f32 %v11450_v49, %v3853_v40  ;;  %v3918_v49 = vmul.f32 1.442695, %v3899_v11  ;;  %v5722_v27 = vsel %vm136_vm0, %v11891_v0, -1e+30  ;;  %v11904_v34 = vmul.f32 %v11488_v63, %v5691_v28  ;;  %v13376_v28 = vld [vmem:[#allocation80_spill] sm:$0xff] }
 0x8db   :  { %v5024_v4 = vadd.f32 %v11572_v2, %v11782_v48  ;;  %v5692_v39 = vsel %vm5660_vm11, %v5644_v25, %v5676_v46  ;;  %vm5661_vm12 = vcmp.gt.f32.partialorder %v5645_v12, 0.0  ;;  %v5646_v2 = vadd.f32 %v11805_v17, %v11389_v23 }
 0x8dc   :  { %v3898_v22 = vsel %vm136_vm0, %v3882_v30, -1e+30  ;;  %8557 = vpow2.f32 %v3918_v49  ;;  %v5723_v53 = vsel %vm136_vm0, %v11904_v34, -1e+30  ;;  %v11916_v63 = vmul.f32 %v11467_v32, %v5692_v39 }
 0x8dd   :  { %v11865_v37 = vpop.eup %8549  ;;  %v11867_v20 = vpop.xlane.xlu1 %4481  ;;  %v3916_v57 = vmul.f32 1.442695, %v3898_v22  ;;  %v5056_v48 = vmul.f32 0.2, %v5024_v4  ;;  %v5693_v25 = vsel %vm5661_vm12, %v5645_v12, %v5677_v58  ;;  %vm5040_vm13 = vcmp.gt.f32.partialorder %v5024_v4, 0.0  ;;  %v13377_v58 = vld [vmem:[#allocation73_spill] sm:$0xff] }
 0x8de   :  { %3946 = vadd.xlane.f32.xlu1 %v11865_v37  ;;  %5737 = vmax.xlane.f32.xlu0 %v5720_v36  ;;  %v5724_v32 = vsel %vm136_vm0, %v11916_v63, -1e+30  ;;  %v11931_v23 = vmul.f32 %v11513_v13, %v5693_v25  ;;  %v5647_v12 = vadd.f32 %v11805_v17, %v11481_v47  ;;  %vm5662_vm14 = vcmp.gt.f32.partialorder %v5646_v2, 0.0 }
 0x8df   :  { %8559 = vpow2.f32 %v3916_v57 }
 0x8e0   :  { %v5725_v13 = vsel %vm136_vm0, %v11931_v23, -1e+30  ;;  %v5679_v39 = vmul.f32 0.2, %v5647_v12  ;;  %vm5663_vm15 = vcmp.gt.f32.partialorder %v5647_v12, 0.0 }
 0x8e1   :  { %v11881_v54 = vpop.eup %8551  ;;  %v3859_v61 = vpop.xlane.xlu1 %3858 }
 0x8e2   :  { %v3885_v26 = vsub.f32 %v11470_v50, %v3859_v61  ;;  %4575 = vadd.xlane.f32.xlu1 %v11881_v54  ;;  %5739 = vmax.xlane.f32.xlu0 %v5721_v62  ;;  %v11895_v40 = vpop.eup %8553  ;;  %v5678_v61 = vmul.f32 0.2, %v5646_v2 }
 0x8e3   :  { %v11908_v11 = vpop.eup %8555 }
 0x8e4   :  { %v3901_v42 = vsel %vm136_vm0, %v3885_v26, -1e+30  ;;  %v5072_v26 = vsel %vm5040_vm13, %v5024_v4, %v5056_v48 }
 0x8e5   :  { %v11897_v50 = vpop.xlane.xlu1 %4487  ;;  %v3922_v15 = vmul.f32 1.442695, %v3901_v42  ;;  %v11944_v47 = vmul.f32 %v11714_v35, %v5072_v26 }
 0x8e6   :  { %3944 = vadd.xlane.f32.xlu1 %v11895_v40  ;;  %5741 = vmax.xlane.f32.xlu0 %v5722_v27  ;;  %v11922_v1 = vpop.eup %8557 }
 0x8e7   :  { %8561 = vpow2.f32 %v3922_v15  ;;  %v13378_v15 = vld [vmem:[#allocation61_spill] sm:$0xff] }
 0x8e8   :  { %v5648_v4 = vadd.f32 %v11805_v17, %v13378_v15 }
 0x8e9   :  { %v3857_v30 = vpop.xlane.xlu1 %3856  ;;  %v11935_v62 = vpop.eup %8559 }
 0x8ea   :  { %v3884_v36 = vsub.f32 %v11491_v16, %v3857_v30  ;;  %4573 = vadd.xlane.f32.xlu1 %v11908_v11  ;;  %5743 = vmax.xlane.f32.xlu0 %v5723_v53  ;;  %v5694_v30 = vsel %vm5662_vm14, %v5646_v2, %v5678_v61  ;;  %v13379_v61 = vld [vmem:[#allocation82_spill] sm:$0xff]  ;;  %vm5664_vm1 = vcmp.gt.f32.partialorder %v5648_v4, 0.0 }
 0x8eb   :  { %v11961_v2 = vmul.f32 %v11506_v5, %v5694_v30  ;;  %v5649_v26 = vadd.f32 %v11805_v17, %v13379_v61  ;;  %v13381_v30 = vld [vmem:[#allocation37_spill] sm:$0xff] }
 0x8ec   :  { %v3900_v16 = vsel %vm136_vm0, %v3884_v36, -1e+30 }
 0x8ed   :  { %v3920_v49 = vmul.f32 1.442695, %v3900_v16  ;;  %v11924_v22 = vpop.xlane.xlu1 %4485  ;;  %vm5665_vm2 = vcmp.gt.f32.partialorder %v5649_v26, 0.0 }
 0x8ee   :  { %3950 = vadd.xlane.f32.xlu1 %v11922_v1  ;;  %5745 = vmax.xlane.f32.xlu0 %v5724_v32  ;;  %v5680_v32 = vmul.f32 0.2, %v5648_v4 }
 0x8ef   :  { %8563 = vpow2.f32 %v3920_v49  ;;  %v5104_v49 = vsel %vm136_vm0, %v11944_v47, -1e+30 }
 0x8f0   :  { %v3861_v46 = vpop.xlane.xlu0 %3860 }
 0x8f1   :  { %v3863_v57 = vpop.xlane.xlu1 %3862  ;;  %v3886_v42 = vsub.f32 %v13376_v28, %v3861_v46  ;;  %v11950_v53 = vpop.eup %8561  ;;  %v5695_v46 = vsel %vm5663_vm15, %v5647_v12, %v5679_v39  ;;  %v5681_v12 = vmul.f32 0.2, %v5649_v26  ;;  %v5696_v39 = vsel %vm5664_vm1, %v5648_v4, %v5680_v32 }
 0x8f2   :  { %v3887_v27 = vsub.f32 %v13377_v58, %v3863_v57  ;;  %3948 = vadd.xlane.f32.xlu1 %v11935_v62  ;;  %5747 = vmax.xlane.f32.xlu0 %v5725_v13  ;;  %v5726_v58 = vsel %vm136_vm0, %v11961_v2, -1e+30  ;;  %v11974_v5 = vmul.f32 %v11543_v3, %v5695_v46  ;;  %v11984_v3 = vmul.f32 %v11551_v43, %v5696_v39  ;;  %v13385_v43 = vld [vmem:[#allocation34_spill] sm:$0xff] }
 0x8f3   :  { %v3902_v48 = vsel %vm136_vm0, %v3886_v42, -1e+30  ;;  %v5697_v4 = vsel %vm5665_vm2, %v5649_v26, %v5681_v12  ;;  %v5652_v39 = vadd.f32 %v11805_v17, %v13385_v43 }
 0x8f4   :  { %v3903_v36 = vsel %vm136_vm0, %v3887_v27, -1e+30  ;;  %v3924_v57 = vmul.f32 1.442695, %v3902_v48  ;;  %v13380_v27 = vld [vmem:[#allocation85_spill] sm:$0xff]  ;;  %v12002_v26 = vmul.f32 %v11609_v10, %v5697_v4  ;;  %v5653_v4 = vadd.f32 %v11805_v17, %v11792_v51 }
 0x8f5   :  { %v3926_v25 = vmul.f32 1.442695, %v3903_v36  ;;  %v11954_v16 = vpop.xlane.xlu1 %4491  ;;  %v5650_v13 = vadd.f32 %v11805_v17, %v13380_v27  ;;  %v5727_v61 = vsel %vm136_vm0, %v11974_v5, -1e+30  ;;  %v13383_v27 = vld [vmem:[#allocation81_spill] sm:$0xff]  ;;  %vm5668_vm4 = vcmp.gt.f32.partialorder %v5652_v39, 0.0 }
 0x8f6   :  { %3954 = vadd.xlane.f32.xlu1 %v11950_v53  ;;  %5134 = vmax.xlane.f32.xlu0 %v5104_v49  ;;  %v5729_v43 = vsel %vm136_vm0, %v12002_v26, -1e+30  ;;  %vm5669_vm5 = vcmp.gt.f32.partialorder %v5653_v4, 0.0 }
 0x8f7   :  { %8565 = vpow2.f32 %v3926_v25  ;;  %v13382_v25 = vld [vmem:[#allocation84_spill] sm:$0xff]  ;;  %v5682_v46 = vmul.f32 0.2, %v5650_v13  ;;  %vm5666_vm3 = vcmp.gt.f32.partialorder %v5650_v13, 0.0 }
 0x8f8   :  { %8567 = vpow2.f32 %v3924_v57 }
 0x8f9   :  { %v11965_v28 = vpop.eup %8563  ;;  %v11967_v42 = vpop.xlane.xlu1 %4489 }
 0x8fa   :  { %3952 = vadd.xlane.f32.xlu1 %v11965_v28  ;;  %5749 = vmax.xlane.f32.xlu0 %v5726_v58  ;;  %v3865_v15 = vpop.xlane.xlu0 %3864  ;;  %v5651_v58 = vadd.f32 %v11805_v17, %v13383_v27 }
 0x8fb   :  { %v3888_v36 = vsub.f32 %v13381_v30, %v3865_v15 }
 0x8fc   :  { %v5683_v12 = vmul.f32 0.2, %v5651_v58  ;;  %vm5667_vm10 = vcmp.gt.f32.partialorder %v5651_v58, 0.0 }
 0x8fd   :  { %v3867_v48 = vpop.xlane.xlu1 %3866  ;;  %v3904_v32 = vsel %vm136_vm0, %v3888_v36, -1e+30 }
 0x8fe   :  { %v3889_v49 = vsub.f32 %v13382_v25, %v3867_v48  ;;  %5751 = vmax.xlane.f32.xlu0 %v5727_v61  ;;  %v5728_v25 = vsel %vm136_vm0, %v11984_v3, -1e+30  ;;  %v3928_v36 = vmul.f32 1.442695, %v3904_v32  ;;  %v13386_v32 = vld [vmem:[#allocation83_spill] sm:$0xff] }
 0x900   :  { %v3905_v57 = vsel %vm136_vm0, %v3889_v49, -1e+30  ;;  %v5698_v49 = vsel %vm5666_vm3, %v5650_v13, %v5682_v46  ;;  %v5699_v13 = vsel %vm5667_vm10, %v5651_v58, %v5683_v12 }
 0x901   :  { %v3930_v15 = vmul.f32 1.442695, %v3905_v57  ;;  %v11992_v30 = vpop.xlane.xlu1 %4495  ;;  %v11994_v48 = vpop.eup %8565  ;;  %v5684_v57 = vmul.f32 0.2, %v5652_v39  ;;  %v12013_v10 = vmul.f32 %v11589_v21, %v5698_v49  ;;  %v5685_v49 = vmul.f32 0.2, %v5653_v4 }
 0x902   :  { %13384 = vst [vmem:[#allocation27_spill] sm:$0xff] %v11994_v48  ;;  %5753 = vmax.xlane.f32.xlu0 %v5728_v25  ;;  %3958 = vadd.xlane.f32.xlu1 %v11994_v48  ;;  %v12007_v27 = vpop.eup %8567  ;;  %v12023_v48 = vmul.f32 %v11685_v6, %v5699_v13  ;;  %v13389_v13 = vld [vmem:[#allocation58_spill] sm:$0xff] }
 0x903   :  { %8569 = vpow2.f32 %v3930_v15  ;;  %v5730_v25 = vsel %vm136_vm0, %v12013_v10, -1e+30  ;;  %v5700_v21 = vsel %vm5668_vm4, %v5652_v39, %v5684_v57  ;;  %v5701_v57 = vsel %vm5669_vm5, %v5653_v4, %v5685_v49 }
 0x904   :  { %8571 = vpow2.f32 %v3928_v36  ;;  %v5731_v6 = vsel %vm136_vm0, %v12023_v48, -1e+30  ;;  %v12054_v4 = vmul.f32 %v11714_v35, %v5701_v57 }
 0x905   :  { %v12005_v61 = vpop.xlane.xlu1 %4493 }
 0x906   :  { %5755 = vmax.xlane.f32.xlu0 %v5729_v43  ;;  %3956 = vadd.xlane.f32.xlu1 %v12007_v27  ;;  %v12030_v43 = vmul.f32 %v11675_v31, %v5700_v21  ;;  %v13391_v21 = vld [vmem:[#allocation76_spill] sm:$0xff] }
 0x908   :  { %v5732_v31 = vsel %vm136_vm0, %v12030_v43, -1e+30 }
 0x909   :  { %v3871_v46 = vpop.xlane.xlu1 %3870 }
 0x90a   :  { %v3891_v15 = vsub.f32 %v13386_v32, %v3871_v46  ;;  %5757 = vmax.xlane.f32.xlu0 %v5730_v25  ;;  %v13388_v46 = vld [vmem:[#allocation54_spill] sm:$0xff] }
 0x90b   :  { %v4514_v32 = vsub.f32 %v13388_v46, %v11897_v50  ;;  %v4516_v46 = vsub.f32 %v13391_v21, %v11954_v16  ;;  %v5733_v16 = vsel %vm136_vm0, %v12054_v4, -1e+30 }
 0x90c   :  { %v3907_v51 = vsel %vm136_vm0, %v3891_v15, -1e+30 }
 0x90d   :  { %v12027_v36 = vpop.eup %8569  ;;  %v3934_v58 = vmul.f32 1.442695, %v3907_v51  ;;  %v4500_v12 = vpop.xlane.xlu1 %4499  ;;  %v4530_v50 = vsel %vm136_vm0, %v4514_v32, -1e+30  ;;  %v13392_v32 = vld [vmem:[#allocation31_spill] sm:$0xff] }
 0x90e   :  { %13387 = vst [vmem:[#allocation28_spill] sm:$0xff] %v12027_v36  ;;  %3962 = vadd.xlane.f32.xlu1 %v12027_v36  ;;  %5759 = vmax.xlane.f32.xlu0 %v5731_v6  ;;  %v3869_v39 = vpop.xlane.xlu0 %3868  ;;  %v12039_v25 = vpop.eup %8571  ;;  %v4551_v6 = vmul.f32 1.442695, %v4530_v50  ;;  %v4518_v36 = vsub.f32 %v13392_v32, %v11992_v30 }
 0x90f   :  { %8573 = vpow2.f32 %v3934_v58  ;;  %v3890_v15 = vsub.f32 %v13389_v13, %v3869_v39  ;;  %13390 = vst [vmem:[#allocation29_spill] sm:$0xff] %v12039_v25  ;;  %v4532_v13 = vsel %vm136_vm0, %v4516_v46, -1e+30  ;;  %v13394_v46 = vld [vmem:[#allocation43_spill] sm:$0xff] }
 0x910   :  { %v4534_v21 = vsel %vm136_vm0, %v4518_v36, -1e+30 }
 0x911   :  { %v12041_v51 = vpop.xlane.xlu1 %5106  ;;  %v3906_v58 = vsel %vm136_vm0, %v3890_v15, -1e+30  ;;  %v4559_v32 = vmul.f32 1.442695, %v4534_v21 }
 0x912   :  { %3960 = vadd.xlane.f32.xlu1 %v12039_v25  ;;  %v3932_v49 = vmul.f32 1.442695, %v3906_v58  ;;  %5761 = vmax.xlane.f32.xlu0 %v5732_v31  ;;  %v4555_v31 = vmul.f32 1.442695, %v4532_v13  ;;  %v4520_v58 = vsub.f32 %v13394_v46, %v4500_v12  ;;  %v13398_v46 = vld [vmem:[#allocation69_spill] sm:$0xff] }
 0x914   :  { %8575 = vpow2.f32 %v3932_v49 }
 0x915   :  { %v5109_v39 = vpop.xlane.xlu1 %5108  ;;  %8577 = vpow2.f32 %v4551_v6  ;;  %v4536_v6 = vsel %vm136_vm0, %v4520_v58, -1e+30 }
 0x916   :  { %5763 = vmax.xlane.f32.xlu0 %v5733_v16  ;;  %v5633_v15 = vpop.permute.xlu0 %5632  ;;  %8579 = vpow2.f32 %v4555_v31  ;;  %v4563_v12 = vmul.f32 1.442695, %v4536_v6 }
 0x917   :  { %v5654_v35 = vadd.f32 %v11805_v17, %v5633_v15  ;;  %8581 = vpow2.f32 %v4559_v32 }
 0x918   :  { %8583 = vpow2.f32 %v4563_v12 }
 0x919   :  { %v12064_v57 = vpop.eup %8573  ;;  %v12066_v50 = vpop.xlane.xlu1 %5110  ;;  %vm5670_vm6 = vcmp.gt.f32.partialorder %v5654_v35, 0.0  ;;  %v5686_v30 = vmul.f32 0.2, %v5654_v35 }
 0x91a   :  { %13393 = vst [vmem:[#allocation30_spill] sm:$0xff] %v12064_v57  ;;  %3966 = vadd.xlane.f32.xlu1 %v12064_v57 }
 0x91b   :  { %v5702_v49 = vsel %vm5670_vm6, %v5654_v35, %v5686_v30 }
 0x91c   :  { %v12073_v17 = vmul.f32 %v11696_v55, %v5702_v49 }
 0x91d   :  { %v5113_v16 = vpop.xlane.xlu1 %5112 }
 0x91e   :  { %v12077_v13 = vpop.eup %8575  ;;  %v5734_v36 = vsel %vm136_vm0, %v12073_v17, -1e+30 }
 0x91f   :  { %13395 = vst [vmem:[#allocation55_spill] sm:$0xff] %v12077_v13  ;;  %3964 = vadd.xlane.f32.xlu1 %v12077_v13  ;;  %5765 = vmax.xlane.f32.xlu0 %v5734_v36  ;;  %v12085_v35 = vpop.eup %8577  ;;  %v13402_v13 = vld [vmem:[#allocation63_spill] sm:$0xff] }
 0x920   :  { %13396 = vst [vmem:[#allocation26_spill] sm:$0xff] %v12085_v35  ;;  %v12090_v31 = vpop.eup %8579 }
 0x921   :  { %v12083_v15 = vpop.xlane.xlu1 %5114  ;;  %13397 = vst [vmem:[#allocation80_spill] sm:$0xff] %v12090_v31  ;;  %v12094_v30 = vpop.eup %8581 }
 0x922   :  { %13399 = vst [vmem:[#allocation73_spill] sm:$0xff] %v12094_v30  ;;  %v12099_v36 = vpop.eup %8583 }
 0x923   :  { %4583 = vadd.xlane.f32.xlu0 %v12085_v35  ;;  %13400 = vst [vmem:[#allocation61_spill] sm:$0xff] %v12099_v36  ;;  %v13401_v35 = vld [vmem:[#allocation56_spill] sm:$0xff] }
 0x925   :  { %v12088_v55 = vpop.xlane.xlu1 %4497 }
 0x927   :  { %4587 = vadd.xlane.f32.xlu0 %v12090_v31  ;;  %v5139_v31 = vsub.f32 %v13401_v35, %v5109_v39 }
 0x929   :  { %v4504_v21 = vpop.xlane.xlu1 %4503 }
 0x92a   :  { %v4522_v58 = vsub.f32 %v13398_v46, %v4504_v21  ;;  %v5155_v46 = vsel %vm136_vm0, %v5139_v31, -1e+30 }
 0x92b   :  { %4591 = vadd.xlane.f32.xlu0 %v12094_v30 }
 0x92c   :  { %v4538_v49 = vsel %vm136_vm0, %v4522_v58, -1e+30  ;;  %v5141_v58 = vsub.f32 %v13402_v13, %v5113_v16 }
 0x92d   :  { %v4567_v32 = vmul.f32 1.442695, %v4538_v49  ;;  %v3873_v6 = vpop.xlane.xlu1 %3872 }
 0x92e   :  { %v5157_v39 = vsel %vm136_vm0, %v5141_v58, -1e+30 }
 0x92f   :  { %8585 = vpow2.f32 %v4567_v32  ;;  %4595 = vadd.xlane.f32.xlu0 %v12099_v36  ;;  %v5172_v32 = vmul.f32 1.442695, %v5155_v46  ;;  %v13406_v46 = vld [vmem:[#allocation49_spill] sm:$0xff] }
 0x931   :  { %v3879_v12 = vpop.xlane.xlu1 %3878 }
 0x935   :  { %v4508_v57 = vpop.xlane.xlu1 %4507 }
 0x936   :  { %v4524_v21 = vsub.f32 %v11705_v52, %v4508_v57  ;;  %v5176_v52 = vmul.f32 1.442695, %v5157_v39  ;;  %v13404_v57 = vld [vmem:[#allocation74_spill] sm:$0xff] }
 0x937   :  { %v3892_v35 = vsub.f32 %v13404_v57, %v3873_v6 }
 0x938   :  { %v4540_v49 = vsel %vm136_vm0, %v4524_v21, -1e+30 }
 0x939   :  { %v12109_v30 = vpop.eup %8585  ;;  %v4571_v25 = vmul.f32 1.442695, %v4540_v49  ;;  %v3908_v21 = vsel %vm136_vm0, %v3892_v35, -1e+30  ;;  %v3877_v49 = vpop.xlane.xlu1 %3876 }
 0x93a   :  { %13403 = vst [vmem:[#allocation82_spill] sm:$0xff] %v12109_v30  ;;  %4599 = vadd.xlane.f32.xlu0 %v12109_v30  ;;  %v13408_v30 = vld [vmem:[#allocation86_spill] sm:$0xff] }
 0x93b   :  { %8587 = vpow2.f32 %v4571_v25  ;;  %v3895_v25 = vsub.f32 %v13406_v46, %v3879_v12 }
 0x93c   :  { %8589 = vpow2.f32 %v5172_v32 }
 0x93d   :  { %8591 = vpow2.f32 %v5176_v52  ;;  %v3936_v52 = vmul.f32 1.442695, %v3908_v21  ;;  %v3911_v35 = vsel %vm136_vm0, %v3895_v25, -1e+30  ;;  %v13410_v21 = vld [vmem:[#allocation51_spill] sm:$0xff] }
 0x943   :  { %v3875_v31 = vpop.xlane.xlu0 %3874 }
 0x944   :  { %v3893_v13 = vsub.f32 %v11739_v14, %v3875_v31  ;;  %v3894_v14 = vsub.f32 %v13408_v30, %v3877_v49 }
 0x945   :  { %v12115_v16 = vpop.eup %8587 }
 0x946   :  { %13405 = vst [vmem:[#allocation85_spill] sm:$0xff] %v12115_v16  ;;  %4603 = vadd.xlane.f32.xlu0 %v12115_v16  ;;  %v3909_v58 = vsel %vm136_vm0, %v3893_v13, -1e+30  ;;  %v12124_v6 = vpop.eup %8589  ;;  %v3910_v30 = vsel %vm136_vm0, %v3894_v14, -1e+30 }
 0x947   :  { %v3938_v32 = vmul.f32 1.442695, %v3909_v58  ;;  %v5117_v39 = vpop.xlane.xlu0 %5116  ;;  %13407 = vst [vmem:[#allocation37_spill] sm:$0xff] %v12124_v6  ;;  %v12135_v46 = vpop.eup %8591  ;;  %v3942_v58 = vmul.f32 1.442695, %v3911_v35 }
 0x948   :  { %v5143_v57 = vsub.f32 %v11755_v45, %v5117_v39  ;;  %13409 = vst [vmem:[#allocation84_spill] sm:$0xff] %v12135_v46  ;;  %v4511_v45 = vsub.f32 %v13410_v21, %v11867_v20  ;;  %v3940_v49 = vmul.f32 1.442695, %v3910_v30  ;;  %v13411_v39 = vld [vmem:[#allocation48_spill] sm:$0xff]  ;;  %v12151_v21 = vpop.xlane.xlu1 %5118 }
 0x949   :  { %8593 = vpow2.f32 %v3938_v32 }
 0x94a   :  { %5204 = vadd.xlane.f32.xlu0 %v12124_v6  ;;  %v5159_v12 = vsel %vm136_vm0, %v5143_v57, -1e+30  ;;  %8595 = vpow2.f32 %v3936_v52  ;;  %v4512_v57 = vsub.f32 %v13411_v39, %v11841_v24  ;;  %v4527_v52 = vsel %vm136_vm0, %v4511_v45, -1e+30 }
 0x94b   :  { %v5180_v31 = vmul.f32 1.442695, %v5159_v12  ;;  %v12133_v13 = vpop.xlane.xlu0 %4501 }
 0x94c   :  { %v4528_v24 = vsel %vm136_vm0, %v4512_v57, -1e+30  ;;  %v13414_v57 = vld [vmem:[#allocation59_spill] sm:$0xff] }
 0x94d   :  { %8597 = vpow2.f32 %v5180_v31  ;;  %v4545_v31 = vmul.f32 1.442695, %v4527_v52  ;;  %v4547_v52 = vmul.f32 1.442695, %v4528_v24 }
 0x94e   :  { %5208 = vadd.xlane.f32.xlu0 %v12135_v46  ;;  %8599 = vpow2.f32 %v3942_v58  ;;  %v13412_v58 = vld [vmem:[#allocation77_spill] sm:$0xff] }
 0x94f   :  { %v5121_v25 = vpop.xlane.xlu0 %5120  ;;  %8601 = vpow2.f32 %v3940_v49  ;;  %v4513_v30 = vsub.f32 %v13412_v58, %v11924_v22  ;;  %v13415_v58 = vld [vmem:[#allocation32_spill] sm:$0xff] }
 0x950   :  { %v5145_v32 = vsub.f32 %v11778_v8, %v5121_v25 }
 0x951   :  { %v4529_v22 = vsel %vm136_vm0, %v4513_v30, -1e+30  ;;  %v4517_v30 = vsub.f32 %v13415_v58, %v12005_v61 }
 0x952   :  { %v5161_v20 = vsel %vm136_vm0, %v5145_v32, -1e+30  ;;  %v4549_v24 = vmul.f32 1.442695, %v4529_v22  ;;  %v13417_v22 = vld [vmem:[#allocation46_spill] sm:$0xff] }
 0x953   :  { %v12149_v35 = vpop.eup %8593  ;;  %v5184_v14 = vmul.f32 1.442695, %v5161_v20  ;;  %v5125_v12 = vpop.xlane.xlu0 %5124  ;;  %v4515_v20 = vsub.f32 %v13414_v57, %v11967_v42 }
 0x954   :  { %v5147_v8 = vsub.f32 %v11788_v44, %v5125_v12  ;;  %3970 = vadd.xlane.f32.xlu1 %v12149_v35  ;;  %v12157_v45 = vpop.eup %8595 }
 0x955   :  { %8603 = vpow2.f32 %v5184_v14  ;;  %v12172_v14 = vpop.xlane.xlu1 %5122  ;;  %v4531_v42 = vsel %vm136_vm0, %v4515_v20, -1e+30  ;;  %v4533_v20 = vsel %vm136_vm0, %v4517_v30, -1e+30 }
 0x956   :  { %v5163_v25 = vsel %vm136_vm0, %v5147_v8, -1e+30  ;;  %8605 = vpow2.f32 %v4545_v31 }
 0x957   :  { %v12163_v32 = vpop.eup %8597  ;;  %v5188_v49 = vmul.f32 1.442695, %v5163_v25  ;;  %v5129_v39 = vpop.xlane.xlu0 %5128 }
 0x958   :  { %13413 = vst [vmem:[#allocation81_spill] sm:$0xff] %v12163_v32  ;;  %v5149_v44 = vsub.f32 %v11798_v29, %v5129_v39  ;;  %3968 = vadd.xlane.f32.xlu1 %v12157_v45  ;;  %5212 = vadd.xlane.f32.xlu0 %v12163_v32  ;;  %v12176_v8 = vpop.eup %8599 }
 0x959   :  { %8607 = vpow2.f32 %v5188_v49  ;;  %v12185_v25 = vpop.eup %8601  ;;  %v12189_v57 = vpop.xlane.xlu1 %5126 }
 0x95a   :  { %v5165_v12 = vsel %vm136_vm0, %v5149_v44, -1e+30  ;;  %8609 = vpow2.f32 %v4547_v52  ;;  %v4553_v44 = vmul.f32 1.442695, %v4531_v42 }
 0x95b   :  { %v5192_v31 = vmul.f32 1.442695, %v5165_v12  ;;  %v12178_v29 = vpop.xlane.xlu0 %5130  ;;  %v4519_v12 = vsub.f32 %v13417_v22, %v12088_v55 }
 0x95c   :  { %3974 = vadd.xlane.f32.xlu1 %v12176_v8 }
 0x95d   :  { %8611 = vpow2.f32 %v5192_v31  ;;  %v4535_v30 = vsel %vm136_vm0, %v4519_v12, -1e+30 }
 0x95e   :  { %8613 = vpow2.f32 %v4549_v24  ;;  %v4521_v24 = vsub.f32 %v11767_v59, %v12133_v13  ;;  %v4561_v59 = vmul.f32 1.442695, %v4535_v30 }
 0x95f   :  { %v12187_v49 = vpop.eup %8603  ;;  %v5133_v39 = vpop.xlane.xlu0 %5132  ;;  %8615 = vpow2.f32 %v4553_v44 }
 0x960   :  { %13416 = vst [vmem:[#allocation34_spill] sm:$0xff] %v12187_v49  ;;  %v5151_v52 = vsub.f32 %v11820_v56, %v5133_v39  ;;  %3972 = vadd.xlane.f32.xlu1 %v12185_v25  ;;  %5216 = vadd.xlane.f32.xlu0 %v12187_v49  ;;  %v12196_v61 = vpop.eup %8605  ;;  %v4557_v39 = vmul.f32 1.442695, %v4533_v20  ;;  %v4537_v13 = vsel %vm136_vm0, %v4521_v24, -1e+30 }
 0x962   :  { %v5167_v31 = vsel %vm136_vm0, %v5151_v52, -1e+30  ;;  %v4506_v52 = vpop.xlane.xlu1 %4505 }
 0x963   :  { %v12202_v42 = vpop.eup %8607  ;;  %v5196_v58 = vmul.f32 1.442695, %v5167_v31  ;;  %v5137_v56 = vpop.xlane.xlu0 %5136  ;;  %v4523_v12 = vsub.f32 %v11761_v41, %v4506_v52 }
 0x964   :  { %13418 = vst [vmem:[#allocation83_spill] sm:$0xff] %v12202_v42  ;;  %v5153_v49 = vsub.f32 %v11832_v18, %v5137_v56  ;;  %4577 = vadd.xlane.f32.xlu1 %v12196_v61  ;;  %5220 = vadd.xlane.f32.xlu0 %v12202_v42  ;;  %v12209_v55 = vpop.eup %8609  ;;  %v4565_v56 = vmul.f32 1.442695, %v4537_v13 }
 0x965   :  { %8617 = vpow2.f32 %v5196_v58  ;;  %v4539_v24 = vsel %vm136_vm0, %v4523_v12, -1e+30 }
 0x966   :  { %v5169_v44 = vsel %vm136_vm0, %v5153_v49, -1e+30  ;;  %8619 = vpow2.f32 %v4557_v39  ;;  %v13420_v39 = vld [vmem:[#allocation57_spill] sm:$0xff] }
 0x967   :  { %v12215_v20 = vpop.eup %8611  ;;  %v5200_v18 = vmul.f32 1.442695, %v5169_v44  ;;  %v12217_v22 = vpop.xlane.xlu0 %5735 }
 0x968   :  { %13419 = vst [vmem:[#allocation54_spill] sm:$0xff] %v12215_v20  ;;  %4579 = vadd.xlane.f32.xlu1 %v12209_v55  ;;  %5224 = vadd.xlane.f32.xlu0 %v12215_v20  ;;  %v12224_v58 = vpop.eup %8613  ;;  %v5138_v20 = vsub.f32 %v13420_v39, %v12041_v51 }
 0x969   :  { %8621 = vpow2.f32 %v5200_v18  ;;  %v12230_v30 = vpop.eup %8615 }
 0x96a   :  { %v5154_v51 = vsel %vm136_vm0, %v5138_v20, -1e+30 }
 0x96b   :  { %v3947_v31 = vpop.xlane.xlu1 %3946  ;;  %v5738_v49 = vpop.xlane.xlu0 %5737 }
 0x96c   :  { %8623 = vrcp.f32 %v3947_v31  ;;  %v5768_v44 = vsub.f32 %v11858_v19, %v5738_v49  ;;  %4581 = vadd.xlane.f32.xlu1 %v12224_v58  ;;  %v13423_v49 = vld [vmem:[#allocation40_spill] sm:$0xff] }
 0x96d   :  { %8625 = vpow2.f32 %v4561_v59  ;;  %v4569_v59 = vmul.f32 1.442695, %v4539_v24  ;;  %v13425_v24 = vld [vmem:[#allocation65_spill] sm:$0xff] }
 0x96e   :  { %v5784_v41 = vsel %vm136_vm0, %v5768_v44, -1e+30  ;;  %v5140_v44 = vsub.f32 %v13423_v49, %v12066_v50 }
 0x96f   :  { %v4576_v52 = vpop.xlane.xlu1 %4575  ;;  %v12236_v18 = vpop.eup %8617  ;;  %v5801_v13 = vmul.f32 1.442695, %v5784_v41 }
 0x970   :  { %13421 = vst [vmem:[#allocation58_spill] sm:$0xff] %v12236_v18  ;;  %8627 = vrcp.f32 %v4576_v52  ;;  %v12238_v19 = vpop.xlane.xlu0 %5739  ;;  %4585 = vadd.xlane.f32.xlu1 %v12230_v30  ;;  %5228 = vadd.xlane.f32.xlu0 %v12236_v18  ;;  %v12244_v12 = vpop.eup %8619  ;;  %v5156_v50 = vsel %vm136_vm0, %v5140_v44, -1e+30 }
 0x971   :  { %8629 = vpow2.f32 %v4565_v56  ;;  %13422 = vst [vmem:[#allocation76_spill] sm:$0xff] %v12244_v12  ;;  %v5170_v56 = vmul.f32 1.442695, %v5154_v51 }
 0x972   :  { %8631 = vpow2.f32 %v5801_v13  ;;  %v5142_v13 = vsub.f32 %v13425_v24, %v12083_v15 }
 0x973   :  { %v3945_v39 = vpop.xlane.xlu1 %3944  ;;  %v12248_v41 = vpop.eup %8621 }
 0x974   :  { %13424 = vst [vmem:[#allocation31_spill] sm:$0xff] %v12248_v41  ;;  %8633 = vrcp.f32 %v3945_v39  ;;  %v5742_v42 = vpop.xlane.xlu0 %5741  ;;  %4589 = vadd.xlane.f32.xlu1 %v12244_v12  ;;  %5232 = vadd.xlane.f32.xlu0 %v12248_v41  ;;  %v5158_v44 = vsel %vm136_vm0, %v5142_v13, -1e+30 }
 0x975   :  { %v5770_v32 = vsub.f32 %v11891_v0, %v5742_v42  ;;  %8635 = vpow2.f32 %v4569_v59  ;;  %v5174_v59 = vmul.f32 1.442695, %v5156_v50 }
 0x976   :  { %v8624_v20 = vpop.eup %8623 }
 0x977   :  { %v3993_v49 = vmul.f32 %v8624_v20, %v3947_v31  ;;  %v5786_v18 = vsel %vm136_vm0, %v5770_v32, -1e+30  ;;  %v4574_v46 = vpop.xlane.xlu1 %4573  ;;  %v12259_v51 = vpop.eup %8625  ;;  %v13427_v31 = vld [vmem:[#allocation52_spill] sm:$0xff] }
 0x978   :  { %13426 = vst [vmem:[#allocation43_spill] sm:$0xff] %v12259_v51  ;;  %v5805_v0 = vmul.f32 1.442695, %v5786_v18  ;;  %8637 = vrcp.f32 %v4574_v46  ;;  %v12261_v42 = vpop.xlane.xlu0 %5743  ;;  %4593 = vadd.xlane.f32.xlu1 %v12259_v51  ;;  %v5144_v24 = vsub.f32 %v13427_v31, %v12151_v21 }
 0x979   :  { %8639 = vpow2.f32 %v5170_v56  ;;  %v4009_v41 = vsub.f32 2.0, %v3993_v49  ;;  %v5178_v49 = vmul.f32 1.442695, %v5158_v44 }
 0x97a   :  { %v8628_v15 = vpop.eup %8627  ;;  %8641 = vpow2.f32 %v5805_v0 }
 0x97b   :  { %v12268_v32 = vpop.eup %8629  ;;  %v4025_v16 = vmul.f32 %v8624_v20, %v4009_v41  ;;  %v4622_v18 = vmul.f32 %v8628_v15, %v4576_v52  ;;  %v3951_v36 = vpop.xlane.xlu1 %3950  ;;  %v5160_v52 = vsel %vm136_vm0, %v5144_v24, -1e+30  ;;  %v5146_v41 = vsub.f32 %v11736_v60, %v12172_v14 }
 0x97c   :  { %v12270_v6 = vpop.eup %8631  ;;  %8643 = vrcp.f32 %v3951_v36  ;;  %v5746_v56 = vpop.xlane.xlu0 %5745  ;;  %4597 = vadd.xlane.f32.xlu1 %v12268_v32  ;;  %v5182_v14 = vmul.f32 1.442695, %v5160_v52 }
 0x97d   :  { %v4041_v51 = vmul.f32 %v11865_v37, %v4025_v16  ;;  %v4638_v50 = vsub.f32 2.0, %v4622_v18  ;;  %v5772_v12 = vsub.f32 %v11916_v63, %v5746_v56  ;;  %5833 = vadd.xlane.f32.xlu0 %v12270_v6  ;;  %8645 = vpow2.f32 %v5174_v59 }
 0x97e   :  { %v8634_v21 = vpop.eup %8633 }
 0x97f   :  { %v4654_v20 = vmul.f32 %v8628_v15, %v4638_v50  ;;  %v3992_v13 = vmul.f32 %v8634_v21, %v3945_v39  ;;  %v5788_v37 = vsel %vm136_vm0, %v5772_v12, -1e+30  ;;  %v3949_v16 = vpop.xlane.xlu1 %3948  ;;  %v12282_v0 = vpop.eup %8635  ;;  %v5148_v39 = vsub.f32 %v11747_v38, %v12189_v57 }
 0x980   :  { %v5809_v63 = vmul.f32 1.442695, %v5788_v37  ;;  %8647 = vrcp.f32 %v3949_v16  ;;  %v12284_v44 = vpop.xlane.xlu0 %5747  ;;  %4601 = vadd.xlane.f32.xlu1 %v12282_v0  ;;  %v5162_v15 = vsel %vm136_vm0, %v5146_v41, -1e+30 }
 0x981   :  { %8649 = vpow2.f32 %v5178_v49  ;;  %v12287_v59 = vmul.f32 %v11881_v54, %v4654_v20  ;;  %v4008_v31 = vsub.f32 2.0, %v3992_v13  ;;  %v5186_v41 = vmul.f32 1.442695, %v5162_v15  ;;  %v13430_v15 = vld [vmem:[#allocation62_spill] sm:$0xff] }
 0x982   :  { %v8638_v60 = vpop.eup %8637  ;;  %8651 = vpow2.f32 %v5809_v63  ;;  %v5164_v20 = vsel %vm136_vm0, %v5148_v39, -1e+30  ;;  %v13431_v39 = vld [vmem:[#allocation38_spill] sm:$0xff] }
 0x983   :  { %v12292_v12 = vpop.eup %8639  ;;  %v12297_v24 = vadd.f32 %v12287_v59, %v4041_v51  ;;  %v4024_v18 = vmul.f32 %v8634_v21, %v4008_v31  ;;  %v4621_v54 = vmul.f32 %v8638_v60, %v4574_v46  ;;  %v3955_v56 = vpop.xlane.xlu1 %3954  ;;  %v13429_v46 = vld [vmem:[#allocation87_spill] sm:$0xff] }
 0x984   :  { %v12299_v49 = vpop.eup %8641  ;;  %8653 = vrcp.f32 %v3955_v56  ;;  %v5135_v50 = vpop.xlane.xlu0 %5134  ;;  %5202 = vadd.xlane.f32.xlu1 %v12292_v12  ;;  %v5150_v21 = vsub.f32 %v13429_v46, %v12178_v29 }
 0x985   :  { %13428 = vst [vmem:[#allocation69_spill] sm:$0xff] %v12299_v49  ;;  %v4637_v52 = vsub.f32 2.0, %v4621_v54  ;;  %5837 = vadd.xlane.f32.xlu0 %v12299_v49  ;;  %v4040_v38 = vmul.f32 %v11895_v40, %v4024_v18  ;;  %8655 = vpow2.f32 %v5182_v14  ;;  %v5152_v54 = vsub.f32 %v11944_v47, %v5135_v50 }
 0x986   :  { %v8644_v57 = vpop.eup %8643  ;;  %v5190_v40 = vmul.f32 1.442695, %v5164_v20  ;;  %v5166_v47 = vsel %vm136_vm0, %v5150_v21, -1e+30 }
 0x987   :  { %v4653_v13 = vmul.f32 %v8638_v60, %v4637_v52  ;;  %v3995_v37 = vmul.f32 %v8644_v57, %v3951_v36  ;;  %7335 = vmatprep.mubr.f32.mxu1 %v4040_v38  ;;  %v3953_v63 = vpop.xlane.xlu1 %3952  ;;  %v12308_v31 = vpop.eup %8645  ;;  %v5168_v20 = vsel %vm136_vm0, %v5152_v54, -1e+30  ;;  %v5194_v46 = vmul.f32 1.442695, %v5166_v47 }
 0x988   :  { %8657 = vrcp.f32 %v3953_v63  ;;  %v5750_v49 = vpop.xlane.xlu0 %5749  ;;  %7336 = vmatmul.mubr.f32.vlgmr.msra.gmra.mrb[16].mxu1 %v4041_v51  ;;  %5206 = vadd.xlane.f32.xlu1 %v12308_v31  ;;  %v5198_v54 = vmul.f32 1.442695, %v5168_v20 }
 0x989   :  { %v5774_v14 = vsub.f32 %v11961_v2, %v5750_v49  ;;  %7866 = vmatpush3.bf16.msra.mxu1 %v13430_v15  ;;  %v12315_v29 = vmul.f32 %v11908_v11, %v4653_v13  ;;  %8659 = vpow2.f32 %v5186_v41  ;;  %v4011_v60 = vsub.f32 2.0, %v3995_v37 }
 0x98a   :  { %v8648_v36 = vpop.eup %8647  ;;  %7868 = vmatprep.subr.bf16.mxu1 %v13431_v39  ;;  %8661 = vpow2.f32 %v5190_v40  ;;  %v5767_v13 = vsub.f32 %v11849_v33, %v12217_v22  ;;  %v5769_v33 = vsub.f32 %v11874_v7, %v12238_v19 }
 0x98b   :  { %v12318_v18 = vpop.eup %8649  ;;  %v3994_v51 = vmul.f32 %v8648_v36, %v3949_v16  ;;  %v5790_v2 = vsel %vm136_vm0, %v5774_v14, -1e+30  ;;  %v12325_v49 = vadd.f32 %v12315_v29, %v4040_v38  ;;  %v4027_v21 = vmul.f32 %v8644_v57, %v4011_v60  ;;  %v13432_v38 = vld [vmem:[#allocation75_spill] sm:$0xff] }
 0x98c   :  { %v12327_v50 = vpop.eup %8651  ;;  %v5813_v11 = vmul.f32 1.442695, %v5790_v2  ;;  %v12329_v52 = vpop.xlane.xlu0 %5751  ;;  %5210 = vadd.xlane.f32.xlu1 %v12318_v18 }
 0x98d   :  { %v4010_v41 = vsub.f32 2.0, %v3994_v51  ;;  %7870 = vmatpush3.bf16.msra.mxu1 %v13431_v39  ;;  %5841 = vadd.xlane.f32.xlu0 %v12327_v50 }
 0x98e   :  { %v8654_v16 = vpop.eup %8653  ;;  %8663 = vpow2.f32 %v5813_v11  ;;  %7872 = vmatprep.subr.bf16.mxu1 %v13432_v38 }
 0x98f   :  { %v4026_v37 = vmul.f32 %v8648_v36, %v4010_v41  ;;  %v3997_v40 = vmul.f32 %v8654_v16, %v3955_v56  ;;  %v12339_v14 = vpop.eup %8655  ;;  %v3959_v15 = vpop.xlane.xlu1 %3958  ;;  %v13434_v56 = vld [vmem:[#allocation47_spill] sm:$0xff]  ;;  %v12351_v36 = vmul.f32 %v11922_v1, %v4027_v21  ;;  %v5785_v41 = vsel %vm136_vm0, %v5769_v33, -1e+30 }
 0x990   :  { %v5754_v39 = vpop.xlane.xlu0 %5753  ;;  %8665 = vrcp.f32 %v3959_v15  ;;  %5214 = vadd.xlane.f32.xlu1 %v12339_v14 }
 0x991   :  { %v5776_v51 = vsub.f32 %v11984_v3, %v5754_v39  ;;  %7874 = vmatpush3.bf16.msra.mxu1 %v13432_v38  ;;  %v12345_v57 = vmul.f32 %v11935_v62, %v4026_v37  ;;  %8667 = vpow2.f32 %v5194_v46  ;;  %v4013_v22 = vsub.f32 2.0, %v3997_v40  ;;  %v13435_v46 = vld [vmem:[#allocation79_spill] sm:$0xff] }
 0x992   :  { %v8658_v60 = vpop.eup %8657  ;;  %7876 = vmatprep.subr.bf16.mxu1 %v13434_v56  ;;  %v5783_v3 = vsel %vm136_vm0, %v5767_v13, -1e+30  ;;  %8669 = vpow2.f32 %v5198_v54  ;;  %v5771_v38 = vsub.f32 %v11904_v34, %v12261_v42  ;;  %v5803_v54 = vmul.f32 1.442695, %v5785_v41  ;;  %v13437_v34 = vld [vmem:[#allocation33_spill] sm:$0xff] }
 0x993   :  { %13433 = vst [vmem:[#allocation56_spill] sm:$0xff] %v12345_v57  ;;  %v3996_v47 = vmul.f32 %v8658_v60, %v3953_v63  ;;  %v5792_v2 = vsel %vm136_vm0, %v5776_v51, -1e+30  ;;  %7338 = vmatprep.mubr.f32.mxu1 %v12345_v57  ;;  %v12358_v62 = vpop.eup %8659  ;;  %v3957_v7 = vpop.xlane.xlu1 %3956  ;;  %v5799_v63 = vmul.f32 1.442695, %v5783_v3  ;;  %v4029_v20 = vmul.f32 %v8654_v16, %v4013_v22 }
 0x994   :  { %v5817_v11 = vmul.f32 1.442695, %v5792_v2  ;;  %v12360_v19 = vpop.xlane.xlu0 %5755  ;;  %7339 = vmatmul.mubr.f32.gmra.mrb[18].mxu1 %v12351_v36  ;;  %8671 = vrcp.f32 %v3957_v7  ;;  %5218 = vadd.xlane.f32.xlu1 %v12358_v62  ;;  %v12368_v21 = vpop.eup %8661  ;;  %v5773_v51 = vsub.f32 %v11931_v23, %v12284_v44  ;;  %v13438_v2 = vld [vmem:[#allocation39_spill] sm:$0xff] }
 0x995   :  { %v4012_v1 = vsub.f32 2.0, %v3996_v47  ;;  %7878 = vmatpush3.bf16.msra.mxu1 %v13434_v56  ;;  %v12385_v42 = vmul.f32 %v11950_v53, %v4029_v20 }
 0x996   :  { %8673 = vpow2.f32 %v5817_v11  ;;  %7880 = vmatprep.subr.bf16.mxu1 %v13435_v46  ;;  %v5789_v47 = vsel %vm136_vm0, %v5773_v51, -1e+30  ;;  %v5775_v11 = vsub.f32 %v11974_v5, %v12329_v52  ;;  %v13439_v5 = vld [vmem:[#allocation78_spill] sm:$0xff] }
 0x997   :  { %v4028_v13 = vmul.f32 %v8658_v60, %v4012_v1  ;;  %8675 = vpow2.f32 %v5799_v63 }
 0x998   :  { %v12372_v37 = vpop.eup %8663  ;;  %v5758_v40 = vpop.xlane.xlu0 %5757  ;;  %5222 = vadd.xlane.f32.xlu1 %v12368_v21  ;;  %v5791_v52 = vsel %vm136_vm0, %v5775_v11, -1e+30 }
 0x999   :  { %v5778_v39 = vsub.f32 %v12013_v10, %v5758_v40  ;;  %7882 = vmatpush3.bf16.msra.mxu1 %v13435_v46  ;;  %v12378_v16 = vmul.f32 %v11965_v28, %v4028_v13  ;;  %5845 = vadd.xlane.f32.xlu0 %v12372_v37  ;;  %v5787_v10 = vsel %vm136_vm0, %v5771_v38, -1e+30  ;;  %v5811_v38 = vmul.f32 1.442695, %v5789_v47 }
 0x99a   :  { %7884 = vmatprep.subr.bf16.mxu1 %v13437_v34  ;;  %v8666_v60 = vpop.eup %8665  ;;  %v5807_v3 = vmul.f32 1.442695, %v5787_v10 }
 0x99b   :  { %13436 = vst [vmem:[#allocation63_spill] sm:$0xff] %v12378_v16  ;;  %v5794_v33 = vsel %vm136_vm0, %v5778_v39, -1e+30  ;;  %7341 = vmatprep.mubr.f32.mxu1 %v12378_v16  ;;  %v3963_v28 = vpop.xlane.xlu1 %3962  ;;  %v12392_v22 = vpop.eup %8667  ;;  %v3999_v23 = vmul.f32 %v8666_v60, %v3959_v15 }
 0x99c   :  { %v5821_v44 = vmul.f32 1.442695, %v5794_v33  ;;  %8677 = vrcp.f32 %v3963_v28  ;;  %v5760_v56 = vpop.xlane.xlu0 %5759  ;;  %7342 = vmatmul.mubr.f32.gmra.mrb[20].mxu1 %v12385_v42  ;;  %5226 = vadd.xlane.f32.xlu1 %v12392_v22  ;;  %v12397_v53 = vpop.eup %8669  ;;  %v13440_v33 = vld [vmem:[#allocation70_spill] sm:$0xff] }
 0x99d   :  { %8679 = vpow2.f32 %v5803_v54  ;;  %7886 = vmatpush3.bf16.msra.mxu1 %v13437_v34  ;;  %v4015_v1 = vsub.f32 2.0, %v3999_v23  ;;  %v5777_v54 = vsub.f32 %v12002_v26, %v12360_v19  ;;  %v5815_v19 = vmul.f32 1.442695, %v5791_v52 }
 0x99e   :  { %8681 = vpow2.f32 %v5821_v44  ;;  %7888 = vmatprep.subr.bf16.mxu1 %v13438_v2  ;;  %v8672_v15 = vpop.eup %8671 }
 0x99f   :  { %v3961_v63 = vpop.xlane.xlu1 %3960  ;;  %v3998_v20 = vmul.f32 %v8672_v15, %v3957_v7  ;;  %v4031_v7 = vmul.f32 %v8666_v60, %v4015_v1  ;;  %v5793_v10 = vsel %vm136_vm0, %v5777_v54, -1e+30 }
 0x9a0   :  { %v12404_v41 = vpop.eup %8673  ;;  %8683 = vrcp.f32 %v3961_v63  ;;  %v5762_v46 = vpop.xlane.xlu0 %5761  ;;  %5230 = vadd.xlane.f32.xlu1 %v12397_v53 }
 0x9a1   :  { %v5780_v13 = vsub.f32 %v12030_v43, %v5762_v46  ;;  %7890 = vmatpush3.bf16.msra.mxu1 %v13438_v2  ;;  %8685 = vpow2.f32 %v5807_v3  ;;  %v4014_v40 = vsub.f32 2.0, %v3998_v20  ;;  %5849 = vadd.xlane.f32.xlu0 %v12404_v41  ;;  %v12417_v39 = vpop.eup %8675  ;;  %v5779_v3 = vsub.f32 %v12023_v48, %v5760_v56  ;;  %v13443_v2 = vld [vmem:[#allocation27_spill] sm:$0xff] }
 0x9a2   :  { %7892 = vmatprep.subr.bf16.mxu1 %v13439_v5  ;;  %8687 = vpow2.f32 %v5811_v38  ;;  %v5819_v20 = vmul.f32 1.442695, %v5793_v10 }
 0x9a3   :  { %v5796_v43 = vsel %vm136_vm0, %v5780_v13, -1e+30  ;;  %v4030_v51 = vmul.f32 %v8672_v15, %v4014_v40  ;;  %v12431_v15 = vmul.f32 %v13443_v2, %v4031_v7  ;;  %v5795_v48 = vsel %vm136_vm0, %v5779_v3, -1e+30  ;;  %v13450_v3 = vld [vmem:[#allocation28_spill] sm:$0xff] }
 0x9a4   :  { %v5825_v34 = vmul.f32 1.442695, %v5796_v43  ;;  %5831 = vadd.xlane.f32.xlu1 %v12417_v39  ;;  %v5764_v1 = vpop.xlane.xlu0 %5763  ;;  %v5823_v52 = vmul.f32 1.442695, %v5795_v48 }
 0x9a5   :  { %7894 = vmatpush3.bf16.msra.mxu1 %v13439_v5  ;;  %v12425_v60 = vmul.f32 %v12007_v27, %v4030_v51  ;;  %v5781_v46 = vsub.f32 %v12054_v4, %v5764_v1 }
 0x9a6   :  { %v8678_v26 = vpop.eup %8677  ;;  %8689 = vpow2.f32 %v5825_v34  ;;  %7896 = vmatprep.subr.bf16.mxu1 %v13440_v33 }
 0x9a7   :  { %13441 = vst [vmem:[#allocation74_spill] sm:$0xff] %v12425_v60  ;;  %v12427_v23 = vpop.eup %8679  ;;  %v4001_v44 = vmul.f32 %v8678_v26, %v3963_v28  ;;  %v3967_v47 = vpop.xlane.xlu1 %3966  ;;  %7344 = vmatprep.mubr.f32.mxu1 %v12425_v60 }
 0x9a8   :  { %13442 = vst [vmem:[#allocation49_spill] sm:$0xff] %v12427_v23  ;;  %v12433_v11 = vpop.eup %8681  ;;  %8691 = vrcp.f32 %v3967_v47  ;;  %7345 = vmatmul.mubr.f32.gmra.mrb[22].mxu1 %v12431_v15  ;;  %5835 = vadd.xlane.f32.xlu1 %v12427_v23 }
 0x9a9   :  { %13444 = vst [vmem:[#allocation86_spill] sm:$0xff] %v12433_v11  ;;  %8693 = vpow2.f32 %v5815_v19  ;;  %v4017_v28 = vsub.f32 2.0, %v4001_v44  ;;  %5853 = vadd.xlane.f32.xlu0 %v12433_v11 }
 0x9aa   :  { %v8684_v27 = vpop.eup %8683  ;;  %8695 = vpow2.f32 %v5819_v20 }
 0x9ab   :  { %v4000_v56 = vmul.f32 %v8684_v27, %v3961_v63  ;;  %v12442_v38 = vpop.eup %8685  ;;  %v4033_v5 = vmul.f32 %v8678_v26, %v4017_v28  ;;  %v5797_v63 = vsel %vm136_vm0, %v5781_v46, -1e+30  ;;  %v13448_v26 = vld [vmem:[#allocation29_spill] sm:$0xff] }
 0x9ac   :  { %13445 = vst [vmem:[#allocation51_spill] sm:$0xff] %v12442_v38  ;;  %v3965_v40 = vpop.xlane.xlu1 %3964  ;;  %5839 = vadd.xlane.f32.xlu1 %v12442_v38  ;;  %v5766_v54 = vpop.xlane.xlu0 %5765  ;;  %v5827_v44 = vmul.f32 1.442695, %v5797_v63 }
 0x9ad   :  { %v4016_v13 = vsub.f32 2.0, %v4000_v56  ;;  %8697 = vrcp.f32 %v3965_v40  ;;  %v5782_v7 = vsub.f32 %v12073_v17, %v5766_v54  ;;  %v12446_v43 = vpop.eup %8687  ;;  %v12460_v2 = vmul.f32 %v13450_v3, %v4033_v5 }
 0x9ae   :  { %13446 = vst [vmem:[#allocation48_spill] sm:$0xff] %v12446_v43  ;;  %8699 = vpow2.f32 %v5823_v52 }
 0x9af   :  { %v4032_v51 = vmul.f32 %v8684_v27, %v4016_v13  ;;  %v5798_v34 = vsel %vm136_vm0, %v5782_v7, -1e+30 }
 0x9b0   :  { %v12450_v4 = vpop.eup %8689  ;;  %v5829_v19 = vmul.f32 1.442695, %v5798_v34  ;;  %5843 = vadd.xlane.f32.xlu1 %v12446_v43  ;;  %v4584_v63 = vpop.xlane.xlu0 %4583 }
 0x9b1   :  { %13447 = vst [vmem:[#allocation77_spill] sm:$0xff] %v12450_v4  ;;  %5857 = vadd.xlane.f32.xlu0 %v12450_v4  ;;  %v12457_v10 = vmul.f32 %v13448_v26, %v4032_v51  ;;  %v13458_v51 = vld [vmem:[#allocation30_spill] sm:$0xff] }
 0x9b2   :  { %v8692_v17 = vpop.eup %8691  ;;  %8701 = vpow2.f32 %v5829_v19 }
 0x9b3   :  { %13449 = vst [vmem:[#allocation59_spill] sm:$0xff] %v12457_v10  ;;  %7347 = vmatprep.mubr.f32.mxu1 %v12457_v10  ;;  %v12463_v1 = vpop.eup %8693  ;;  %v4003_v9 = vmul.f32 %v8692_v17, %v3967_v47  ;;  %8703 = vpow2.f32 %v5827_v44  ;;  %v13455_v47 = vld [vmem:[#allocation55_spill] sm:$0xff] }
 0x9b4   :  { %13451 = vst [vmem:[#allocation32_spill] sm:$0xff] %v12463_v1  ;;  %7348 = vmatmul.mubr.f32.gmra.mrb[24].mxu1 %v12460_v2  ;;  %5847 = vadd.xlane.f32.xlu1 %v12463_v1  ;;  %v12467_v20 = vpop.eup %8695  ;;  %v12487_v34 = vpop.xlane.xlu0 %4587 }
 0x9b5   :  { %13452 = vst [vmem:[#allocation46_spill] sm:$0xff] %v12467_v20  ;;  %v4019_v28 = vsub.f32 2.0, %v4003_v9 }
 0x9b7   :  { %v8698_v27 = vpop.eup %8697  ;;  %v4035_v13 = vmul.f32 %v8692_v17, %v4019_v28 }
 0x9b8   :  { %v4002_v48 = vmul.f32 %v8698_v27, %v3965_v40  ;;  %5851 = vadd.xlane.f32.xlu1 %v12467_v20  ;;  %v12470_v46 = vpop.eup %8699  ;;  %v12489_v19 = vpop.xlane.xlu0 %4591 }
 0x9b9   :  { %13453 = vst [vmem:[#allocation57_spill] sm:$0xff] %v12470_v46  ;;  %v12482_v40 = vmul.f32 %v13458_v51, %v4035_v13 }
 0x9ba   :  { %v4018_v56 = vsub.f32 2.0, %v4002_v48 }
 0x9bb   :  { %13459 = vst [vmem:[#allocation87_spill] sm:$0xff] %v12482_v40 }
 0x9bc   :  { %v12472_v54 = vpop.eup %8701  ;;  %v4034_v5 = vmul.f32 %v8698_v27, %v4018_v56  ;;  %5855 = vadd.xlane.f32.xlu1 %v12470_v46  ;;  %v12491_v26 = vpop.xlane.xlu0 %4595 }
 0x9bd   :  { %13454 = vst [vmem:[#allocation40_spill] sm:$0xff] %v12472_v54  ;;  %5861 = vadd.xlane.f32.xlu0 %v12472_v54  ;;  %v12479_v7 = vpop.eup %8703 }
 0x9be   :  { %v12477_v52 = vmul.f32 %v13455_v47, %v4034_v5  ;;  %13457 = vst [vmem:[#allocation52_spill] sm:$0xff] %v12479_v7 }
 0x9c0   :  { %13456 = vst [vmem:[#allocation65_spill] sm:$0xff] %v12477_v52  ;;  %7350 = vmatprep.mubr.f32.mxu1 %v12477_v52  ;;  %5859 = vadd.xlane.f32.xlu1 %v12479_v7 }
 0x9c1   :  { %7351 = vmatmul.mubr.f32.gmra.mrb[26].mxu1 %v12482_v40 }
 0x9c7   :  { %v12493_v17 = vpop.xlane.xlu0 %4599 }
 0x9d3   :  { %v12495_v44 = vpop.xlane.xlu0 %4603 }
 0x9d7   :  { %v12497_v3 = vpop.xlane.xlu0 %5204 }
 0x9db   :  { %v12499_v28 = vpop.xlane.xlu0 %5208 }
 0x9e1   :  { %v3971_v9 = vpop.xlane.xlu1 %3970 }
 0x9e2   :  { %8705 = vrcp.f32 %v3971_v9 }
 0x9e5   :  { %v3969_v27 = vpop.xlane.xlu1 %3968  ;;  %v12501_v56 = vpop.xlane.xlu0 %5212 }
 0x9e6   :  { %8707 = vrcp.f32 %v3969_v27 }
 0x9e9   :  { %v3975_v48 = vpop.xlane.xlu1 %3974 }
 0x9ea   :  { %8709 = vrcp.f32 %v3975_v48 }
 0x9ec   :  { %v8706_v13 = vpop.eup %8705 }
 0x9ed   :  { %v4005_v5 = vmul.f32 %v8706_v13, %v3971_v9  ;;  %v3973_v47 = vpop.xlane.xlu1 %3972  ;;  %v12503_v51 = vpop.xlane.xlu0 %5216 }
 0x9ee   :  { %8711 = vrcp.f32 %v3973_v47 }
 0x9ef   :  { %v4021_v54 = vsub.f32 2.0, %v4005_v5 }
 0x9f0   :  { %v8708_v7 = vpop.eup %8707 }
 0x9f1   :  { %v4004_v46 = vmul.f32 %v8708_v7, %v3969_v27  ;;  %v4578_v20 = vpop.xlane.xlu1 %4577  ;;  %v4037_v10 = vmul.f32 %v8706_v13, %v4021_v54  ;;  %v12506_v60 = vpop.xlane.xlu0 %5220 }
 0x9f2   :  { %8713 = vrcp.f32 %v4578_v20 }
 0x9f3   :  { %8715 = vrcp.f32 %v4584_v63  ;;  %v4020_v52 = vsub.f32 2.0, %v4004_v46  ;;  %v12512_v27 = vmul.f32 %v12149_v35, %v4037_v10 }
 0x9f4   :  { %v8710_v1 = vpop.eup %8709  ;;  %8717 = vrcp.f32 %v12487_v34 }
 0x9f5   :  { %v4036_v4 = vmul.f32 %v8708_v7, %v4020_v52  ;;  %v4007_v43 = vmul.f32 %v8710_v1, %v3975_v48  ;;  %v4580_v9 = vpop.xlane.xlu1 %4579  ;;  %13461 = vst [vmem:[#allocation38_spill] sm:$0xff] %v12512_v27  ;;  %v12517_v52 = vpop.xlane.xlu0 %5224 }
 0x9f6   :  { %8719 = vrcp.f32 %v4580_v9 }
 0x9f7   :  { %v12509_v38 = vmul.f32 %v12157_v45, %v4036_v4  ;;  %v4023_v5 = vsub.f32 2.0, %v4007_v43 }
 0x9f8   :  { %v8712_v11 = vpop.eup %8711 }
 0x9f9   :  { %13460 = vst [vmem:[#allocation62_spill] sm:$0xff] %v12509_v38  ;;  %v4006_v16 = vmul.f32 %v8712_v11, %v3973_v47  ;;  %7353 = vmatprep.mubr.f32.mxu1 %v12509_v38  ;;  %v4582_v46 = vpop.xlane.xlu1 %4581  ;;  %v4039_v45 = vmul.f32 %v8710_v1, %v4023_v5 }
 0x9fa   :  { %8721 = vrcp.f32 %v4582_v46  ;;  %7354 = vmatmul.mubr.f32.gmra.mrb[28].mxu1 %v12512_v27 }
 0x9fb   :  { %8723 = vrcp.f32 %v12489_v19  ;;  %v4022_v54 = vsub.f32 2.0, %v4006_v16  ;;  %v12527_v1 = vmul.f32 %v12176_v8, %v4039_v45 }
 0x9fc   :  { %v8714_v7 = vpop.eup %8713  ;;  %8725 = vrcp.f32 %v12491_v26 }
 0x9fd   :  { %v8716_v4 = vpop.eup %8715  ;;  %v4038_v43 = vmul.f32 %v8712_v11, %v4022_v54  ;;  %v4623_v35 = vmul.f32 %v8714_v7, %v4578_v20  ;;  %v4586_v10 = vpop.xlane.xlu1 %4585  ;;  %13463 = vst [vmem:[#allocation47_spill] sm:$0xff] %v12527_v1 }
 0x9fe   :  { %8727 = vrcp.f32 %v4586_v10  ;;  %v8718_v48 = vpop.eup %8717  ;;  %v12521_v47 = vpop.xlane.xlu0 %5228  ;;  %v4626_v27 = vmul.f32 %v8716_v4, %v4584_v63 }
 0x9ff   :  { %8729 = vrcp.f32 %v12497_v3  ;;  %v4639_v13 = vsub.f32 2.0, %v4623_v35  ;;  %v12524_v38 = vmul.f32 %v12185_v25, %v4038_v43  ;;  %v4628_v20 = vmul.f32 %v8718_v48, %v12487_v34 }
 0xa00   :  { %v8720_v16 = vpop.eup %8719  ;;  %v4642_v63 = vsub.f32 2.0, %v4626_v27 }
 0xa01   :  { %13462 = vst [vmem:[#allocation75_spill] sm:$0xff] %v12524_v38  ;;  %v4655_v5 = vmul.f32 %v8714_v7, %v4639_v13  ;;  %v4624_v23 = vmul.f32 %v8720_v16, %v4580_v9  ;;  %7356 = vmatprep.mubr.f32.mxu1 %v12524_v38  ;;  %v4590_v11 = vpop.xlane.xlu1 %4589 }
 0xa02   :  { %8731 = vrcp.f32 %v4590_v11  ;;  %7357 = vmatmul.mubr.f32.gmra.mrb[30].mxu1 %v12527_v1  ;;  %v12535_v7 = vpop.xlane.xlu0 %5232 }
 0xa03   :  { %8733 = vrcp.f32 %v12493_v17  ;;  %v4640_v54 = vsub.f32 2.0, %v4624_v23  ;;  %7391 = vmatprep.mubr.f32.mxu1 %v12315_v29  ;;  %v12538_v35 = vmul.f32 %v12196_v61, %v4655_v5  ;;  %v4644_v23 = vsub.f32 2.0, %v4628_v20 }
 0xa04   :  { %v8722_v25 = vpop.eup %8721  ;;  %8735 = vrcp.f32 %v12495_v44 }
 0xa05   :  { %v8724_v43 = vpop.eup %8723  ;;  %v4656_v8 = vmul.f32 %v8720_v16, %v4640_v54  ;;  %v4625_v9 = vmul.f32 %v8722_v25, %v4582_v46  ;;  %v4594_v45 = vpop.xlane.xlu1 %4593  ;;  %13464 = vst [vmem:[#allocation79_spill] sm:$0xff] %v12538_v35  ;;  %v4658_v46 = vmul.f32 %v8716_v4, %v4642_v63  ;;  %v13465_v54 = vld [vmem:[#allocation64_spill] sm:$0xff] }
 0xa06   :  { %8737 = vrcp.f32 %v4594_v45  ;;  %7392 = vmatmul.mubr.f32.vlgmr.msra.gmra.mrb[16].mxu1 %v12287_v59  ;;  %v8726_v34 = vpop.eup %8725  ;;  %v4630_v16 = vmul.f32 %v8724_v43, %v12489_v19 }
 0xa07   :  { %v4641_v13 = vsub.f32 2.0, %v4625_v9  ;;  %7898 = vmatpush3.bf16.msra.mxu1 %v13440_v33  ;;  %7394 = vmatprep.mubr.f32.mxu1 %v12538_v35  ;;  %v12544_v29 = vmul.f32 %v12209_v55, %v4656_v8  ;;  %8739 = vrcp.f32 %v12499_v28  ;;  %v4660_v33 = vmul.f32 %v8718_v48, %v4644_v23  ;;  %v13468_v8 = vld [vmem:[#allocation26_spill] sm:$0xff] }
 0xa08   :  { %v8728_v27 = vpop.eup %8727  ;;  %7900 = vmatprep.subr.bf16.mxu1 %v13465_v54  ;;  %v4646_v4 = vsub.f32 2.0, %v4630_v16  ;;  %v4632_v63 = vmul.f32 %v8726_v34, %v12491_v26 }
 0xa09   :  { %v8730_v61 = vpop.eup %8729  ;;  %v4657_v59 = vmul.f32 %v8722_v25, %v4641_v13  ;;  %v4627_v5 = vmul.f32 %v8728_v27, %v4586_v10  ;;  %v4598_v20 = vpop.xlane.xlu1 %4597  ;;  %v13467_v10 = vld [vmem:[#allocation67_spill] sm:$0xff]  ;;  %v12558_v13 = vmul.f32 %v13468_v8, %v4658_v46  ;;  %v13470_v46 = vld [vmem:[#allocation80_spill] sm:$0xff] }
 0xa0a   :  { %v5834_v9 = vpop.xlane.xlu0 %5833  ;;  %8741 = vrcp.f32 %v4598_v20  ;;  %7395 = vmatmul.mubr.f32.gmra.mrb[18].mxu1 %v12544_v29  ;;  %v5251_v25 = vmul.f32 %v8730_v61, %v12497_v3  ;;  %v12568_v16 = vmul.f32 %v13470_v46, %v4660_v33  ;;  %v13471_v8 = vld [vmem:[#allocation72_spill] sm:$0xff] }
 0xa0b   :  { %v4643_v38 = vsub.f32 2.0, %v4627_v5  ;;  %8743 = vrcp.f32 %v5834_v9  ;;  %7902 = vmatpush3.bf16.msra.mxu1 %v13465_v54  ;;  %v12552_v55 = vmul.f32 %v12224_v58, %v4657_v59 }
 0xa0c   :  { %v8732_v19 = vpop.eup %8731  ;;  %7904 = vmatprep.subr.bf16.mxu1 %v13467_v10  ;;  %v5267_v5 = vsub.f32 2.0, %v5251_v25 }
 0xa0d   :  { %13466 = vst [vmem:[#allocation33_spill] sm:$0xff] %v12552_v55  ;;  %v8734_v1 = vpop.eup %8733  ;;  %v4659_v48 = vmul.f32 %v8728_v27, %v4643_v38  ;;  %v4629_v23 = vmul.f32 %v8732_v19, %v4590_v11  ;;  %7397 = vmatprep.mubr.f32.mxu1 %v12552_v55  ;;  %v4602_v54 = vpop.xlane.xlu1 %4601  ;;  %v4662_v11 = vmul.f32 %v8724_v43, %v4646_v4  ;;  %v4648_v27 = vsub.f32 2.0, %v4632_v63 }
 0xa0e   :  { %8745 = vrcp.f32 %v4602_v54  ;;  %7398 = vmatmul.mubr.f32.gmra.mrb[20].mxu1 %v12558_v13  ;;  %v8736_v58 = vpop.eup %8735  ;;  %v4634_v59 = vmul.f32 %v8734_v1, %v12493_v17  ;;  %v13472_v17 = vld [vmem:[#allocation76_spill] sm:$0xff]  ;;  %v5283_v25 = vmul.f32 %v8730_v61, %v5267_v5 }
 0xa0f   :  { %8747 = vrcp.f32 %v12501_v56  ;;  %v4645_v26 = vsub.f32 2.0, %v4629_v23  ;;  %7906 = vmatpush3.bf16.msra.mxu1 %v13467_v10  ;;  %v12565_v3 = vmul.f32 %v12230_v30, %v4659_v48  ;;  %v4636_v33 = vmul.f32 %v8736_v58, %v12495_v44  ;;  %v13473_v48 = vld [vmem:[#allocation53_spill] sm:$0xff] }
 0xa10   :  { %v8738_v38 = vpop.eup %8737  ;;  %7908 = vmatprep.subr.bf16.mxu1 %v13471_v8  ;;  %v4650_v63 = vsub.f32 2.0, %v4634_v59  ;;  %v13474_v23 = vld [vmem:[#allocation73_spill] sm:$0xff] }
 0xa11   :  { %13469 = vst [vmem:[#allocation39_spill] sm:$0xff] %v12565_v3  ;;  %v4661_v55 = vmul.f32 %v8732_v19, %v4645_v26  ;;  %v4631_v40 = vmul.f32 %v8738_v38, %v4594_v45  ;;  %v5203_v35 = vpop.xlane.xlu1 %5202  ;;  %7400 = vmatprep.mubr.f32.mxu1 %v12565_v3  ;;  %v8740_v30 = vpop.eup %8739  ;;  %v4664_v19 = vmul.f32 %v8726_v34, %v4648_v27  ;;  %v4652_v34 = vsub.f32 2.0, %v4636_v33  ;;  %v13476_v27 = vld [vmem:[#allocation37_spill] sm:$0xff] }
 0xa12   :  { %v12573_v10 = vpop.xlane.xlu0 %5837  ;;  %8749 = vrcp.f32 %v5203_v35  ;;  %7401 = vmatmul.mubr.f32.gmra.mrb[22].mxu1 %v12568_v16  ;;  %v12584_v26 = vmul.f32 %v13474_v23, %v4662_v11  ;;  %v12595_v59 = vmul.f32 %v13476_v27, %v5283_v25 }
 0xa13   :  { %v4647_v43 = vsub.f32 2.0, %v4631_v40  ;;  %8751 = vrcp.f32 %v12573_v10  ;;  %7910 = vmatpush3.bf16.msra.mxu1 %v13471_v8  ;;  %v12580_v4 = vmul.f32 %v13472_v17, %v4661_v55  ;;  %v5253_v8 = vmul.f32 %v8740_v30, %v12499_v28  ;;  %v13475_v55 = vld [vmem:[#allocation43_spill] sm:$0xff]  ;;  %v13477_v28 = vld [vmem:[#allocation36_spill] sm:$0xff] }
 0xa14   :  { %v8742_v45 = vpop.eup %8741  ;;  %7912 = vmatprep.subr.bf16.mxu1 %v13473_v48 }
 0xa15   :  { %v8744_v46 = vpop.eup %8743  ;;  %v4663_v3 = vmul.f32 %v8738_v38, %v4647_v43  ;;  %v4633_v44 = vmul.f32 %v8742_v45, %v4598_v20  ;;  %v5207_v40 = vpop.xlane.xlu1 %5206  ;;  %7403 = vmatprep.mubr.f32.mxu1 %v12580_v4  ;;  %v4666_v20 = vmul.f32 %v8734_v1, %v4650_v63 }
 0xa16   :  { %v5880_v57 = vmul.f32 %v8744_v46, %v5834_v9  ;;  %8753 = vrcp.f32 %v5207_v40  ;;  %7404 = vmatmul.mubr.f32.gmra.mrb[24].mxu1 %v12584_v26  ;;  %v13478_v9 = vld [vmem:[#allocation61_spill] sm:$0xff] }
 0xa17   :  { %8755 = vrcp.f32 %v12503_v51  ;;  %v4649_v61 = vsub.f32 2.0, %v4633_v44  ;;  %7914 = vmatpush3.bf16.msra.mxu1 %v13473_v48  ;;  %v12592_v11 = vmul.f32 %v13475_v55, %v4663_v3  ;;  %v12599_v43 = vmul.f32 %v13478_v9, %v4664_v19 }
 0xa18   :  { %v8746_v38 = vpop.eup %8745  ;;  %v5896_v5 = vsub.f32 2.0, %v5880_v57  ;;  %7916 = vmatprep.subr.bf16.mxu1 %v13477_v28  ;;  %8757 = vrcp.f32 %v12506_v60  ;;  %v5269_v3 = vsub.f32 2.0, %v5253_v8  ;;  %v4668_v57 = vmul.f32 %v8736_v58, %v4652_v34  ;;  %v13479_v8 = vld [vmem:[#allocation42_spill] sm:$0xff] }
 0xa19   :  { %v8748_v33 = vpop.eup %8747  ;;  %v4665_v17 = vmul.f32 %v8742_v45, %v4649_v61  ;;  %v4635_v23 = vmul.f32 %v8746_v38, %v4602_v54  ;;  %v12602_v48 = vpop.xlane.xlu1 %5210  ;;  %7406 = vmatprep.mubr.f32.mxu1 %v12592_v11  ;;  %v5331_v45 = vadd.f32 %v12595_v59, %v12297_v24  ;;  %v13480_v61 = vld [vmem:[#allocation82_spill] sm:$0xff] }
 0xa1a   :  { %v5912_v1 = vmul.f32 %v8744_v46, %v5896_v5  ;;  %8759 = vrcp.f32 %v12602_v48  ;;  %v5842_v63 = vpop.xlane.xlu0 %5841  ;;  %7407 = vmatmul.mubr.f32.gmra.mrb[26].mxu1 %v12599_v43  ;;  %v5255_v44 = vmul.f32 %v8748_v33, %v12501_v56  ;;  %v12619_v58 = vmul.f32 %v13480_v61, %v4666_v20 }
 0xa1b   :  { %v4651_v25 = vsub.f32 2.0, %v4635_v23  ;;  %8761 = vrcp.f32 %v5842_v63  ;;  %7918 = vmatpush3.bf16.msra.mxu1 %v13477_v28  ;;  %v12609_v19 = vmul.f32 %v12268_v32, %v4665_v17  ;;  %v5285_v32 = vmul.f32 %v8740_v30, %v5269_v3  ;;  %v13482_v23 = vld [vmem:[#allocation68_spill] sm:$0xff] }
 0xa1c   :  { %v8750_v54 = vpop.eup %8749  ;;  %v12615_v46 = vmul.f32 %v12270_v6, %v5912_v1  ;;  %7920 = vmatprep.subr.bf16.mxu1 %v13479_v8  ;;  %v5271_v28 = vsub.f32 2.0, %v5255_v44 }
 0xa1d   :  { %v8752_v34 = vpop.eup %8751  ;;  %v4667_v55 = vmul.f32 %v8746_v38, %v4651_v25  ;;  %v5250_v27 = vmul.f32 %v8750_v54, %v5203_v35  ;;  %v12621_v5 = vpop.xlane.xlu1 %5214  ;;  %7409 = vmatprep.mubr.f32.mxu1 %v12609_v19  ;;  %v13481_v38 = vld [vmem:[#allocation85_spill] sm:$0xff] }
 0xa1e   :  { %v5960_v24 = vadd.f32 %v12615_v46, %v5331_v45  ;;  %v5882_v56 = vmul.f32 %v8752_v34, %v12573_v10  ;;  %8763 = vrcp.f32 %v12621_v5  ;;  %7410 = vmatmul.mubr.f32.gmra.mrb[28].mxu1 %v12619_v58  ;;  %v12634_v20 = vmul.f32 %v13481_v38, %v4668_v57  ;;  %v13483_v57 = vld [vmem:[#allocation84_spill] sm:$0xff] }
 0xa1f   :  { %8765 = vrcp.f32 %v12517_v52  ;;  %v5266_v6 = vsub.f32 2.0, %v5250_v27  ;;  %7922 = vmatpush3.bf16.msra.mxu1 %v13479_v8  ;;  %v12631_v35 = vmul.f32 %v12282_v0, %v4667_v55  ;;  %v4704_v10 = vadd.f32 %v12544_v29, %v12351_v36  ;;  %v13485_v27 = vld [vmem:[#allocation69_spill] sm:$0xff] }
 0xa20   :  { %v8754_v30 = vpop.eup %8753  ;;  %v6265_v9 = vmul.f32 0.25, %v5960_v24  ;;  %v5898_v17 = vsub.f32 2.0, %v5882_v56  ;;  %7924 = vmatprep.subr.bf16.mxu1 %v13482_v23  ;;  %v5301_v44 = vmul.f32 %v13483_v57, %v5285_v32 }
 0xa21   :  { %v8756_v3 = vpop.eup %8755  ;;  %v5282_v1 = vmul.f32 %v8750_v54, %v5266_v6  ;;  %v5252_v25 = vmul.f32 %v8754_v30, %v5207_v40  ;;  %v5219_v45 = vpop.xlane.xlu1 %5218  ;;  %7412 = vmatprep.mubr.f32.mxu1 %v12631_v35  ;;  %v5287_v54 = vmul.f32 %v8748_v33, %v5271_v28 }
 0xa22   :  { %6281 = vst [vmem:[#allocation17 + $0x8] sm:$0xff] %v6265_v9  ;;  %v5914_v0 = vmul.f32 %v8752_v34, %v5898_v17  ;;  %8767 = vrcp.f32 %v5219_v45  ;;  %7413 = vmatmul.mubr.f32.gmra.mrb[30].mxu1 %v12634_v20  ;;  %v12642_v8 = vpop.eup %8757  ;;  %v5257_v61 = vmul.f32 %v8756_v3, %v12503_v51  ;;  %v13484_v34 = vld [vmem:[#allocation35_spill] sm:$0xff]  ;;  %v5333_v55 = vadd.f32 %v5301_v44, %v4704_v10 }
 0xa23   :  { %8769 = vrcp.f32 %v12521_v47  ;;  %v5268_v36 = vsub.f32 2.0, %v5252_v25  ;;  %7926 = vmatpush3.bf16.msra.mxu1 %v13482_v23  ;;  %v12647_v29 = vmul.f32 %v12292_v12, %v5282_v1  ;;  %v5259_v28 = vmul.f32 %v12642_v8, %v12506_v60  ;;  %v13487_v23 = vld [vmem:[#allocation81_spill] sm:$0xff] }
 0xa24   :  { %v8760_v40 = vpop.eup %8759  ;;  %7928 = vmatprep.subr.bf16.mxu1 %v13484_v34  ;;  %v12652_v24 = vmul.f32 %v13485_v27, %v5914_v0  ;;  %8771 = vrcp.f32 %v12535_v7  ;;  %v5273_v10 = vsub.f32 2.0, %v5257_v61  ;;  %v5303_v1 = vmul.f32 %v13487_v23, %v5287_v54  ;;  %v13488_v27 = vld [vmem:[#allocation44_spill] sm:$0xff] }
 0xa25   :  { %v8762_v32 = vpop.eup %8761  ;;  %v5284_v56 = vmul.f32 %v8754_v30, %v5268_v36  ;;  %v5254_v6 = vmul.f32 %v8760_v40, %v12602_v48  ;;  %v5223_v38 = vpop.xlane.xlu1 %5222  ;;  %7447 = vmatprep.mubr.f32.mxu1 %v12647_v29  ;;  %v4706_v36 = vadd.f32 %v12558_v13, %v12385_v42  ;;  %v5275_v61 = vsub.f32 2.0, %v5259_v28 }
 0xa26   :  { %v5884_v12 = vmul.f32 %v8762_v32, %v5842_v63  ;;  %8773 = vrcp.f32 %v5223_v38  ;;  %v5846_v33 = vpop.xlane.xlu0 %5845  ;;  %7448 = vmatmul.mubr.f32.vlgmr.msra.gmra.mrb[16].mxu1 %v12595_v59  ;;  %v5962_v51 = vadd.f32 %v12652_v24, %v5333_v55  ;;  %v13486_v63 = vld [vmem:[#allocation41_spill] sm:$0xff]  ;;  %v5289_v55 = vmul.f32 %v8756_v3, %v5273_v10  ;;  %v13490_v10 = vld [vmem:[#allocation34_spill] sm:$0xff] }
 0xa27   :  { %v5270_v9 = vsub.f32 2.0, %v5254_v6  ;;  %8775 = vrcp.f32 %v5846_v33  ;;  %7930 = vmatpush3.bf16.msra.mxu1 %v13484_v34  ;;  %v12663_v30 = vmul.f32 %v12308_v31, %v5284_v56  ;;  %v5335_v56 = vadd.f32 %v5303_v1, %v4706_v36 }
 0xa28   :  { %v8764_v48 = vpop.eup %8763  ;;  %v5900_v17 = vsub.f32 2.0, %v5884_v12  ;;  %7932 = vmatprep.subr.bf16.mxu1 %v13486_v63  ;;  %v6267_v59 = vmul.f32 0.25, %v5962_v51 }
 0xa29   :  { %v8766_v25 = vpop.eup %8765  ;;  %v5286_v0 = vmul.f32 %v8760_v40, %v5270_v9  ;;  %v5256_v57 = vmul.f32 %v8764_v48, %v12621_v5  ;;  %v5227_v60 = vpop.xlane.xlu1 %5226  ;;  %7450 = vmatprep.mubr.f32.mxu1 %v12663_v30 }
 0xa2a   :  { %v5916_v31 = vmul.f32 %v8762_v32, %v5900_v17  ;;  %8777 = vrcp.f32 %v5227_v60  ;;  %7451 = vmatmul.mubr.f32.gmra.mrb[18].mxu1 %v5301_v44  ;;  %6283 = vst [vmem:[#allocation17 + $0x18] sm:$0xff] %v6267_v59  ;;  %v5261_v5 = vmul.f32 %v8766_v25, %v12517_v52  ;;  %v5291_v52 = vmul.f32 %v12642_v8, %v5275_v61 }
 0xa2b   :  { %v5272_v34 = vsub.f32 2.0, %v5256_v57  ;;  %7934 = vmatpush3.bf16.msra.mxu1 %v13486_v63  ;;  %v12673_v54 = vmul.f32 %v12318_v18, %v5286_v0  ;;  %v5305_v17 = vmul.f32 %v13490_v10, %v5289_v55  ;;  %v13491_v57 = vld [vmem:[#allocation83_spill] sm:$0xff]  ;;  %v13492_v55 = vld [vmem:[#allocation60_spill] sm:$0xff] }
 0xa2c   :  { %v8768_v40 = vpop.eup %8767  ;;  %7936 = vmatprep.subr.bf16.mxu1 %v13488_v27  ;;  %v12678_v42 = vmul.f32 %v12327_v50, %v5916_v31  ;;  %v5277_v28 = vsub.f32 2.0, %v5261_v5  ;;  %v5307_v36 = vmul.f32 %v13491_v57, %v5291_v52 }
 0xa2d   :  { %v8770_v13 = vpop.eup %8769  ;;  %v5288_v44 = vmul.f32 %v8764_v48, %v5272_v34  ;;  %v5258_v32 = vmul.f32 %v8768_v40, %v5219_v45  ;;  %v5231_v6 = vpop.xlane.xlu1 %5230  ;;  %7453 = vmatprep.mubr.f32.mxu1 %v12673_v54  ;;  %v13489_v48 = vld [vmem:[#allocation50_spill] sm:$0xff] }
 0xa2e   :  { %8779 = vrcp.f32 %v5231_v6  ;;  %v5850_v12 = vpop.xlane.xlu0 %5849  ;;  %7454 = vmatmul.mubr.f32.gmra.mrb[20].mxu1 %v5303_v1  ;;  %v5964_v18 = vadd.f32 %v12678_v42, %v5335_v56  ;;  %v12682_v3 = vpop.eup %8771  ;;  %v5263_v9 = vmul.f32 %v8770_v13, %v12521_v47  ;;  %v5293_v61 = vmul.f32 %v8766_v25, %v5277_v28 }
 0xa2f   :  { %v5274_v51 = vsub.f32 2.0, %v5258_v32  ;;  %8781 = vrcp.f32 %v5850_v12  ;;  %7938 = vmatpush3.bf16.msra.mxu1 %v13488_v27  ;;  %v12687_v50 = vmul.f32 %v12339_v14, %v5288_v44 }
 0xa30   :  { %v8774_v45 = vpop.eup %8773  ;;  %7940 = vmatprep.subr.bf16.mxu1 %v13489_v48  ;;  %v6269_v63 = vmul.f32 0.25, %v5964_v18  ;;  %v5279_v34 = vsub.f32 2.0, %v5263_v9 }
 0xa31   :  { %v8776_v23 = vpop.eup %8775  ;;  %v5290_v1 = vmul.f32 %v8768_v40, %v5274_v51  ;;  %v5260_v59 = vmul.f32 %v8774_v45, %v5223_v38  ;;  %v5832_v8 = vpop.xlane.xlu1 %5831  ;;  %7456 = vmatprep.mubr.f32.mxu1 %v12687_v50  ;;  %v5265_v38 = vmul.f32 %v12682_v3, %v12535_v7 }
 0xa32   :  { %v5886_v0 = vmul.f32 %v8776_v23, %v5846_v33  ;;  %8783 = vrcp.f32 %v5832_v8  ;;  %7457 = vmatmul.mubr.f32.gmra.mrb[22].mxu1 %v5305_v17  ;;  %6285 = vst [vmem:[#allocation17 + $0x28] sm:$0xff] %v6269_v63  ;;  %v4708_v33 = vadd.f32 %v12568_v16, %v12431_v15  ;;  %v5295_v52 = vmul.f32 %v8770_v13, %v5279_v34  ;;  %v13493_v16 = vld [vmem:[#allocation66_spill] sm:$0xff] }
 0xa33   :  { %v5276_v14 = vsub.f32 2.0, %v5260_v59  ;;  %7942 = vmatpush3.bf16.msra.mxu1 %v13489_v48  ;;  %v12695_v47 = vmul.f32 %v12358_v62, %v5290_v1  ;;  %v5281_v15 = vsub.f32 2.0, %v5265_v38  ;;  %v13496_v59 = vld [vmem:[#allocation58_spill] sm:$0xff] }
 0xa34   :  { %v8778_v31 = vpop.eup %8777  ;;  %v5902_v40 = vsub.f32 2.0, %v5886_v0  ;;  %7944 = vmatprep.subr.bf16.mxu1 %v13492_v55  ;;  %v5337_v32 = vadd.f32 %v5305_v17, %v4708_v33  ;;  %v12725_v0 = vmul.f32 %v13496_v59, %v5295_v52  ;;  %v13498_v33 = vld [vmem:[#allocation31_spill] sm:$0xff] }
 0xa35   :  { %v5292_v5 = vmul.f32 %v8774_v45, %v5276_v14  ;;  %v5262_v27 = vmul.f32 %v8778_v31, %v5227_v60  ;;  %v5836_v56 = vpop.xlane.xlu1 %5835  ;;  %7459 = vmatprep.mubr.f32.mxu1 %v12695_v47  ;;  %v13494_v60 = vld [vmem:[#allocation54_spill] sm:$0xff]  ;;  %v13503_v59 = vld [vmem:[#allocation63_spill] sm:$0xff] }
 0xa36   :  { %v5918_v62 = vmul.f32 %v8776_v23, %v5902_v40  ;;  %8785 = vrcp.f32 %v5836_v56  ;;  %v5854_v44 = vpop.xlane.xlu0 %5853  ;;  %7460 = vmatmul.mubr.f32.gmra.mrb[24].mxu1 %v5307_v36  ;;  %v12710_v51 = vmul.f32 %v13494_v60, %v5293_v61  ;;  %v5297_v23 = vmul.f32 %v12682_v3, %v5281_v15  ;;  %v13500_v60 = vld [vmem:[#allocation79_spill] sm:$0xff] }
 0xa37   :  { %v5278_v25 = vsub.f32 2.0, %v5262_v27  ;;  %8787 = vrcp.f32 %v5854_v44  ;;  %7946 = vmatpush3.bf16.msra.mxu1 %v13492_v55  ;;  %v12706_v7 = vmul.f32 %v12368_v21, %v5292_v5  ;;  %v13497_v55 = vld [vmem:[#allocation71_spill] sm:$0xff] }
 0xa38   :  { %v8780_v18 = vpop.eup %8779  ;;  %7948 = vmatprep.subr.bf16.mxu1 %v13493_v16  ;;  %v12713_v45 = vmul.f32 %v12372_v37, %v5918_v62  ;;  %v12737_v5 = vmul.f32 %v13498_v33, %v5297_v23  ;;  %v13502_v23 = vld [vmem:[#allocation49_spill] sm:$0xff] }
 0xa39   :  { %v8782_v28 = vpop.eup %8781  ;;  %v5294_v9 = vmul.f32 %v8778_v31, %v5278_v25  ;;  %v5264_v48 = vmul.f32 %v8780_v18, %v5231_v6  ;;  %v5840_v10 = vpop.xlane.xlu1 %5839  ;;  %7462 = vmatprep.mubr.f32.mxu1 %v12706_v7  ;;  %v13495_v6 = vld [vmem:[#allocation45_spill] sm:$0xff] }
 0xa3a   :  { %v5888_v17 = vmul.f32 %v8782_v28, %v5850_v12  ;;  %8789 = vrcp.f32 %v5840_v10  ;;  %7463 = vmatmul.mubr.f32.gmra.mrb[26].mxu1 %v12710_v51  ;;  %v5966_v21 = vadd.f32 %v12713_v45, %v5337_v32 }
 0xa3b   :  { %v5280_v13 = vsub.f32 2.0, %v5264_v48  ;;  %7950 = vmatpush3.bf16.msra.mxu1 %v13493_v16  ;;  %v12720_v63 = vmul.f32 %v12392_v22, %v5294_v9  ;;  %v4710_v22 = vadd.f32 %v12584_v26, %v12460_v2  ;;  %v13499_v16 = vld [vmem:[#allocation56_spill] sm:$0xff] }
 0xa3c   :  { %v8784_v37 = vpop.eup %8783  ;;  %v5904_v1 = vsub.f32 2.0, %v5888_v17  ;;  %7952 = vmatprep.subr.bf16.mxu1 %v13495_v6  ;;  %v6271_v12 = vmul.f32 0.25, %v5966_v21  ;;  %v13501_v21 = vld [vmem:[#allocation87_spill] sm:$0xff] }
 0xa3d   :  { %v5296_v14 = vmul.f32 %v8780_v18, %v5280_v13  ;;  %v5879_v57 = vmul.f32 %v8784_v37, %v5832_v8  ;;  %v5844_v31 = vpop.xlane.xlu1 %5843  ;;  %7465 = vmatprep.mubr.f32.mxu1 %v12720_v63  ;;  %v5339_v40 = vadd.f32 %v5307_v36, %v4710_v22  ;;  %v5330_v36 = vadd.f32 %v12647_v29, %v12325_v49 }
 0xa3e   :  { %v5858_v61 = vpop.xlane.xlu0 %5857  ;;  %v5920_v34 = vmul.f32 %v8782_v28, %v5904_v1  ;;  %8791 = vrcp.f32 %v5844_v31  ;;  %7466 = vmatmul.mubr.f32.gmra.mrb[28].mxu1 %v12725_v0  ;;  %6287 = vst [vmem:[#allocation17 + $0x38] sm:$0xff] %v6271_v12  ;;  %v4703_v28 = vadd.f32 %v13500_v60, %v13499_v16  ;;  %v4712_v13 = vadd.f32 %v12599_v43, %v13501_v21 }
 0xa3f   :  { %v5895_v3 = vsub.f32 2.0, %v5879_v57  ;;  %8793 = vrcp.f32 %v5858_v61  ;;  %7954 = vmatpush3.bf16.msra.mxu1 %v13495_v6  ;;  %v12733_v38 = vmul.f32 %v12397_v53, %v5296_v14  ;;  %v13505_v57 = vld [vmem:[#allocation86_spill] sm:$0xff] }
 0xa40   :  { %v8786_v8 = vpop.eup %8785  ;;  %7956 = vmatprep.subr.bf16.mxu1 %v13497_v55  ;;  %v12740_v2 = vmul.f32 %v12404_v41, %v5920_v34  ;;  %v5341_v14 = vadd.f32 %v12710_v51, %v4712_v13  ;;  %v13511_v13 = vld [vmem:[#allocation77_spill] sm:$0xff] }
 0xa41   :  { %v8788_v26 = vpop.eup %8787  ;;  %v5911_v27 = vmul.f32 %v8784_v37, %v5895_v3  ;;  %v5881_v62 = vmul.f32 %v8786_v8, %v5836_v56  ;;  %v5848_v25 = vpop.xlane.xlu1 %5847  ;;  %7468 = vmatprep.mubr.f32.mxu1 %v12733_v38 }
 0xa42   :  { %v5890_v32 = vmul.f32 %v8788_v26, %v5854_v44  ;;  %8795 = vrcp.f32 %v5848_v25  ;;  %7469 = vmatmul.mubr.f32.gmra.mrb[30].mxu1 %v12737_v5  ;;  %v5968_v53 = vadd.f32 %v12740_v2, %v5339_v40 }
 0xa43   :  { %v5897_v18 = vsub.f32 2.0, %v5881_v62  ;;  %7958 = vmatpush3.bf16.msra.mxu1 %v13497_v55  ;;  %v5927_v41 = vmul.f32 %v12417_v39, %v5911_v27  ;;  %v5332_v39 = vadd.f32 %v12663_v30, %v4703_v28  ;;  %v13506_v27 = vld [vmem:[#allocation51_spill] sm:$0xff] }
 0xa44   :  { %v8790_v52 = vpop.eup %8789  ;;  %v5906_v15 = vsub.f32 2.0, %v5890_v32  ;;  %v6273_v56 = vmul.f32 0.25, %v5968_v53 }
 0xa45   :  { %v5913_v44 = vmul.f32 %v8786_v8, %v5897_v18  ;;  %v5883_v9 = vmul.f32 %v8790_v52, %v5840_v10  ;;  %v5852_v48 = vpop.xlane.xlu1 %5851  ;;  %v5959_v17 = vadd.f32 %v5927_v41, %v5330_v36  ;;  %7503 = vmatprep.mubr.f32.mxu1 %v5927_v41  ;;  %v13504_v10 = vld [vmem:[#allocation33_spill] sm:$0xff]  ;;  %v13507_v36 = vld [vmem:[#allocation74_spill] sm:$0xff]  ;;  %v13508_v18 = vld [vmem:[#allocation39_spill] sm:$0xff] }
 0xa46   :  { %v5922_v49 = vmul.f32 %v8788_v26, %v5906_v15  ;;  %8797 = vrcp.f32 %v5852_v48  ;;  %7504 = vmatmul.mubr.f32.vlgmr.msra.gmra.mrb[16].mxu1 %v12615_v46  ;;  %6289 = vst [vmem:[#allocation17 + $0x48] sm:$0xff] %v6273_v56  ;;  %v4705_v12 = vadd.f32 %v13504_v10, %v13503_v59  ;;  %v4707_v41 = vadd.f32 %v13508_v18, %v13507_v36  ;;  %v13513_v59 = vld [vmem:[#allocation32_spill] sm:$0xff]  ;;  %v13518_v36 = vld [vmem:[#allocation57_spill] sm:$0xff] }
 0xa47   :  { %v5899_v29 = vsub.f32 2.0, %v5883_v9  ;;  %v6264_v37 = vmul.f32 0.25, %v5959_v17  ;;  %v5929_v1 = vmul.f32 %v13502_v23, %v5913_v44  ;;  %v13510_v9 = vld [vmem:[#allocation48_spill] sm:$0xff] }
 0xa48   :  { %v8792_v6 = vpop.eup %8791  ;;  %v12760_v22 = vmul.f32 %v13505_v57, %v5922_v49  ;;  %v5334_v30 = vadd.f32 %v12673_v54, %v4705_v12  ;;  %v5336_v60 = vadd.f32 %v12687_v50, %v4707_v41  ;;  %v13514_v57 = vld [vmem:[#allocation65_spill] sm:$0xff] }
 0xa49   :  { %v8794_v43 = vpop.eup %8793  ;;  %v5915_v34 = vmul.f32 %v8790_v52, %v5899_v29  ;;  %v5885_v3 = vmul.f32 %v8792_v6, %v5844_v31  ;;  %6280 = vst [vmem:[#allocation17] sm:$0xff] %v6264_v37  ;;  %v5856_v46 = vpop.xlane.xlu1 %5855  ;;  %v5961_v8 = vadd.f32 %v5929_v1, %v5332_v39  ;;  %7506 = vmatprep.mubr.f32.mxu1 %v5929_v1  ;;  %v13512_v39 = vld [vmem:[#allocation59_spill] sm:$0xff] }
 0xa4a   :  { %v5892_v40 = vmul.f32 %v8794_v43, %v5858_v61  ;;  %8799 = vrcp.f32 %v5856_v46  ;;  %7507 = vmatmul.mubr.f32.gmra.mrb[18].mxu1 %v12652_v24  ;;  %v5862_v55 = vpop.xlane.xlu0 %5861  ;;  %v5970_v33 = vadd.f32 %v12760_v22, %v5341_v14  ;;  %v13509_v24 = vld [vmem:[#allocation38_spill] sm:$0xff]  ;;  %v4709_v29 = vadd.f32 %v12580_v4, %v13512_v39 }
 0xa4b   :  { %v5901_v51 = vsub.f32 2.0, %v5885_v3  ;;  %v6266_v26 = vmul.f32 0.25, %v5961_v8  ;;  %8801 = vrcp.f32 %v5862_v55  ;;  %v5931_v62 = vmul.f32 %v13506_v27, %v5915_v34 }
 0xa4c   :  { %v8796_v32 = vpop.eup %8795  ;;  %v5908_v31 = vsub.f32 2.0, %v5892_v40  ;;  %v6275_v53 = vmul.f32 0.25, %v5970_v33  ;;  %v4714_v56 = vadd.f32 %v12619_v58, %v13509_v24  ;;  %v5338_v50 = vadd.f32 %v12695_v47, %v4709_v29 }
 0xa4d   :  { %v5917_v52 = vmul.f32 %v8792_v6, %v5901_v51  ;;  %v5887_v54 = vmul.f32 %v8796_v32, %v5848_v25  ;;  %6282 = vst [vmem:[#allocation17 + $0x10] sm:$0xff] %v6266_v26  ;;  %v5860_v61 = vpop.xlane.xlu1 %5859  ;;  %v5963_v15 = vadd.f32 %v5931_v62, %v5334_v30  ;;  %7509 = vmatprep.mubr.f32.mxu1 %v5931_v62  ;;  %v13515_v30 = vld [vmem:[#allocation46_spill] sm:$0xff] }
 0xa4e   :  { %v5924_v16 = vmul.f32 %v8794_v43, %v5908_v31  ;;  %8803 = vrcp.f32 %v5860_v61  ;;  %7510 = vmatmul.mubr.f32.gmra.mrb[20].mxu1 %v12678_v42  ;;  %6291 = vst [vmem:[#allocation17 + $0x58] sm:$0xff] %v6275_v53  ;;  %v5343_v25 = vadd.f32 %v12725_v0, %v4714_v56  ;;  %v4711_v4 = vadd.f32 %v12592_v11, %v13514_v57  ;;  %v13516_v26 = vld [vmem:[#allocation62_spill] sm:$0xff]  ;;  %v13521_v56 = vld [vmem:[#allocation52_spill] sm:$0xff] }
 0xa4f   :  { %v5903_v28 = vsub.f32 2.0, %v5887_v54  ;;  %v6268_v44 = vmul.f32 0.25, %v5963_v15  ;;  %v5933_v17 = vmul.f32 %v13510_v9, %v5917_v52  ;;  %v4713_v11 = vadd.f32 %v12609_v19, %v13516_v26  ;;  %v13519_v19 = vld [vmem:[#allocation40_spill] sm:$0xff]  ;;  %v13520_v54 = vld [vmem:[#allocation75_spill] sm:$0xff] }
 0xa50   :  { %v8798_v21 = vpop.eup %8797  ;;  %v5940_v49 = vmul.f32 %v13511_v13, %v5924_v16  ;;  %v5340_v47 = vadd.f32 %v12706_v7, %v4711_v4 }
 0xa51   :  { %v5919_v58 = vmul.f32 %v8796_v32, %v5903_v28  ;;  %v5889_v37 = vmul.f32 %v8798_v21, %v5852_v48  ;;  %6284 = vst [vmem:[#allocation17 + $0x20] sm:$0xff] %v6268_v44  ;;  %v5965_v23 = vadd.f32 %v5933_v17, %v5336_v60  ;;  %7512 = vmatprep.mubr.f32.mxu1 %v5933_v17 }
 0xa52   :  { %7513 = vmatmul.mubr.f32.gmra.mrb[22].mxu1 %v12713_v45  ;;  %v5972_v42 = vadd.f32 %v5940_v49, %v5343_v25  ;;  %v5342_v7 = vadd.f32 %v12720_v63, %v4713_v11 }
 0xa53   :  { %v5905_v1 = vsub.f32 2.0, %v5889_v37  ;;  %v6270_v6 = vmul.f32 0.25, %v5965_v23  ;;  %v5935_v10 = vmul.f32 %v13513_v59, %v5919_v58 }
 0xa54   :  { %v8800_v0 = vpop.eup %8799  ;;  %v6277_v12 = vmul.f32 0.25, %v5972_v42 }
 0xa55   :  { %v8802_v14 = vpop.eup %8801  ;;  %v5921_v43 = vmul.f32 %v8798_v21, %v5905_v1  ;;  %v5891_v48 = vmul.f32 %v8800_v0, %v5856_v46  ;;  %6286 = vst [vmem:[#allocation17 + $0x30] sm:$0xff] %v6270_v6  ;;  %v5967_v34 = vadd.f32 %v5935_v10, %v5338_v50  ;;  %7515 = vmatprep.mubr.f32.mxu1 %v5935_v10 }
 0xa56   :  { %v5894_v3 = vmul.f32 %v8802_v14, %v5862_v55  ;;  %7516 = vmatmul.mubr.f32.gmra.mrb[24].mxu1 %v12740_v2  ;;  %6293 = vst [vmem:[#allocation17 + $0x68] sm:$0xff] %v6277_v12  ;;  %v13517_v55 = vld [vmem:[#allocation47_spill] sm:$0xff] }
 0xa57   :  { %v5907_v45 = vsub.f32 2.0, %v5891_v48  ;;  %v6272_v8 = vmul.f32 0.25, %v5967_v34  ;;  %v5937_v40 = vmul.f32 %v13515_v30, %v5921_v43  ;;  %v4716_v2 = vadd.f32 %v12634_v20, %v13517_v55 }
 0xa58   :  { %v8804_v33 = vpop.eup %8803  ;;  %v5910_v51 = vsub.f32 2.0, %v5894_v3 }
 0xa59   :  { %v5923_v27 = vmul.f32 %v8800_v0, %v5907_v45  ;;  %v5893_v46 = vmul.f32 %v8804_v33, %v5860_v61  ;;  %6288 = vst [vmem:[#allocation17 + $0x40] sm:$0xff] %v6272_v8  ;;  %v5969_v62 = vadd.f32 %v5937_v40, %v5340_v47  ;;  %7518 = vmatprep.mubr.f32.mxu1 %v5937_v40 }
 0xa5a   :  { %v5926_v32 = vmul.f32 %v8802_v14, %v5910_v51  ;;  %7519 = vmatmul.mubr.f32.gmra.mrb[26].mxu1 %v12760_v22  ;;  %v5345_v41 = vadd.f32 %v12737_v5, %v4716_v2  ;;  %v4715_v61 = vadd.f32 %v12631_v35, %v13520_v54 }
 0xa5b   :  { %v5909_v31 = vsub.f32 2.0, %v5893_v46  ;;  %v6274_v53 = vmul.f32 0.25, %v5969_v62  ;;  %v5939_v18 = vmul.f32 %v13518_v36, %v5923_v27 }
 0xa5c   :  { %v5942_v52 = vmul.f32 %v13519_v19, %v5926_v32  ;;  %v5344_v22 = vadd.f32 %v12733_v38, %v4715_v61 }
 0xa5d   :  { %v5925_v15 = vmul.f32 %v8804_v33, %v5909_v31  ;;  %6290 = vst [vmem:[#allocation17 + $0x50] sm:$0xff] %v6274_v53  ;;  %v5971_v24 = vadd.f32 %v5939_v18, %v5342_v7  ;;  %7521 = vmatprep.mubr.f32.mxu1 %v5939_v18 }
 0xa5e   :  { %7522 = vmatmul.mubr.f32.gmra.mrb[28].mxu1 %v5940_v49  ;;  %v5974_v20 = vadd.f32 %v5942_v52, %v5345_v41 }
 0xa5f   :  { %v6276_v63 = vmul.f32 0.25, %v5971_v24  ;;  %v5941_v16 = vmul.f32 %v13521_v56, %v5925_v15 }
 0xa60   :  { %v6279_v60 = vmul.f32 0.25, %v5974_v20 }
 0xa61   :  { %6292 = vst [vmem:[#allocation17 + $0x60] sm:$0xff] %v6276_v63  ;;  %v5973_v28 = vadd.f32 %v5941_v16, %v5344_v22  ;;  %7524 = vmatprep.mubr.f32.mxu1 %v5941_v16 }
 0xa62   :  { %7525 = vmatmul.mubr.f32.gmra.mrb[30].mxu1 %v5942_v52  ;;  %6295 = vst [vmem:[#allocation17 + $0x78] sm:$0xff] %v6279_v60 }
 0xa63   :  { %v6278_v5 = vmul.f32 0.25, %v5973_v28 }
 0xa65   :  { %6294 = vst [vmem:[#allocation17 + $0x70] sm:$0xff] %v6278_v5 }
 0xa66   :  { %8964 = shalt.err (!%p8961_p10)
}
 0xa67   :  { %s8965_s19 = scalar_lea.hbm %s12873_s8, 2048 }
 0xa68   :  { %p8966_p11 = scmp.ne.s32.totalorder %s12873_s8, %s8965_s19  ;;  %p8969_p12 = scmp.lt.u32.totalorder %s8965_s19, %s12873_s8 }
 0xa6a   :  { %p8971_p13 = pnand %p8969_p12, %p8966_p11 }
 0xa6c   :  { %8974 = shalt.err (!%p8971_p13)
}
 0xa6d   :  { %6307 = dma.vmem_to_hbm [thread:$0]  %s6302_s16, 2048, %s12873_s8, [#allocation4], %s9057_s29, %s9057_s29, %s9058_s30  }
 0xa6e   :  { %s9071_s18 = smov [#allocation17]  }
 0xa6f   :  { %s6337_s24 = sshll.u32 %s9071_s18, 4  ;;  %s6338_s24 = int_to_ptr.vmem [resolvable:$true] %s6337_s24 }
 0xa70   :  { %s8975_s26 = scalar_lea.vmem %s6338_s24, 2048  ;;  %p8980_p1 = scmp.lt.s32.totalorder %s6338_s24, %s6338_s24 }
 0xa71   :  { %p8976_p0 = scmp.ne.s32.totalorder %s6338_s24, %s8975_s26  ;;  %p8981_p2 = scmp.lt.s32.totalorder %s8975_s26, %s8975_s26 }
 0xa73   :  { %p8982_p3 = por %p8981_p2, %p8980_p1 }
 0xa75   :  { %p8983_p4 = pnand %p8982_p3, %p8976_p0 }
 0xa77   :  { %8986 = shalt.err (!%p8983_p4)
}
 0xa78   :  { %s8987_s25 = scalar_lea.hbm %s12876_s11, 2048 }
 0xa79   :  { %p8988_p5 = scmp.ne.s32.totalorder %s12876_s11, %s8987_s25  ;;  %p8991_p6 = scmp.lt.u32.totalorder %s8987_s25, %s12876_s11 }
 0xa7b   :  { %p8993_p7 = pnand %p8991_p6, %p8988_p5 }
 0xa7d   :  { %8996 = shalt.err (!%p8993_p7)
}
 0xa7e   :  { %6343 = dma.vmem_to_hbm [thread:$0]  %s6338_s24, 2048, %s12876_s11, [#allocation18], %s9057_s29, %s9057_s29, %s9058_s30  }
 0xa7f   :  { %s9072_s11 = smov [#allocation14]   ;;  %s9073_s15 = smov [#allocation16]  }
 0xa80   :  { %s6313_s4 = sshll.u32 %s9072_s11, 4  ;;  %s6325_s7 = sshll.u32 %s9073_s15, 4  ;;  %s6314_s4 = int_to_ptr.vmem [resolvable:$true] %s6313_s4  ;;  %s12828_s7 = int_to_ptr.vmem [resolvable:$true] %s6325_s7 }
 0xa81   :  { %s8997_s16 = scalar_lea.vmem %s6314_s4, 2048  ;;  %p9002_p9 = scmp.lt.s32.totalorder %s6314_s4, %s6314_s4 }
 0xa82   :  { %p8998_p8 = scmp.ne.s32.totalorder %s6314_s4, %s8997_s16  ;;  %p9003_p10 = scmp.lt.s32.totalorder %s8997_s16, %s8997_s16 }
 0xa84   :  { %p9004_p11 = por %p9003_p10, %p9002_p9 }
 0xa86   :  { %p9005_p12 = pnand %p9004_p11, %p8998_p8 }
 0xb19   :  { %v7505_v35 = vpop.f32.mrb[16].mxu1 }
 0xb1a   :  { %v6089_v38 = vpop.f32.mrb[17].mxu1  ;;  %v6217_v44 = vmax.f32 %v7505_v35, 0.0 }
 0xb1b   :  { %v6216_v9 = vmax.f32 %v6089_v38, 0.0 }
 0xb1c   :  { %6233 = vst [vmem:[#allocation14 + $0x8] sm:$0xff] %v6217_v44 }
 0xb1d   :  { %v7508_v17 = vpop.f32.mrb[18].mxu1  ;;  %6232 = vst [vmem:[#allocation14] sm:$0xff] %v6216_v9 }
 0xb1e   :  { %v6099_v21 = vpop.f32.mrb[19].mxu1  ;;  %v6219_v25 = vmax.f32 %v7508_v17, 0.0 }
 0xb1f   :  { %v6218_v13 = vmax.f32 %v6099_v21, 0.0 }
 0xb20   :  { %6235 = vst [vmem:[#allocation14 + $0x18] sm:$0xff] %v6219_v25 }
 0xb21   :  { %v7511_v49 = vpop.f32.mrb[20].mxu1  ;;  %6234 = vst [vmem:[#allocation14 + $0x10] sm:$0xff] %v6218_v13 }
 0xb22   :  { %v6109_v39 = vpop.f32.mrb[21].mxu1  ;;  %v6221_v29 = vmax.f32 %v7511_v49, 0.0 }
 0xb23   :  { %v6220_v58 = vmax.f32 %v6109_v39, 0.0 }
 0xb24   :  { %6237 = vst [vmem:[#allocation14 + $0x28] sm:$0xff] %v6221_v29 }
 0xb25   :  { %v7514_v37 = vpop.f32.mrb[22].mxu1  ;;  %6236 = vst [vmem:[#allocation14 + $0x20] sm:$0xff] %v6220_v58 }
 0xb26   :  { %v6119_v23 = vpop.f32.mrb[23].mxu1  ;;  %v6223_v42 = vmax.f32 %v7514_v37, 0.0 }
 0xb27   :  { %v6222_v50 = vmax.f32 %v6119_v23, 0.0 }
 0xb28   :  { %6239 = vst [vmem:[#allocation14 + $0x38] sm:$0xff] %v6223_v42 }
 0xb29   :  { %v7517_v1 = vpop.f32.mrb[24].mxu1  ;;  %6238 = vst [vmem:[#allocation14 + $0x30] sm:$0xff] %v6222_v50 }
 0xb2a   :  { %v6129_v6 = vpop.f32.mrb[25].mxu1  ;;  %v6225_v59 = vmax.f32 %v7517_v1, 0.0 }
 0xb2b   :  { %v6224_v10 = vmax.f32 %v6129_v6, 0.0 }
 0xb2c   :  { %6241 = vst [vmem:[#allocation14 + $0x48] sm:$0xff] %v6225_v59 }
 0xb2d   :  { %v7520_v0 = vpop.f32.mrb[26].mxu1  ;;  %6240 = vst [vmem:[#allocation14 + $0x40] sm:$0xff] %v6224_v10 }
 0xb2e   :  { %v6139_v12 = vpop.f32.mrb[27].mxu1  ;;  %v6227_v14 = vmax.f32 %v7520_v0, 0.0 }
 0xb2f   :  { %v6226_v57 = vmax.f32 %v6139_v12, 0.0 }
 0xb30   :  { %6243 = vst [vmem:[#allocation14 + $0x58] sm:$0xff] %v6227_v14 }
 0xb31   :  { %v7523_v4 = vpop.f32.mrb[28].mxu1  ;;  %6242 = vst [vmem:[#allocation14 + $0x50] sm:$0xff] %v6226_v57 }
 0xb32   :  { %v6149_v43 = vpop.f32.mrb[29].mxu1  ;;  %v6229_v48 = vmax.f32 %v7523_v4, 0.0 }
 0xb33   :  { %v6228_v34 = vmax.f32 %v6149_v43, 0.0 }
 0xb34   :  { %6245 = vst [vmem:[#allocation14 + $0x68] sm:$0xff] %v6229_v48 }
 0xb35   :  { %v7526_v3 = vpop.f32.mrb[30].mxu1  ;;  %6244 = vst [vmem:[#allocation14 + $0x60] sm:$0xff] %v6228_v34 }
 0xb36   :  { %v6159_v47 = vpop.f32.mrb[31].mxu1  ;;  %v6231_v45 = vmax.f32 %v7526_v3, 0.0 }
 0xb37   :  { %v6230_v8 = vmax.f32 %v6159_v47, 0.0 }
 0xb38   :  { %6247 = vst [vmem:[#allocation14 + $0x78] sm:$0xff] %v6231_v45 }
 0xb39   :  { %6246 = vst [vmem:[#allocation14 + $0x70] sm:$0xff] %v6230_v8 }
 0xb3a   :  { %9008 = shalt.err (!%p9005_p12)
}
 0xb3b   :  { %s9009_s20 = scalar_lea.hbm %s12874_s9, 2048 }
 0xb3c   :  { %p9010_p13 = scmp.ne.s32.totalorder %s12874_s9, %s9009_s20  ;;  %p9013_p0 = scmp.lt.u32.totalorder %s9009_s20, %s12874_s9 }
 0xb3e   :  { %p9015_p1 = pnand %p9013_p0, %p9010_p13 }
 0xb40   :  { %9018 = shalt.err (!%p9015_p1)
}
 0xb41   :  { %6319 = dma.vmem_to_hbm [thread:$0]  %s6314_s4, 2048, %s12874_s9, [#allocation15], %s9057_s29, %s9057_s29, %s9058_s30  }
 0xb42   :  { %s9019_s1 = scalar_lea.vmem %s12828_s7, 2048  ;;  %p9024_p3 = scmp.lt.s32.totalorder %s12828_s7, %s12828_s7 }
 0xb43   :  { %p9020_p2 = scmp.ne.s32.totalorder %s12828_s7, %s9019_s1  ;;  %p9025_p4 = scmp.lt.s32.totalorder %s9019_s1, %s9019_s1 }
 0xb45   :  { %p9026_p5 = por %p9025_p4, %p9024_p3 }
 0xb47   :  { %p9027_p6 = pnand %p9026_p5, %p9020_p2 }
 0xb49   :  { %9030 = shalt.err (!%p9027_p6)
}
 0xb4a   :  { %s9031_s26 = scalar_lea.hbm %s12875_s10, 2048 }
 0xb4b   :  { %p9032_p7 = scmp.ne.s32.totalorder %s12875_s10, %s9031_s26  ;;  %p9035_p8 = scmp.lt.u32.totalorder %s9031_s26, %s12875_s10 }
 0xb4d   :  { %p9037_p9 = pnand %p9035_p8, %p9032_p7 }
 0xb4f   :  { %9040 = shalt.err (!%p9037_p9)
}
 0xb50   :  { %6331 = dma.vmem_to_hbm [thread:$0]  %s12828_s7, 2048, %s12875_s10, [#allocation15], %s9057_s29, %s9057_s29, %s9058_s30  }
 0xb51   :  { %9049 = dma.done.wait [#allocation4], 2048  }
 0xb52   :  { %9050 = vsyncadd [#allocation4], 4294965248 }
 0xb53   :  { %9051 = dma.done.wait [#allocation15], 4096  }
 0xb54   :  { %9052 = vsyncadd [#allocation15], 4294963200 }
 0xb55   :  { %9053 = dma.done.wait [#allocation18], 2048  }
 0xb56   :  { %9054 = vsyncadd [#allocation18], 4294965248 }
 0xb57   :  { %6356 = vsyncpa [#allocation3], 1 }
 0xb58   :  { %6357 = vsyncpa [#allocation6], 1 }
 0xb59   :  { %6358 = vsyncpa [#allocation9], 1 }
 0xb5a   :  { %6359 = vsyncpa [#allocation12], 1 }
 0xb5b   :  { %6360 = vsyncpa [#allocation4], 1 }
 0xb5c   :  { %6361 = vsyncpa [#allocation15], 1 }
 0xb5d   :  { %6362 = vsyncpa [#allocation18], 1 }

</bundles_post_ra>
